<compile_context>
chip_gen: v5e
topology: v5e:2x2
jax: 0.10.0
libtpu: 0.0.40
codegen_flags: <defaults>
</compile_context>

<pallas_src>
import jax
import jax.numpy as jnp
from jax import lax
from jax.experimental import pallas as pl
from jax.experimental.pallas import tpu as pltpu

K7 = 7    # spatial-attention kernel size
PAD = 3   # spatial-attention padding


def _guide_kernel(x_ref, g_ref, fc1_ref, fc2_ref, band_ref, ow_ref, ob_ref,
                  out_ref, pad_ref):
    Bt, H, W, C = x_ref.shape
    x = x_ref[...]                                   # (Bt, H, W, C) skip connection

    # ---------------- Channel attention (merged avg/max MLP) ----------------
    avg_vec = jnp.mean(x, axis=(1, 2))               # (Bt, C) global avg pool
    max_vec = jnp.max(x, axis=(1, 2))                # (Bt, C) global max pool
    pools = jnp.concatenate([avg_vec, max_vec], axis=0)          # (2*Bt, C)
    h = jnp.maximum(
        jnp.dot(pools, fc1_ref[...], preferred_element_type=jnp.float32), 0.0)
    m = jnp.dot(h, fc2_ref[...], preferred_element_type=jnp.float32)
    ca = jax.nn.sigmoid(m[:Bt] + m[Bt:])             # (Bt, C)
    x1 = x * ca[:, None, None, :]

    # ---- 1x1 conv (fa-folded, bias added later) commuted past spatial attention:
    #      (x1 * sa) @ W == sa * (x1 @ W) since sa is a per-pixel scalar.  Independent
    #      of the 7x7 conv below, so the MXU matmul overlaps the VALU/XLU work.
    t = jnp.dot(x1.reshape(Bt * H * W, C).astype(jnp.bfloat16), ow_ref[...],
                preferred_element_type=jnp.float32).reshape(Bt, H, W, C)

    # ---------------- Spatial attention (guided) ----------------
    gmap = jax.nn.sigmoid(g_ref[...])                # (Bt, H, W)
    avg_c = jnp.mean(x1, axis=3) * gmap              # guided channel-mean
    max_c = jnp.max(x1, axis=3) * gmap               # guided channel-max

    # H-halo-padded scratch: (Bt, H+6, 2*W), avg in lanes [0,W), max in lanes [W,2W).
    # Zero only the 3-row halos every step (megacore-safe: scratch is per-TC and the
    # interior is fully overwritten below).  W-direction padding lives in the band.
    pad_ref[:, 0:PAD, :] = jnp.zeros((Bt, PAD, 2 * W), jnp.float32)
    pad_ref[:, PAD + H:2 * PAD + H, :] = jnp.zeros((Bt, PAD, 2 * W), jnp.float32)
    pad_ref[:, PAD:PAD + H, 0:W] = avg_c
    pad_ref[:, PAD:PAD + H, W:2 * W] = max_c

    # 7x7, 2-in / 1-out conv as ONE MXU matmul: lane-concat the 7 dy-shifted slabs and
    # multiply by the host-built banded weight matrix (K7*2*W, W).
    lhs = jnp.concatenate([pad_ref[:, dy:dy + H, :] for dy in range(K7)], axis=2)
    conv = jnp.dot(lhs.reshape(Bt * H, K7 * 2 * W), band_ref[...],
                   preferred_element_type=jnp.float32).reshape(Bt, H, W)
    sa = jax.nn.sigmoid(conv)                        # (Bt, H, W)

    # ------------- Frequency attention (scale already folded into ow) -------------
    y = jax.nn.sigmoid(sa[:, :, :, None] * t + ob_ref[...])
    out_ref[...] = y + x                             # residual skip connection


def _build_band(sa_w_flat, w_dim):
    """Banded (K7*2*W, W) matrix encoding the 7x7 2-in/1-out conv with zero W-padding.

    Row index = dy*2W + jj, where jj<W selects the avg map column jj and jj>=W the max
    map column jj-W; band[dy*2W+jj, x] = weight[in_ch, dy, jj - x + PAD] if in range.
    """
    w = sa_w_flat.reshape(2, K7, K7)                 # (in=avg/max, dy, dx)
    j = jnp.arange(w_dim)[:, None]
    x = jnp.arange(w_dim)[None, :]
    dx = j - x + PAD
    valid = (dx >= 0) & (dx < K7)
    dxc = jnp.clip(dx, 0, K7 - 1)
    w_avg = jnp.where(valid[None, :, :], w[0][:, dxc], 0.0)      # (K7, W, W)
    w_max = jnp.where(valid[None, :, :], w[1][:, dxc], 0.0)      # (K7, W, W)
    band = jnp.concatenate([w_avg, w_max], axis=1)               # (K7, 2W, W)
    return band.reshape(K7 * 2 * w_dim, w_dim).astype(jnp.float32)


def _pick_block_b(batch):
    """Single grid step on 1-TC chips (v5e/v6e); >=2 parallel steps on v7x (2 TCs)."""
    try:
        kind = jax.devices()[0].device_kind.lower()
    except Exception:  # pragma: no cover - defensive
        kind = ""
    steps = 2 if ("v7" in kind and batch >= 2) else 1
    bt = -(-batch // steps)
    if batch % bt != 0:          # awkward batch: fall back to one big step rather than
        bt = batch               # many tiny (overhead-dominated) blocks
    return bt


def _bilinear_align_corners(g, h_out, w_out):
    """F.interpolate(g, (h_out, w_out), mode='bilinear', align_corners=True), NCHW."""
    _, _, h_in, w_in = g.shape

    def coords(n_out, n_in):
        if n_out == 1:
            src = jnp.zeros((1,), jnp.float32)
        else:
            src = jnp.arange(n_out, dtype=jnp.float32) * ((n_in - 1) / (n_out - 1))
        i0 = jnp.clip(jnp.floor(src), 0, n_in - 1).astype(jnp.int32)
        i1 = jnp.clip(i0 + 1, 0, n_in - 1)
        frac = src - i0.astype(jnp.float32)
        return i0, i1, frac

    y0, y1, wy = coords(h_out, h_in)
    x0, x1, wx = coords(w_out, w_in)
    r0 = jnp.take(g, y0, axis=2)
    r1 = jnp.take(g, y1, axis=2)
    v00 = jnp.take(r0, x0, axis=3)
    v01 = jnp.take(r0, x1, axis=3)
    v10 = jnp.take(r1, x0, axis=3)
    v11 = jnp.take(r1, x1, axis=3)
    wy = wy[None, None, :, None]
    wx = wx[None, None, None, :]
    return (v00 * (1 - wy) * (1 - wx) + v01 * (1 - wy) * wx +
            v10 * wy * (1 - wx) + v11 * wy * wx)


def my_guide_module2(x_nchw, guiding_map0, params, block_b=None):
    B, C, H, W = x_nchw.shape
    Cr = params["fc1_t"].shape[1]
    g_i = _bilinear_align_corners(guiding_map0, H, W)           # (B, 1, H, W), pre-sigmoid
    x_nhwc = jnp.transpose(x_nchw, (0, 2, 3, 1)).astype(jnp.float32)
    g_bhw = g_i[:, 0].astype(jnp.float32)                       # (B, H, W): W lane-dense

    if block_b is None:
        block_b = _pick_block_b(B)
    Bt = block_b
    nsteps = B // Bt
    # NOTE(v7x): if Bt/H/W/C are scaled up, re-derive the per-step VMEM budget
    # (double-buffered x + out blocks + scratch) against the 32 MiB scoped default /
    # 64 MiB physical VMEM and set vmem_limit_bytes explicitly.

    # Fold the frequency-attention per-channel scale into the 1x1 conv weight:
    #   (x2 * diag(fa)) @ W  ==  x2 @ (diag(fa) @ W)
    ow_scaled = (params["fa_w"].reshape(C, 1) * params["out_w_t"]).astype(jnp.bfloat16)
    band = _build_band(params["sa_w_flat"], W)                  # (K7*2*W, W) f32

    out = pl.pallas_call(
        _guide_kernel,
        out_shape=jax.ShapeDtypeStruct((B, H, W, C), jnp.float32),
        grid=(nsteps,),
        in_specs=[
            pl.BlockSpec((Bt, H, W, C), lambda i: (i, 0, 0, 0)),    # x (NHWC)
            pl.BlockSpec((Bt, H, W), lambda i: (i, 0, 0)),          # interpolated guide
            pl.BlockSpec((C, Cr), lambda i: (0, 0)),                # fc1 (transposed)
            pl.BlockSpec((Cr, C), lambda i: (0, 0)),                # fc2 (transposed)
            pl.BlockSpec((K7 * 2 * W, W), lambda i: (0, 0)),        # banded 7x7 conv matrix
            pl.BlockSpec((C, C), lambda i: (0, 0)),                 # fa-folded 1x1 conv (bf16)
            pl.BlockSpec((1, C), lambda i: (0, 0)),                 # 1x1 conv bias
        ],
        out_specs=pl.BlockSpec((Bt, H, W, C), lambda i: (i, 0, 0, 0)),
        scratch_shapes=[pltpu.VMEM((Bt, H + 2 * PAD, 2 * W), jnp.float32)],
        compiler_params=pltpu.CompilerParams(dimension_semantics=("parallel",)),
    )(x_nhwc, g_bhw,
      params["fc1_t"], params["fc2_t"], band, ow_scaled, params["out_b"])

    return jnp.transpose(out, (0, 3, 1, 2))


def reference(x, g0, params):
    """Pure-JAX NCHW reference mirroring the PyTorch forward (FFT path simplified exactly)."""
    C = x.shape[1]
    hp = lax.Precision.HIGHEST
    fc1_t, fc2_t = params["fc1_t"], params["fc2_t"]
    sa_w = params["sa_w_flat"].reshape(1, 2, K7, K7)
    fa_w = params["fa_w"].reshape(C)
    out_w = params["out_w_t"].T
    out_b = params["out_b"].reshape(C)

    avg = jnp.mean(x, axis=(2, 3))
    mx = jnp.max(x, axis=(2, 3))

    def mlp(v):
        return jnp.dot(jnp.maximum(jnp.dot(v, fc1_t, precision=hp), 0.0), fc2_t, precision=hp)

    ca = jax.nn.sigmoid(mlp(avg) + mlp(mx))
    x1 = x * ca[:, :, None, None]

    gmap = jax.nn.sigmoid(_bilinear_align_corners(g0, x.shape[2], x.shape[3]))
    avg_c = jnp.mean(x1, axis=1, keepdims=True) * gmap
    max_c = jnp.max(x1, axis=1, keepdims=True) * gmap
    cat = jnp.concatenate([avg_c, max_c], axis=1)
    conv = lax.conv_general_dilated(cat, sa_w, (1, 1), [(PAD, PAD), (PAD, PAD)],
                                    dimension_numbers=("NCHW", "OIHW", "NCHW"), precision=hp)
    x2 = x1 * jax.nn.sigmoid(conv)

    scaled = x2 * fa_w[None, :, None, None]
    y = jnp.einsum("bchw,oc->bohw", scaled, out_w, precision=hp) + out_b[None, :, None, None]
    return jax.nn.sigmoid(y) + x


if __name__ == "__main__":
    B, C, H, W = 2, 32, 16, 16
    Gh, Gw = 8, 8
    Cr = C // 8

    key = jax.random.PRNGKey(0)
    k = jax.random.split(key, 7)
    x = jax.random.normal(k[0], (B, C, H, W), jnp.float32)
    guiding = jax.random.normal(k[1], (B, 1, Gh, Gw), jnp.float32)

    params = {
        # ca.fc1: Conv2d(C, C//8, 1, bias=False)  -> weight (C//8, C, 1, 1), passed transposed
        "fc1_t": (0.1 * jax.random.normal(k[2], (Cr, C), jnp.float32)).T,
        # ca.fc2: Conv2d(C//8, C, 1, bias=False)  -> weight (C, C//8, 1, 1), passed transposed
        "fc2_t": (0.1 * jax.random.normal(k[3], (C, Cr), jnp.float32)).T,
        # my_sa.conv1: Conv2d(2, 1, 7, padding=3, bias=False) -> weight (1, 2, 7, 7), flattened
        "sa_w_flat": (0.1 * jax.random.normal(k[4], (1, 2, K7, K7), jnp.float32)).reshape(-1),
        # my_fa.attention_weights: nn.Parameter(torch.ones(C))
        "fa_w": jnp.ones((1, C), jnp.float32),
        # my_fa.output: Conv2d(C, C, 1) -> weight (C, C, 1, 1) (passed transposed) + bias (C,)
        "out_w_t": (0.1 * jax.random.normal(k[5], (C, C), jnp.float32)).T,
        "out_b": 0.1 * jax.random.normal(k[6], (1, C), jnp.float32),
    }

    out = jax.block_until_ready(my_guide_module2(x, guiding, params))
    ref = reference(x, guiding, params)

    assert out.shape == (B, C, H, W)
    err = float(jnp.max(jnp.abs(out - ref)))
    assert err < 1e-2, f"max abs error {err}"
    print("KERNEL_OK")
</pallas_src>

<mosaic_0001>
module attributes {stable_mosaic.version = 11 : i64} {
  func.func @_guide_kernel(%arg0: i32, %arg1: memref<2x16x16x32xf32, #tpu.memory_space<vmem>>, %arg2: memref<2x16x16xf32, #tpu.memory_space<vmem>>, %arg3: memref<32x4xf32, #tpu.memory_space<vmem>>, %arg4: memref<4x32xf32, #tpu.memory_space<vmem>>, %arg5: memref<224x16xf32, #tpu.memory_space<vmem>>, %arg6: memref<32x32xbf16, #tpu.memory_space<vmem>>, %arg7: memref<1x32xf32, #tpu.memory_space<vmem>>, %arg8: memref<2x16x16x32xf32, #tpu.memory_space<vmem>>, %arg9: memref<2x22x32xf32, #tpu.memory_space<vmem>>) attributes {dimension_semantics = [#tpu.dimension_semantics<parallel>], iteration_bounds = array<i64: 1>, scalar_prefetch = 0 : i64, scratch_operands = 1 : i64, tpu.core_type = #tpu.core_type<tc>, window_params = [{transform_indices = @transform_0, window_bounds = array<i64: 2, 16, 16, 32>}, {transform_indices = @transform_1, window_bounds = array<i64: 2, 16, 16>}, {pipeline_mode = #tpu.pipeline_mode<synchronous>, transform_indices = @transform_2, window_bounds = array<i64: 32, 4>}, {pipeline_mode = #tpu.pipeline_mode<synchronous>, transform_indices = @transform_3, window_bounds = array<i64: 4, 32>}, {pipeline_mode = #tpu.pipeline_mode<synchronous>, transform_indices = @transform_4, window_bounds = array<i64: 224, 16>}, {pipeline_mode = #tpu.pipeline_mode<synchronous>, transform_indices = @transform_5, window_bounds = array<i64: 32, 32>}, {pipeline_mode = #tpu.pipeline_mode<synchronous>, transform_indices = @transform_6, window_bounds = array<i64: 1, 32>}, {transform_indices = @transform_7, window_bounds = array<i64: 2, 16, 16, 32>}]} {
    %c0 = arith.constant 0 : index
    %c0_0 = arith.constant 0 : index
    %c0_1 = arith.constant 0 : index
    %c0_2 = arith.constant 0 : index
    %0 = vector.load %arg1[%c0, %c0_0, %c0_1, %c0_2] : memref<2x16x16x32xf32, #tpu.memory_space<vmem>>, vector<2x16x16x32xf32>
    %cst = arith.constant dense<0.000000e+00> : vector<2x32xf32>
    %1 = vector.multi_reduction <add>, %0, %cst [1, 2] : vector<2x16x16x32xf32> to vector<2x32xf32>
    %cst_3 = arith.constant 2.560000e+02 : f32
    %2 = vector.broadcast %cst_3 : f32 to vector<2x32xf32>
    %3 = arith.divf %1, %2 : vector<2x32xf32>
    %cst_4 = arith.constant dense<0xFF800000> : vector<2x32xf32>
    %4 = vector.multi_reduction <maximumf>, %0, %cst_4 [1, 2] : vector<2x16x16x32xf32> to vector<2x32xf32>
    %5 = tpu.concatenate %3, %4 in 0 : vector<2x32xf32>, vector<2x32xf32> -> vector<4x32xf32>
    %c0_5 = arith.constant 0 : index
    %c0_6 = arith.constant 0 : index
    %6 = vector.load %arg3[%c0_5, %c0_6] : memref<32x4xf32, #tpu.memory_space<vmem>>, vector<32x4xf32>
    %cst_7 = arith.constant dense<0.000000e+00> : vector<4x4xf32>
    %7 = tpu.matmul %5, %6, %cst_7 {dimension_numbers = #tpu.dot_dimension_numbers<[1], [0], [0], [1], [0, 0, 1, 1], [], []>} : vector<4x32xf32>, vector<32x4xf32>, vector<4x4xf32> -> vector<4x4xf32>
    %cst_8 = arith.constant 0.000000e+00 : f32
    %8 = vector.broadcast %cst_8 : f32 to vector<4x4xf32>
    %9 = arith.maximumf %7, %8 : vector<4x4xf32>
    %c0_9 = arith.constant 0 : index
    %c0_10 = arith.constant 0 : index
    %10 = vector.load %arg4[%c0_9, %c0_10] : memref<4x32xf32, #tpu.memory_space<vmem>>, vector<4x32xf32>
    %cst_11 = arith.constant dense<0.000000e+00> : vector<4x32xf32>
    %11 = tpu.matmul %9, %10, %cst_11 {dimension_numbers = #tpu.dot_dimension_numbers<[1], [0], [0], [1], [0, 0, 1, 1], [], []>} : vector<4x4xf32>, vector<4x32xf32>, vector<4x32xf32> -> vector<4x32xf32>
    %12 = vector.extract_strided_slice %11 {offsets = [0, 0], sizes = [2, 32], strides = [1, 1]} : vector<4x32xf32> to vector<2x32xf32>
    %13 = vector.extract_strided_slice %11 {offsets = [2, 0], sizes = [2, 32], strides = [1, 1]} : vector<4x32xf32> to vector<2x32xf32>
    %14 = arith.addf %12, %13 : vector<2x32xf32>
    %15 = arith.negf %14 : vector<2x32xf32>
    %16 = math.exp %15 : vector<2x32xf32>
    %cst_12 = arith.constant 1.000000e+00 : f32
    %17 = vector.broadcast %cst_12 : f32 to vector<2x32xf32>
    %18 = arith.addf %17, %16 : vector<2x32xf32>
    %19 = arith.divf %17, %18 : vector<2x32xf32>
    %20 = vector.shape_cast %19 : vector<2x32xf32> to vector<2x1x1x32xf32>
    %21 = vector.broadcast %20 : vector<2x1x1x32xf32> to vector<2x16x16x32xf32>
    %22 = arith.mulf %0, %21 : vector<2x16x16x32xf32>
    %23 = vector.shape_cast %22 : vector<2x16x16x32xf32> to vector<512x32xf32>
    %24 = arith.truncf %23 : vector<512x32xf32> to vector<512x32xbf16>
    %c0_13 = arith.constant 0 : index
    %c0_14 = arith.constant 0 : index
    %25 = vector.load %arg6[%c0_13, %c0_14] : memref<32x32xbf16, #tpu.memory_space<vmem>>, vector<32x32xbf16>
    %cst_15 = arith.constant dense<0.000000e+00> : vector<512x32xf32>
    %26 = tpu.matmul %24, %25, %cst_15 {dimension_numbers = #tpu.dot_dimension_numbers<[1], [0], [0], [1], [0, 0, 1, 1], [], []>} : vector<512x32xbf16>, vector<32x32xbf16>, vector<512x32xf32> -> vector<512x32xf32>
    %27 = vector.shape_cast %26 : vector<512x32xf32> to vector<2x16x16x32xf32>
    %c0_16 = arith.constant 0 : index
    %c0_17 = arith.constant 0 : index
    %c0_18 = arith.constant 0 : index
    %28 = vector.load %arg2[%c0_16, %c0_17, %c0_18] : memref<2x16x16xf32, #tpu.memory_space<vmem>>, vector<2x16x16xf32>
    %29 = arith.negf %28 : vector<2x16x16xf32>
    %30 = math.exp %29 : vector<2x16x16xf32>
    %cst_19 = arith.constant 1.000000e+00 : f32
    %31 = vector.broadcast %cst_19 : f32 to vector<2x16x16xf32>
    %32 = arith.addf %31, %30 : vector<2x16x16xf32>
    %33 = arith.divf %31, %32 : vector<2x16x16xf32>
    %cst_20 = arith.constant dense<0.000000e+00> : vector<2x16x16xf32>
    %34 = vector.multi_reduction <add>, %22, %cst_20 [3] : vector<2x16x16x32xf32> to vector<2x16x16xf32>
    %cst_21 = arith.constant 3.200000e+01 : f32
    %35 = vector.broadcast %cst_21 : f32 to vector<2x16x16xf32>
    %36 = arith.divf %34, %35 : vector<2x16x16xf32>
    %37 = arith.mulf %36, %33 : vector<2x16x16xf32>
    %cst_22 = arith.constant dense<0xFF800000> : vector<2x16x16xf32>
    %38 = vector.multi_reduction <maximumf>, %22, %cst_22 [3] : vector<2x16x16x32xf32> to vector<2x16x16xf32>
    %39 = arith.mulf %38, %33 : vector<2x16x16xf32>
    %cst_23 = arith.constant 0.000000e+00 : f32
    %40 = vector.broadcast %cst_23 : f32 to vector<2x3x32xf32>
    %c0_24 = arith.constant 0 : index
    %c0_25 = arith.constant 0 : index
    %c0_26 = arith.constant 0 : index
    %41 = vector.load %arg9[%c0_24, %c0_25, %c0_26] : memref<2x22x32xf32, #tpu.memory_space<vmem>>, vector<2x3x32xf32>
    tpu.vector_store %arg9[%c0_24, %c0_25, %c0_26], %40 {strides = array<i32>} : memref<2x22x32xf32, #tpu.memory_space<vmem>>, vector<2x3x32xf32>,
    %cst_27 = arith.constant 0.000000e+00 : f32
    %42 = vector.broadcast %cst_27 : f32 to vector<2x3x32xf32>
    %c0_28 = arith.constant 0 : index
    %c19 = arith.constant 19 : index
    %c0_29 = arith.constant 0 : index
    %43 = vector.load %arg9[%c0_28, %c19, %c0_29] : memref<2x22x32xf32, #tpu.memory_space<vmem>>, vector<2x3x32xf32>
    tpu.vector_store %arg9[%c0_28, %c19, %c0_29], %42 {strides = array<i32>} : memref<2x22x32xf32, #tpu.memory_space<vmem>>, vector<2x3x32xf32>,
    %c0_30 = arith.constant 0 : index
    %c3 = arith.constant 3 : index
    %c0_31 = arith.constant 0 : index
    %44 = vector.load %arg9[%c0_30, %c3, %c0_31] : memref<2x22x32xf32, #tpu.memory_space<vmem>>, vector<2x16x16xf32>
    tpu.vector_store %arg9[%c0_30, %c3, %c0_31], %37 {strides = array<i32>} : memref<2x22x32xf32, #tpu.memory_space<vmem>>, vector<2x16x16xf32>,
    %c0_32 = arith.constant 0 : index
    %c3_33 = arith.constant 3 : index
    %c16 = arith.constant 16 : index
    %45 = vector.load %arg9[%c0_32, %c3_33, %c16] : memref<2x22x32xf32, #tpu.memory_space<vmem>>, vector<2x16x16xf32>
    tpu.vector_store %arg9[%c0_32, %c3_33, %c16], %39 {strides = array<i32>} : memref<2x22x32xf32, #tpu.memory_space<vmem>>, vector<2x16x16xf32>,
    %c0_34 = arith.constant 0 : index
    %c0_35 = arith.constant 0 : index
    %c0_36 = arith.constant 0 : index
    %46 = vector.load %arg9[%c0_34, %c0_35, %c0_36] : memref<2x22x32xf32, #tpu.memory_space<vmem>>, vector<2x16x32xf32>
    %c0_37 = arith.constant 0 : index
    %c1 = arith.constant 1 : index
    %c0_38 = arith.constant 0 : index
    %47 = vector.load %arg9[%c0_37, %c1, %c0_38] : memref<2x22x32xf32, #tpu.memory_space<vmem>>, vector<2x16x32xf32>
    %c0_39 = arith.constant 0 : index
    %c2 = arith.constant 2 : index
    %c0_40 = arith.constant 0 : index
    %48 = vector.load %arg9[%c0_39, %c2, %c0_40] : memref<2x22x32xf32, #tpu.memory_space<vmem>>, vector<2x16x32xf32>
    %c0_41 = arith.constant 0 : index
    %c3_42 = arith.constant 3 : index
    %c0_43 = arith.constant 0 : index
    %49 = vector.load %arg9[%c0_41, %c3_42, %c0_43] : memref<2x22x32xf32, #tpu.memory_space<vmem>>, vector<2x16x32xf32>
    %c0_44 = arith.constant 0 : index
    %c4 = arith.constant 4 : index
    %c0_45 = arith.constant 0 : index
    %50 = vector.load %arg9[%c0_44, %c4, %c0_45] : memref<2x22x32xf32, #tpu.memory_space<vmem>>, vector<2x16x32xf32>
    %c0_46 = arith.constant 0 : index
    %c5 = arith.constant 5 : index
    %c0_47 = arith.constant 0 : index
    %51 = vector.load %arg9[%c0_46, %c5, %c0_47] : memref<2x22x32xf32, #tpu.memory_space<vmem>>, vector<2x16x32xf32>
    %c0_48 = arith.constant 0 : index
    %c6 = arith.constant 6 : index
    %c0_49 = arith.constant 0 : index
    %52 = vector.load %arg9[%c0_48, %c6, %c0_49] : memref<2x22x32xf32, #tpu.memory_space<vmem>>, vector<2x16x32xf32>
    %53 = tpu.concatenate %46, %47, %48, %49, %50, %51, %52 in 2 : vector<2x16x32xf32>, vector<2x16x32xf32>, vector<2x16x32xf32>, vector<2x16x32xf32>, vector<2x16x32xf32>, vector<2x16x32xf32>, vector<2x16x32xf32> -> vector<2x16x224xf32>
    %54 = vector.shape_cast %53 : vector<2x16x224xf32> to vector<32x224xf32>
    %c0_50 = arith.constant 0 : index
    %c0_51 = arith.constant 0 : index
    %55 = vector.load %arg5[%c0_50, %c0_51] : memref<224x16xf32, #tpu.memory_space<vmem>>, vector<224x16xf32>
    %cst_52 = arith.constant dense<0.000000e+00> : vector<32x16xf32>
    %56 = tpu.matmul %54, %55, %cst_52 {dimension_numbers = #tpu.dot_dimension_numbers<[1], [0], [0], [1], [0, 0, 1, 1], [], []>} : vector<32x224xf32>, vector<224x16xf32>, vector<32x16xf32> -> vector<32x16xf32>
    %57 = vector.shape_cast %56 : vector<32x16xf32> to vector<2x16x16xf32>
    %58 = arith.negf %57 : vector<2x16x16xf32>
    %59 = math.exp %58 : vector<2x16x16xf32>
    %cst_53 = arith.constant 1.000000e+00 : f32
    %60 = vector.broadcast %cst_53 : f32 to vector<2x16x16xf32>
    %61 = arith.addf %60, %59 : vector<2x16x16xf32>
    %62 = arith.divf %60, %61 : vector<2x16x16xf32>
    %63 = vector.shape_cast %62 : vector<2x16x16xf32> to vector<2x16x16x1xf32>
    %64 = vector.broadcast %63 : vector<2x16x16x1xf32> to vector<2x16x16x32xf32>
    %65 = arith.mulf %64, %27 : vector<2x16x16x32xf32>
    %c0_54 = arith.constant 0 : index
    %c0_55 = arith.constant 0 : index
    %66 = vector.load %arg7[%c0_54, %c0_55] : memref<1x32xf32, #tpu.memory_space<vmem>>, vector<1x32xf32>
    %67 = vector.shape_cast %66 : vector<1x32xf32> to vector<1x1x1x32xf32>
    %68 = vector.broadcast %67 : vector<1x1x1x32xf32> to vector<2x16x16x32xf32>
    %69 = arith.addf %65, %68 : vector<2x16x16x32xf32>
    %70 = arith.negf %69 : vector<2x16x16x32xf32>
    %71 = math.exp %70 : vector<2x16x16x32xf32>
    %cst_56 = arith.constant 1.000000e+00 : f32
    %72 = vector.broadcast %cst_56 : f32 to vector<2x16x16x32xf32>
    %73 = arith.addf %72, %71 : vector<2x16x16x32xf32>
    %74 = arith.divf %72, %73 : vector<2x16x16x32xf32>
    %75 = arith.addf %74, %0 : vector<2x16x16x32xf32>
    %c0_57 = arith.constant 0 : index
    %c0_58 = arith.constant 0 : index
    %c0_59 = arith.constant 0 : index
    %c0_60 = arith.constant 0 : index
    %76 = vector.load %arg8[%c0_57, %c0_58, %c0_59, %c0_60] : memref<2x16x16x32xf32, #tpu.memory_space<vmem>>, vector<2x16x16x32xf32>
    tpu.vector_store %arg8[%c0_57, %c0_58, %c0_59, %c0_60], %75 {strides = array<i32>} : memref<2x16x16x32xf32, #tpu.memory_space<vmem>>, vector<2x16x16x32xf32>,
    return
  }
  func.func @transform_0(%arg0: i32) -> (i32, i32, i32, i32) {
    %c0_i32 = arith.constant 0 : i32
    %c0_i32_0 = arith.constant 0 : i32
    %c0_i32_1 = arith.constant 0 : i32
    %c0_i32_2 = arith.constant 0 : i32
    return %arg0, %c0_i32, %c0_i32_0, %c0_i32_1 : i32, i32, i32, i32
  }
  func.func @transform_1(%arg0: i32) -> (i32, i32, i32) {
    %c0_i32 = arith.constant 0 : i32
    %c0_i32_0 = arith.constant 0 : i32
    %c0_i32_1 = arith.constant 0 : i32
    return %arg0, %c0_i32, %c0_i32_0 : i32, i32, i32
  }
  func.func @transform_2(%arg0: i32) -> (i32, i32) {
    %c0_i32 = arith.constant 0 : i32
    %c0_i32_0 = arith.constant 0 : i32
    %c0_i32_1 = arith.constant 0 : i32
    return %c0_i32, %c0_i32_0 : i32, i32
  }
  func.func @transform_3(%arg0: i32) -> (i32, i32) {
    %c0_i32 = arith.constant 0 : i32
    %c0_i32_0 = arith.constant 0 : i32
    %c0_i32_1 = arith.constant 0 : i32
    return %c0_i32, %c0_i32_0 : i32, i32
  }
  func.func @transform_4(%arg0: i32) -> (i32, i32) {
    %c0_i32 = arith.constant 0 : i32
    %c0_i32_0 = arith.constant 0 : i32
    %c0_i32_1 = arith.constant 0 : i32
    return %c0_i32, %c0_i32_0 : i32, i32
  }
  func.func @transform_5(%arg0: i32) -> (i32, i32) {
    %c0_i32 = arith.constant 0 : i32
    %c0_i32_0 = arith.constant 0 : i32
    %c0_i32_1 = arith.constant 0 : i32
    return %c0_i32, %c0_i32_0 : i32, i32
  }
  func.func @transform_6(%arg0: i32) -> (i32, i32) {
    %c0_i32 = arith.constant 0 : i32
    %c0_i32_0 = arith.constant 0 : i32
    %c0_i32_1 = arith.constant 0 : i32
    return %c0_i32, %c0_i32_0 : i32, i32
  }
  func.func @transform_7(%arg0: i32) -> (i32, i32, i32, i32) {
    %c0_i32 = arith.constant 0 : i32
    %c0_i32_0 = arith.constant 0 : i32
    %c0_i32_1 = arith.constant 0 : i32
    %c0_i32_2 = arith.constant 0 : i32
    return %arg0, %c0_i32, %c0_i32_0, %c0_i32_1 : i32, i32, i32, i32
  }
}

</mosaic_0001>

<bundles_post_ra>
// kernel: tpu_custom_call.1
= control target key start
LH: loop header
LB: loop body
LE: loop exit
PB: predicated region body
PF: predicated region fallthrough
CT: control target
= control target key end

     0   :  { %12 = vsyncpa [#allocation4], 0  ;;  %s9447_s0 = inlined_call_operand.hbm [shape: f32[2,16,16,32], index: 0, kind: input, shape index: {}]   ;;  %s9448_s1 = inlined_call_operand.vmem [shape: f32[2,16,16], index: 1, kind: input, shape index: {}]   ;;  %s9449_s2 = inlined_call_operand.vmem [shape: f32[32,4], index: 2, kind: input, shape index: {}]   ;;  %s9450_s3 = inlined_call_operand.vmem [shape: f32[4,32], index: 3, kind: input, shape index: {}]   ;;  %s9451_s4 = inlined_call_operand.vmem [shape: f32[224,16], index: 4, kind: input, shape index: {}]   ;;  %s9452_s5 = inlined_call_operand.vmem [shape: bf16[32,32], index: 5, kind: input, shape index: {}]   ;;  %s9453_s6 = inlined_call_operand.vmem [shape: f32[1,32], index: 6, kind: input, shape index: {}]   ;;  %s9454_s7 = inlined_call_operand.hbm [shape: f32[2,16,16,32], index: 7, kind: output, shape index: {}]  }
   0x1   :  { %13 = vsyncpa [#allocation5], 0  ;;  %s18_s26 = sshll.u32 %s9447_s0, 4  ;;  %s5728_s27 = smov [#allocation3]   ;;  %s19_s26 = int_to_ptr.hbm [resolvable:$true] %s18_s26 }
   0x2   :  { %s20_s28 = sshll.u32 %s5728_s27, 4  ;;  %s5729_s29 = smov 128   ;;  %s21_s28 = int_to_ptr.vmem [resolvable:$true] %s20_s28 }
   0x3   :  { %s5730_s30 = smov 8  }
   0x4   :  { %26 = dma.hbm_to_vmem [thread:$0]  %s19_s26, 8192, %s21_s28, [#allocation4], %s5729_s29, %s5729_s29, %s5730_s30  }
   0x5   :  { %5724 = dma.done.wait [#allocation4], 8192  }
   0x6   :  { %5725 = vsyncadd [#allocation4], 4294959104  ;;  %v9455_v0 = vlaneseq  ;;  %vm108_vm0 = vcmask 261120   ;;  %v869_v3 = vld [vmem:[%s9448_s1] sm:$0xff]  ;;  %v5796_v4 = vld [vmem:[#allocation3] sm:$0xff]  ;;  %vm396_vm6 = vcmask 1041409  }
   0x7   :  { %v5798_v5 = vld [vmem:[#allocation3 + $0x8] sm:$0xff]  ;;  %v5070_v6 = vmul.f32 -1.442695, %v869_v3  ;;  %v5801_v7 = vld [vmem:[#allocation3 + $0x10] sm:$0xff]  ;;  %v5803_v8 = vld [vmem:[#allocation3 + $0x18] sm:$0xff]  ;;  %v109_v9 = vsel %vm108_vm0, %v5796_v4, 0.0 }
   0x8   :  { %v5786_v1 = vshrl.u32 %v9455_v0, 7  ;;  %v110_v10 = vsel %vm108_vm0, %v5798_v5, 0.0  ;;  %v112_v11 = vsel %vm108_vm0, %v5801_v7, 0.0  ;;  %v5811_v12 = vld [vmem:[#allocation3 + $0x20] sm:$0xff]  ;;  %v114_v14 = vsel %vm108_vm0, %v5803_v8, 0.0  ;;  %v5815_v15 = vld [vmem:[#allocation3 + $0x28] sm:$0xff] }
   0x9   :  { %5254 = vpow2.f32 %v5070_v6  ;;  %v111_v13 = vadd.f32 %v110_v10, %v109_v9  ;;  %v116_v17 = vsel %vm108_vm0, %v5811_v12, 0.0  ;;  %v5819_v18 = vld [vmem:[#allocation3 + $0x30] sm:$0xff]  ;;  %v5821_v19 = vld [vmem:[#allocation3 + $0x100] sm:$0xff]  ;;  %v5823_v20 = vld [vmem:[#allocation3 + $0x108] sm:$0xff]  ;;  %v118_v25 = vsel %vm108_vm0, %v5815_v15, 0.0  ;;  %s5736_s26 = smov 32  }
   0xa   :  { %9563 = vst [vmem:[#allocation9_spill] sm:$0xff] %v5786_v1  ;;  %5165 = vset.pattern.permute.xlu1 %v5786_v1  ;;  %5167 = vset.pattern.permute.xlu0 %v5786_v1  ;;  %v5791_v2 = vadd.s32 8, %v5786_v1  ;;  %v5825_v22 = vld [vmem:[#allocation3 + $0x38] sm:$0xff]  ;;  %v5827_v23 = vld [vmem:[#allocation3 + $0x110] sm:$0xff]  ;;  %v178_v26 = vsel %vm108_vm0, %v5821_v19, 0.0  ;;  %v179_v27 = vsel %vm108_vm0, %v5823_v20, 0.0 }
   0xb   :  { %v113_v16 = vadd.f32 %v112_v11, %v111_v13  ;;  %9565 = vst [vmem:[#allocation11_spill] sm:$0xff] %v5821_v19  ;;  %v5829_v24 = vld [vmem:[#allocation3 + $0x118] sm:$0xff]  ;;  %v5837_v29 = vld [vmem:[#allocation3 + $0x40] sm:$0xff]  ;;  %v5839_v30 = vld [vmem:[#allocation3 + $0x48] sm:$0xff]  ;;  %v180_v33 = vadd.f32 %v179_v27, %v178_v26  ;;  %v181_v34 = vsel %vm108_vm0, %v5827_v23, 0.0  ;;  %v120_v38 = vsel %vm108_vm0, %v5819_v18, 0.0 }
   0xc   :  { %9564 = vst [vmem:[#allocation10_spill] sm:$0xff] %v5791_v2  ;;  %5166 = vset.pattern.permute.xlu2 %v5791_v2  ;;  %v5841_v31 = vld [vmem:[#allocation3 + $0x120] sm:$0xff]  ;;  %v5847_v36 = vld [vmem:[#allocation3 + $0x50] sm:$0xff]  ;;  %v5849_v37 = vld [vmem:[#allocation3 + $0x58] sm:$0xff]  ;;  %v183_v39 = vsel %vm108_vm0, %v5829_v24, 0.0  ;;  %v122_v43 = vsel %vm108_vm0, %v5825_v22, 0.0 }
   0xd   :  { %9566 = vst [vmem:[#allocation12_spill] sm:$0xff] %v5823_v20  ;;  %v115_v21 = vadd.f32 %v114_v14, %v113_v16  ;;  %v5855_v40 = vld [vmem:[#allocation3 + $0x60] sm:$0xff]  ;;  %v5857_v41 = vld [vmem:[#allocation3 + $0x128] sm:$0xff]  ;;  %v182_v44 = vadd.f32 %v181_v34, %v180_v33  ;;  %v5864_v46 = vld [vmem:[#allocation3 + $0x70] sm:$0xff]  ;;  %v124_v47 = vsel %vm108_vm0, %v5837_v29, 0.0  ;;  %v126_v48 = vsel %vm108_vm0, %v5839_v30, 0.0 }
   0xe   :  { %9567 = vst [vmem:[#allocation13_spill] sm:$0xff] %v5827_v23  ;;  %v5862_v45 = vld [vmem:[#allocation3 + $0x68] sm:$0xff]  ;;  %v185_v49 = vsel %vm108_vm0, %v5841_v31, 0.0  ;;  %v5872_v50 = vld [vmem:[#allocation3 + $0x78] sm:$0xff]  ;;  %v5874_v51 = vld [vmem:[#allocation3 + $0x80] sm:$0xff]  ;;  %v128_v54 = vsel %vm108_vm0, %v5847_v36, 0.0 }
   0xf   :  { %9568 = vst [vmem:[#allocation14_spill] sm:$0xff] %v5829_v24  ;;  %v5255_v28 = vpop.eup %5254  ;;  %v117_v32 = vadd.f32 %v116_v17, %v115_v21  ;;  %v5876_v52 = vld [vmem:[#allocation3 + $0x130] sm:$0xff]  ;;  %v130_v55 = vsel %vm108_vm0, %v5849_v37, 0.0  ;;  %v184_v56 = vadd.f32 %v183_v39, %v182_v44  ;;  %v5883_v58 = vld [vmem:[#allocation3 + $0x88] sm:$0xff]  ;;  %v5889_v60 = vsel %vm108_vm0, %v5855_v40, 0.0  ;;  %v5894_v63 = vld [vmem:[#allocation3 + $0x98] sm:$0xff] }
  0x10   :  { %9569 = vst [vmem:[#allocation15_spill] sm:$0xff] %v5841_v31  ;;  %v5845_v35 = vadd.f32 1.0, %v5255_v28  ;;  %v5885_v59 = vld [vmem:[#allocation3 + $0x90] sm:$0xff]  ;;  %v187_v61 = vsel %vm108_vm0, %v5857_v41, 0.0  ;;  %v5896_v3 = vld [vmem:[#allocation3 + $0x138] sm:$0xff]  ;;  %v5900_v9 = vsel %vm108_vm0, %v5862_v45, 0.0 }
  0x11   :  { %9570 = vst [vmem:[#allocation16_spill] sm:$0xff] %v5857_v41  ;;  %v119_v42 = vadd.f32 %v118_v25, %v117_v32  ;;  %v186_v10 = vadd.f32 %v185_v49, %v184_v56  ;;  %v5902_v11 = vld [vmem:[#allocation3 + $0xa0] sm:$0xff]  ;;  %v5904_v13 = vld [vmem:[#allocation3 + $0xa8] sm:$0xff]  ;;  %v5908_v14 = vsel %vm108_vm0, %v5864_v46, 0.0  ;;  %v5912_v16 = vsel %vm108_vm0, %v5872_v50, 0.0  ;;  %v5939_v39 = vld [vmem:[#allocation3 + $0x150] sm:$0xff] }
  0x12   :  { %5256 = vrcp.f32 %v5845_v35  ;;  %9571 = vst [vmem:[#allocation17_spill] sm:$0xff] %v5876_v52  ;;  %v898_v57 = vand.u32 2147483647, %v5845_v35  ;;  %v900_v62 = vand.u32 2147483648, %v5845_v35  ;;  %v5916_v17 = vsel %vm108_vm0, %v5874_v51, 0.0  ;;  %v5920_v25 = vld [vmem:[#allocation3 + $0x140] sm:$0xff] }
  0x13   :  { %v121_v53 = vadd.f32 %v120_v38, %v119_v42  ;;  %9572 = vst [vmem:[#allocation18_spill] sm:$0xff] %v5896_v3  ;;  %v189_v21 = vsel %vm108_vm0, %v5876_v52, 0.0  ;;  %v5922_v26 = vld [vmem:[#allocation3 + $0x148] sm:$0xff]  ;;  %v5926_v28 = vsel %vm108_vm0, %v5883_v58, 0.0  ;;  %v5930_v32 = vsel %vm108_vm0, %v5885_v59, 0.0  ;;  %v5949_v49 = vld [vmem:[#allocation3 + $0x158] sm:$0xff] }
  0x14   :  { %9573 = vst [vmem:[#allocation19_spill] sm:$0xff] %v5920_v25  ;;  %v188_v33 = vadd.f32 %v187_v61, %v186_v10  ;;  %vm894_vm1 = vweird.f32 %v5845_v35  ;;  %vm5935_vm2 = vcmp.eq.f32.partialorder %v898_v57, 8.507059e+37  ;;  %v5943_v42 = vsel %vm108_vm0, %v5894_v63, 0.0  ;;  %v5953_v56 = vld [vmem:[#allocation3 + $0x168] sm:$0xff]  ;;  %v5957_v10 = vld [vmem:[#allocation3 + $0x170] sm:$0xff]  ;;  %v5976_v52 = vld [vmem:[#allocation3 + $0xb8] sm:$0xff] }
  0x15   :  { %v123_v6 = vadd.f32 %v122_v43, %v121_v53  ;;  %9574 = vst [vmem:[#allocation20_spill] sm:$0xff] %v5922_v26  ;;  %v191_v43 = vsel %vm108_vm0, %v5896_v3, 0.0  ;;  %v5951_v53 = vld [vmem:[#allocation3 + $0x160] sm:$0xff]  ;;  %v5961_v0 = vsel %vm108_vm0, %v5902_v11, 0.0  ;;  %v5965_v1 = vsel %vm108_vm0, %v5904_v13, 0.0  ;;  %v5978_v41 = vld [vmem:[#allocation3 + $0x188] sm:$0xff] }
  0x16   :  { %9577 = vst [vmem:[#allocation21_spill] sm:$0xff] %v5939_v39  ;;  %v190_v61 = vadd.f32 %v189_v21, %v188_v33  ;;  %v195_v2 = vsel %vm108_vm0, %v5922_v26, 0.0  ;;  %v5972_v21 = vld [vmem:[#allocation3 + $0x178] sm:$0xff]  ;;  %v197_v31 = vsel %vm108_vm0, %v5939_v39, 0.0  ;;  %v5988_v26 = vsel %vm108_vm0, %v5953_v56, 0.0  ;;  %s5737_s15 = smov 96  }
  0x17   :  { %v125_v27 = vadd.f32 %v124_v47, %v123_v6  ;;  %v901_v47 = vor.u32 1.1754944e-38, %v900_v62  ;;  %9578 = vst [vmem:[#allocation22_spill] sm:$0xff] %v5949_v49  ;;  %v5955_v6 = vld [vmem:[#allocation3 + $0xb0] sm:$0xff]  ;;  %v193_v62 = vsel %vm108_vm0, %v5920_v25, 0.0  ;;  %v199_v25 = vsel %vm108_vm0, %v5949_v49, 0.0  ;;  %v6015_v39 = vld [vmem:[#allocation3 + $0x198] sm:$0xff] }
  0x18   :  { %v5932_v34 = vpop.eup %5256  ;;  %9579 = vst [vmem:[#allocation23_spill] sm:$0xff] %v5951_v53  ;;  %v192_v3 = vadd.f32 %v191_v43, %v190_v61  ;;  %v409_v43 = vld [vmem:[%s9449_s2 + $0x18] sm:$0xff]  ;;  %v5997_v61 = vld [vmem:[#allocation3 + $0x190] sm:$0xff]  ;;  %v256_v24 = vsel %vm108_vm0, %v5796_v4, -inf  ;;  %vm401_vm7 = vcmask 1043459   ;;  %vm404_vm8 = vcmask 1041408  }
  0x19   :  { %v890_v44 = vmul.f32 %v5932_v34, %v5845_v35  ;;  %9580 = vst [vmem:[#allocation24_spill] sm:$0xff] %v5953_v56  ;;  %v127_v57 = vadd.f32 %v126_v48, %v125_v27  ;;  %vm895_vm3 = vweird.f32 %v5932_v34  ;;  %v5974_v27 = vld [vmem:[#allocation3 + $0x180] sm:$0xff]  ;;  %v6005_v56 = vsel %vm108_vm0, %v5957_v10, 0.0  ;;  %425 = vmatpush.msra.mxu0 %v409_v43  ;;  %v407_v43 = vld [vmem:[%s9449_s2 + $0x8] sm:$0xff]  ;;  %v6040_v4 = vld [vmem:[#allocation3 + $0x1a8] sm:$0xff]  ;;  %s5013_s21 = sshll.u32 %s9454_s7, 4  ;;  %s5014_s21 = int_to_ptr.hbm [resolvable:$true] %s5013_s21 }
  0x1a   :  { %9581 = vst [vmem:[#allocation25_spill] sm:$0xff] %v5957_v10  ;;  %vm6011_vm4 = vmor %vm894_vm1, %vm895_vm3  ;;  %v6023_v10 = vsel %vm108_vm0, %v5974_v27, 0.0  ;;  %v6088_v38 = vsel %vm108_vm0, %v6040_v4, 0.0  ;;  %vm435_vm3 = vcmask 31744  }
  0x1b   :  { %v891_v48 = vsub.f32 1.0, %v890_v44  ;;  %9582 = vst [vmem:[#allocation26_spill] sm:$0xff] %v5972_v21  ;;  %v129_v33 = vadd.f32 %v128_v54, %v127_v57  ;;  %v201_v44 = vsel %vm108_vm0, %v5951_v53, 0.0  ;;  %v408_v57 = vld [vmem:[%s9449_s2 + $0x10] sm:$0xff]  ;;  %v6001_v53 = vsel %vm108_vm0, %v5955_v6, 0.0 }
  0x1c   :  { %9583 = vst [vmem:[#allocation27_spill] sm:$0xff] %v5974_v27  ;;  %426 = vmatpush.msra.mxu0 %v408_v57  ;;  %v6036_v27 = vld [vmem:[#allocation3 + $0xc0] sm:$0xff]  ;;  %v6060_v57 = vld [vmem:[#allocation3 + $0x1b0] sm:$0xff] }
  0x1d   :  { %9584 = vst [vmem:[#allocation28_spill] sm:$0xff] %v5976_v52  ;;  %v892_v54 = vmul.f32 %v5932_v34, %v891_v48  ;;  %v131_v49 = vadd.f32 %v130_v55, %v129_v33  ;;  %v194_v55 = vadd.f32 %v193_v62, %v192_v3  ;;  %v6019_v33 = vsel %vm108_vm0, %v5972_v21, 0.0  ;;  %v6038_v21 = vld [vmem:[#allocation3 + $0x1a0] sm:$0xff]  ;;  %v6075_v48 = vld [vmem:[#allocation3 + $0x1b8] sm:$0xff] }
  0x1e   :  { %9585 = vst [vmem:[#allocation29_spill] sm:$0xff] %v5978_v41  ;;  %v257_v3 = vsel %vm108_vm0, %v5798_v5, -inf  ;;  %v258_v62 = vsel %vm108_vm0, %v5801_v7, -inf  ;;  %v6052_v5 = vsel %vm108_vm0, %v5997_v61, 0.0  ;;  %427 = vmatpush.msra.mxu0 %v407_v43 }
  0x1f   :  { %9586 = vst [vmem:[#allocation30_spill] sm:$0xff] %v5997_v61  ;;  %v893_v35 = vadd.f32 %v5932_v34, %v892_v54  ;;  %v133_v23 = vadd.f32 %v5889_v60, %v131_v49  ;;  %v6044_v54 = vsel %vm108_vm0, %v5976_v52, 0.0  ;;  %v196_v20 = vadd.f32 %v195_v2, %v194_v55  ;;  %v406_v49 = vld [vmem:[%s9449_s2] sm:$0xff] }
  0x20   :  { %v6048_v60 = vsel %vm108_vm0, %v5978_v41, 0.0  ;;  %9589 = vst [vmem:[#allocation31_spill] sm:$0xff] %v6060_v57  ;;  %v6065_v55 = vsel %vm108_vm0, %v6015_v39, 0.0  ;;  %v260_v61 = vsel %vm108_vm0, %v5803_v8, -inf  ;;  %v259_v19 = vmax.f32 %v256_v24, %v258_v62  ;;  %428 = vmatpush.msra.mxu0 %v406_v49 }
  0x21   :  { %v897_v7 = vsel %vm6011_vm4, %v5932_v34, %v893_v35  ;;  %v135_v2 = vadd.f32 %v5900_v9, %v133_v23  ;;  %v6073_v34 = vld [vmem:[#allocation3 + $0xc8] sm:$0xff]  ;;  %9590 = vst [vmem:[#allocation32_spill] sm:$0xff] %v6075_v48  ;;  %v198_v35 = vadd.f32 %v197_v31, %v196_v20  ;;  %v261_v52 = vmax.f32 %v257_v3, %v260_v61  ;;  %v6091_v20 = vld [vmem:[#allocation3 + $0xd0] sm:$0xff] }
  0x22   :  { %v6071_v41 = vsel %vm5935_vm2, %v901_v47, %v897_v7  ;;  %v6080_v9 = vsel %vm108_vm0, %v6036_v27, 0.0  ;;  %v6084_v8 = vsel %vm108_vm0, %v6038_v21, 0.0  ;;  %v6096_v61 = vsel %vm108_vm0, %v6060_v57, 0.0 }
  0x23   :  { %v1216_v23 = vperm.slane %v6071_v41, 0  ;;  %v1229_v47 = vperm.slane %v6071_v41, 1  ;;  %v137_v24 = vadd.f32 %v5908_v14, %v135_v2  ;;  %v200_v31 = vadd.f32 %v199_v25, %v198_v35  ;;  %v6110_v25 = vld [vmem:[#allocation3 + $0xd8] sm:$0xff] }
  0x24   :  { %v6100_v43 = vsel %vm108_vm0, %v6073_v34, 0.0  ;;  %v6104_v3 = vsel %vm108_vm0, %v6075_v48, 0.0  ;;  %v262_v62 = vsel %vm108_vm0, %v5811_v12, -inf  ;;  %v264_v14 = vsel %vm108_vm0, %v5815_v15, -inf }
  0x25   :  { %1221 = vperm.xlu1 %5165, %v1216_v23   ;;  %1227 = vperm.xlu2 %5166, %v1216_v23   ;;  %v139_v7 = vadd.f32 %v5912_v16, %v137_v24  ;;  %v202_v49 = vadd.f32 %v201_v44, %v200_v31  ;;  %v263_v2 = vmax.f32 %v259_v19, %v262_v62  ;;  %v6113_v23 = vld [vmem:[#allocation3 + $0xe0] sm:$0xff]  ;;  %v6117_v48 = vsel %vm108_vm0, %v6091_v20, 0.0 }
  0x26   :  { %v265_v35 = vmax.f32 %v261_v52, %v264_v14  ;;  %1234 = vperm.xlu0 %5167, %v1229_v47   ;;  %v266_v12 = vsel %vm108_vm0, %v5819_v18, -inf  ;;  %v268_v15 = vsel %vm108_vm0, %v5825_v22, -inf  ;;  %v270_v57 = vsel %vm108_vm0, %v5837_v29, -inf  ;;  %v6125_v16 = vld [vmem:[#allocation3 + $0x1c0] sm:$0xff]  ;;  %v6138_v29 = vld [vmem:[#allocation3 + $0xe8] sm:$0xff] }
  0x27   :  { %v141_v19 = vadd.f32 %v5916_v17, %v139_v7  ;;  %v204_v52 = vadd.f32 %v5988_v26, %v202_v49  ;;  %v267_v44 = vmax.f32 %v263_v2, %v266_v12  ;;  %v1242_v31 = vperm.slane %v6071_v41, 2  ;;  %v6140_v14 = vld [vmem:[#allocation3 + $0x1c8] sm:$0xff]  ;;  %v6156_v12 = vld [vmem:[#allocation3 + $0xf0] sm:$0xff] }
  0x28   :  { %v269_v24 = vmax.f32 %v265_v35, %v268_v15  ;;  %v6132_v62 = vsel %vm108_vm0, %v6110_v25, 0.0  ;;  %v272_v18 = vsel %vm108_vm0, %v5839_v30, -inf  ;;  %v274_v22 = vsel %vm108_vm0, %v5847_v36, -inf }
  0x29   :  { %v143_v17 = vadd.f32 %v5926_v28, %v141_v19  ;;  %v6145_v26 = vsel %vm108_vm0, %v6113_v23, 0.0  ;;  %v206_v7 = vadd.f32 %v6005_v56, %v204_v52  ;;  %v271_v49 = vmax.f32 %v267_v44, %v270_v57  ;;  %v6158_v28 = vld [vmem:[#allocation3 + $0x1d0] sm:$0xff] }
  0x2a   :  { %v6150_v2 = vsel %vm108_vm0, %v6125_v16, 0.0  ;;  %v273_v30 = vmax.f32 %v269_v24, %v272_v18  ;;  %v276_v36 = vsel %vm108_vm0, %v5849_v37, -inf  ;;  %v278_v35 = vsel %vm108_vm0, %v5855_v40, -inf }
  0x2b   :  { %v145_v15 = vadd.f32 %v5930_v32, %v143_v17  ;;  %v208_v56 = vadd.f32 %v6019_v33, %v206_v7  ;;  %v275_v57 = vmax.f32 %v271_v49, %v274_v22  ;;  %v280_v19 = vsel %vm108_vm0, %v5862_v45, -inf  ;;  %v6188_v17 = vld [vmem:[#allocation3 + $0xf8] sm:$0xff] }
  0x2c   :  { %v6166_v37 = vsel %vm108_vm0, %v6138_v29, 0.0  ;;  %v6170_v40 = vsel %vm108_vm0, %v6140_v14, 0.0  ;;  %v277_v52 = vmax.f32 %v273_v30, %v276_v36  ;;  %v282_v32 = vsel %vm108_vm0, %v5864_v46, -inf }
  0x2d   :  { %1247 = vperm.xlu1 %5165, %v1242_v31   ;;  %1240 = vperm.xlu2 %5166, %v1229_v47   ;;  %v147_v33 = vadd.f32 %v5943_v42, %v145_v15  ;;  %v210_v44 = vadd.f32 %v6023_v10, %v208_v56  ;;  %v279_v24 = vmax.f32 %v275_v57, %v278_v35  ;;  %v284_v45 = vsel %vm108_vm0, %v5872_v50, -inf  ;;  %v6198_v15 = vld [vmem:[#allocation3 + $0x1d8] sm:$0xff] }
  0x2e   :  { %v6180_v47 = vsel %vm108_vm0, %v6156_v12, 0.0  ;;  %v6184_v18 = vsel %vm108_vm0, %v6158_v28, 0.0  ;;  %v281_v22 = vmax.f32 %v277_v52, %v280_v19  ;;  %v286_v46 = vsel %vm108_vm0, %v5874_v51, -inf  ;;  %v6200_v51 = vld [vmem:[#allocation3 + $0x1e0] sm:$0xff] }
  0x2f   :  { %v149_v42 = vadd.f32 %v5961_v0, %v147_v33  ;;  %v212_v10 = vadd.f32 %v6048_v60, %v210_v44  ;;  %v283_v7 = vmax.f32 %v279_v24, %v282_v32  ;;  %v288_v50 = vsel %vm108_vm0, %v5883_v58, -inf }
  0x30   :  { %v1255_v49 = vperm.slane %v6071_v41, 3  ;;  %v1268_v30 = vperm.slane %v6071_v41, 4  ;;  %v285_v36 = vmax.f32 %v281_v22, %v284_v45  ;;  %v290_v35 = vsel %vm108_vm0, %v5885_v59, -inf }
  0x31   :  { %v151_v0 = vadd.f32 %v5965_v1, %v149_v42  ;;  %v214_v60 = vadd.f32 %v6052_v5, %v212_v10  ;;  %v287_v56 = vmax.f32 %v283_v7, %v286_v46  ;;  %v292_v58 = vsel %vm108_vm0, %v5894_v63, -inf  ;;  %v9592_v42 = vld [vmem:[#allocation11_spill] sm:$0xff] }
  0x32   :  { %v6208_v57 = vsel %vm108_vm0, %v6188_v17, 0.0  ;;  %v289_v19 = vmax.f32 %v285_v36, %v288_v50  ;;  %v294_v59 = vsel %vm108_vm0, %v5902_v11, -inf  ;;  %v296_v1 = vsel %vm108_vm0, %v5904_v13, -inf  ;;  %v9591_v13 = vld [vmem:[#allocation28_spill] sm:$0xff] }
  0x33   :  { %v153_v52 = vadd.f32 %v6001_v53, %v151_v0  ;;  %v216_v32 = vadd.f32 %v6065_v55, %v214_v60  ;;  %v291_v33 = vmax.f32 %v287_v56, %v290_v35  ;;  %v6218_v63 = vsel %vm108_vm0, %v6198_v15, 0.0  ;;  %v9593_v35 = vld [vmem:[#allocation12_spill] sm:$0xff]  ;;  %v9594_v60 = vld [vmem:[#allocation13_spill] sm:$0xff] }
  0x34   :  { %v6222_v5 = vsel %vm108_vm0, %v6200_v51, 0.0  ;;  %v293_v44 = vmax.f32 %v289_v19, %v292_v58  ;;  %v298_v11 = vsel %vm108_vm0, %v5955_v6, -inf  ;;  %v5731_v45 = vmov 256.0  }
  0x35   :  { %1260 = vperm.xlu1 %5165, %v1255_v49   ;;  %1253 = vperm.xlu2 %5166, %v1242_v31   ;;  %v155_v53 = vadd.f32 %v6044_v54, %v153_v52  ;;  %v218_v55 = vadd.f32 %v6084_v8, %v216_v32  ;;  %v295_v24 = vmax.f32 %v291_v33, %v294_v59  ;;  %v300_v31 = vsel %vm108_vm0, %v9591_v13, -inf  ;;  %v9595_v59 = vld [vmem:[#allocation14_spill] sm:$0xff]  ;;  %v9596_v52 = vld [vmem:[#allocation15_spill] sm:$0xff] }
  0x36   :  { %5258 = vrcp.f32 %v5731_v45  ;;  %v297_v22 = vmax.f32 %v293_v44, %v296_v1  ;;  %v302_v46 = vsel %vm108_vm0, %v6036_v27, -inf  ;;  %v325_v10 = vsel %vm108_vm0, %v9592_v42, -inf }
  0x37   :  { %v157_v7 = vadd.f32 %v6080_v9, %v155_v53  ;;  %v220_v6 = vadd.f32 %v6088_v38, %v218_v55  ;;  %v299_v54 = vmax.f32 %v295_v24, %v298_v11  ;;  %v304_v8 = vsel %vm108_vm0, %v6073_v34, -inf  ;;  %v9598_v24 = vld [vmem:[#allocation17_spill] sm:$0xff] }
  0x38   :  { %v301_v50 = vmax.f32 %v297_v22, %v300_v31  ;;  %v306_v36 = vsel %vm108_vm0, %v6091_v20, -inf  ;;  %v326_v0 = vsel %vm108_vm0, %v9593_v35, -inf  ;;  %v327_v27 = vsel %vm108_vm0, %v9594_v60, -inf  ;;  %v9597_v20 = vld [vmem:[#allocation16_spill] sm:$0xff] }
  0x39   :  { %v159_v56 = vadd.f32 %v6100_v43, %v157_v7  ;;  %v222_v9 = vadd.f32 %v6096_v61, %v220_v6  ;;  %v303_v58 = vmax.f32 %v299_v54, %v302_v46  ;;  %v328_v38 = vmax.f32 %v325_v10, %v327_v27  ;;  %v9600_v10 = vld [vmem:[#allocation19_spill] sm:$0xff]  ;;  %v9601_v7 = vld [vmem:[#allocation20_spill] sm:$0xff]  ;;  %v6282_v27 = vld [vmem:[#allocation3 + $0x1e8] sm:$0xff] }
  0x3a   :  { %v305_v19 = vmax.f32 %v301_v50, %v304_v8  ;;  %v329_v34 = vsel %vm108_vm0, %v9595_v59, -inf  ;;  %v331_v32 = vsel %vm108_vm0, %v9596_v52, -inf  ;;  %v333_v33 = vsel %vm108_vm0, %v9597_v20, -inf }
  0x3b   :  { %v161_v1 = vadd.f32 %v6117_v48, %v159_v56  ;;  %v224_v44 = vadd.f32 %v6104_v3, %v222_v9  ;;  %v308_v43 = vsel %vm108_vm0, %v6110_v25, -inf  ;;  %v330_v61 = vmax.f32 %v326_v0, %v329_v34  ;;  %v9599_v48 = vld [vmem:[#allocation18_spill] sm:$0xff]  ;;  %v9604_v9 = vld [vmem:[#allocation23_spill] sm:$0xff] }
  0x3c   :  { %v6256_v11 = vpop.eup %5258  ;;  %v310_v53 = vsel %vm108_vm0, %v6113_v23, -inf  ;;  %v332_v55 = vmax.f32 %v328_v38, %v331_v32  ;;  %v335_v13 = vsel %vm108_vm0, %v9598_v24, -inf  ;;  %v337_v3 = vsel %vm108_vm0, %v9599_v48, -inf  ;;  %v9603_v0 = vld [vmem:[#allocation22_spill] sm:$0xff]  ;;  %v6290_v34 = vld [vmem:[#allocation3 + $0x1f0] sm:$0xff] }
  0x3d   :  { %1273 = vperm.xlu1 %5165, %v1268_v30   ;;  %1266 = vperm.xlu2 %5166, %v1255_v49   ;;  %v163_v31 = vadd.f32 %v6132_v62, %v161_v1  ;;  %v226_v25 = vadd.f32 %v6150_v2, %v224_v44  ;;  %v307_v45 = vmax.f32 %v303_v58, %v306_v36  ;;  %v339_v49 = vsel %vm108_vm0, %v9600_v10, -inf  ;;  %v9602_v36 = vld [vmem:[#allocation21_spill] sm:$0xff]  ;;  %v9610_v48 = vld [vmem:[#allocation27_spill] sm:$0xff] }
  0x3e   :  { %v334_v22 = vmax.f32 %v330_v61, %v333_v33  ;;  %v309_v46 = vmax.f32 %v305_v19, %v308_v43  ;;  %v336_v42 = vmax.f32 %v332_v55, %v335_v13  ;;  %v341_v23 = vsel %vm108_vm0, %v9601_v7, -inf  ;;  %v9605_v19 = vld [vmem:[#allocation24_spill] sm:$0xff]  ;;  %v9607_v43 = vld [vmem:[#allocation26_spill] sm:$0xff]  ;;  %v9609_v55 = vld [vmem:[#allocation9_spill] sm:$0xff] }
  0x3f   :  { %v165_v6 = vadd.f32 %v6145_v26, %v163_v31  ;;  %v228_v54 = vadd.f32 %v6170_v40, %v226_v25  ;;  %v312_v8 = vsel %vm108_vm0, %v6138_v29, -inf  ;;  %v314_v2 = vsel %vm108_vm0, %v6156_v12, -inf }
  0x40   :  { %v338_v62 = vmax.f32 %v334_v22, %v337_v3  ;;  %v340_v50 = vmax.f32 %v336_v42, %v339_v49  ;;  %v343_v35 = vsel %vm108_vm0, %v9602_v36, -inf  ;;  %v345_v60 = vsel %vm108_vm0, %v9603_v0, -inf  ;;  %v9612_v49 = vld [vmem:[#allocation30_spill] sm:$0xff] }
  0x41   :  { %v167_v26 = vadd.f32 %v6166_v37, %v165_v6  ;;  %v230_v40 = vadd.f32 %v6184_v18, %v228_v54  ;;  %v347_v29 = vsel %vm108_vm0, %v9604_v9, -inf  ;;  %v311_v58 = vmax.f32 %v307_v45, %v310_v53  ;;  %v9606_v37 = vld [vmem:[#allocation25_spill] sm:$0xff]  ;;  %v9608_v53 = vld [vmem:[#allocation10_spill] sm:$0xff] }
  0x42   :  { %v342_v56 = vmax.f32 %v338_v62, %v341_v23  ;;  %v313_v38 = vmax.f32 %v309_v46, %v312_v8  ;;  %v344_v12 = vmax.f32 %v340_v50, %v343_v35  ;;  %v349_v59 = vsel %vm108_vm0, %v9605_v19, -inf  ;;  %v9611_v45 = vld [vmem:[#allocation29_spill] sm:$0xff] }
  0x43   :  { %v169_v52 = vadd.f32 %v6180_v47, %v167_v26  ;;  %v232_v32 = vadd.f32 %v6218_v63, %v230_v40  ;;  %v351_v18 = vsel %vm108_vm0, %v9606_v37, -inf  ;;  %v235_v33 = vsel %vm108_vm0, %v6282_v27, 0.0  ;;  %v6304_v47 = vld [vmem:[#allocation3 + $0x1f8] sm:$0xff]  ;;  %v9613_v26 = vld [vmem:[#allocation31_spill] sm:$0xff] }
  0x44   :  { %v346_v20 = vmax.f32 %v342_v56, %v345_v60  ;;  %v316_v1 = vsel %vm108_vm0, %v6188_v17, -inf  ;;  %v348_v44 = vmax.f32 %v344_v12, %v347_v29  ;;  %v353_v61 = vsel %vm108_vm0, %v9607_v43, -inf }
  0x45   :  { %5169 = vset.pattern.permute.xlu1 %v9608_v53  ;;  %5168 = vset.pattern.permute.xlu2 %v9609_v55  ;;  %v171_v63 = vadd.f32 %v6208_v57, %v169_v52  ;;  %v234_v24 = vadd.f32 %v6222_v5, %v232_v32  ;;  %v355_v3 = vsel %vm108_vm0, %v9610_v48, -inf  ;;  %v237_v17 = vsel %vm108_vm0, %v6290_v34, 0.0  ;;  %v870_v32 = vld [vmem:[%s9448_s1 + $0x8] sm:$0xff] }
  0x46   :  { %v350_v13 = vmax.f32 %v346_v20, %v349_v59  ;;  %v315_v31 = vmax.f32 %v311_v58, %v314_v2  ;;  %v352_v25 = vmax.f32 %v348_v44, %v351_v18  ;;  %v357_v22 = vsel %vm108_vm0, %v9611_v45, -inf }
  0x47   :  { %v236_v46 = vadd.f32 %v235_v33, %v234_v24  ;;  %v317_v42 = vmax.f32 %v313_v38, %v316_v1  ;;  %v359_v57 = vsel %vm108_vm0, %v9612_v49, -inf  ;;  %v172_v7 = vrot.slane %v171_v63, 4 }
  0x48   :  { %v354_v10 = vmax.f32 %v350_v13, %v353_v61  ;;  %v239_v5 = vsel %vm108_vm0, %v6304_v47, 0.0  ;;  %v356_v23 = vmax.f32 %v352_v25, %v355_v3  ;;  %v361_v6 = vsel %vm108_vm0, %v6015_v39, -inf  ;;  %v9614_v39 = vld [vmem:[#allocation32_spill] sm:$0xff] }
  0x49   :  { %v238_v54 = vadd.f32 %v237_v17, %v236_v46  ;;  %v363_v62 = vsel %vm108_vm0, %v6038_v21, -inf  ;;  %v248_v2 = vmul.f32 256.0, %v6256_v11  ;;  %v365_v36 = vsel %vm108_vm0, %v6040_v4, -inf }
  0x4a   :  { %v358_v8 = vmax.f32 %v354_v10, %v357_v22  ;;  %v360_v50 = vmax.f32 %v356_v23, %v359_v57  ;;  %v318_v0 = vmax.f32 %v315_v31, %v317_v42  ;;  %v367_v40 = vsel %vm108_vm0, %v9613_v26, -inf }
  0x4b   :  { %v240_v35 = vadd.f32 %v239_v5, %v238_v54  ;;  %v173_v56 = vadd.f32 %v172_v7, %v171_v63  ;;  %v369_v29 = vsel %vm108_vm0, %v9614_v39, -inf  ;;  %v371_v12 = vsel %vm108_vm0, %v6125_v16, -inf }
  0x4c   :  { %v362_v60 = vmax.f32 %v358_v8, %v361_v6  ;;  %v364_v9 = vmax.f32 %v360_v50, %v363_v62  ;;  %v249_v19 = vsub.f32 1.0, %v248_v2  ;;  %v373_v52 = vsel %vm108_vm0, %v6140_v14, -inf }
  0x4d   :  { %v241_v58 = vrot.slane %v240_v35, 4  ;;  %v319_v37 = vrot.slane %v318_v0, 4  ;;  %v375_v33 = vsel %vm108_vm0, %v6158_v28, -inf  ;;  %v174_v1 = vrot.slane %v173_v56, 2 }
  0x4e   :  { %v366_v38 = vmax.f32 %v362_v60, %v365_v36  ;;  %v368_v59 = vmax.f32 %v364_v9, %v367_v40  ;;  %v377_v16 = vsel %vm108_vm0, %v6198_v15, -inf  ;;  %v1281_v43 = vperm.slane %v6071_v41, 5 }
  0x4f   :  { %v242_v20 = vadd.f32 %v241_v58, %v240_v35  ;;  %v379_v14 = vsel %vm108_vm0, %v6200_v51, -inf  ;;  %v5071_v24 = vmul.f32 -1.442695, %v870_v32  ;;  %v381_v48 = vsel %vm108_vm0, %v6282_v27, -inf }
  0x50   :  { %v370_v18 = vmax.f32 %v366_v38, %v369_v29  ;;  %v372_v44 = vmax.f32 %v368_v59, %v371_v12  ;;  %1292 = vperm.xlu1 %5169, %v1281_v43   ;;  %1286 = vperm.xlu2 %5168, %v1281_v43   ;;  %v320_v28 = vmax.f32 %v318_v0, %v319_v37  ;;  %v383_v17 = vsel %vm108_vm0, %v6290_v34, -inf }
  0x51   :  { %v243_v61 = vrot.slane %v242_v20, 2  ;;  %5260 = vpow2.f32 %v5071_v24  ;;  %v175_v15 = vadd.f32 %v174_v1, %v173_v56  ;;  %v385_v45 = vsel %vm108_vm0, %v6304_v47, -inf  ;;  %v871_v24 = vld [vmem:[%s9448_s1 + $0x10] sm:$0xff] }
  0x52   :  { %v374_v63 = vmax.f32 %v370_v18, %v373_v52  ;;  %v376_v13 = vmax.f32 %v372_v44, %v375_v33  ;;  %v250_v51 = vmul.f32 %v6256_v11, %v249_v19  ;;  %v1294_v42 = vperm.slane %v6071_v41, 6 }
  0x53   :  { %v244_v31 = vadd.f32 %v243_v61, %v242_v20  ;;  %v321_v10 = vrot.slane %v320_v28, 2  ;;  %v1307_v57 = vperm.slane %v6071_v41, 7  ;;  %v176_v7 = vrot.slane %v175_v15, 1 }
  0x54   :  { %v378_v3 = vmax.f32 %v374_v63, %v377_v16  ;;  %v380_v25 = vmax.f32 %v376_v13, %v379_v14  ;;  %v251_v6 = vadd.f32 %v6256_v11, %v250_v51  ;;  %vm252_vm5 = vweird.f32 %v6256_v11 }
  0x55   :  { %v245_v5 = vrot.slane %v244_v31, 1  ;;  %1312 = vperm.xlu0 %5167, %v1307_v57   ;;  %v322_v62 = vmax.f32 %v320_v28, %v321_v10  ;;  %v177_v50 = vadd.f32 %v176_v7, %v175_v15  ;;  %v5072_v13 = vmul.f32 -1.442695, %v871_v24 }
  0x56   :  { %v382_v22 = vmax.f32 %v378_v3, %v381_v48  ;;  %v384_v46 = vmax.f32 %v380_v25, %v383_v17  ;;  %v253_v35 = vsel %vm252_vm5, %v6256_v11, %v251_v6  ;;  %vm439_vm2 = vcmask 1043456  }
  0x57   :  { %v5261_v23 = vpop.eup %5260  ;;  %v246_v36 = vadd.f32 %v245_v5, %v244_v31  ;;  %v323_v60 = vrot.slane %v322_v62, 1  ;;  %v254_v40 = vmul.f32 %v253_v35, %v177_v50  ;;  %v434_v5 = vld [vmem:[%s9450_s3] sm:$0xf] }
  0x58   :  { %v386_v49 = vmax.f32 %v382_v22, %v385_v45  ;;  %1305 = vperm.xlu1 %5169, %v1294_v42   ;;  %1299 = vperm.xlu2 %5168, %v1294_v42   ;;  %v886_v8 = vadd.f32 1.0, %v5261_v23 }
  0x59   :  { %v255_v56 = vmul.f32 %v253_v35, %v246_v36  ;;  %v324_v29 = vmax.f32 %v322_v62, %v323_v60  ;;  %5027 = vmatpush.msk.msra.mxu1 %vm439_vm2, %v434_v5  ;;  %v872_v62 = vld [vmem:[%s9448_s1 + $0x18] sm:$0xff]  ;;  %vm2381_vm2 = vcmask 1044484  }
  0x5a   :  { %v387_v54 = vmax.f32 %v384_v46, %v386_v49  ;;  %5262 = vrcp.f32 %v886_v8  ;;  %vm909_vm9 = vweird.f32 %v886_v8  ;;  %v915_v11 = vand.u32 2147483648, %v886_v8 }
  0x5b   :  { %v397_v12 = vsel %vm396_vm6, %v255_v56, %v254_v40  ;;  %v913_v52 = vand.u32 2147483647, %v886_v8  ;;  %5264 = vpow2.f32 %v5072_v13 }
  0x5c   :  { %v388_v2 = vrot.slane %v387_v54, 4  ;;  %v916_v18 = vor.u32 1.1754944e-38, %v915_v11 }
  0x5d   :  { %vm914_vm12 = vcmp.eq.f32.partialorder %v913_v52, 8.507059e+37 }
  0x5e   :  { %v389_v0 = vmax.f32 %v387_v54, %v388_v2  ;;  %v5073_v2 = vmul.f32 -1.442695, %v872_v62 }
  0x60   :  { %v390_v26 = vrot.slane %v389_v0, 2  ;;  %v5263_v39 = vpop.eup %5262  ;;  %5171 = vset.pattern.permute.xlu1 %v9609_v55  ;;  %5170 = vset.pattern.permute.xlu2 %v9608_v53 }
  0x61   :  { %v905_v38 = vmul.f32 %v5263_v39, %v886_v8  ;;  %vm910_vm10 = vweird.f32 %v5263_v39  ;;  %v5265_v28 = vpop.eup %5264 }
  0x62   :  { %v391_v9 = vmax.f32 %v389_v0, %v390_v26  ;;  %vm911_vm11 = vmor %vm909_vm9, %vm910_vm10  ;;  %v887_v3 = vadd.f32 1.0, %v5265_v28 }
  0x63   :  { %v906_v59 = vsub.f32 1.0, %v905_v38 }
  0x64   :  { %v392_v58 = vrot.slane %v391_v9, 1  ;;  %5266 = vrcp.f32 %v887_v3  ;;  %vm924_vm13 = vweird.f32 %v887_v3  ;;  %v930_v45 = vand.u32 2147483648, %v887_v3 }
  0x65   :  { %v907_v20 = vmul.f32 %v5263_v39, %v906_v59  ;;  %v928_v22 = vand.u32 2147483647, %v887_v3  ;;  %5268 = vpow2.f32 %v5073_v2 }
  0x66   :  { %v393_v19 = vmax.f32 %v391_v9, %v392_v58  ;;  %v931_v10 = vor.u32 1.1754944e-38, %v930_v45 }
  0x67   :  { %v908_v33 = vadd.f32 %v5263_v39, %v907_v20  ;;  %vm929_vm1 = vcmp.eq.f32.partialorder %v928_v22, 8.507059e+37 }
  0x68   :  { %v402_v32 = vsel %vm401_vm7, %v393_v19, %v324_v29  ;;  %1318 = vperm.xlu2 %5170, %v1307_v57  }
  0x69   :  { %v405_v37 = vsel %vm404_vm8, %v397_v12, %v402_v32  ;;  %v912_v1 = vsel %vm911_vm11, %v5263_v39, %v908_v33 }
  0x6a   :  { %5026 = vmatmul.msk.f32.vlgmr.msra.gmra.mxu0 %vm108_vm0, %v405_v37  ;;  %v6360_v44 = vsel %vm914_vm12, %v916_v18, %v912_v1  ;;  %v5267_v15 = vpop.eup %5266 }
  0x6b   :  { %v1320_v16 = vperm.slane %v6360_v44, 0  ;;  %v1333_v43 = vperm.slane %v6360_v44, 1  ;;  %v1346_v61 = vperm.slane %v6360_v44, 2  ;;  %v1372_v63 = vperm.slane %v6360_v44, 4  ;;  %v5269_v36 = vpop.eup %5268 }
  0x6c   :  { %v1359_v14 = vperm.slane %v6360_v44, 3  ;;  %v1385_v48 = vperm.slane %v6360_v44, 5  ;;  %v1398_v17 = vperm.slane %v6360_v44, 6  ;;  %v920_v31 = vmul.f32 %v5267_v15, %v887_v3  ;;  %v5147_v3 = vld [vmem:[%s9452_s5 + $0x8] sm:$0xff] }
  0x6d   :  { %1325 = vperm.xlu1 %5171, %v1320_v16   ;;  %1377 = vperm.xlu0 %5167, %v1372_v63   ;;  %vm925_vm14 = vweird.f32 %v5267_v15  ;;  %v1411_v46 = vperm.slane %v6360_v44, 7  ;;  %v888_v35 = vadd.f32 1.0, %v5269_v36 }
  0x6e   :  { %v921_v25 = vsub.f32 1.0, %v920_v31  ;;  %vm926_vm15 = vmor %vm924_vm13, %vm925_vm14  ;;  %706 = vmatpush.bf16.msrb.mxu0 %v5147_v3  ;;  %5148 = vmatpush.bf16.msrb.mxu1 %v5147_v3 }
  0x6f   :  { %5270 = vrcp.f32 %v888_v35  ;;  %v945_v9 = vand.u32 2147483648, %v888_v35  ;;  %vm939_vm4 = vweird.f32 %v888_v35  ;;  %v943_v29 = vand.u32 2147483647, %v888_v35  ;;  %5149 = vmatpush.bf16.msra.mxu2 %v5147_v3  ;;  %5150 = vmatpush.bf16.msra.mxu3 %v5147_v3 }
  0x70   :  { %1331 = vperm.xlu2 %5170, %v1320_v16   ;;  %v922_v51 = vmul.f32 %v5267_v15, %v921_v25  ;;  %v5146_v25 = vld [vmem:[%s9452_s5] sm:$0xff]  ;;  %s5735_s5 = smov 64  }
  0x71   :  { %v946_v38 = vor.u32 1.1754944e-38, %v945_v9  ;;  %vm944_vm9 = vcmp.eq.f32.partialorder %v943_v29, 8.507059e+37  ;;  %v5550_v9 = vld [vmem:[#allocation3 + $0x20] sm:$0xff]  ;;  %v5551_v29 = vld [vmem:[#allocation3 + $0x10] sm:$0xff] }
  0x72   :  { %v923_v42 = vadd.f32 %v5267_v15, %v922_v51  ;;  %707 = vmatpush.bf16.msrb.mxu0 %v5146_v25  ;;  %5151 = vmatpush.bf16.msrb.mxu1 %v5146_v25 }
  0x73   :  { %5152 = vmatpush.bf16.msra.mxu2 %v5146_v25  ;;  %5153 = vmatpush.bf16.msra.mxu3 %v5146_v25  ;;  %v5556_v25 = vld [vmem:[#allocation3 + $0x100] sm:$0xff] }
  0x74   :  { %v927_v49 = vsel %vm926_vm15, %v5267_v15, %v923_v42  ;;  %vm2282_vm15 = vcmask 130112  }
  0x75   :  { %1338 = vperm.xlu1 %5171, %v1333_v43   ;;  %v6383_v57 = vsel %vm929_vm1, %v931_v10, %v927_v49  ;;  %v5271_v40 = vpop.eup %5270  ;;  %vm2378_vm1 = vcmask 1042434  }
  0x76   :  { %v1424_v7 = vperm.slane %v6383_v57, 0  ;;  %v1437_v23 = vperm.slane %v6383_v57, 1  ;;  %v1450_v6 = vperm.slane %v6383_v57, 2  ;;  %v1502_v54 = vperm.slane %v6383_v57, 6 }
  0x77   :  { %v1463_v8 = vperm.slane %v6383_v57, 3  ;;  %v1476_v50 = vperm.slane %v6383_v57, 4  ;;  %v1489_v26 = vperm.slane %v6383_v57, 5  ;;  %v935_v56 = vmul.f32 %v5271_v40, %v888_v35 }
  0x78   :  { %5172 = vset.pattern.permute.xlu2 %v9609_v55  ;;  %1442 = vperm.xlu0 %5167, %v1437_v23   ;;  %vm940_vm5 = vweird.f32 %v5271_v40  ;;  %v1515_v52 = vperm.slane %v6383_v57, 7 }
  0x79   :  { %v936_v39 = vsub.f32 1.0, %v935_v56  ;;  %vm941_vm8 = vmor %vm939_vm4, %vm940_vm5  ;;  %vm2385_vm4 = vcmask 1046534   ;;  %vm2387_vm5 = vcmask 1047559  }
  0x7b   :  { %v937_v58 = vmul.f32 %v5271_v40, %v936_v39 }
  0x7d   :  { %5173 = vset.pattern.permute.xlu1 %v9608_v53  ;;  %v938_v12 = vadd.f32 %v5271_v40, %v937_v58 }
  0x7f   :  { %v942_v11 = vsel %vm941_vm8, %v5271_v40, %v938_v12  ;;  %v6422_v41 = vpop.permute.xlu2 %1227  ;;  %vm2414_vm8 = vcmask 130048  }
  0x80   :  { %1351 = vperm.xlu2 %5172, %v1346_v61   ;;  %1507 = vperm.xlu0 %5167, %v1502_v54   ;;  %v6403_v19 = vsel %vm944_vm9, %v946_v38, %v942_v11  ;;  %9615 = vst [vmem:[#allocation28_spill] sm:$0xff] %v6422_v41  ;;  %v5552_v38 = vld [vmem:[#allocation3] sm:$0xff]  ;;  %vm2679_vm9 = vcmask 261312  }
  0x81   :  { %v1567_v59 = vperm.slane %v6403_v19, 3  ;;  %v1528_v32 = vperm.slane %v6403_v19, 0  ;;  %v1541_v20 = vperm.slane %v6403_v19, 1  ;;  %v1554_v37 = vperm.slane %v6403_v19, 2  ;;  %v5596_v41 = vld [vmem:[#allocation3 + $0xe0] sm:$0xff] }
  0x82   :  { %v9482_v33 = vperm.slane %v6403_v19, 5 }
  0x85   :  { %1357 = vperm.xlu1 %5173, %v1346_v61  }
  0x87   :  { %v6428_v1 = vpop.permute.xlu2 %1240 }
  0x88   :  { %1364 = vperm.xlu2 %5172, %v1359_v14   ;;  %1572 = vperm.xlu0 %5167, %v1567_v59   ;;  %9617 = vst [vmem:[#allocation12_spill] sm:$0xff] %v6428_v1 }
  0x8d   :  { %1370 = vperm.xlu1 %5173, %v1359_v14  }
  0x8f   :  { %v6435_v16 = vpop.permute.xlu2 %1253 }
  0x90   :  { %5174 = vset.pattern.permute.xlu2 %v9608_v53  ;;  %5186 = vset.pattern.permute.xlu0 %v9608_v53  ;;  %9619 = vst [vmem:[#allocation14_spill] sm:$0xff] %v6435_v16 }
  0x95   :  { %5175 = vset.pattern.permute.xlu1 %v9609_v55 }
  0x97   :  { %v6425_v18 = vpop.permute.xlu1 %1221  ;;  %v6440_v61 = vpop.permute.xlu2 %1266 }
  0x98   :  { %1383 = vperm.xlu2 %5174, %v1372_v63   ;;  %1279 = vperm.xlu0 %5186, %v1268_v30   ;;  %v1580_v30 = vperm.slane %v6403_v19, 4  ;;  %9616 = vst [vmem:[#allocation11_spill] sm:$0xff] %v6425_v18 }
  0x99   :  { %9621 = vst [vmem:[#allocation16_spill] sm:$0xff] %v6440_v61 }
  0x9d   :  { %1390 = vperm.xlu1 %5175, %v1385_v48  }
  0x9f   :  { %v6432_v44 = vpop.permute.xlu1 %1247 }
  0xa0   :  { %1396 = vperm.xlu2 %5174, %v1385_v48   ;;  %1344 = vperm.xlu0 %5186, %v1333_v43   ;;  %9618 = vst [vmem:[#allocation13_spill] sm:$0xff] %v6432_v44  ;;  %v5592_v44 = vld [vmem:[#allocation3 + $0x140] sm:$0xff] }
  0xa5   :  { %1403 = vperm.xlu1 %5175, %v1398_v17  }
  0xa7   :  { %v6438_v43 = vpop.permute.xlu1 %1260 }
  0xa8   :  { %5176 = vset.pattern.permute.xlu2 %v9609_v55  ;;  %1409 = vperm.xlu0 %5186, %v1398_v17   ;;  %9620 = vst [vmem:[#allocation15_spill] sm:$0xff] %v6438_v43 }
  0xaa   :  { %v6444_v14 = vpop.permute.xlu2 %1286 }
  0xab   :  { %9623 = vst [vmem:[#allocation18_spill] sm:$0xff] %v6444_v14 }
  0xad   :  { %5177 = vset.pattern.permute.xlu1 %v9608_v53 }
  0xaf   :  { %v6442_v63 = vpop.permute.xlu1 %1273 }
  0xb0   :  { %1416 = vperm.xlu2 %5176, %v1411_v46   ;;  %1474 = vperm.xlu0 %5186, %v1463_v8   ;;  %9622 = vst [vmem:[#allocation17_spill] sm:$0xff] %v6442_v63  ;;  %v5586_v63 = vld [vmem:[#allocation3 + $0x130] sm:$0xff] }
  0xb2   :  { %v6448_v13 = vpop.permute.xlu2 %1299 }
  0xb3   :  { %9625 = vst [vmem:[#allocation20_spill] sm:$0xff] %v6448_v13 }
  0xb5   :  { %1422 = vperm.xlu1 %5177, %v1411_v46  }
  0xb8   :  { %1429 = vperm.xlu2 %5176, %v1424_v7   ;;  %1539 = vperm.xlu0 %5186, %v1528_v32  }
  0xbd   :  { %1435 = vperm.xlu1 %5177, %v1424_v7  }
  0xc0   :  { %5178 = vset.pattern.permute.xlu2 %v9608_v53 }
  0xc2   :  { %v6446_v24 = vpop.permute.xlu1 %1292  ;;  %v6452_v28 = vpop.permute.xlu2 %1318 }
  0xc3   :  { %9624 = vst [vmem:[#allocation19_spill] sm:$0xff] %v6446_v24 }
  0xc4   :  { %9627 = vst [vmem:[#allocation22_spill] sm:$0xff] %v6452_v28 }
  0xc5   :  { %5179 = vset.pattern.permute.xlu1 %v9609_v55 }
  0xc8   :  { %1448 = vperm.xlu2 %5178, %v1437_v23  }
  0xca   :  { %v6450_v48 = vpop.permute.xlu1 %1305  ;;  %v6462_v22 = vpop.permute.xlu2 %1331 }
  0xcb   :  { %9626 = vst [vmem:[#allocation21_spill] sm:$0xff] %v6450_v48 }
  0xcc   :  { %9629 = vst [vmem:[#allocation24_spill] sm:$0xff] %v6462_v22  ;;  %v5581_v22 = vld [vmem:[#allocation3 + $0x128] sm:$0xff] }
  0xcd   :  { %1455 = vperm.xlu1 %5179, %v1450_v6  }
  0xd0   :  { %1461 = vperm.xlu2 %5178, %v1450_v6  }
  0xd5   :  { %1468 = vperm.xlu1 %5179, %v1463_v8  }
  0xd8   :  { %5180 = vset.pattern.permute.xlu2 %v9609_v55 }
  0xda   :  { %v6466_v10 = vpop.permute.xlu2 %1351 }
  0xdb   :  { %9631 = vst [vmem:[#allocation26_spill] sm:$0xff] %v6466_v10  ;;  %v5578_v10 = vld [vmem:[#allocation3 + $0xb0] sm:$0xff] }
  0xdd   :  { %5181 = vset.pattern.permute.xlu1 %v9608_v53 }
  0xdf   :  { %v6457_v17 = vpop.permute.xlu1 %1325 }
  0xe0   :  { %1481 = vperm.xlu2 %5180, %v1476_v50   ;;  %9628 = vst [vmem:[#allocation23_spill] sm:$0xff] %v6457_v17 }
  0xe2   :  { %v6470_v23 = vpop.permute.xlu2 %1364 }
  0xe3   :  { %9633 = vst [vmem:[#allocation29_spill] sm:$0xff] %v6470_v23 }
  0xe5   :  { %1487 = vperm.xlu1 %5181, %v1476_v50  }
  0xe7   :  { %v430_v0 = vpop.f32.mrf.mxu0  ;;  %v6464_v46 = vpop.permute.xlu1 %1338 }
  0xe8   :  { %v433_v60 = vmax.f32 %v430_v0, 0.0  ;;  %1494 = vperm.xlu2 %5180, %v1489_v26   ;;  %9630 = vst [vmem:[#allocation25_spill] sm:$0xff] %v6464_v46  ;;  %v5580_v46 = vld [vmem:[#allocation3 + $0x120] sm:$0xff] }
  0xea   :  { %5028 = vmatmul.msk.f32.vlgmr.msra.gmra.mxu1 %vm435_vm3, %v433_v60  ;;  %vm2383_vm3 = vcmask 1045509  }
  0xed   :  { %1500 = vperm.xlu1 %5181, %v1489_v26  }
  0xf0   :  { %5182 = vset.pattern.permute.xlu2 %v9608_v53 }
  0xf2   :  { %v6474_v0 = vpop.permute.xlu2 %1383 }
  0xf3   :  { %9635 = vst [vmem:[#allocation31_spill] sm:$0xff] %v6474_v0  ;;  %v5582_v0 = vld [vmem:[#allocation3 + $0x1c0] sm:$0xff] }
  0xf5   :  { %5183 = vset.pattern.permute.xlu1 %v9609_v55 }
  0xf7   :  { %v6468_v57 = vpop.permute.xlu1 %1357 }
  0xf8   :  { %1513 = vperm.xlu2 %5182, %v1502_v54   ;;  %9632 = vst [vmem:[#allocation27_spill] sm:$0xff] %v6468_v57  ;;  %v5576_v57 = vld [vmem:[#allocation3 + $0x88] sm:$0xff] }
  0xfd   :  { %1520 = vperm.xlu1 %5183, %v1515_v52  }
  0xff   :  { %v6472_v2 = vpop.permute.xlu1 %1370 }
 0x100   :  { %1526 = vperm.xlu2 %5182, %v1515_v52   ;;  %9634 = vst [vmem:[#allocation30_spill] sm:$0xff] %v6472_v2 }
 0x105   :  { %1533 = vperm.xlu1 %5183, %v1528_v32   ;;  %v5554_v32 = vld [vmem:[#allocation3 + $0x90] sm:$0xff] }
 0x108   :  { %5184 = vset.pattern.permute.xlu2 %v9609_v55 }
 0x10d   :  { %5185 = vset.pattern.permute.xlu1 %v9608_v53 }
 0x10f   :  { %v6489_v11 = vpop.permute.xlu1 %1390 }
 0x110   :  { %1546 = vperm.xlu2 %5184, %v1541_v20   ;;  %9636 = vst [vmem:[#allocation32_spill] sm:$0xff] %v6489_v11 }
 0x115   :  { %1552 = vperm.xlu1 %5185, %v1541_v20  }
 0x118   :  { %1559 = vperm.xlu2 %5184, %v1554_v37  }
 0x11d   :  { %1565 = vperm.xlu1 %5185, %v1554_v37   ;;  %v5555_v37 = vld [vmem:[#allocation3 + $0x98] sm:$0xff] }
 0x120   :  { %5187 = vset.pattern.permute.xlu2 %v9608_v53 }
 0x125   :  { %5188 = vset.pattern.permute.xlu1 %v9609_v55 }
 0x128   :  { %1578 = vperm.xlu2 %5187, %v1567_v59   ;;  %v5553_v59 = vld [vmem:[#allocation3 + $0x8] sm:$0xff] }
 0x12d   :  { %1585 = vperm.xlu1 %5188, %v1580_v30  }
 0x130   :  { %1591 = vperm.xlu2 %5187, %v1580_v30  }
 0x135   :  { %1598 = vperm.xlu1 %5188, %v9482_v33   ;;  %v5570_v33 = vld [vmem:[#allocation3 + $0x50] sm:$0xff] }
 0x138   :  { %5189 = vset.pattern.permute.xlu2 %v9609_v55 }
 0x13d   :  { %5190 = vset.pattern.permute.xlu1 %v9608_v53  ;;  %v5572_v53 = vld [vmem:[#allocation3 + $0x68] sm:$0xff] }
 0x167   :  { %v460_v15 = vpop.f32.mrf.mxu1 }
 0x168   :  { %v464_v31 = vrot.slane %v460_v15, 2 }
 0x16a   :  { %v466_v45 = vadd.f32 %v464_v31, %v460_v15 }
 0x16c   :  { %v5029_v51 = vmul.f32 -1.442695, %v466_v45 }
 0x16e   :  { %5272 = vpow2.f32 %v5029_v51 }
 0x174   :  { %v5273_v42 = vpop.eup %5272 }
 0x175   :  { %v470_v49 = vadd.f32 1.0, %v5273_v42 }
 0x177   :  { %5274 = vrcp.f32 %v470_v49  ;;  %v482_v54 = vand.u32 2147483648, %v470_v49  ;;  %v480_v62 = vand.u32 2147483647, %v470_v49  ;;  %vm476_vm11 = vweird.f32 %v470_v49 }
 0x179   :  { %v483_v36 = vor.u32 1.1754944e-38, %v482_v54  ;;  %vm481_vm13 = vcmp.eq.f32.partialorder %v480_v62, 8.507059e+37  ;;  %v5558_v62 = vld [vmem:[#allocation3 + $0x28] sm:$0xff] }
 0x17d   :  { %v5275_v7 = vpop.eup %5274 }
 0x17e   :  { %v472_v5 = vmul.f32 %v5275_v7, %v470_v49  ;;  %vm477_vm10 = vweird.f32 %v5275_v7  ;;  %v5557_v49 = vld [vmem:[#allocation3 + $0x108] sm:$0xff] }
 0x17f   :  { %vm478_vm12 = vmor %vm476_vm11, %vm477_vm10  ;;  %vm2806_vm10 = vcmask 261248   ;;  %vm2016_vm11 = vcmask 256000  }
 0x180   :  { %v473_v6 = vsub.f32 1.0, %v472_v5 }
 0x182   :  { %v474_v8 = vmul.f32 %v5275_v7, %v473_v6 }
 0x184   :  { %v475_v50 = vadd.f32 %v5275_v7, %v474_v8 }
 0x186   :  { %v479_v35 = vsel %vm478_vm12, %v5275_v7, %v475_v50 }
 0x187   :  { %v484_v60 = vsel %vm481_vm13, %v483_v36, %v479_v35 }
 0x188   :  { %v487_v26 = vrot.slane %v484_v60, 1  ;;  %v6476_v40 = vperm.slane %v484_v60, 0 }
 0x18a   :  { %v6478_v56 = vperm.slane %v487_v26, 0  ;;  %v6481_v39 = vmul.f32 %v5550_v9, %v6476_v40  ;;  %v6484_v58 = vmul.f32 %v5551_v29, %v6476_v40  ;;  %v6487_v12 = vmul.f32 %v5552_v38, %v6476_v40  ;;  %v6544_v26 = vpop.permute.xlu1 %1403  ;;  %v5560_v29 = vld [vmem:[#allocation3 + $0x40] sm:$0xff] }
 0x18b   :  { %v6492_v52 = vmul.f32 %v5553_v59, %v6476_v40  ;;  %v6495_v20 = vmul.f32 %v5554_v32, %v6476_v40  ;;  %v6498_v30 = vmul.f32 %v5555_v37, %v6476_v40  ;;  %v6531_v50 = vmul.f32 %v5558_v62, %v6476_v40  ;;  %9639 = vst [vmem:[#allocation35_spill] sm:$0xff] %v6544_v26  ;;  %v5561_v59 = vld [vmem:[#allocation3 + $0x38] sm:$0xff] }
 0x18c   :  { %v961_v3 = vsel %vm108_vm0, %v6481_v39, 0.0  ;;  %v955_v15 = vsel %vm108_vm0, %v6484_v58, 0.0  ;;  %v949_v31 = vsel %vm108_vm0, %v6487_v12, 0.0  ;;  %v6507_v45 = vmul.f32 %v5556_v25, %v6478_v56  ;;  %v5566_v62 = vld [vmem:[#allocation3 + $0x118] sm:$0xff] }
 0x18d   :  { %962 = vadd.xlane.f32.xlu2 %v961_v3  ;;  %956 = vadd.xlane.f32.xlu1 %v955_v15  ;;  %v556_v51 = vpack.c.bf16 %v6492_v52, %v6487_v12  ;;  %v565_v42 = vpack.c.bf16 %v6498_v30, %v6495_v20  ;;  %v6514_v7 = vmul.f32 %v5557_v49, %v6478_v56  ;;  %v964_v35 = vsel %vm108_vm0, %v6531_v50, 0.0  ;;  %v5562_v3 = vld [vmem:[#allocation3 + $0x30] sm:$0xff]  ;;  %v6565_v49 = vpop.permute.xlu0 %1234  ;;  %v5579_v26 = vld [vmem:[#allocation3 + $0xb8] sm:$0xff] }
 0x18e   :  { %9637 = vst [vmem:[#allocation33_spill] sm:$0xff] %v6507_v45  ;;  %950 = vadd.xlane.f32.xlu0 %v949_v31  ;;  %v6518_v5 = vmul.f32 %v6478_v56, %v6038_v21  ;;  %v6522_v6 = vmul.f32 %v6478_v56, %v6040_v4  ;;  %v5559_v21 = vld [vmem:[#allocation3 + $0x18] sm:$0xff]  ;;  %v6536_v4 = vpop.permute.xlu2 %1396  ;;  %v952_v9 = vsel %vm108_vm0, %v6492_v52, 0.0  ;;  %v6549_v38 = vmul.f32 %v5560_v29, %v6476_v40  ;;  %v5563_v31 = vld [vmem:[#allocation3 + $0xa0] sm:$0xff] }
 0x18f   :  { %5038 = vmatmul.msk.bf16.vlgmr.msrb.gmra.mxu0 %vm108_vm0, %v556_v51  ;;  %5047 = vmatmul.msk.bf16.vlgmr.msrb.gmra.mxu1 %vm108_vm0, %v565_v42  ;;  %v572_v54 = vpack.c.bf16 %v6514_v7, %v6507_v45  ;;  %v6534_v36 = vmul.f32 %v5559_v21, %v6476_v40  ;;  %9638 = vst [vmem:[#allocation34_spill] sm:$0xff] %v6536_v4  ;;  %v5564_v51 = vld [vmem:[#allocation3 + $0xa8] sm:$0xff] }
 0x190   :  { %v582_v8 = vpack.c.bf16 %v6522_v6, %v6518_v5  ;;  %v6552_v32 = vmul.f32 %v5561_v59, %v6476_v40  ;;  %v6557_v15 = vmul.f32 %v5562_v3, %v6476_v40  ;;  %v6560_v25 = vmul.f32 %v5563_v31, %v6476_v40  ;;  %9641 = vst [vmem:[#allocation37_spill] sm:$0xff] %v6565_v49  ;;  %v5568_v59 = vld [vmem:[#allocation3 + $0x1b8] sm:$0xff] }
 0x191   :  { %5054 = vmatmul.msk.bf16.vlgmr.msra.gmra.mxu2 %vm108_vm0, %v572_v54  ;;  %v958_v60 = vsel %vm108_vm0, %v6534_v36, 0.0  ;;  %v6563_v42 = vmul.f32 %v5564_v51, %v6476_v40  ;;  %v5565_v54 = vld [vmem:[#allocation3 + $0x110] sm:$0xff]  ;;  %v6571_v21 = vmul.f32 %v5566_v62, %v6478_v56  ;;  %v6581_v3 = vmul.f32 %v5568_v59, %v6478_v56 }
 0x192   :  { %5064 = vmatmul.msk.bf16.vlgmr.msra.gmra.mxu3 %vm108_vm0, %v582_v8  ;;  %v6568_v8 = vmul.f32 %v5565_v54, %v6478_v56  ;;  %v6583_v31 = vpop.permute.xlu1 %1422  ;;  %v967_v51 = vsel %vm108_vm0, %v6557_v15, 0.0  ;;  %v557_v54 = vpack.c.bf16 %v6534_v36, %v6484_v58  ;;  %v6601_v55 = vmul.f32 %v5570_v33, %v6476_v40 }
 0x193   :  { %9643 = vst [vmem:[#allocation39_spill] sm:$0xff] %v6583_v31  ;;  %v566_v62 = vpack.c.bf16 %v6563_v42, %v6560_v25  ;;  %v6661_v28 = vmul.f32 %v5582_v0, %v6478_v56  ;;  %v559_v43 = vpack.c.bf16 %v6552_v32, %v6557_v15  ;;  %v6793_v61 = vmul.f32 %v5596_v41, %v6476_v40 }
 0x194   :  { %9642 = vst [vmem:[#allocation38_spill] sm:$0xff] %v6568_v8 }
 0x195   :  { %965 = vadd.xlane.f32.xlu2 %v964_v35  ;;  %959 = vadd.xlane.f32.xlu1 %v958_v60  ;;  %v973_v35 = vsel %vm108_vm0, %v6549_v38, 0.0  ;;  %v970_v60 = vsel %vm108_vm0, %v6552_v32, 0.0 }
 0x196   :  { %953 = vadd.xlane.f32.xlu0 %v952_v9  ;;  %v6554_v37 = vpop.permute.xlu2 %1416  ;;  %v5567_v9 = vld [vmem:[#allocation3 + $0x1b0] sm:$0xff] }
 0x197   :  { %9640 = vst [vmem:[#allocation36_spill] sm:$0xff] %v6554_v37  ;;  %v6578_v29 = vmul.f32 %v5567_v9, %v6478_v56  ;;  %v573_v9 = vpack.c.bf16 %v6571_v21, %v6568_v8  ;;  %v6611_v37 = vmul.f32 %v5572_v53, %v6476_v40  ;;  %v5574_v53 = vld [vmem:[#allocation3 + $0x70] sm:$0xff] }
 0x19a   :  { %v6630_v2 = vpop.permute.xlu1 %1435 }
 0x19b   :  { %9646 = vst [vmem:[#allocation42_spill] sm:$0xff] %v6630_v2  ;;  %v5583_v2 = vld [vmem:[#allocation3 + $0x1c8] sm:$0xff] }
 0x19d   :  { %974 = vadd.xlane.f32.xlu2 %v973_v35  ;;  %971 = vadd.xlane.f32.xlu1 %v970_v60  ;;  %v583_v35 = vpack.c.bf16 %v6581_v3, %v6578_v29  ;;  %v5569_v60 = vld [vmem:[#allocation3 + $0x58] sm:$0xff] }
 0x19e   :  { %968 = vadd.xlane.f32.xlu0 %v967_v51  ;;  %v6598_v59 = vmul.f32 %v5569_v60, %v6476_v40  ;;  %v5571_v51 = vld [vmem:[#allocation3 + $0x48] sm:$0xff]  ;;  %v5573_v60 = vld [vmem:[#allocation3 + $0x60] sm:$0xff] }
 0x19f   :  { %5039 = vmatmul.msk.bf16.gmra.mxu0 %vm108_vm0, %v557_v54  ;;  %5048 = vmatmul.msk.bf16.gmra.mxu1 %vm108_vm0, %v566_v62  ;;  %v6605_v54 = vmul.f32 %v5571_v51, %v6476_v40  ;;  %v6608_v62 = vpop.permute.xlu2 %1429  ;;  %v6614_v4 = vmul.f32 %v5573_v60, %v6476_v40  ;;  %v6620_v51 = vpop.permute.xlu0 %1312  ;;  %v5575_v60 = vld [vmem:[#allocation3 + $0x78] sm:$0xff] }
 0x1a0   :  { %9644 = vst [vmem:[#allocation40_spill] sm:$0xff] %v6608_v62  ;;  %v982_v33 = vsel %vm108_vm0, %v6598_v59, 0.0  ;;  %v6625_v62 = vmul.f32 %v5574_v53, %v6476_v40  ;;  %v6628_v11 = vmul.f32 %v5575_v60, %v6476_v40  ;;  %v6641_v53 = vmul.f32 %v5578_v10, %v6476_v40 }
 0x1a1   :  { %5055 = vmatmul.msk.bf16.gmra.mxu2 %vm108_vm0, %v573_v9  ;;  %v979_v9 = vsel %vm108_vm0, %v6601_v55, 0.0  ;;  %9645 = vst [vmem:[#allocation41_spill] sm:$0xff] %v6620_v51  ;;  %v6644_v60 = vmul.f32 %v5579_v26, %v6476_v40  ;;  %v6656_v10 = vmul.f32 %v5581_v22, %v6478_v56  ;;  %v988_v26 = vsel %vm108_vm0, %v6611_v37, 0.0 }
 0x1a2   :  { %5065 = vmatmul.msk.bf16.gmra.mxu3 %vm108_vm0, %v583_v35  ;;  %v976_v35 = vsel %vm108_vm0, %v6605_v54, 0.0  ;;  %v985_v22 = vsel %vm108_vm0, %v6614_v4, 0.0  ;;  %v6674_v0 = vpop.permute.xlu1 %1455  ;;  %v560_v14 = vpack.c.bf16 %v6605_v54, %v6549_v38 }
 0x1a3   :  { %v567_v23 = vpack.c.bf16 %v6644_v60, %v6641_v53  ;;  %9648 = vst [vmem:[#allocation44_spill] sm:$0xff] %v6674_v0 }
 0x1a5   :  { %983 = vadd.xlane.f32.xlu2 %v982_v33  ;;  %980 = vadd.xlane.f32.xlu1 %v979_v9  ;;  %v6635_v33 = vmul.f32 %v5576_v57, %v6476_v40  ;;  %v5577_v9 = vld [vmem:[#allocation3 + $0x80] sm:$0xff]  ;;  %v991_v57 = vsel %vm108_vm0, %v6625_v62, 0.0 }
 0x1a6   :  { %977 = vadd.xlane.f32.xlu0 %v976_v35  ;;  %v6638_v35 = vmul.f32 %v5577_v9, %v6476_v40  ;;  %v6653_v9 = vmul.f32 %v5580_v46, %v6478_v56  ;;  %v558_v46 = vpack.c.bf16 %v6531_v50, %v6481_v39 }
 0x1a7   :  { %v6648_v31 = vpop.permute.xlu2 %1448  ;;  %v6676_v13 = vpop.permute.xlu0 %1377 }
 0x1a8   :  { %9647 = vst [vmem:[#allocation43_spill] sm:$0xff] %v6648_v31  ;;  %v6664_v31 = vmul.f32 %v5583_v2, %v6478_v56  ;;  %v574_v2 = vpack.c.bf16 %v6656_v10, %v6653_v9 }
 0x1a9   :  { %9649 = vst [vmem:[#allocation45_spill] sm:$0xff] %v6676_v13  ;;  %v5585_v13 = vld [vmem:[#allocation3 + $0xc8] sm:$0xff] }
 0x1aa   :  { %v6702_v24 = vmul.f32 %v5585_v13, %v6476_v40  ;;  %v5589_v13 = vld [vmem:[#allocation3 + $0x1d8] sm:$0xff] }
 0x1ab   :  { %v6718_v17 = vmul.f32 %v5589_v13, %v6478_v56 }
 0x1ad   :  { %992 = vadd.xlane.f32.xlu2 %v991_v57  ;;  %989 = vadd.xlane.f32.xlu1 %v988_v26  ;;  %v584_v57 = vpack.c.bf16 %v6664_v31, %v6661_v28  ;;  %v1000_v26 = vsel %vm108_vm0, %v6635_v33, 0.0 }
 0x1ae   :  { %986 = vadd.xlane.f32.xlu0 %v985_v22  ;;  %v997_v22 = vsel %vm108_vm0, %v6638_v35, 0.0 }
 0x1af   :  { %5040 = vmatmul.msk.bf16.gmra.mxu0 %vm108_vm0, %v558_v46  ;;  %5049 = vmatmul.msk.bf16.gmra.mxu1 %vm108_vm0, %v567_v23  ;;  %v6690_v51 = vpop.permute.xlu2 %1461  ;;  %v994_v23 = vsel %vm108_vm0, %v6628_v11, 0.0  ;;  %v6694_v46 = vpop.permute.xlu1 %1468 }
 0x1b0   :  { %9650 = vst [vmem:[#allocation46_spill] sm:$0xff] %v6690_v51  ;;  %v6696_v0 = vpop.permute.xlu0 %1442 }
 0x1b1   :  { %5056 = vmatmul.msk.bf16.gmra.mxu2 %vm108_vm0, %v574_v2  ;;  %9651 = vst [vmem:[#allocation47_spill] sm:$0xff] %v6694_v46  ;;  %v5584_v2 = vld [vmem:[#allocation3 + $0xc0] sm:$0xff]  ;;  %v1006_v46 = vsel %vm108_vm0, %v6498_v30, 0.0 }
 0x1b2   :  { %5066 = vmatmul.msk.bf16.gmra.mxu3 %vm108_vm0, %v584_v57  ;;  %9652 = vst [vmem:[#allocation48_spill] sm:$0xff] %v6696_v0  ;;  %v6699_v57 = vmul.f32 %v5584_v2, %v6476_v40  ;;  %v5588_v2 = vld [vmem:[#allocation3 + $0x1d0] sm:$0xff] }
 0x1b3   :  { %v6715_v0 = vmul.f32 %v5588_v2, %v6478_v56 }
 0x1b4   :  { %9653 = vst [vmem:[#allocation49_spill] sm:$0xff] %v6699_v57  ;;  %v568_v16 = vpack.c.bf16 %v6702_v24, %v6699_v57 }
 0x1b5   :  { %1001 = vadd.xlane.f32.xlu2 %v1000_v26  ;;  %998 = vadd.xlane.f32.xlu1 %v997_v22  ;;  %v6705_v26 = vmul.f32 %v5586_v63, %v6478_v56  ;;  %v5587_v22 = vld [vmem:[#allocation3 + $0x138] sm:$0xff] }
 0x1b6   :  { %995 = vadd.xlane.f32.xlu0 %v994_v23  ;;  %v6708_v51 = vmul.f32 %v5587_v22, %v6478_v56  ;;  %v1009_v23 = vsel %vm108_vm0, %v6560_v25, 0.0  ;;  %v1003_v22 = vsel %vm108_vm0, %v6495_v20, 0.0 }
 0x1b7   :  { %v6720_v63 = vpop.permute.xlu2 %1481 }
 0x1b8   :  { %9654 = vst [vmem:[#allocation50_spill] sm:$0xff] %v6720_v63  ;;  %v575_v2 = vpack.c.bf16 %v6708_v51, %v6705_v26  ;;  %v6738_v13 = vpop.permute.xlu0 %1507 }
 0x1b9   :  { %9656 = vst [vmem:[#allocation52_spill] sm:$0xff] %v6738_v13 }
 0x1bd   :  { %1010 = vadd.xlane.f32.xlu2 %v1009_v23  ;;  %1007 = vadd.xlane.f32.xlu1 %v1006_v46  ;;  %v585_v46 = vpack.c.bf16 %v6718_v17, %v6715_v0  ;;  %v6734_v23 = vpop.permute.xlu1 %1487 }
 0x1be   :  { %1004 = vadd.xlane.f32.xlu0 %v1003_v22  ;;  %9655 = vst [vmem:[#allocation51_spill] sm:$0xff] %v6734_v23  ;;  %v1018_v22 = vsel %vm108_vm0, %v6644_v60, 0.0  ;;  %v5590_v23 = vld [vmem:[#allocation3 + $0xd0] sm:$0xff] }
 0x1bf   :  { %5041 = vmatmul.msk.bf16.gmra.mxu0 %vm108_vm0, %v559_v43  ;;  %5050 = vmatmul.msk.bf16.gmra.mxu1 %vm108_vm0, %v568_v16  ;;  %v1015_v16 = vsel %vm108_vm0, %v6641_v53, 0.0  ;;  %v1012_v43 = vsel %vm108_vm0, %v6563_v42, 0.0  ;;  %v6746_v63 = vpop.permute.xlu2 %1494 }
 0x1c0   :  { %9657 = vst [vmem:[#allocation53_spill] sm:$0xff] %v6746_v63  ;;  %v5594_v63 = vld [vmem:[#allocation3 + $0x1e0] sm:$0xff] }
 0x1c1   :  { %5057 = vmatmul.msk.bf16.gmra.mxu2 %vm108_vm0, %v575_v2  ;;  %v6749_v2 = vmul.f32 %v5590_v23, %v6476_v40  ;;  %v1024_v23 = vsel %vm108_vm0, %v6702_v24, 0.0 }
 0x1c2   :  { %5067 = vmatmul.msk.bf16.gmra.mxu3 %vm108_vm0, %v585_v46  ;;  %v5591_v46 = vld [vmem:[#allocation3 + $0xd8] sm:$0xff] }
 0x1c3   :  { %9658 = vst [vmem:[#allocation54_spill] sm:$0xff] %v6749_v2  ;;  %v6752_v13 = vmul.f32 %v5591_v46, %v6476_v40  ;;  %v6767_v46 = vmul.f32 %v5594_v63, %v6478_v56 }
 0x1c5   :  { %1019 = vadd.xlane.f32.xlu2 %v1018_v22  ;;  %1016 = vadd.xlane.f32.xlu1 %v1015_v16  ;;  %v6754_v48 = vpop.permute.xlu1 %1500  ;;  %v6757_v22 = vmul.f32 %v5592_v44, %v6478_v56  ;;  %v5593_v16 = vld [vmem:[#allocation3 + $0x148] sm:$0xff]  ;;  %v6773_v44 = vpop.permute.xlu0 %1572  ;;  %v569_v49 = vpack.c.bf16 %v6752_v13, %v6749_v2  ;;  %v1030_v41 = vsel %vm108_vm0, %v6752_v13, 0.0 }
 0x1c6   :  { %1013 = vadd.xlane.f32.xlu0 %v1012_v43  ;;  %9659 = vst [vmem:[#allocation55_spill] sm:$0xff] %v6754_v48  ;;  %v6760_v1 = vmul.f32 %v5593_v16, %v6478_v56  ;;  %v1027_v43 = vsel %vm108_vm0, %v6749_v2, 0.0  ;;  %v6771_v48 = vmul.f32 %v6478_v56, %v6282_v27  ;;  %v1021_v16 = vsel %vm108_vm0, %v6699_v57, 0.0  ;;  %v5599_v2 = vld [vmem:[#allocation3 + $0x150] sm:$0xff] }
 0x1c7   :  { %9660 = vst [vmem:[#allocation56_spill] sm:$0xff] %v6757_v22  ;;  %v6781_v63 = vpop.permute.xlu2 %1513  ;;  %v6816_v57 = vmul.f32 %v5599_v2, %v6478_v56 }
 0x1c8   :  { %9661 = vst [vmem:[#allocation57_spill] sm:$0xff] %v6760_v1  ;;  %v576_v27 = vpack.c.bf16 %v6760_v1, %v6757_v22 }
 0x1c9   :  { %9662 = vst [vmem:[#allocation58_spill] sm:$0xff] %v6771_v48 }
 0x1ca   :  { %9663 = vst [vmem:[#allocation59_spill] sm:$0xff] %v6773_v44 }
 0x1cb   :  { %9664 = vst [vmem:[#allocation60_spill] sm:$0xff] %v6781_v63 }
 0x1cd   :  { %1028 = vadd.xlane.f32.xlu2 %v1027_v43  ;;  %1025 = vadd.xlane.f32.xlu1 %v1024_v23  ;;  %v586_v43 = vpack.c.bf16 %v6771_v48, %v6767_v46  ;;  %v5595_v23 = vld [vmem:[#allocation3 + $0xe8] sm:$0xff]  ;;  %v6803_v63 = vpop.permute.xlu0 %1279 }
 0x1ce   :  { %1022 = vadd.xlane.f32.xlu0 %v1021_v16  ;;  %v6790_v44 = vmul.f32 %v5595_v23, %v6476_v40  ;;  %v1033_v16 = vsel %vm108_vm0, %v6793_v61, 0.0  ;;  %9666 = vst [vmem:[#allocation62_spill] sm:$0xff] %v6803_v63  ;;  %v5597_v23 = vld [vmem:[#allocation3 + $0xf8] sm:$0xff] }
 0x1cf   :  { %5042 = vmatmul.msk.bf16.gmra.mxu0 %vm108_vm0, %v560_v14  ;;  %5051 = vmatmul.msk.bf16.gmra.mxu1 %vm108_vm0, %v569_v49  ;;  %v6797_v14 = vpop.permute.xlu1 %1520 }
 0x1d0   :  { %9665 = vst [vmem:[#allocation61_spill] sm:$0xff] %v6797_v14  ;;  %v1036_v49 = vsel %vm108_vm0, %v6790_v44, 0.0  ;;  %v5598_v14 = vld [vmem:[#allocation3 + $0xf0] sm:$0xff]  ;;  %v570_v63 = vpack.c.bf16 %v6790_v44, %v6793_v61 }
 0x1d1   :  { %5058 = vmatmul.msk.bf16.gmra.mxu2 %vm108_vm0, %v576_v27  ;;  %v6808_v27 = vmul.f32 %v5597_v23, %v6476_v40  ;;  %v6813_v18 = vmul.f32 %v5598_v14, %v6476_v40  ;;  %v1045_v23 = vsel %vm108_vm0, %v6507_v45, 0.0  ;;  %v6831_v40 = vmul.f32 %v6478_v56, %v6304_v47 }
 0x1d2   :  { %5068 = vmatmul.msk.bf16.gmra.mxu3 %vm108_vm0, %v586_v43  ;;  %v6810_v43 = vpop.permute.xlu2 %1526 }
 0x1d3   :  { %9667 = vst [vmem:[#allocation63_spill] sm:$0xff] %v6810_v43  ;;  %v6827_v43 = vmul.f32 %v6478_v56, %v6290_v34  ;;  %v1039_v14 = vsel %vm108_vm0, %v6813_v18, 0.0 }
 0x1d5   :  { %1037 = vadd.xlane.f32.xlu2 %v1036_v49  ;;  %1034 = vadd.xlane.f32.xlu1 %v1033_v16  ;;  %v5600_v49 = vld [vmem:[#allocation3 + $0x158] sm:$0xff]  ;;  %9668 = vst [vmem:[#allocation64_spill] sm:$0xff] %v6827_v43  ;;  %v6841_v34 = vpop.permute.xlu0 %1344 }
 0x1d6   :  { %1031 = vadd.xlane.f32.xlu0 %v1030_v41  ;;  %v6819_v16 = vmul.f32 %v5600_v49, %v6478_v56  ;;  %v1042_v41 = vsel %vm108_vm0, %v6808_v27, 0.0  ;;  %v561_v49 = vpack.c.bf16 %v6598_v59, %v6601_v55  ;;  %9670 = vst [vmem:[#allocation66_spill] sm:$0xff] %v6841_v34 }
 0x1d7   :  { %v6833_v2 = vpop.permute.xlu1 %1533 }
 0x1d8   :  { %9669 = vst [vmem:[#allocation65_spill] sm:$0xff] %v6833_v2  ;;  %v577_v47 = vpack.c.bf16 %v6819_v16, %v6816_v57 }
 0x1dd   :  { %1043 = vadd.xlane.f32.xlu1 %v1042_v41  ;;  %1046 = vadd.xlane.f32.xlu2 %v1045_v23  ;;  %v587_v41 = vpack.c.bf16 %v6831_v40, %v6827_v43  ;;  %v6849_v23 = vpop.permute.xlu2 %1546  ;;  %v6861_v34 = vpop.permute.xlu0 %1409 }
 0x1de   :  { %1040 = vadd.xlane.f32.xlu0 %v1039_v14  ;;  %9671 = vst [vmem:[#allocation67_spill] sm:$0xff] %v6849_v23  ;;  %v1051_v14 = vsel %vm108_vm0, %v6568_v8, 0.0  ;;  %v5602_v8 = vld [vmem:[#allocation3 + $0x168] sm:$0xff] }
 0x1df   :  { %5043 = vmatmul.msk.bf16.gmra.mxu0 %vm108_vm0, %v561_v49  ;;  %5052 = vmatmul.msk.bf16.gmra.mxu1 %vm108_vm0, %v570_v63  ;;  %v1054_v49 = vsel %vm108_vm0, %v6571_v21, 0.0  ;;  %v6857_v2 = vpop.permute.xlu1 %1552  ;;  %v1048_v63 = vsel %vm108_vm0, %v6514_v7, 0.0  ;;  %9673 = vst [vmem:[#allocation69_spill] sm:$0xff] %v6861_v34  ;;  %v6869_v45 = vmul.f32 %v5602_v8, %v6478_v56  ;;  %v9677_v8 = vpack.c.bf16 %v6611_v37, %v6614_v4  ;;  %v5603_v34 = vld [vmem:[#allocation3 + $0x170] sm:$0xff] }
 0x1e0   :  { %9672 = vst [vmem:[#allocation68_spill] sm:$0xff] %v6857_v2  ;;  %v1063_v2 = vsel %vm108_vm0, %v6705_v26, 0.0 }
 0x1e1   :  { %5059 = vmatmul.msk.bf16.gmra.mxu2 %vm108_vm0, %v577_v47  ;;  %v5601_v47 = vld [vmem:[#allocation3 + $0x160] sm:$0xff] }
 0x1e2   :  { %5069 = vmatmul.msk.bf16.gmra.mxu3 %vm108_vm0, %v587_v41  ;;  %v6866_v41 = vmul.f32 %v5601_v47, %v6478_v56 }
 0x1e4   :  { %9675 = vst [vmem:[#allocation71_spill] sm:$0xff] %v6866_v41 }
 0x1e5   :  { %1052 = vadd.xlane.f32.xlu1 %v1051_v14  ;;  %1055 = vadd.xlane.f32.xlu2 %v1054_v49  ;;  %v6863_v23 = vpop.permute.xlu2 %1559  ;;  %v1060_v14 = vsel %vm108_vm0, %v6656_v10, 0.0  ;;  %v1057_v49 = vsel %vm108_vm0, %v6653_v9, 0.0 }
 0x1e6   :  { %1049 = vadd.xlane.f32.xlu0 %v1048_v63  ;;  %9674 = vst [vmem:[#allocation70_spill] sm:$0xff] %v6863_v23  ;;  %v571_v63 = vpack.c.bf16 %v6808_v27, %v6813_v18 }
 0x1e7   :  { %v6879_v47 = vpop.permute.xlu1 %1565 }
 0x1e8   :  { %9676 = vst [vmem:[#allocation72_spill] sm:$0xff] %v6879_v47  ;;  %v1072_v47 = vsel %vm108_vm0, %v6760_v1, 0.0 }
 0x1ed   :  { %1061 = vadd.xlane.f32.xlu1 %v1060_v14  ;;  %1064 = vadd.xlane.f32.xlu2 %v1063_v2  ;;  %v578_v14 = vpack.c.bf16 %v6869_v45, %v6866_v41  ;;  %v6889_v23 = vpop.permute.xlu2 %1578  ;;  %v6891_v2 = vpop.permute.xlu0 %1474 }
 0x1ee   :  { %1058 = vadd.xlane.f32.xlu0 %v1057_v49  ;;  %9678 = vst [vmem:[#allocation73_spill] sm:$0xff] %v6889_v23  ;;  %v1069_v49 = vsel %vm108_vm0, %v6757_v22, 0.0  ;;  %v5604_v23 = vld [vmem:[#allocation3 + $0x178] sm:$0xff]  ;;  %v1078_v22 = vsel %vm108_vm0, %v6819_v16, 0.0 }
 0x1ef   :  { %5044 = vmatmul.msk.bf16.gmra.mxu0 %vm108_vm0, %v9677_v8  ;;  %5053 = vmatmul.msk.bf16.gmra.mxu1 %vm108_vm0, %v571_v63  ;;  %9679 = vst [vmem:[#allocation74_spill] sm:$0xff] %v6891_v2  ;;  %v1066_v8 = vsel %vm108_vm0, %v6708_v51, 0.0  ;;  %v6899_v63 = vpop.permute.xlu1 %1585  ;;  %v6905_v2 = vmul.f32 %v5604_v23, %v6478_v56 }
 0x1f0   :  { %9680 = vst [vmem:[#allocation75_spill] sm:$0xff] %v6899_v63 }
 0x1f1   :  { %5060 = vmatmul.msk.bf16.gmra.mxu2 %vm108_vm0, %v578_v14  ;;  %v6902_v14 = vmul.f32 %v5603_v34, %v6478_v56  ;;  %9682 = vst [vmem:[#allocation77_spill] sm:$0xff] %v6905_v2  ;;  %v9685_v34 = vpack.c.bf16 %v6628_v11, %v6625_v62 }
 0x1f3   :  { %9681 = vst [vmem:[#allocation76_spill] sm:$0xff] %v6902_v14  ;;  %v579_v23 = vpack.c.bf16 %v6905_v2, %v6902_v14 }
 0x1f5   :  { %1070 = vadd.xlane.f32.xlu1 %v1069_v49  ;;  %1073 = vadd.xlane.f32.xlu2 %v1072_v47  ;;  %v1081_v49 = vsel %vm108_vm0, %v6866_v41, 0.0  ;;  %v6911_v1 = vpop.permute.xlu2 %1591  ;;  %v6913_v47 = vpop.permute.xlu0 %1539 }
 0x1f6   :  { %1067 = vadd.xlane.f32.xlu0 %v1066_v8  ;;  %9683 = vst [vmem:[#allocation78_spill] sm:$0xff] %v6911_v1  ;;  %v1075_v8 = vsel %vm108_vm0, %v6816_v57, 0.0  ;;  %v1090_v1 = vsel %vm108_vm0, %v6905_v2, 0.0  ;;  %v5607_v2 = vld [vmem:[#allocation3 + $0x180] sm:$0xff] }
 0x1f7   :  { %9684 = vst [vmem:[#allocation79_spill] sm:$0xff] %v6913_v47  ;;  %v6923_v63 = vpop.permute.xlu1 %1598  ;;  %v5605_v47 = vld [vmem:[#allocation3 + $0x188] sm:$0xff] }
 0x1f8   :  { %9686 = vst [vmem:[#allocation80_spill] sm:$0xff] %v6923_v63  ;;  %v6937_v63 = vmul.f32 %v5605_v47, %v6478_v56 }
 0x1fd   :  { %1079 = vadd.xlane.f32.xlu1 %v1078_v22  ;;  %1082 = vadd.xlane.f32.xlu2 %v1081_v49  ;;  %v1087_v22 = vsel %vm108_vm0, %v6902_v14, 0.0 }
 0x1fe   :  { %1076 = vadd.xlane.f32.xlu0 %v1075_v8 }
 0x1ff   :  { %5045 = vmatmul.msk.bf16.gmra.mxu0 %vm108_vm0, %v9685_v34  ;;  %v1084_v34 = vsel %vm108_vm0, %v6869_v45, 0.0 }
 0x200   :  { %v6930_v49 = vpop.xlane.xlu2 %962  ;;  %v6942_v41 = vpop.xlane.xlu1 %956 }
 0x201   :  { %5061 = vmatmul.msk.bf16.gmra.mxu2 %vm108_vm0, %v579_v23  ;;  %9687 = vst [vmem:[#allocation81_spill] sm:$0xff] %v6930_v49  ;;  %v6932_v8 = vpop.xlane.xlu0 %950  ;;  %v5606_v23 = vld [vmem:[#allocation3 + $0x190] sm:$0xff]  ;;  %v6945_v49 = vmul.f32 %v5607_v2, %v6478_v56  ;;  %v9692_v2 = vpack.c.bf16 %v6635_v33, %v6638_v35 }
 0x202   :  { %9688 = vst [vmem:[#allocation82_spill] sm:$0xff] %v6932_v8  ;;  %v6940_v14 = vmul.f32 %v5606_v23, %v6478_v56 }
 0x203   :  { %9689 = vst [vmem:[#allocation83_spill] sm:$0xff] %v6942_v41  ;;  %v1093_v47 = vsel %vm108_vm0, %v6945_v49, 0.0  ;;  %v580_v41 = vpack.c.bf16 %v6937_v63, %v6945_v49 }
 0x205   :  { %1088 = vadd.xlane.f32.xlu1 %v1087_v22  ;;  %1091 = vadd.xlane.f32.xlu2 %v1090_v1  ;;  %v1096_v22 = vsel %vm108_vm0, %v6937_v63, 0.0  ;;  %v1099_v1 = vsel %vm108_vm0, %v6940_v14, 0.0 }
 0x206   :  { %1085 = vadd.xlane.f32.xlu0 %v1084_v34 }
 0x208   :  { %v6953_v34 = vpop.xlane.xlu2 %965 }
 0x209   :  { %9690 = vst [vmem:[#allocation84_spill] sm:$0xff] %v6953_v34  ;;  %v6955_v23 = vpop.xlane.xlu0 %953  ;;  %v1108_v34 = vsel %vm108_vm0, %v6522_v6, 0.0 }
 0x20a   :  { %9691 = vst [vmem:[#allocation85_spill] sm:$0xff] %v6955_v23 }
 0x20d   :  { %1097 = vadd.xlane.f32.xlu1 %v1096_v22  ;;  %1100 = vadd.xlane.f32.xlu2 %v1099_v1  ;;  %v5608_v22 = vld [vmem:[#allocation3 + $0x198] sm:$0xff]  ;;  %v6967_v1 = vpop.xlane.xlu1 %959 }
 0x20e   :  { %1094 = vadd.xlane.f32.xlu0 %v1093_v47  ;;  %v6965_v8 = vmul.f32 %v5608_v22, %v6478_v56  ;;  %9693 = vst [vmem:[#allocation86_spill] sm:$0xff] %v6967_v1  ;;  %v1105_v47 = vsel %vm108_vm0, %v6518_v5, 0.0  ;;  %v1114_v56 = vsel %vm108_vm0, %v6581_v3, 0.0  ;;  %v1117_v22 = vsel %vm108_vm0, %v6661_v28, 0.0 }
 0x20f   :  { %5046 = vmatmul.msk.bf16.gmra.mxu0 %vm108_vm0, %v9692_v2 }
 0x210   :  { %v1102_v2 = vsel %vm108_vm0, %v6965_v8, 0.0  ;;  %v6975_v23 = vpop.xlane.xlu2 %974 }
 0x211   :  { %5062 = vmatmul.msk.bf16.gmra.mxu2 %vm108_vm0, %v580_v41  ;;  %9694 = vst [vmem:[#allocation87_spill] sm:$0xff] %v6975_v23  ;;  %v6977_v41 = vpop.xlane.xlu0 %968 }
 0x212   :  { %9695 = vst [vmem:[#allocation88_spill] sm:$0xff] %v6977_v41  ;;  %v1123_v41 = vsel %vm108_vm0, %v6715_v0, 0.0 }
 0x215   :  { %1106 = vadd.xlane.f32.xlu1 %v1105_v47  ;;  %1109 = vadd.xlane.f32.xlu2 %v1108_v34  ;;  %v6983_v1 = vpop.xlane.xlu1 %971  ;;  %v1111_v47 = vsel %vm108_vm0, %v6578_v29, 0.0  ;;  %v581_v34 = vpack.c.bf16 %v6965_v8, %v6940_v14 }
 0x216   :  { %1103 = vadd.xlane.f32.xlu0 %v1102_v2  ;;  %9696 = vst [vmem:[#allocation89_spill] sm:$0xff] %v6983_v1 }
 0x218   :  { %v6990_v2 = vpop.xlane.xlu2 %983 }
 0x219   :  { %9697 = vst [vmem:[#allocation90_spill] sm:$0xff] %v6990_v2  ;;  %v6992_v23 = vpop.xlane.xlu0 %977  ;;  %v1135_v2 = vsel %vm108_vm0, %v6827_v43, 0.0 }
 0x21a   :  { %9698 = vst [vmem:[#allocation91_spill] sm:$0xff] %v6992_v23 }
 0x21d   :  { %1115 = vadd.xlane.f32.xlu1 %v1114_v56  ;;  %1118 = vadd.xlane.f32.xlu2 %v1117_v22  ;;  %v1126_v56 = vsel %vm108_vm0, %v6718_v17, 0.0  ;;  %v1120_v22 = vsel %vm108_vm0, %v6664_v31, 0.0 }
 0x21e   :  { %1112 = vadd.xlane.f32.xlu0 %v1111_v47  ;;  %v7000_v47 = vpop.xlane.xlu1 %980 }
 0x21f   :  { %9699 = vst [vmem:[#allocation92_spill] sm:$0xff] %v7000_v47 }
 0x220   :  { %v7006_v23 = vpop.xlane.xlu2 %992 }
 0x221   :  { %5063 = vmatmul.msk.bf16.gmra.mxu2 %vm108_vm0, %v581_v34  ;;  %v1132_v34 = vsel %vm108_vm0, %v6771_v48, 0.0  ;;  %9700 = vst [vmem:[#allocation93_spill] sm:$0xff] %v7006_v23  ;;  %v7008_v1 = vpop.xlane.xlu0 %986 }
 0x222   :  { %9701 = vst [vmem:[#allocation94_spill] sm:$0xff] %v7008_v1  ;;  %v1606_v1 = vperm.slane %v6403_v19, 6 }
 0x225   :  { %1124 = vadd.xlane.f32.xlu1 %v1123_v41  ;;  %1127 = vadd.xlane.f32.xlu2 %v1126_v56  ;;  %v1129_v41 = vsel %vm108_vm0, %v6767_v46, 0.0 }
 0x226   :  { %1121 = vadd.xlane.f32.xlu0 %v1120_v22  ;;  %v7012_v56 = vpop.xlane.xlu1 %989  ;;  %v1138_v22 = vsel %vm108_vm0, %v6831_v40, 0.0 }
 0x227   :  { %9702 = vst [vmem:[#allocation95_spill] sm:$0xff] %v7012_v56 }
 0x228   :  { %v7016_v47 = vpop.xlane.xlu2 %1001 }
 0x229   :  { %9703 = vst [vmem:[#allocation96_spill] sm:$0xff] %v7016_v47  ;;  %v7018_v48 = vpop.xlane.xlu0 %995 }
 0x22a   :  { %9704 = vst [vmem:[#allocation97_spill] sm:$0xff] %v7018_v48 }
 0x22d   :  { %1133 = vadd.xlane.f32.xlu1 %v1132_v34  ;;  %1136 = vadd.xlane.f32.xlu2 %v1135_v2 }
 0x22e   :  { %1130 = vadd.xlane.f32.xlu0 %v1129_v41  ;;  %v7020_v43 = vpop.xlane.xlu1 %998  ;;  %v1619_v41 = vperm.slane %v6403_v19, 7 }
 0x22f   :  { %9705 = vst [vmem:[#allocation98_spill] sm:$0xff] %v7020_v43 }
 0x230   :  { %v7022_v23 = vpop.xlane.xlu2 %1010 }
 0x231   :  { %9706 = vst [vmem:[#allocation99_spill] sm:$0xff] %v7022_v23  ;;  %v7024_v34 = vpop.xlane.xlu0 %1004 }
 0x232   :  { %9707 = vst [vmem:[#allocation100_spill] sm:$0xff] %v7024_v34 }
 0x236   :  { %1139 = vadd.xlane.f32.xlu0 %v1138_v22  ;;  %v7027_v2 = vpop.xlane.xlu1 %1007  ;;  %v9709_v22 = vperm.slane %v6403_v19, 5 }
 0x237   :  { %9708 = vst [vmem:[#allocation101_spill] sm:$0xff] %v7027_v2 }
 0x238   :  { %v7032_v47 = vpop.xlane.xlu2 %1019 }
 0x239   :  { %9710 = vst [vmem:[#allocation102_spill] sm:$0xff] %v7032_v47  ;;  %v7034_v48 = vpop.xlane.xlu0 %1013 }
 0x23a   :  { %9711 = vst [vmem:[#allocation103_spill] sm:$0xff] %v7034_v48 }
 0x23e   :  { %v7036_v23 = vpop.xlane.xlu1 %1016 }
 0x23f   :  { %9712 = vst [vmem:[#allocation104_spill] sm:$0xff] %v7036_v23 }
 0x240   :  { %v7038_v34 = vpop.xlane.xlu2 %1028 }
 0x241   :  { %9713 = vst [vmem:[#allocation105_spill] sm:$0xff] %v7038_v34  ;;  %v7040_v43 = vpop.xlane.xlu0 %1022  ;;  %v1760_v34 = vsel %vm108_vm0, %v6487_v12, -inf  ;;  %v1769_v12 = vsel %vm108_vm0, %v6534_v36, -inf  ;;  %v1784_v36 = vsel %vm108_vm0, %v6549_v38, -inf  ;;  %v1799_v38 = vsel %vm108_vm0, %v6611_v37, -inf }
 0x242   :  { %v1805_v37 = vsel %vm108_vm0, %v6628_v11, -inf  ;;  %v1820_v11 = vsel %vm108_vm0, %v6560_v25, -inf }
 0x245   :  { %1611 = vperm.xlu2 %5189, %v1606_v1  }
 0x246   :  { %1617 = vperm.xlu1 %5190, %v1606_v1   ;;  %v7042_v2 = vpop.xlane.xlu1 %1025 }
 0x248   :  { %v7044_v1 = vpop.xlane.xlu2 %1037 }
 0x249   :  { %9714 = vst [vmem:[#allocation106_spill] sm:$0xff] %v7044_v1  ;;  %v7046_v56 = vpop.xlane.xlu0 %1031  ;;  %v1763_v1 = vsel %vm108_vm0, %v6492_v52, -inf  ;;  %v1775_v52 = vsel %vm108_vm0, %v6531_v50, -inf }
 0x24a   :  { %1604 = vperm.xlu0 %5186, %v9709_v22   ;;  %9715 = vst [vmem:[#allocation107_spill] sm:$0xff] %v7046_v56 }
 0x24d   :  { %1624 = vperm.xlu2 %5189, %v1619_v41  }
 0x24e   :  { %1630 = vperm.xlu1 %5190, %v1619_v41   ;;  %v7048_v19 = vpop.xlane.xlu1 %1034 }
 0x250   :  { %v7052_v47 = vpop.xlane.xlu2 %1046 }
 0x251   :  { %v7050_v22 = vpop.xlane.xlu0 %1040  ;;  %9717 = vst [vmem:[#allocation109_spill] sm:$0xff] %v7052_v47  ;;  %v1772_v47 = vsel %vm108_vm0, %v6481_v39, -inf  ;;  %v1778_v39 = vsel %vm108_vm0, %v6557_v15, -inf  ;;  %v1793_v15 = vsel %vm108_vm0, %v6598_v59, -inf }
 0x252   :  { %9716 = vst [vmem:[#allocation108_spill] sm:$0xff] %v7050_v22  ;;  %v1766_v22 = vsel %vm108_vm0, %v6484_v58, -inf  ;;  %v1781_v58 = vsel %vm108_vm0, %v6552_v32, -inf  ;;  %v1787_v32 = vsel %vm108_vm0, %v6605_v54, -inf  ;;  %v1802_v54 = vsel %vm108_vm0, %v6625_v62, -inf }
 0x253   :  { %v1817_v62 = vsel %vm108_vm0, %v6498_v30, -inf  ;;  %v1823_v30 = vsel %vm108_vm0, %v6563_v42, -inf  ;;  %v9721_v42 = vld [vmem:[#allocation54_spill] sm:$0xff] }
 0x256   :  { %v7054_v48 = vpop.xlane.xlu1 %1043 }
 0x258   :  { %v7058_v23 = vpop.xlane.xlu2 %1055 }
 0x259   :  { %v7056_v41 = vpop.xlane.xlu0 %1049  ;;  %9719 = vst [vmem:[#allocation111_spill] sm:$0xff] %v7058_v23 }
 0x25a   :  { %9718 = vst [vmem:[#allocation110_spill] sm:$0xff] %v7056_v41 }
 0x25e   :  { %v7064_v56 = vpop.xlane.xlu1 %1052 }
 0x260   :  { %v7072_v23 = vpop.xlane.xlu2 %1064 }
 0x261   :  { %v7070_v41 = vpop.xlane.xlu0 %1058 }
 0x274   :  { %1761 = vmax.xlane.f32.xlu0 %v1760_v34  ;;  %v7078_v34 = vpop.xlane.xlu1 %1061 }
 0x276   :  { %1764 = vmax.xlane.f32.xlu2 %v1763_v1  ;;  %v7086_v1 = vpop.xlane.xlu2 %1073 }
 0x278   :  { %1767 = vmax.xlane.f32.xlu1 %v1766_v22  ;;  %v1790_v22 = vsel %vm108_vm0, %v6601_v55, -inf  ;;  %v1796_v55 = vsel %vm108_vm0, %v6614_v4, -inf  ;;  %v1811_v4 = vsel %vm108_vm0, %v6635_v33, -inf  ;;  %v1826_v33 = vsel %vm108_vm0, %v6641_v53, -inf  ;;  %v9720_v53 = vld [vmem:[#allocation49_spill] sm:$0xff] }
 0x27c   :  { %1773 = vmax.xlane.f32.xlu0 %v1772_v47  ;;  %v7084_v47 = vpop.xlane.xlu0 %1067  ;;  %v7090_v50 = vpop.xlane.xlu1 %1070 }
 0x27e   :  { %1770 = vmax.xlane.f32.xlu2 %v1769_v12 }
 0x280   :  { %1776 = vmax.xlane.f32.xlu1 %v1775_v52  ;;  %v7100_v52 = vpop.xlane.xlu2 %1082 }
 0x284   :  { %1782 = vmax.xlane.f32.xlu0 %v1781_v58  ;;  %v7098_v12 = vpop.xlane.xlu0 %1076  ;;  %v7104_v58 = vpop.xlane.xlu1 %1079 }
 0x286   :  { %1779 = vmax.xlane.f32.xlu2 %v1778_v39 }
 0x288   :  { %1785 = vmax.xlane.f32.xlu1 %v1784_v36  ;;  %v7112_v39 = vpop.xlane.xlu2 %1091  ;;  %v1808_v36 = vsel %vm108_vm0, %v6638_v35, -inf  ;;  %v1814_v35 = vsel %vm108_vm0, %v6495_v20, -inf  ;;  %v1829_v20 = vsel %vm108_vm0, %v6644_v60, -inf  ;;  %v1844_v60 = vsel %vm108_vm0, %v6793_v61, -inf }
 0x289   :  { %v1850_v61 = vsel %vm108_vm0, %v6813_v18, -inf  ;;  %v1865_v18 = vsel %vm108_vm0, %v6571_v21, -inf }
 0x28c   :  { %1791 = vmax.xlane.f32.xlu0 %v1790_v22  ;;  %v7110_v59 = vpop.xlane.xlu0 %1085  ;;  %v7118_v22 = vpop.xlane.xlu1 %1088 }
 0x28e   :  { %1788 = vmax.xlane.f32.xlu2 %v1787_v32 }
 0x290   :  { %1794 = vmax.xlane.f32.xlu1 %v1793_v15  ;;  %v7126_v15 = vpop.xlane.xlu2 %1100 }
 0x294   :  { %1800 = vmax.xlane.f32.xlu0 %v1799_v38  ;;  %v7124_v32 = vpop.xlane.xlu0 %1094  ;;  %v7132_v38 = vpop.xlane.xlu1 %1097 }
 0x296   :  { %1797 = vmax.xlane.f32.xlu2 %v1796_v55 }
 0x298   :  { %1803 = vmax.xlane.f32.xlu1 %v1802_v54  ;;  %v7140_v54 = vpop.xlane.xlu2 %1109 }
 0x29c   :  { %1809 = vmax.xlane.f32.xlu0 %v1808_v36  ;;  %v7138_v55 = vpop.xlane.xlu0 %1103  ;;  %v7144_v25 = vpop.xlane.xlu1 %1106  ;;  %v1835_v36 = vsel %vm108_vm0, %v6702_v24, -inf  ;;  %v1841_v24 = vsel %vm108_vm0, %v6752_v13, -inf  ;;  %v9722_v13 = vld [vmem:[#allocation33_spill] sm:$0xff] }
 0x29e   :  { %1806 = vmax.xlane.f32.xlu2 %v1805_v37  ;;  %v1832_v37 = vsel %vm108_vm0, %v9720_v53, -inf }
 0x2a0   :  { %1812 = vmax.xlane.f32.xlu1 %v1811_v4  ;;  %v1838_v4 = vsel %vm108_vm0, %v9721_v42, -inf }
 0x2a4   :  { %1818 = vmax.xlane.f32.xlu0 %v1817_v62  ;;  %v7152_v62 = vpop.xlane.xlu0 %1112 }
 0x2a6   :  { %1815 = vmax.xlane.f32.xlu2 %v1814_v35  ;;  %v7154_v35 = vpop.xlane.xlu2 %1118 }
 0x2a8   :  { %1821 = vmax.xlane.f32.xlu1 %v1820_v11  ;;  %v7158_v11 = vpop.xlane.xlu1 %1115 }
 0x2ac   :  { %1827 = vmax.xlane.f32.xlu0 %v1826_v33  ;;  %v1847_v33 = vsel %vm108_vm0, %v6790_v44, -inf  ;;  %v9723_v44 = vld [vmem:[#allocation38_spill] sm:$0xff] }
 0x2ad   :  { %v1862_v42 = vsel %vm108_vm0, %v9723_v44, -inf }
 0x2ae   :  { %1824 = vmax.xlane.f32.xlu2 %v1823_v30  ;;  %v7164_v30 = vpop.xlane.xlu0 %1121 }
 0x2b0   :  { %1830 = vmax.xlane.f32.xlu1 %v1829_v20  ;;  %v7166_v20 = vpop.xlane.xlu2 %1127  ;;  %v7172_v53 = vpop.xlane.xlu1 %1124 }
 0x2b4   :  { %1836 = vmax.xlane.f32.xlu0 %v1835_v36  ;;  %v1853_v36 = vsel %vm108_vm0, %v6808_v27, -inf  ;;  %v1859_v27 = vsel %vm108_vm0, %v6514_v7, -inf  ;;  %v1874_v7 = vsel %vm108_vm0, %v6705_v26, -inf }
 0x2b6   :  { %1833 = vmax.xlane.f32.xlu2 %v1832_v37  ;;  %v1856_v37 = vsel %vm108_vm0, %v9722_v13, -inf }
 0x2b8   :  { %1839 = vmax.xlane.f32.xlu1 %v1838_v4  ;;  %v7178_v4 = vpop.xlane.xlu0 %1130 }
 0x2bc   :  { %1845 = vmax.xlane.f32.xlu0 %v1844_v60  ;;  %v7180_v60 = vpop.xlane.xlu2 %1136 }
 0x2be   :  { %1842 = vmax.xlane.f32.xlu2 %v1841_v24  ;;  %v7186_v24 = vpop.xlane.xlu1 %1133 }
 0x2c0   :  { %1848 = vmax.xlane.f32.xlu1 %v1847_v33  ;;  %v1871_v33 = vsel %vm108_vm0, %v6656_v10, -inf  ;;  %v1877_v10 = vsel %vm108_vm0, %v6708_v51, -inf }
 0x2c4   :  { %1854 = vmax.xlane.f32.xlu0 %v1853_v36  ;;  %v1868_v36 = vsel %vm108_vm0, %v6653_v9, -inf  ;;  %v7194_v13 = vpop.permute.xlu2 %1611 }
 0x2c6   :  { %1851 = vmax.xlane.f32.xlu2 %v1850_v61  ;;  %v7192_v61 = vpop.xlane.xlu0 %1139  ;;  %v7198_v21 = vpop.permute.xlu1 %1617 }
 0x2c7   :  { %9724 = vst [vmem:[#allocation49_spill] sm:$0xff] %v7198_v21 }
 0x2c8   :  { %1857 = vmax.xlane.f32.xlu1 %v1856_v37  ;;  %v9725_v37 = vld [vmem:[#allocation56_spill] sm:$0xff] }
 0x2c9   :  { %v1880_v44 = vsel %vm108_vm0, %v9725_v37, -inf }
 0x2cc   :  { %1863 = vmax.xlane.f32.xlu0 %v1862_v42  ;;  %v9726_v42 = vld [vmem:[#allocation57_spill] sm:$0xff] }
 0x2ce   :  { %1860 = vmax.xlane.f32.xlu2 %v1859_v27  ;;  %v7204_v9 = vpop.permute.xlu0 %1604  ;;  %v1883_v27 = vsel %vm108_vm0, %v9726_v42, -inf  ;;  %v7210_v26 = vpop.permute.xlu1 %1630  ;;  %v9730_v42 = vld [vmem:[#allocation76_spill] sm:$0xff] }
 0x2d0   :  { %1866 = vmax.xlane.f32.xlu1 %v1865_v18  ;;  %v7208_v18 = vpop.permute.xlu2 %1624 }
 0x2d4   :  { %1872 = vmax.xlane.f32.xlu0 %v1871_v33  ;;  %v1889_v33 = vsel %vm108_vm0, %v6819_v16, -inf  ;;  %v1895_v16 = vsel %vm108_vm0, %v6869_v45, -inf }
 0x2d6   :  { %1869 = vmax.xlane.f32.xlu2 %v1868_v36  ;;  %v1886_v36 = vsel %vm108_vm0, %v6816_v57, -inf }
 0x2d8   :  { %1875 = vmax.xlane.f32.xlu1 %v1874_v7  ;;  %v9727_v7 = vld [vmem:[#allocation71_spill] sm:$0xff] }
 0x2d9   :  { %v1892_v37 = vsel %vm108_vm0, %v9727_v7, -inf }
 0x2dc   :  { %1881 = vmax.xlane.f32.xlu0 %v1880_v44 }
 0x2de   :  { %1878 = vmax.xlane.f32.xlu2 %v1877_v10 }
 0x2e0   :  { %1884 = vmax.xlane.f32.xlu1 %v1883_v27  ;;  %v1898_v27 = vsel %vm108_vm0, %v9730_v42, -inf  ;;  %v1904_v42 = vsel %vm108_vm0, %v6945_v49, -inf }
 0x2e4   :  { %1890 = vmax.xlane.f32.xlu0 %v1889_v33  ;;  %v9732_v33 = vld [vmem:[#allocation77_spill] sm:$0xff] }
 0x2e6   :  { %1887 = vmax.xlane.f32.xlu2 %v1886_v36  ;;  %v1901_v36 = vsel %vm108_vm0, %v9732_v33, -inf }
 0x2e7   :  { %v7216_v51 = vpop.xlane.xlu0 %1761 }
 0x2e8   :  { %1893 = vmax.xlane.f32.xlu1 %v1892_v37 }
 0x2e9   :  { %v7220_v44 = vpop.xlane.xlu2 %1764 }
 0x2ea   :  { %9728 = vst [vmem:[#allocation54_spill] sm:$0xff] %v7220_v44  ;;  %v9802_v44 = vld [vmem:[#allocation20_spill] sm:$0xff] }
 0x2eb   :  { %v7222_v10 = vpop.xlane.xlu1 %1767 }
 0x2ec   :  { %9729 = vst [vmem:[#allocation33_spill] sm:$0xff] %v7222_v10  ;;  %1899 = vmax.xlane.f32.xlu0 %v1898_v27  ;;  %v1907_v10 = vsel %vm108_vm0, %v6937_v63, -inf  ;;  %v1910_v27 = vsel %vm108_vm0, %v6940_v14, -inf  ;;  %v1913_v63 = vsel %vm108_vm0, %v6965_v8, -inf  ;;  %v5733_v8 = vmov 32.0  }
 0x2ed   :  { %5276 = vrcp.f32 %v5733_v8  ;;  %v1931_v8 = vsel %vm108_vm0, %v6664_v31, -inf  ;;  %v1940_v31 = vsel %vm108_vm0, %v6767_v46, -inf }
 0x2ee   :  { %1896 = vmax.xlane.f32.xlu2 %v1895_v16 }
 0x2ef   :  { %v7228_v57 = vpop.xlane.xlu0 %1773 }
 0x2f0   :  { %9731 = vst [vmem:[#allocation38_spill] sm:$0xff] %v7228_v57  ;;  %1902 = vmax.xlane.f32.xlu1 %v1901_v36  ;;  %v1916_v36 = vsel %vm108_vm0, %v6518_v5, -inf  ;;  %v1922_v5 = vsel %vm108_vm0, %v6578_v29, -inf  ;;  %v1934_v29 = vsel %vm108_vm0, %v6715_v0, -inf }
 0x2f1   :  { %v7232_v7 = vpop.xlane.xlu2 %1770 }
 0x2f3   :  { %v7234_v37 = vpop.xlane.xlu1 %1776 }
 0x2f4   :  { %9733 = vst [vmem:[#allocation56_spill] sm:$0xff] %v7234_v37  ;;  %1908 = vmax.xlane.f32.xlu0 %v1907_v10  ;;  %v1919_v10 = vsel %vm108_vm0, %v6522_v6, -inf  ;;  %v1928_v6 = vsel %vm108_vm0, %v6661_v28, -inf  ;;  %v1937_v28 = vsel %vm108_vm0, %v6718_v17, -inf }
 0x2f6   :  { %1905 = vmax.xlane.f32.xlu2 %v1904_v42 }
 0x2f7   :  { %v7240_v45 = vpop.xlane.xlu0 %1782 }
 0x2f8   :  { %9734 = vst [vmem:[#allocation57_spill] sm:$0xff] %v7240_v45  ;;  %1911 = vmax.xlane.f32.xlu1 %v1910_v27  ;;  %v1925_v27 = vsel %vm108_vm0, %v6581_v3, -inf  ;;  %v9765_v45 = vld [vmem:[#allocation86_spill] sm:$0xff] }
 0x2f9   :  { %v7244_v16 = vpop.xlane.xlu2 %1779 }
 0x2fb   :  { %v7246_v33 = vpop.xlane.xlu1 %1785 }
 0x2fc   :  { %9735 = vst [vmem:[#allocation71_spill] sm:$0xff] %v7246_v33  ;;  %1917 = vmax.xlane.f32.xlu0 %v1916_v36  ;;  %v5732_v36 = vmov 0  }
 0x2fd   :  { %5191 = vset.pattern.permute.xlu0 %v5732_v36  ;;  %5192 = vset.pattern.permute.xlu1 %v5732_v36 }
 0x2fe   :  { %1914 = vmax.xlane.f32.xlu2 %v1913_v63 }
 0x2ff   :  { %v7252_v49 = vpop.xlane.xlu0 %1791  ;;  %5193 = vset.pattern.permute.xlu2 %v5732_v36 }
 0x300   :  { %9736 = vst [vmem:[#allocation76_spill] sm:$0xff] %v7252_v49  ;;  %1920 = vmax.xlane.f32.xlu1 %v1919_v10 }
 0x301   :  { %v7256_v14 = vpop.xlane.xlu2 %1788 }
 0x303   :  { %v7258_v42 = vpop.xlane.xlu1 %1794 }
 0x304   :  { %9737 = vst [vmem:[#allocation77_spill] sm:$0xff] %v7258_v42  ;;  %1926 = vmax.xlane.f32.xlu0 %v1925_v27  ;;  %v5277_v27 = vpop.eup %5276  ;;  %v9744_v42 = vld [vmem:[#allocation58_spill] sm:$0xff] }
 0x305   :  { %v1943_v0 = vsel %vm108_vm0, %v9744_v42, -inf  ;;  %vm1146_vm14 = vweird.f32 %v5277_v27  ;;  %v1949_v42 = vsel %vm108_vm0, %v6831_v40, -inf  ;;  %v9756_v40 = vld [vmem:[#allocation89_spill] sm:$0xff] }
 0x306   :  { %1923 = vmax.xlane.f32.xlu2 %v1922_v5  ;;  %v1142_v5 = vmul.f32 32.0, %v5277_v27 }
 0x307   :  { %v7264_v63 = vpop.xlane.xlu0 %1800 }
 0x308   :  { %9738 = vst [vmem:[#allocation112_spill] sm:$0xff] %v7264_v63  ;;  %1929 = vmax.xlane.f32.xlu1 %v1928_v6  ;;  %v1143_v6 = vsub.f32 1.0, %v1142_v5 }
 0x309   :  { %v7268_v10 = vpop.xlane.xlu2 %1797 }
 0x30a   :  { %9739 = vst [vmem:[#allocation113_spill] sm:$0xff] %v7268_v10 }
 0x30b   :  { %v7270_v3 = vpop.xlane.xlu1 %1803 }
 0x30c   :  { %9740 = vst [vmem:[#allocation114_spill] sm:$0xff] %v7270_v3  ;;  %1935 = vmax.xlane.f32.xlu0 %v1934_v29  ;;  %v1144_v29 = vmul.f32 %v5277_v27, %v1143_v6 }
 0x30e   :  { %1932 = vmax.xlane.f32.xlu2 %v1931_v8  ;;  %v1145_v5 = vadd.f32 %v5277_v27, %v1144_v29 }
 0x30f   :  { %v7276_v63 = vpop.xlane.xlu0 %1809 }
 0x310   :  { %9741 = vst [vmem:[#allocation115_spill] sm:$0xff] %v7276_v63  ;;  %1938 = vmax.xlane.f32.xlu1 %v1937_v28  ;;  %v9746_v63 = vld [vmem:[#allocation64_spill] sm:$0xff] }
 0x311   :  { %v7280_v36 = vpop.xlane.xlu2 %1806  ;;  %v1946_v17 = vsel %vm108_vm0, %v9746_v63, -inf }
 0x312   :  { %9742 = vst [vmem:[#allocation116_spill] sm:$0xff] %v7280_v36 }
 0x313   :  { %v7282_v3 = vpop.xlane.xlu1 %1812 }
 0x314   :  { %9743 = vst [vmem:[#allocation117_spill] sm:$0xff] %v7282_v3  ;;  %1944 = vmax.xlane.f32.xlu0 %v1943_v0  ;;  %v7298_v0 = vsel %vm1146_vm14, %v5277_v27, %v1145_v5  ;;  %v9757_v5 = vld [vmem:[#allocation85_spill] sm:$0xff] }
 0x315   :  { %v1155_v27 = vmul.f32 %v7298_v0, %v9756_v40 }
 0x316   :  { %1941 = vmax.xlane.f32.xlu2 %v1940_v31  ;;  %v9751_v31 = vld [vmem:[#allocation82_spill] sm:$0xff] }
 0x317   :  { %v7288_v8 = vpop.xlane.xlu0 %1818  ;;  %v1148_v63 = vmul.f32 %v7298_v0, %v9751_v31  ;;  %v9760_v31 = vld [vmem:[#allocation28_spill] sm:$0xff] }
 0x318   :  { %9745 = vst [vmem:[#allocation58_spill] sm:$0xff] %v7288_v8  ;;  %1947 = vmax.xlane.f32.xlu1 %v1946_v17  ;;  %v9753_v8 = vld [vmem:[#allocation11_spill] sm:$0xff] }
 0x319   :  { %v7292_v28 = vpop.xlane.xlu2 %1815  ;;  %v1696_v29 = vmul.f32 %v9753_v8, %v1148_v63  ;;  %v9762_v63 = vld [vmem:[#allocation83_spill] sm:$0xff] }
 0x31a   :  { %9747 = vst [vmem:[#allocation64_spill] sm:$0xff] %v7292_v28 }
 0x31b   :  { %v7294_v49 = vpop.xlane.xlu1 %1821 }
 0x31c   :  { %9748 = vst [vmem:[#allocation118_spill] sm:$0xff] %v7294_v49 }
 0x31e   :  { %1950 = vmax.xlane.f32.xlu2 %v1949_v42  ;;  %v1149_v42 = vmul.f32 %v7298_v0, %v9757_v5  ;;  %v1151_v5 = vmul.f32 %v7298_v0, %v9765_v45 }
 0x31f   :  { %v7300_v46 = vpop.xlane.xlu0 %1827 }
 0x320   :  { %9749 = vst [vmem:[#allocation119_spill] sm:$0xff] %v7300_v46  ;;  %v1697_v33 = vmul.f32 %v9760_v31, %v1149_v42  ;;  %v9768_v42 = vld [vmem:[#allocation18_spill] sm:$0xff] }
 0x321   :  { %v7302_v6 = vpop.xlane.xlu2 %1824 }
 0x322   :  { %9750 = vst [vmem:[#allocation120_spill] sm:$0xff] %v7302_v6  ;;  %v9759_v6 = vld [vmem:[#allocation16_spill] sm:$0xff] }
 0x323   :  { %v7306_v17 = vpop.xlane.xlu1 %1830  ;;  %v1703_v28 = vmul.f32 %v9759_v6, %v1155_v27  ;;  %v9767_v27 = vld [vmem:[#allocation37_spill] sm:$0xff] }
 0x324   :  { %9752 = vst [vmem:[#allocation82_spill] sm:$0xff] %v7306_v17 }
 0x327   :  { %v7309_v3 = vpop.xlane.xlu0 %1836 }
 0x328   :  { %9754 = vst [vmem:[#allocation11_spill] sm:$0xff] %v7309_v3  ;;  %2086 = vperm.xlu0 %5191, %v1696_v29   ;;  %v1150_v3 = vmul.f32 %v7298_v0, %v9762_v63 }
 0x329   :  { %v7311_v49 = vpop.xlane.xlu2 %1833 }
 0x32a   :  { %9755 = vst [vmem:[#allocation121_spill] sm:$0xff] %v7311_v49  ;;  %v9764_v49 = vld [vmem:[#allocation92_spill] sm:$0xff]  ;;  %v1698_v6 = vmul.f32 %v9767_v27, %v1150_v3 }
 0x32b   :  { %v7317_v46 = vpop.xlane.xlu1 %1839  ;;  %v1158_v40 = vmul.f32 %v7298_v0, %v9764_v49 }
 0x32c   :  { %9758 = vst [vmem:[#allocation89_spill] sm:$0xff] %v7317_v46 }
 0x32d   :  { %v1706_v36 = vmul.f32 %v9768_v42, %v1158_v40 }
 0x32f   :  { %v7321_v17 = vpop.xlane.xlu0 %1845 }
 0x330   :  { %9761 = vst [vmem:[#allocation85_spill] sm:$0xff] %v7321_v17  ;;  %2107 = vperm.xlu0 %5191, %v1703_v28   ;;  %v9769_v17 = vld [vmem:[#allocation12_spill] sm:$0xff] }
 0x331   :  { %2089 = vperm.xlu1 %5192, %v1697_v33   ;;  %v7325_v29 = vpop.xlane.xlu2 %1842  ;;  %v1699_v37 = vmul.f32 %v9769_v17, %v1151_v5  ;;  %v9771_v33 = vld [vmem:[#allocation81_spill] sm:$0xff] }
 0x332   :  { %9763 = vst [vmem:[#allocation28_spill] sm:$0xff] %v7325_v29  ;;  %v1152_v28 = vmul.f32 %v7298_v0, %v9771_v33  ;;  %v9773_v29 = vld [vmem:[#allocation95_spill] sm:$0xff]  ;;  %v9777_v5 = vld [vmem:[#allocation21_spill] sm:$0xff] }
 0x333   :  { %v7331_v46 = vpop.xlane.xlu1 %1848  ;;  %v1161_v45 = vmul.f32 %v7298_v0, %v9773_v29 }
 0x334   :  { %9766 = vst [vmem:[#allocation83_spill] sm:$0xff] %v7331_v46  ;;  %v9774_v46 = vld [vmem:[#allocation84_spill] sm:$0xff] }
 0x335   :  { %v1153_v3 = vmul.f32 %v7298_v0, %v9774_v46  ;;  %v1709_v42 = vmul.f32 %v9777_v5, %v1161_v45  ;;  %v9785_v45 = vld [vmem:[#allocation15_spill] sm:$0xff] }
 0x336   :  { %2092 = vperm.xlu2 %5193, %v1698_v6   ;;  %v9776_v6 = vld [vmem:[#allocation13_spill] sm:$0xff] }
 0x337   :  { %v7336_v63 = vpop.xlane.xlu0 %1854  ;;  %v1700_v40 = vmul.f32 %v9776_v6, %v1152_v28 }
 0x338   :  { %9770 = vst [vmem:[#allocation92_spill] sm:$0xff] %v7336_v63  ;;  %2116 = vperm.xlu0 %5191, %v1706_v36   ;;  %v9778_v63 = vld [vmem:[#allocation14_spill] sm:$0xff] }
 0x339   :  { %2095 = vperm.xlu1 %5192, %v1699_v37   ;;  %v7340_v49 = vpop.xlane.xlu2 %1851  ;;  %v1701_v10 = vmul.f32 %v9778_v63, %v1153_v3  ;;  %v9780_v37 = vld [vmem:[#allocation88_spill] sm:$0xff]  ;;  %v9786_v3 = vld [vmem:[#allocation23_spill] sm:$0xff] }
 0x33a   :  { %9772 = vst [vmem:[#allocation86_spill] sm:$0xff] %v7340_v49  ;;  %v1154_v36 = vmul.f32 %v7298_v0, %v9780_v37  ;;  %v9782_v49 = vld [vmem:[#allocation98_spill] sm:$0xff] }
 0x33b   :  { %v7346_v57 = vpop.xlane.xlu1 %1857  ;;  %v1164_v46 = vmul.f32 %v7298_v0, %v9782_v49 }
 0x33c   :  { %9775 = vst [vmem:[#allocation12_spill] sm:$0xff] %v7346_v57  ;;  %v9783_v57 = vld [vmem:[#allocation87_spill] sm:$0xff] }
 0x33d   :  { %v1156_v28 = vmul.f32 %v7298_v0, %v9783_v57  ;;  %v1712_v5 = vmul.f32 %v9786_v3, %v1164_v46  ;;  %v9794_v46 = vld [vmem:[#allocation62_spill] sm:$0xff] }
 0x33e   :  { %2098 = vperm.xlu2 %5193, %v1700_v40   ;;  %v1702_v40 = vmul.f32 %v9785_v45, %v1154_v36 }
 0x33f   :  { %v7351_v33 = vpop.xlane.xlu0 %1863 }
 0x340   :  { %9779 = vst [vmem:[#allocation81_spill] sm:$0xff] %v7351_v33  ;;  %2125 = vperm.xlu0 %5191, %v1709_v42   ;;  %v9787_v33 = vld [vmem:[#allocation17_spill] sm:$0xff] }
 0x341   :  { %2101 = vperm.xlu1 %5192, %v1701_v10   ;;  %v7355_v29 = vpop.xlane.xlu2 %1860  ;;  %v1704_v63 = vmul.f32 %v9787_v33, %v1156_v28  ;;  %v9789_v10 = vld [vmem:[#allocation91_spill] sm:$0xff]  ;;  %v9795_v28 = vld [vmem:[#allocation66_spill] sm:$0xff] }
 0x342   :  { %9781 = vst [vmem:[#allocation95_spill] sm:$0xff] %v7355_v29  ;;  %v1157_v42 = vmul.f32 %v7298_v0, %v9789_v10  ;;  %v9791_v29 = vld [vmem:[#allocation101_spill] sm:$0xff] }
 0x343   :  { %v7361_v6 = vpop.xlane.xlu1 %1866  ;;  %v1167_v57 = vmul.f32 %v7298_v0, %v9791_v29 }
 0x344   :  { %9784 = vst [vmem:[#allocation84_spill] sm:$0xff] %v7361_v6  ;;  %v9792_v6 = vld [vmem:[#allocation90_spill] sm:$0xff] }
 0x345   :  { %v1159_v36 = vmul.f32 %v7298_v0, %v9792_v6  ;;  %v1715_v3 = vmul.f32 %v9795_v28, %v1167_v57 }
 0x346   :  { %2104 = vperm.xlu2 %5193, %v1702_v40   ;;  %v1705_v40 = vmul.f32 %v9794_v46, %v1157_v42 }
 0x347   :  { %v7366_v37 = vpop.xlane.xlu0 %1872 }
 0x348   :  { %9788 = vst [vmem:[#allocation88_spill] sm:$0xff] %v7366_v37  ;;  %2134 = vperm.xlu0 %5191, %v1712_v5   ;;  %v9796_v37 = vld [vmem:[#allocation19_spill] sm:$0xff] }
 0x349   :  { %2110 = vperm.xlu1 %5192, %v1704_v63   ;;  %v7370_v49 = vpop.xlane.xlu2 %1869  ;;  %v1707_v33 = vmul.f32 %v9796_v37, %v1159_v36  ;;  %v9798_v63 = vld [vmem:[#allocation94_spill] sm:$0xff]  ;;  %v9804_v36 = vld [vmem:[#allocation29_spill] sm:$0xff] }
 0x34a   :  { %9790 = vst [vmem:[#allocation98_spill] sm:$0xff] %v7370_v49  ;;  %v1160_v5 = vmul.f32 %v7298_v0, %v9798_v63  ;;  %v9800_v49 = vld [vmem:[#allocation104_spill] sm:$0xff] }
 0x34b   :  { %v7376_v27 = vpop.xlane.xlu1 %1875  ;;  %v1170_v6 = vmul.f32 %v7298_v0, %v9800_v49 }
 0x34c   :  { %9793 = vst [vmem:[#allocation87_spill] sm:$0xff] %v7376_v27  ;;  %v9801_v27 = vld [vmem:[#allocation93_spill] sm:$0xff]  ;;  %v1708_v57 = vmul.f32 %v9802_v44, %v1160_v5  ;;  %v9809_v5 = vld [vmem:[#allocation96_spill] sm:$0xff] }
 0x34d   :  { %v1162_v42 = vmul.f32 %v7298_v0, %v9801_v27  ;;  %v1718_v28 = vmul.f32 %v9804_v36, %v1170_v6  ;;  %v1173_v27 = vmul.f32 %v7298_v0, %v7042_v2 }
 0x34e   :  { %2113 = vperm.xlu2 %5193, %v1705_v40  }
 0x34f   :  { %v7381_v10 = vpop.xlane.xlu0 %1881 }
 0x350   :  { %9797 = vst [vmem:[#allocation15_spill] sm:$0xff] %v7381_v10  ;;  %2143 = vperm.xlu0 %5191, %v1715_v3   ;;  %v9805_v10 = vld [vmem:[#allocation41_spill] sm:$0xff] }
 0x351   :  { %2119 = vperm.xlu1 %5192, %v1707_v33   ;;  %v7385_v29 = vpop.xlane.xlu2 %1878  ;;  %v1710_v37 = vmul.f32 %v9805_v10, %v1162_v42  ;;  %v9807_v33 = vld [vmem:[#allocation97_spill] sm:$0xff]  ;;  %v9812_v42 = vld [vmem:[#allocation24_spill] sm:$0xff] }
 0x352   :  { %9799 = vst [vmem:[#allocation91_spill] sm:$0xff] %v7385_v29  ;;  %v1163_v3 = vmul.f32 %v7298_v0, %v9807_v33  ;;  %v9810_v29 = vld [vmem:[#allocation22_spill] sm:$0xff]  ;;  %v9814_v33 = vld [vmem:[#allocation100_spill] sm:$0xff] }
 0x353   :  { %v7392_v40 = vpop.xlane.xlu1 %1884 }
 0x354   :  { %9803 = vst [vmem:[#allocation101_spill] sm:$0xff] %v7392_v40  ;;  %v1165_v40 = vmul.f32 %v7298_v0, %v9809_v5  ;;  %v1711_v6 = vmul.f32 %v9810_v29, %v1163_v3  ;;  %v1176_v5 = vmul.f32 %v7298_v0, %v7048_v19  ;;  %v9817_v3 = vld [vmem:[#allocation99_spill] sm:$0xff]  ;;  %v1179_v19 = vmul.f32 %v7298_v0, %v7054_v48 }
 0x355   :  { %v1182_v48 = vmul.f32 %v7298_v0, %v7064_v56 }
 0x356   :  { %2122 = vperm.xlu2 %5193, %v1708_v57   ;;  %v9811_v57 = vld [vmem:[#allocation31_spill] sm:$0xff] }
 0x357   :  { %v7396_v63 = vpop.xlane.xlu0 %1890  ;;  %v1721_v36 = vmul.f32 %v9811_v57, %v1173_v27  ;;  %v1168_v27 = vmul.f32 %v7298_v0, %v9817_v3 }
 0x358   :  { %9806 = vst [vmem:[#allocation90_spill] sm:$0xff] %v7396_v63  ;;  %2152 = vperm.xlu0 %5191, %v1718_v28   ;;  %v1713_v63 = vmul.f32 %v9812_v42, %v1165_v40  ;;  %v9819_v40 = vld [vmem:[#allocation35_spill] sm:$0xff] }
 0x359   :  { %2128 = vperm.xlu1 %5192, %v1710_v37   ;;  %v7400_v49 = vpop.xlane.xlu2 %1887  ;;  %v1166_v37 = vmul.f32 %v7298_v0, %v9814_v33  ;;  %v1724_v57 = vmul.f32 %v9819_v40, %v1176_v5  ;;  %v9821_v33 = vld [vmem:[#allocation103_spill] sm:$0xff] }
 0x35a   :  { %9808 = vst [vmem:[#allocation62_spill] sm:$0xff] %v7400_v49 }
 0x35b   :  { %v7409_v10 = vpop.xlane.xlu1 %1893 }
 0x35c   :  { %9813 = vst [vmem:[#allocation94_spill] sm:$0xff] %v7409_v10  ;;  %v9820_v10 = vld [vmem:[#allocation26_spill] sm:$0xff] }
 0x35d   :  { %v1716_v42 = vmul.f32 %v9820_v10, %v1168_v27  ;;  %v9827_v27 = vld [vmem:[#allocation39_spill] sm:$0xff] }
 0x35e   :  { %2131 = vperm.xlu2 %5193, %v1711_v6   ;;  %v9818_v6 = vld [vmem:[#allocation25_spill] sm:$0xff]  ;;  %v1727_v40 = vmul.f32 %v9827_v27, %v1179_v19 }
 0x35f   :  { %v7413_v28 = vpop.xlane.xlu0 %1899  ;;  %v1714_v49 = vmul.f32 %v9818_v6, %v1166_v37  ;;  %v9825_v37 = vld [vmem:[#allocation102_spill] sm:$0xff] }
 0x360   :  { %9815 = vst [vmem:[#allocation104_spill] sm:$0xff] %v7413_v28  ;;  %2161 = vperm.xlu0 %5191, %v1721_v36   ;;  %v1169_v28 = vmul.f32 %v7298_v0, %v9821_v33  ;;  %v1171_v5 = vmul.f32 %v7298_v0, %v9825_v37  ;;  %v9828_v33 = vld [vmem:[#allocation30_spill] sm:$0xff] }
 0x361   :  { %2137 = vperm.xlu1 %5192, %v1713_v63   ;;  %v7415_v2 = vpop.xlane.xlu2 %1896 }
 0x362   :  { %9816 = vst [vmem:[#allocation93_spill] sm:$0xff] %v7415_v2 }
 0x363   :  { %v7426_v36 = vpop.xlane.xlu1 %1902 }
 0x364   :  { %9822 = vst [vmem:[#allocation20_spill] sm:$0xff] %v7426_v36 }
 0x366   :  { %2140 = vperm.xlu2 %5193, %v1714_v49   ;;  %v9826_v49 = vld [vmem:[#allocation27_spill] sm:$0xff] }
 0x367   :  { %v7432_v3 = vpop.xlane.xlu0 %1908  ;;  %v1717_v2 = vmul.f32 %v9826_v49, %v1169_v28  ;;  %v9832_v28 = vld [vmem:[#allocation45_spill] sm:$0xff] }
 0x368   :  { %2170 = vperm.xlu0 %5191, %v1724_v57   ;;  %9824 = vst [vmem:[#allocation96_spill] sm:$0xff] %v7432_v3  ;;  %v1719_v57 = vmul.f32 %v9828_v33, %v1171_v5  ;;  %v9830_v3 = vld [vmem:[#allocation105_spill] sm:$0xff]  ;;  %v9834_v5 = vld [vmem:[#allocation48_spill] sm:$0xff]  ;;  %v9839_v33 = vld [vmem:[#allocation34_spill] sm:$0xff] }
 0x369   :  { %2146 = vperm.xlu1 %5192, %v1716_v42   ;;  %v7428_v63 = vpop.xlane.xlu2 %1905  ;;  %v1172_v42 = vmul.f32 %v7298_v0, %v7040_v43  ;;  %v1174_v37 = vmul.f32 %v7298_v0, %v9830_v3  ;;  %v1730_v27 = vmul.f32 %v9834_v5, %v1182_v48  ;;  %v9835_v43 = vld [vmem:[#allocation32_spill] sm:$0xff]  ;;  %v1185_v3 = vmul.f32 %v7298_v0, %v7078_v34  ;;  %v9841_v48 = vld [vmem:[#allocation46_spill] sm:$0xff] }
 0x36a   :  { %9823 = vst [vmem:[#allocation97_spill] sm:$0xff] %v7428_v63  ;;  %v9847_v5 = vld [vmem:[#allocation36_spill] sm:$0xff] }
 0x36b   :  { %v7447_v63 = vpop.xlane.xlu1 %1911  ;;  %v1720_v19 = vmul.f32 %v9832_v28, %v1172_v42 }
 0x36c   :  { %9831 = vst [vmem:[#allocation100_spill] sm:$0xff] %v7447_v63  ;;  %v9838_v63 = vld [vmem:[#allocation106_spill] sm:$0xff] }
 0x36d   :  { %v1177_v42 = vmul.f32 %v7298_v0, %v9838_v63  ;;  %v1188_v63 = vmul.f32 %v7298_v0, %v7090_v50 }
 0x36e   :  { %2149 = vperm.xlu2 %5193, %v1717_v2  }
 0x36f   :  { %v7450_v2 = vpop.xlane.xlu0 %1917 }
 0x370   :  { %2179 = vperm.xlu0 %5191, %v1727_v40   ;;  %9833 = vst [vmem:[#allocation99_spill] sm:$0xff] %v7450_v2  ;;  %v1722_v40 = vmul.f32 %v9835_v43, %v1174_v37 }
 0x371   :  { %2155 = vperm.xlu1 %5192, %v1719_v57   ;;  %v7441_v36 = vpop.xlane.xlu2 %1914  ;;  %v9836_v57 = vld [vmem:[#allocation107_spill] sm:$0xff] }
 0x372   :  { %9829 = vst [vmem:[#allocation22_spill] sm:$0xff] %v7441_v36  ;;  %v1175_v36 = vmul.f32 %v7298_v0, %v9836_v57  ;;  %v9843_v57 = vld [vmem:[#allocation69_spill] sm:$0xff] }
 0x373   :  { %v7463_v10 = vpop.xlane.xlu1 %1920 }
 0x374   :  { %v1723_v2 = vmul.f32 %v9839_v33, %v1175_v36  ;;  %9840 = vst [vmem:[#allocation103_spill] sm:$0xff] %v7463_v10  ;;  %v9846_v36 = vld [vmem:[#allocation109_spill] sm:$0xff] }
 0x375   :  { %v1180_v10 = vmul.f32 %v7298_v0, %v9846_v36  ;;  %v1191_v36 = vmul.f32 %v7298_v0, %v7104_v58  ;;  %v1194_v58 = vmul.f32 %v7298_v0, %v7118_v22  ;;  %v1197_v22 = vmul.f32 %v7298_v0, %v7132_v38 }
 0x376   :  { %2158 = vperm.xlu2 %5193, %v1720_v19   ;;  %v1733_v19 = vmul.f32 %v9841_v48, %v1185_v3  ;;  %v9848_v48 = vld [vmem:[#allocation50_spill] sm:$0xff] }
 0x377   :  { %v7466_v37 = vpop.xlane.xlu0 %1926 }
 0x378   :  { %2188 = vperm.xlu0 %5191, %v1730_v27   ;;  %9842 = vst [vmem:[#allocation102_spill] sm:$0xff] %v7466_v37  ;;  %v1725_v27 = vmul.f32 %v9843_v57, %v1177_v42  ;;  %v1736_v37 = vmul.f32 %v9848_v48, %v1188_v63 }
 0x379   :  { %2164 = vperm.xlu1 %5192, %v1722_v40   ;;  %v7456_v56 = vpop.xlane.xlu2 %1923  ;;  %v9844_v40 = vld [vmem:[#allocation108_spill] sm:$0xff] }
 0x37a   :  { %9837 = vst [vmem:[#allocation25_spill] sm:$0xff] %v7456_v56  ;;  %v1178_v56 = vmul.f32 %v7298_v0, %v9844_v40  ;;  %v9851_v40 = vld [vmem:[#allocation110_spill] sm:$0xff] }
 0x37b   :  { %v7480_v57 = vpop.xlane.xlu1 %1929 }
 0x37c   :  { %v1726_v3 = vmul.f32 %v9847_v5, %v1178_v56  ;;  %9850 = vst [vmem:[#allocation105_spill] sm:$0xff] %v7480_v57  ;;  %v9854_v56 = vld [vmem:[#allocation111_spill] sm:$0xff] }
 0x37d   :  { %v1183_v63 = vmul.f32 %v7298_v0, %v9854_v56  ;;  %v9857_v57 = vld [vmem:[#allocation43_spill] sm:$0xff] }
 0x37e   :  { %2167 = vperm.xlu2 %5193, %v1723_v2   ;;  %v9849_v2 = vld [vmem:[#allocation40_spill] sm:$0xff] }
 0x37f   :  { %v1728_v42 = vmul.f32 %v9849_v2, %v1180_v10  ;;  %v9856_v10 = vld [vmem:[#allocation55_spill] sm:$0xff]  ;;  %v1731_v2 = vmul.f32 %v9857_v57, %v1183_v63  ;;  %v9862_v63 = vld [vmem:[#allocation61_spill] sm:$0xff] }
 0x380   :  { %2197 = vperm.xlu0 %5191, %v1733_v19   ;;  %v1181_v19 = vmul.f32 %v7298_v0, %v9851_v40  ;;  %v1739_v48 = vmul.f32 %v9856_v10, %v1191_v36  ;;  %v1184_v40 = vmul.f32 %v7298_v0, %v7070_v41  ;;  %v9863_v41 = vld [vmem:[#allocation47_spill] sm:$0xff] }
 0x381   :  { %2173 = vperm.xlu1 %5192, %v1725_v27   ;;  %v7471_v34 = vpop.xlane.xlu2 %1932  ;;  %v7484_v27 = vpop.xlane.xlu0 %1935 }
 0x382   :  { %9845 = vst [vmem:[#allocation27_spill] sm:$0xff] %v7471_v34 }
 0x383   :  { %9852 = vst [vmem:[#allocation45_spill] sm:$0xff] %v7484_v27  ;;  %v1742_v27 = vmul.f32 %v9862_v63, %v1194_v58  ;;  %v9865_v58 = vld [vmem:[#allocation74_spill] sm:$0xff]  ;;  %v1203_v63 = vmul.f32 %v7298_v0, %v7158_v11  ;;  %v1206_v11 = vmul.f32 %v7298_v0, %v7172_v53  ;;  %v9877_v53 = vlaneseq }
 0x386   :  { %2176 = vperm.xlu2 %5193, %v1726_v3   ;;  %v9855_v3 = vld [vmem:[#allocation42_spill] sm:$0xff] }
 0x387   :  { %v1729_v34 = vmul.f32 %v9855_v3, %v1181_v19  ;;  %v1186_v19 = vmul.f32 %v7298_v0, %v7072_v23  ;;  %v1189_v23 = vmul.f32 %v7298_v0, %v7086_v1 }
 0x388   :  { %2206 = vperm.xlu0 %5191, %v1736_v37   ;;  %v7497_v37 = vpop.xlane.xlu1 %1938 }
 0x389   :  { %2182 = vperm.xlu1 %5192, %v1728_v42   ;;  %v7486_v50 = vpop.xlane.xlu2 %1941  ;;  %9858 = vst [vmem:[#allocation107_spill] sm:$0xff] %v7497_v37  ;;  %v7503_v56 = vpop.xlane.xlu0 %1944 }
 0x38a   :  { %9853 = vst [vmem:[#allocation32_spill] sm:$0xff] %v7486_v50  ;;  %v1200_v50 = vmul.f32 %v7298_v0, %v7144_v25 }
 0x38b   :  { %9860 = vst [vmem:[#allocation34_spill] sm:$0xff] %v7503_v56 }
 0x38e   :  { %2185 = vperm.xlu2 %5193, %v1729_v34   ;;  %v9861_v34 = vld [vmem:[#allocation44_spill] sm:$0xff] }
 0x38f   :  { %v1732_v36 = vmul.f32 %v9861_v34, %v1184_v40 }
 0x390   :  { %2215 = vperm.xlu0 %5191, %v1739_v48   ;;  %v1734_v48 = vmul.f32 %v9863_v41, %v1186_v19  ;;  %v7520_v40 = vpop.xlane.xlu1 %1947  ;;  %v9866_v19 = vld [vmem:[#allocation79_spill] sm:$0xff]  ;;  %v9874_v41 = vld [vmem:[#allocation65_spill] sm:$0xff] }
 0x391   :  { %2191 = vperm.xlu1 %5192, %v1731_v2   ;;  %v7499_v42 = vpop.xlane.xlu2 %1950  ;;  %v1187_v2 = vmul.f32 %v7298_v0, %v7084_v47  ;;  %9864 = vst [vmem:[#allocation108_spill] sm:$0xff] %v7520_v40  ;;  %v9867_v47 = vld [vmem:[#allocation51_spill] sm:$0xff] }
 0x392   :  { %9859 = vst [vmem:[#allocation106_spill] sm:$0xff] %v7499_v42  ;;  %v1745_v42 = vmul.f32 %v9866_v19, %v1197_v22  ;;  %v9868_v22 = vld [vmem:[#allocation53_spill] sm:$0xff] }
 0x396   :  { %2194 = vperm.xlu2 %5193, %v1732_v36   ;;  %v1735_v36 = vmul.f32 %v9865_v58, %v1187_v2  ;;  %v1192_v2 = vmul.f32 %v7298_v0, %v7100_v52 }
 0x398   :  { %2224 = vperm.xlu0 %5191, %v1742_v27   ;;  %v1737_v27 = vmul.f32 %v9867_v47, %v1189_v23  ;;  %v9869_v23 = vld [vmem:[#allocation70_spill] sm:$0xff] }
 0x399   :  { %2200 = vperm.xlu1 %5192, %v1734_v48   ;;  %v7512_v37 = vpop.permute.xlu2 %2092  ;;  %v1190_v48 = vmul.f32 %v7298_v0, %v7098_v12  ;;  %v1748_v19 = vmul.f32 %v9869_v23, %v1200_v50  ;;  %v9870_v12 = vld [vmem:[#allocation52_spill] sm:$0xff]  ;;  %v9872_v23 = vld [vmem:[#allocation73_spill] sm:$0xff] }
 0x39a   :  { %v7516_v56 = vpop.permute.xlu0 %2086  ;;  %v9871_v50 = vld [vmem:[#allocation60_spill] sm:$0xff] }
 0x39e   :  { %2203 = vperm.xlu2 %5193, %v1735_v36   ;;  %v1738_v36 = vmul.f32 %v9868_v22, %v1190_v48  ;;  %v1195_v48 = vmul.f32 %v7298_v0, %v7112_v39  ;;  %v1198_v39 = vmul.f32 %v7298_v0, %v7126_v15  ;;  %v1201_v15 = vmul.f32 %v7298_v0, %v7140_v54 }
 0x39f   :  { %v1202_v54 = vmul.f32 %v7298_v0, %v7152_v62  ;;  %v1204_v62 = vmul.f32 %v7298_v0, %v7154_v35  ;;  %v1952_v35 = vmul.f32 %v7216_v51, %v9753_v8 }
 0x3a0   :  { %2233 = vperm.xlu0 %5191, %v1745_v42   ;;  %v1740_v42 = vmul.f32 %v9870_v12, %v1192_v2  ;;  %v1751_v2 = vmul.f32 %v9872_v23, %v1203_v63  ;;  %v9873_v12 = vld [vmem:[#allocation63_spill] sm:$0xff] }
 0x3a1   :  { %2209 = vperm.xlu1 %5192, %v1737_v27   ;;  %v7527_v38 = vpop.permute.xlu2 %2098  ;;  %v1193_v27 = vmul.f32 %v7298_v0, %v7110_v59  ;;  %v1743_v59 = vmul.f32 %v9873_v12, %v1195_v48  ;;  %v9876_v48 = vld [vmem:[#allocation67_spill] sm:$0xff] }
 0x3a2   :  { %v7531_v1 = vpop.permute.xlu0 %2107  ;;  %v1746_v12 = vmul.f32 %v9876_v48, %v1198_v39  ;;  %v1209_v39 = vmul.f32 %v7298_v0, %v7186_v24 }
 0x3a3   :  { %v7535_v40 = vpop.permute.xlu1 %2089 }
 0x3a6   :  { %2212 = vperm.xlu2 %5193, %v1738_v36   ;;  %v1741_v36 = vmul.f32 %v9871_v50, %v1193_v27 }
 0x3a8   :  { %2242 = vperm.xlu0 %5191, %v1748_v19   ;;  %v1196_v19 = vmul.f32 %v7298_v0, %v7124_v32  ;;  %v1199_v32 = vmul.f32 %v7298_v0, %v7138_v55 }
 0x3a9   :  { %2218 = vperm.xlu1 %5192, %v1740_v42   ;;  %v7542_v25 = vpop.permute.xlu2 %2104 }
 0x3aa   :  { %v7546_v52 = vpop.permute.xlu0 %2116  ;;  %v1744_v63 = vmul.f32 %v9874_v41, %v1196_v19 }
 0x3ab   :  { %v2096_v10 = vpop.permute.xlu1 %2095 }
 0x3ae   :  { %2221 = vperm.xlu2 %5193, %v1741_v36   ;;  %v9875_v36 = vld [vmem:[#allocation80_spill] sm:$0xff] }
 0x3af   :  { %v1754_v23 = vmul.f32 %v9875_v36, %v1206_v11  ;;  %v9878_v11 = vld [vmem:[#allocation68_spill] sm:$0xff] }
 0x3b0   :  { %2251 = vperm.xlu0 %5191, %v1751_v2  }
 0x3b1   :  { %2227 = vperm.xlu1 %5192, %v1743_v59   ;;  %v2114_v42 = vpop.permute.xlu2 %2113  ;;  %v7569_v59 = vand.u32 127, %v9877_v53  ;;  %v9879_v53 = vld [vmem:[#allocation72_spill] sm:$0xff] }
 0x3b2   :  { %v7557_v47 = vpop.permute.xlu0 %2125  ;;  %v1749_v36 = vmul.f32 %v9879_v53, %v1201_v15 }
 0x3b3   :  { %v2102_v27 = vpop.permute.xlu1 %2101  ;;  %v7579_v55 = vadd.s32 4294967288, %v7569_v59  ;;  %v2279_v15 = vperm.slane %v7516_v56, %v7569_v59  ;;  %v2290_v56 = vperm.slane %v7542_v25, %v7569_v59 }
 0x3b5   :  { %v2288_v48 = vperm.slane %v2102_v27, %v7579_v55  ;;  %v2281_v24 = vperm.slane %v7535_v40, %v7579_v55  ;;  %v2294_v53 = vperm.slane %v2114_v42, %v7579_v55  ;;  %v1205_v42 = vmul.f32 %v7298_v0, %v7164_v30 }
 0x3b6   :  { %2230 = vperm.xlu2 %5193, %v1744_v63   ;;  %v1747_v63 = vmul.f32 %v9878_v11, %v1199_v32  ;;  %v2284_v32 = vperm.slane %v7512_v37, %v7569_v59  ;;  %v2300_v30 = vperm.slane %v7557_v47, %v7579_v55  ;;  %v1955_v47 = vmul.f32 %v7232_v7, %v9769_v17 }
 0x3b8   :  { %2260 = vperm.xlu0 %5191, %v1754_v23   ;;  %v1757_v23 = vmul.f32 %v7198_v21, %v1209_v39  ;;  %v2287_v39 = vperm.slane %v7527_v38, %v7569_v59  ;;  %v9880_v38 = vld [vmem:[#allocation59_spill] sm:$0xff] }
 0x3b9   :  { %2236 = vperm.xlu1 %5192, %v1746_v12   ;;  %v7566_v2 = vpop.permute.xlu2 %2122  ;;  %v2285_v12 = vperm.slane %v2096_v10, %v7579_v55  ;;  %v1750_v21 = vmul.f32 %v9880_v38, %v1202_v54 }
 0x3ba   :  { %v7571_v50 = vpop.permute.xlu0 %2134  ;;  %v2289_v37 = vsel %vm2282_vm15, %v2288_v48, %v2287_v39  ;;  %v2291_v48 = vperm.slane %v7531_v1, %v7579_v55  ;;  %v2299_v8 = vperm.slane %v7566_v2, %v7569_v59 }
 0x3bb   :  { %v2111_v19 = vpop.permute.xlu1 %2110  ;;  %v2286_v27 = vsel %vm2282_vm15, %v2285_v12, %v2284_v32 }
 0x3bc   :  { %v2293_v40 = vperm.slane %v2111_v19, %v7569_v59  ;;  %v2296_v19 = vperm.slane %v7546_v52, %v7569_v59 }
 0x3be   :  { %2239 = vperm.xlu2 %5193, %v1747_v63   ;;  %v2295_v39 = vsel %vm2282_vm15, %v2294_v53, %v2293_v40 }
 0x3c0   :  { %2269 = vperm.xlu0 %5191, %v1757_v23  }
 0x3c1   :  { %2245 = vperm.xlu1 %5192, %v1749_v36   ;;  %v2132_v10 = vpop.permute.xlu2 %2131  ;;  %v2283_v36 = vsel %vm2282_vm15, %v2281_v24, %v2279_v15  ;;  %v9881_v24 = vld [vmem:[#allocation75_spill] sm:$0xff]  ;;  %v2292_v15 = vsel %vm2282_vm15, %v2291_v48, %v2290_v56  ;;  %v2301_v56 = vsel %vm2282_vm15, %v2300_v30, %v2299_v8  ;;  %v1208_v48 = vmul.f32 %v7298_v0, %v7178_v4 }
 0x3c2   :  { %v7596_v63 = vpop.permute.xlu0 %2143  ;;  %v2377_v32 = vsel %vm396_vm6, %v2286_v27, %v2283_v36  ;;  %v1752_v25 = vmul.f32 %v9881_v24, %v1204_v62  ;;  %v2303_v2 = vperm.slane %v2132_v10, %v7579_v55  ;;  %v1207_v36 = vmul.f32 %v7298_v0, %v7166_v20 }
 0x3c3   :  { %v2120_v23 = vpop.permute.xlu1 %2119  ;;  %v2379_v54 = vsel %vm2378_vm1, %v2289_v37, %v2377_v32  ;;  %v9882_v37 = vld [vmem:[#allocation78_spill] sm:$0xff]  ;;  %v1756_v17 = vmul.f32 %v7194_v13, %v1208_v48  ;;  %v1211_v4 = vmul.f32 %v7298_v0, %v7192_v61  ;;  %v9886_v61 = vld [vmem:[#allocation113_spill] sm:$0xff] }
 0x3c4   :  { %v2297_v12 = vperm.slane %v2120_v23, %v7579_v55  ;;  %v2380_v1 = vsel %vm401_vm7, %v2292_v15, %v2379_v54  ;;  %v1753_v40 = vmul.f32 %v9882_v37, %v1205_v42  ;;  %v1210_v54 = vmul.f32 %v7298_v0, %v7180_v60  ;;  %v9883_v60 = vld [vmem:[#allocation54_spill] sm:$0xff] }
 0x3c5   :  { %v2382_v52 = vsel %vm2381_vm2, %v2295_v39, %v2380_v1  ;;  %v1759_v8 = vmul.f32 %v7210_v26, %v1211_v4  ;;  %v1961_v1 = vmul.f32 %v7256_v14, %v9794_v46  ;;  %v1964_v0 = vmul.f32 %v9886_v61, %v9802_v44  ;;  %v9892_v4 = vld [vmem:[#allocation16_spill] sm:$0xff] }
 0x3c6   :  { %2248 = vperm.xlu2 %5193, %v1750_v21   ;;  %v2298_v51 = vsel %vm2282_vm15, %v2297_v12, %v2296_v19  ;;  %v1758_v39 = vmul.f32 %v7208_v18, %v1210_v54 }
 0x3c7   :  { %v2384_v27 = vsel %vm2383_vm3, %v2298_v51, %v2382_v52 }
 0x3c8   :  { %2484 = vperm.xlu0 %5191, %v1952_v35   ;;  %v2386_v32 = vsel %vm2385_vm4, %v2301_v56, %v2384_v27  ;;  %v1755_v35 = vmul.f32 %v7204_v9, %v1207_v36  ;;  %v9884_v27 = vld [vmem:[#allocation37_spill] sm:$0xff] }
 0x3c9   :  { %2254 = vperm.xlu1 %5192, %v1752_v25   ;;  %v7625_v21 = vpop.permute.xlu2 %2140  ;;  %v1958_v25 = vmul.f32 %v7244_v16, %v9785_v45  ;;  %v1953_v16 = vmul.f32 %v9883_v60, %v9760_v31 }
 0x3ca   :  { %v7628_v53 = vpop.permute.xlu0 %2152 }
 0x3cb   :  { %v2129_v62 = vpop.permute.xlu1 %2128  ;;  %v2314_v54 = vperm.slane %v7628_v53, %v7569_v59 }
 0x3cc   :  { %v2302_v23 = vperm.slane %v2129_v62, %v7569_v59  ;;  %v9885_v62 = vld [vmem:[#allocation33_spill] sm:$0xff] }
 0x3ce   :  { %v2304_v12 = vsel %vm2282_vm15, %v2303_v2, %v2302_v23  ;;  %2257 = vperm.xlu2 %5193, %v1753_v40   ;;  %v1954_v40 = vmul.f32 %v9885_v62, %v9884_v27  ;;  %v9887_v2 = vld [vmem:[#allocation13_spill] sm:$0xff]  ;;  %v9888_v23 = vld [vmem:[#allocation38_spill] sm:$0xff] }
 0x3cf   :  { %v2388_v10 = vsel %vm2387_vm5, %v2304_v12, %v2386_v32  ;;  %v1956_v36 = vmul.f32 %v9888_v23, %v9887_v2  ;;  %v2308_v12 = vperm.slane %v7625_v21, %v7569_v59  ;;  %v9894_v2 = vld [vmem:[#allocation17_spill] sm:$0xff]  ;;  %v9895_v23 = vld [vmem:[#allocation71_spill] sm:$0xff] }
 0x3d0   :  { %2415 = vst.msk [vmem:[#allocation2 + $0x3] sm:$0xff] %vm2414_vm8, %v2388_v10  ;;  %2493 = vperm.xlu0 %5191, %v1955_v47   ;;  %v2305_v47 = vperm.slane %v7571_v50, %v7569_v59  ;;  %v9890_v10 = vld [vmem:[#allocation56_spill] sm:$0xff] }
 0x3d1   :  { %2263 = vperm.xlu1 %5192, %v1755_v35   ;;  %v2150_v20 = vpop.permute.xlu2 %2149  ;;  %v9889_v35 = vld [vmem:[#allocation14_spill] sm:$0xff]  ;;  %v9891_v50 = vld [vmem:[#allocation116_spill] sm:$0xff] }
 0x3d2   :  { %v7648_v19 = vpop.permute.xlu0 %2161  ;;  %v1957_v48 = vmul.f32 %v9890_v10, %v9889_v35  ;;  %v9897_v35 = vld [vmem:[#allocation18_spill] sm:$0xff]  ;;  %v9898_v10 = vld [vmem:[#allocation76_spill] sm:$0xff] }
 0x3d3   :  { %v2138_v7 = vpop.permute.xlu1 %2137  ;;  %v2318_v27 = vperm.slane %v7648_v19, %v7579_v55 }
 0x3d4   :  { %v2306_v14 = vperm.slane %v2138_v7, %v7579_v55  ;;  %v2312_v7 = vperm.slane %v2150_v20, %v7579_v55 }
 0x3d6   :  { %2266 = vperm.xlu2 %5193, %v1756_v17   ;;  %v2309_v17 = vperm.slane %v7596_v63, %v7579_v55 }
 0x3d8   :  { %2502 = vperm.xlu0 %5191, %v1958_v25   ;;  %v2307_v25 = vsel %vm2282_vm15, %v2306_v14, %v2305_v47 }
 0x3d9   :  { %2272 = vperm.xlu1 %5192, %v1758_v39   ;;  %v2159_v42 = vpop.permute.xlu2 %2158  ;;  %v1967_v39 = vmul.f32 %v9891_v50, %v9810_v29  ;;  %v9900_v50 = vld [vmem:[#allocation77_spill] sm:$0xff] }
 0x3da   :  { %v2171_v15 = vpop.permute.xlu0 %2170  ;;  %v2317_v53 = vperm.slane %v2159_v42, %v7569_v59 }
 0x3db   :  { %v2147_v51 = vpop.permute.xlu1 %2146 }
 0x3dc   :  { %v2311_v46 = vperm.slane %v2147_v51, %v7569_v59  ;;  %v9893_v51 = vld [vmem:[#allocation57_spill] sm:$0xff]  ;;  %v2319_v14 = vsel %vm2282_vm15, %v2318_v27, %v2317_v53 }
 0x3dd   :  { %v9904_v53 = vld [vmem:[#allocation41_spill] sm:$0xff] }
 0x3de   :  { %2275 = vperm.xlu2 %5193, %v1759_v8   ;;  %v2313_v21 = vsel %vm2282_vm15, %v2312_v7, %v2311_v46  ;;  %v1959_v8 = vmul.f32 %v9893_v51, %v9892_v4  ;;  %v9902_v51 = vld [vmem:[#allocation21_spill] sm:$0xff] }
 0x3df   :  { %v9906_v27 = vld [vmem:[#allocation121_spill] sm:$0xff] }
 0x3e0   :  { %2511 = vperm.xlu0 %5191, %v1961_v1   ;;  %v2310_v1 = vsel %vm2282_vm15, %v2309_v17, %v2308_v12  ;;  %v9896_v12 = vld [vmem:[#allocation64_spill] sm:$0xff] }
 0x3e1   :  { %2487 = vperm.xlu1 %5192, %v1953_v16   ;;  %v2168_v45 = vpop.permute.xlu2 %2167  ;;  %v2389_v60 = vsel %vm396_vm6, %v2310_v1, %v2307_v25  ;;  %v9899_v25 = vld [vmem:[#allocation19_spill] sm:$0xff] }
 0x3e2   :  { %v2180_v52 = vpop.permute.xlu0 %2179  ;;  %v2390_v16 = vsel %vm2378_vm1, %v2313_v21, %v2389_v60  ;;  %v2321_v29 = vperm.slane %v2168_v45, %v7579_v55  ;;  %v2323_v45 = vperm.slane %v2171_v15, %v7569_v59  ;;  %v9901_v21 = vld [vmem:[#allocation120_spill] sm:$0xff] }
 0x3e3   :  { %v2156_v30 = vpop.permute.xlu1 %2155  ;;  %v2327_v19 = vperm.slane %v2180_v52, %v7579_v55  ;;  %v1973_v4 = vmul.f32 %v9901_v21, %v9826_v49 }
 0x3e4   :  { %v2315_v44 = vperm.slane %v2156_v30, %v7579_v55 }
 0x3e6   :  { %2490 = vperm.xlu2 %5193, %v1954_v40   ;;  %v2316_v20 = vsel %vm2282_vm15, %v2315_v44, %v2314_v54  ;;  %v1970_v44 = vmul.f32 %v9896_v12, %v9818_v6  ;;  %v9913_v12 = vld [vmem:[#allocation58_spill] sm:$0xff] }
 0x3e7   :  { %v2391_v62 = vsel %vm401_vm7, %v2316_v20, %v2390_v16  ;;  %v9905_v16 = vld [vmem:[#allocation114_spill] sm:$0xff] }
 0x3e8   :  { %2520 = vperm.xlu0 %5191, %v1964_v0   ;;  %v2392_v47 = vsel %vm2381_vm2, %v2319_v14, %v2391_v62  ;;  %v1976_v62 = vmul.f32 %v9906_v27, %v9832_v28 }
 0x3e9   :  { %2496 = vperm.xlu1 %5192, %v1956_v36   ;;  %v2177_v31 = vpop.permute.xlu2 %2176  ;;  %v1960_v36 = vmul.f32 %v9895_v23, %v9894_v2 }
 0x3ea   :  { %v7671_v56 = vpop.permute.xlu0 %2188  ;;  %v2326_v61 = vperm.slane %v2177_v31, %v7569_v59 }
 0x3eb   :  { %v2165_v32 = vpop.permute.xlu1 %2164 }
 0x3ec   :  { %v2320_v63 = vperm.slane %v2165_v32, %v7569_v59  ;;  %v2328_v15 = vsel %vm2282_vm15, %v2327_v19, %v2326_v61  ;;  %v9907_v61 = vld [vmem:[#allocation23_spill] sm:$0xff] }
 0x3ee   :  { %2499 = vperm.xlu2 %5193, %v1957_v48   ;;  %v2322_v0 = vsel %vm2282_vm15, %v2321_v29, %v2320_v63  ;;  %v1962_v48 = vmul.f32 %v9898_v10, %v9897_v35  ;;  %v1966_v29 = vmul.f32 %v9905_v16, %v9904_v53  ;;  %v9914_v35 = vld [vmem:[#allocation26_spill] sm:$0xff] }
 0x3ef   :  { %v2393_v31 = vsel %vm2383_vm3, %v2322_v0, %v2392_v47  ;;  %v9908_v0 = vld [vmem:[#allocation115_spill] sm:$0xff]  ;;  %v9912_v47 = vld [vmem:[#allocation66_spill] sm:$0xff] }
 0x3f0   :  { %2529 = vperm.xlu0 %5191, %v1967_v39   ;;  %v1963_v39 = vmul.f32 %v9900_v50, %v9899_v25  ;;  %v1968_v49 = vmul.f32 %v9908_v0, %v9907_v61  ;;  %v9915_v10 = vld [vmem:[#allocation118_spill] sm:$0xff]  ;;  %v9918_v25 = vld [vmem:[#allocation119_spill] sm:$0xff] }
 0x3f1   :  { %2505 = vperm.xlu1 %5192, %v1959_v8   ;;  %v7698_v30 = vpop.permute.xlu2 %2185  ;;  %v9903_v8 = vld [vmem:[#allocation112_spill] sm:$0xff]  ;;  %v9919_v16 = vld [vmem:[#allocation30_spill] sm:$0xff] }
 0x3f2   :  { %v7703_v40 = vpop.permute.xlu0 %2197  ;;  %v1965_v1 = vmul.f32 %v9903_v8, %v9902_v51  ;;  %v2330_v51 = vperm.slane %v7698_v30, %v7579_v55 }
 0x3f3   :  { %v2174_v42 = vpop.permute.xlu1 %2173  ;;  %v2336_v30 = vperm.slane %v7703_v40, %v7579_v55 }
 0x3f4   :  { %v2324_v46 = vperm.slane %v2174_v42, %v7579_v55 }
 0x3f6   :  { %v2325_v32 = vsel %vm2282_vm15, %v2324_v46, %v2323_v45  ;;  %2508 = vperm.xlu2 %5193, %v1960_v36   ;;  %v9909_v36 = vld [vmem:[#allocation24_spill] sm:$0xff]  ;;  %v9910_v45 = vld [vmem:[#allocation117_spill] sm:$0xff] }
 0x3f7   :  { %v2394_v7 = vsel %vm2385_vm4, %v2325_v32, %v2393_v31  ;;  %v1969_v14 = vmul.f32 %v9910_v45, %v9909_v36  ;;  %v9911_v46 = vld [vmem:[#allocation28_spill] sm:$0xff]  ;;  %v9922_v36 = vld [vmem:[#allocation31_spill] sm:$0xff] }
 0x3f8   :  { %v2395_v17 = vsel %vm2387_vm5, %v2328_v15, %v2394_v7  ;;  %2538 = vperm.xlu0 %5191, %v1970_v44   ;;  %v1979_v19 = vmul.f32 %v9911_v46, %v9839_v33  ;;  %v1971_v44 = vmul.f32 %v9913_v12, %v9912_v47  ;;  %v9916_v15 = vld [vmem:[#allocation86_spill] sm:$0xff]  ;;  %v9917_v33 = vld [vmem:[#allocation29_spill] sm:$0xff]  ;;  %v9923_v45 = vld [vmem:[#allocation11_spill] sm:$0xff] }
 0x3f9   :  { %2416 = vst.msk [vmem:[#allocation2 + $0xb] sm:$0xff] %vm2414_vm8, %v2395_v17  ;;  %2514 = vperm.xlu1 %5192, %v1962_v48   ;;  %v2195_v52 = vpop.permute.xlu2 %2194  ;;  %v1972_v48 = vmul.f32 %v9915_v10, %v9914_v35  ;;  %v1982_v7 = vmul.f32 %v9916_v15, %v9847_v5  ;;  %v1974_v50 = vmul.f32 %v9918_v25, %v9917_v33 }
 0x3fa   :  { %v2207_v6 = vpop.permute.xlu0 %2206 }
 0x3fb   :  { %v2183_v54 = vpop.permute.xlu1 %2182  ;;  %v2341_v61 = vperm.slane %v2207_v6, %v7569_v59 }
 0x3fc   :  { %v2329_v21 = vperm.slane %v2183_v54, %v7569_v59  ;;  %v9920_v54 = vld [vmem:[#allocation82_spill] sm:$0xff] }
 0x3fe   :  { %2517 = vperm.xlu2 %5193, %v1963_v39   ;;  %v2332_v39 = vperm.slane %v7671_v56, %v7569_v59  ;;  %v2331_v27 = vsel %vm2282_vm15, %v2330_v51, %v2329_v21  ;;  %v9926_v21 = vld [vmem:[#allocation35_spill] sm:$0xff]  ;;  %v9927_v51 = vld [vmem:[#allocation85_spill] sm:$0xff] }
 0x400   :  { %2547 = vperm.xlu0 %5191, %v1973_v4  }
 0x401   :  { %2523 = vperm.xlu1 %5192, %v1965_v1   ;;  %v2204_v20 = vpop.permute.xlu2 %2203 }
 0x402   :  { %v7730_v63 = vpop.permute.xlu0 %2215 }
 0x403   :  { %v2192_v60 = vpop.permute.xlu1 %2191 }
 0x404   :  { %v2333_v17 = vperm.slane %v2192_v60, %v7579_v55  ;;  %v2335_v60 = vperm.slane %v2195_v52, %v7569_v59 }
 0x406   :  { %2526 = vperm.xlu2 %5193, %v1966_v29   ;;  %v2334_v5 = vsel %vm2282_vm15, %v2333_v17, %v2332_v39  ;;  %v1975_v29 = vmul.f32 %v9920_v54, %v9919_v16  ;;  %v2337_v46 = vsel %vm2282_vm15, %v2336_v30, %v2335_v60  ;;  %v9930_v16 = vld [vmem:[#allocation91_spill] sm:$0xff] }
 0x407   :  { %v2396_v0 = vsel %vm396_vm6, %v2334_v5, %v2331_v27  ;;  %v1980_v5 = vmul.f32 %v9927_v51, %v9926_v21  ;;  %v1991_v54 = vmul.f32 %v9930_v16, %v9865_v58  ;;  %v9932_v27 = vld [vmem:[#allocation92_spill] sm:$0xff]  ;;  %v9943_v21 = vld [vmem:[#allocation47_spill] sm:$0xff] }
 0x408   :  { %2556 = vperm.xlu0 %5191, %v1976_v62   ;;  %v2339_v62 = vperm.slane %v2204_v20, %v7579_v55  ;;  %v2397_v6 = vsel %vm2378_vm1, %v2337_v46, %v2396_v0  ;;  %v9937_v46 = vld [vmem:[#allocation81_spill] sm:$0xff] }
 0x409   :  { %2532 = vperm.xlu1 %5192, %v1968_v49   ;;  %v2213_v42 = vpop.permute.xlu2 %2212  ;;  %v9921_v49 = vld [vmem:[#allocation95_spill] sm:$0xff] }
 0x40a   :  { %v2225_v2 = vpop.permute.xlu0 %2224  ;;  %v1985_v52 = vmul.f32 %v9921_v49, %v9855_v3  ;;  %v2344_v40 = vperm.slane %v2213_v42, %v7569_v59  ;;  %v9924_v42 = vld [vmem:[#allocation89_spill] sm:$0xff]  ;;  %v9933_v49 = vld [vmem:[#allocation40_spill] sm:$0xff] }
 0x40b   :  { %v2201_v23 = vpop.permute.xlu1 %2200  ;;  %v1978_v15 = vmul.f32 %v9924_v42, %v9835_v43 }
 0x40c   :  { %v2338_v8 = vperm.slane %v2201_v23, %v7569_v59 }
 0x40e   :  { %2535 = vperm.xlu2 %5193, %v1969_v14   ;;  %v2340_v23 = vsel %vm2282_vm15, %v2339_v62, %v2338_v8  ;;  %v1977_v14 = vmul.f32 %v9923_v45, %v9922_v36  ;;  %v9935_v36 = vld [vmem:[#allocation62_spill] sm:$0xff] }
 0x40f   :  { %v2398_v47 = vsel %vm401_vm7, %v2340_v23, %v2397_v6  ;;  %v1994_v45 = vmul.f32 %v9935_v36, %v9868_v22  ;;  %v9938_v6 = vld [vmem:[#allocation84_spill] sm:$0xff]  ;;  %v9941_v22 = vld [vmem:[#allocation46_spill] sm:$0xff] }
 0x410   :  { %2565 = vperm.xlu0 %5191, %v1979_v19  }
 0x411   :  { %2541 = vperm.xlu1 %5192, %v1971_v44   ;;  %v2222_v28 = vpop.permute.xlu2 %2221  ;;  %v2345_v44 = vperm.slane %v7730_v63, %v7579_v55  ;;  %v9925_v63 = vld [vmem:[#allocation98_spill] sm:$0xff] }
 0x412   :  { %v7744_v31 = vpop.permute.xlu0 %2233  ;;  %v2348_v3 = vperm.slane %v2222_v28, %v7579_v55  ;;  %v1988_v25 = vmul.f32 %v9925_v63, %v9861_v34 }
 0x413   :  { %v2210_v32 = vpop.permute.xlu1 %2209  ;;  %v2346_v17 = vsel %vm2282_vm15, %v2345_v44, %v2344_v40  ;;  %v9940_v44 = vld [vmem:[#allocation93_spill] sm:$0xff] }
 0x414   :  { %v2342_v53 = vperm.slane %v2210_v32, %v7579_v55 }
 0x416   :  { %2544 = vperm.xlu2 %5193, %v1972_v48   ;;  %v2343_v20 = vsel %vm2282_vm15, %v2342_v53, %v2341_v61  ;;  %v9928_v53 = vld [vmem:[#allocation69_spill] sm:$0xff] }
 0x417   :  { %v2399_v32 = vsel %vm2381_vm2, %v2343_v20, %v2398_v47  ;;  %v1987_v47 = vmul.f32 %v9938_v6, %v9857_v57 }
 0x418   :  { %2574 = vperm.xlu0 %5191, %v1982_v7   ;;  %v2350_v7 = vperm.slane %v2225_v2, %v7569_v59  ;;  %v2400_v33 = vsel %vm2383_vm3, %v2346_v17, %v2399_v32 }
 0x419   :  { %2550 = vperm.xlu1 %5192, %v1974_v50   ;;  %v7756_v4 = vpop.permute.xlu2 %2230 }
 0x41a   :  { %v7762_v1 = vpop.permute.xlu0 %2242 }
 0x41b   :  { %v2219_v56 = vpop.permute.xlu1 %2218  ;;  %v2359_v57 = vperm.slane %v7762_v1, %v7569_v59 }
 0x41c   :  { %v2347_v19 = vperm.slane %v2219_v56, %v7569_v59  ;;  %v9929_v56 = vld [vmem:[#allocation83_spill] sm:$0xff] }
 0x41d   :  { %v1981_v34 = vmul.f32 %v9929_v56, %v9928_v53  ;;  %v9945_v53 = vld [vmem:[#allocation97_spill] sm:$0xff] }
 0x41e   :  { %2553 = vperm.xlu2 %5193, %v1975_v29   ;;  %v2349_v10 = vsel %vm2282_vm15, %v2348_v3, %v2347_v19  ;;  %v9931_v29 = vld [vmem:[#allocation39_spill] sm:$0xff]  ;;  %v9939_v3 = vld [vmem:[#allocation60_spill] sm:$0xff]  ;;  %v2000_v56 = vmul.f32 %v9945_v53, %v9874_v41 }
 0x41f   :  { %v2401_v50 = vsel %vm2385_vm4, %v2349_v10, %v2400_v33  ;;  %v1983_v62 = vmul.f32 %v9932_v27, %v9931_v29  ;;  %v1997_v32 = vmul.f32 %v9940_v44, %v9939_v3  ;;  %v2354_v33 = vperm.slane %v7744_v31, %v7579_v55  ;;  %v9946_v29 = vld [vmem:[#allocation50_spill] sm:$0xff]  ;;  %v9947_v27 = vld [vmem:[#allocation15_spill] sm:$0xff] }
 0x420   :  { %2583 = vperm.xlu0 %5191, %v1985_v52   ;;  %v9934_v52 = vld [vmem:[#allocation12_spill] sm:$0xff] }
 0x421   :  { %2559 = vperm.xlu1 %5192, %v1977_v14   ;;  %v2240_v12 = vpop.permute.xlu2 %2239  ;;  %v1984_v23 = vmul.f32 %v9934_v52, %v9933_v49  ;;  %v9936_v14 = vld [vmem:[#allocation48_spill] sm:$0xff] }
 0x422   :  { %v7789_v35 = vpop.permute.xlu0 %2251  ;;  %v1986_v20 = vmul.f32 %v9937_v46, %v9936_v14  ;;  %v2357_v17 = vperm.slane %v2240_v12, %v7579_v55  ;;  %v9944_v12 = vld [vmem:[#allocation87_spill] sm:$0xff]  ;;  %v9949_v46 = vld [vmem:[#allocation101_spill] sm:$0xff] }
 0x423   :  { %v2228_v48 = vpop.permute.xlu1 %2227  ;;  %v1990_v51 = vmul.f32 %v9944_v12, %v9943_v21  ;;  %v9948_v14 = vld [vmem:[#allocation51_spill] sm:$0xff] }
 0x424   :  { %v2351_v28 = vperm.slane %v2228_v48, %v7579_v55  ;;  %v9942_v48 = vld [vmem:[#allocation88_spill] sm:$0xff]  ;;  %v9958_v12 = vld [vmem:[#allocation63_spill] sm:$0xff] }
 0x425   :  { %v1989_v42 = vmul.f32 %v9942_v48, %v9941_v22 }
 0x426   :  { %v2352_v39 = vsel %vm2282_vm15, %v2351_v28, %v2350_v7  ;;  %2562 = vperm.xlu2 %5193, %v1978_v15   ;;  %v2353_v7 = vperm.slane %v7756_v4, %v7569_v59 }
 0x427   :  { %v2402_v43 = vsel %vm2387_vm5, %v2352_v39, %v2401_v50 }
 0x428   :  { %2417 = vst.msk [vmem:[#allocation2 + $0x1b] sm:$0xff] %vm2414_vm8, %v2402_v43  ;;  %2592 = vperm.xlu0 %5191, %v1988_v25  }
 0x429   :  { %2568 = vperm.xlu1 %5192, %v1980_v5   ;;  %v2249_v2 = vpop.permute.xlu2 %2248  ;;  %v2355_v5 = vsel %vm2282_vm15, %v2354_v33, %v2353_v7  ;;  %v9953_v7 = vld [vmem:[#allocation52_spill] sm:$0xff]  ;;  %v9956_v33 = vld [vmem:[#allocation61_spill] sm:$0xff] }
 0x42a   :  { %v2261_v8 = vpop.permute.xlu0 %2260  ;;  %v2362_v1 = vperm.slane %v2249_v2, %v7569_v59  ;;  %v1992_v2 = vmul.f32 %v9947_v27, %v9946_v29  ;;  %v9965_v27 = vld [vmem:[#allocation32_spill] sm:$0xff] }
 0x42b   :  { %v2237_v60 = vpop.permute.xlu1 %2236  ;;  %v2368_v16 = vperm.slane %v2261_v8, %v7569_v59 }
 0x42c   :  { %v2356_v10 = vperm.slane %v2237_v60, %v7569_v59 }
 0x42e   :  { %2571 = vperm.xlu2 %5193, %v1981_v34   ;;  %v2358_v63 = vsel %vm2282_vm15, %v2357_v17, %v2356_v10  ;;  %v2363_v34 = vperm.slane %v7789_v35, %v7579_v55  ;;  %v9952_v10 = vld [vmem:[#allocation90_spill] sm:$0xff] }
 0x42f   :  { %v2403_v31 = vsel %vm396_vm6, %v2358_v63, %v2355_v5  ;;  %v9957_v63 = vld [vmem:[#allocation104_spill] sm:$0xff] }
 0x430   :  { %2601 = vperm.xlu0 %5191, %v1991_v54  }
 0x431   :  { %2577 = vperm.xlu1 %5192, %v1983_v62   ;;  %v2258_v30 = vpop.permute.xlu2 %2257 }
 0x432   :  { %v2270_v61 = vpop.permute.xlu0 %2269  ;;  %v2366_v60 = vperm.slane %v2258_v30, %v7579_v55 }
 0x433   :  { %v2246_v0 = vpop.permute.xlu1 %2245 }
 0x434   :  { %v2360_v15 = vperm.slane %v2246_v0, %v7579_v55  ;;  %v2364_v0 = vsel %vm2282_vm15, %v2363_v34, %v2362_v1  ;;  %v9960_v1 = vld [vmem:[#allocation27_spill] sm:$0xff] }
 0x436   :  { %2580 = vperm.xlu2 %5193, %v1984_v23   ;;  %v2361_v50 = vsel %vm2282_vm15, %v2360_v15, %v2359_v57  ;;  %v2372_v23 = vperm.slane %v2270_v61, %v7579_v55  ;;  %v9951_v61 = vld [vmem:[#allocation55_spill] sm:$0xff]  ;;  %v9955_v57 = vld [vmem:[#allocation25_spill] sm:$0xff] }
 0x437   :  { %v2404_v54 = vsel %vm2378_vm1, %v2361_v50, %v2403_v31  ;;  %v1995_v22 = vmul.f32 %v9952_v10, %v9951_v61  ;;  %v1998_v50 = vmul.f32 %v9957_v63, %v9956_v33  ;;  %v9961_v31 = vld [vmem:[#allocation79_spill] sm:$0xff]  ;;  %v9972_v61 = vld [vmem:[#allocation102_spill] sm:$0xff] }
 0x438   :  { %2610 = vperm.xlu0 %5191, %v1994_v45   ;;  %v2405_v49 = vsel %vm401_vm7, %v2364_v0, %v2404_v54  ;;  %v9964_v54 = vld [vmem:[#allocation100_spill] sm:$0xff]  ;;  %v9967_v0 = vld [vmem:[#allocation99_spill] sm:$0xff] }
 0x439   :  { %2586 = vperm.xlu1 %5192, %v1986_v20   ;;  %v2267_v58 = vpop.permute.xlu2 %2266  ;;  %v1993_v20 = vmul.f32 %v9949_v46, %v9948_v14 }
 0x43a   :  { %v7818_v19 = vpop.permute.xlu0 %2484  ;;  %v2371_v41 = vperm.slane %v2267_v58, %v7569_v59 }
 0x43b   :  { %v2255_v40 = vpop.permute.xlu1 %2254 }
 0x43c   :  { %v2365_v39 = vperm.slane %v2255_v40, %v7569_v59  ;;  %v2373_v6 = vsel %vm2282_vm15, %v2372_v23, %v2371_v41  ;;  %v7906_v41 = vadd.s32 4294967272, %v7569_v59 }
 0x43e   :  { %2589 = vperm.xlu2 %5193, %v1987_v47   ;;  %v2367_v62 = vsel %vm2282_vm15, %v2366_v60, %v2365_v39  ;;  %v9950_v47 = vld [vmem:[#allocation22_spill] sm:$0xff]  ;;  %v9962_v60 = vld [vmem:[#allocation96_spill] sm:$0xff] }
 0x43f   :  { %v2406_v8 = vsel %vm2381_vm2, %v2367_v62, %v2405_v49  ;;  %v2003_v3 = vmul.f32 %v9950_v47, %v9878_v11  ;;  %v9954_v11 = vld [vmem:[#allocation94_spill] sm:$0xff] }
 0x440   :  { %2619 = vperm.xlu0 %5191, %v1997_v32   ;;  %v1996_v17 = vmul.f32 %v9954_v11, %v9953_v7  ;;  %v9966_v62 = vld [vmem:[#allocation70_spill] sm:$0xff] }
 0x441   :  { %2595 = vperm.xlu1 %5192, %v1989_v42   ;;  %v2276_v28 = vpop.permute.xlu2 %2275 }
 0x442   :  { %v7836_v25 = vpop.permute.xlu0 %2493  ;;  %v2375_v40 = vperm.slane %v2276_v28, %v7579_v55  ;;  %v2006_v28 = vmul.f32 %v9955_v57, %v9880_v38  ;;  %v2001_v38 = vmul.f32 %v9962_v60, %v9961_v31  ;;  %v9974_v31 = vld [vmem:[#allocation80_spill] sm:$0xff]  ;;  %v9975_v60 = vld [vmem:[#allocation45_spill] sm:$0xff] }
 0x443   :  { %v2264_v4 = vpop.permute.xlu1 %2263 }
 0x444   :  { %v2369_v43 = vperm.slane %v2264_v4, %v7579_v55 }
 0x446   :  { %2598 = vperm.xlu2 %5193, %v1990_v51   ;;  %v2370_v30 = vsel %vm2282_vm15, %v2369_v43, %v2368_v16  ;;  %v9959_v51 = vld [vmem:[#allocation20_spill] sm:$0xff]  ;;  %v2009_v43 = vmul.f32 %v9960_v1, %v9882_v37  ;;  %v9963_v16 = vld [vmem:[#allocation67_spill] sm:$0xff]  ;;  %v7903_v37 = vadd.s32 4294967280, %v7569_v59 }
 0x447   :  { %v2407_v36 = vsel %vm2383_vm3, %v2370_v30, %v2406_v8  ;;  %v1999_v5 = vmul.f32 %v9959_v51, %v9958_v12  ;;  %v2002_v29 = vmul.f32 %v9964_v54, %v9963_v16  ;;  %v2004_v30 = vmul.f32 %v9967_v0, %v9966_v62  ;;  %v9979_v62 = vld [vmem:[#allocation34_spill] sm:$0xff] }
 0x448   :  { %2628 = vperm.xlu0 %5191, %v2000_v56   ;;  %v2408_v32 = vsel %vm2385_vm4, %v2373_v6, %v2407_v36  ;;  %v2682_v6 = vperm.slane %v7836_v25, %v7906_v41 }
 0x449   :  { %2604 = vperm.xlu1 %5192, %v1992_v2   ;;  %v7860_v35 = vpop.permute.xlu2 %2490  ;;  %v2012_v2 = vmul.f32 %v9965_v27, %v7194_v13  ;;  %v2676_v13 = vperm.slane %v7818_v19, %v7903_v37 }
 0x44a   :  { %v7863_v52 = vpop.permute.xlu0 %2502 }
 0x44b   :  { %v2273_v45 = vpop.permute.xlu1 %2272  ;;  %v2687_v47 = vperm.slane %v7863_v52, %v7903_v37 }
 0x44c   :  { %v2374_v58 = vperm.slane %v2273_v45, %v7569_v59  ;;  %v2681_v45 = vperm.slane %v7860_v35, %v7903_v37  ;;  %v9968_v59 = vld [vmem:[#allocation72_spill] sm:$0xff] }
 0x44e   :  { %v2376_v44 = vsel %vm2282_vm15, %v2375_v40, %v2374_v58  ;;  %2607 = vperm.xlu2 %5193, %v1993_v20   ;;  %v9969_v20 = vld [vmem:[#allocation103_spill] sm:$0xff] }
 0x44f   :  { %v2409_v48 = vsel %vm2387_vm5, %v2376_v44, %v2408_v32  ;;  %v2005_v40 = vmul.f32 %v9969_v20, %v9968_v59  ;;  %v9971_v32 = vld [vmem:[#allocation73_spill] sm:$0xff]  ;;  %v5734_v59 = vmov 0.0  }
 0x450   :  { %2418 = vst.msk [vmem:[#allocation2 + $0x23] sm:$0xff] %vm2414_vm8, %v2409_v48  ;;  %2637 = vperm.xlu0 %5191, %v2003_v3   ;;  %v9970_v3 = vld [vmem:[#allocation106_spill] sm:$0xff]  ;;  %v2007_v10 = vmul.f32 %v9972_v61, %v9971_v32 }
 0x451   :  { %2613 = vperm.xlu1 %5192, %v1995_v22   ;;  %v2500_v55 = vpop.permute.xlu2 %2499  ;;  %v2015_v35 = vmul.f32 %v9970_v3, %v7210_v26  ;;  %v2683_v22 = vsel %vm2679_vm9, %v2682_v6, %v2681_v45  ;;  %2017 = vst.msk [vmem:[#allocation2] sm:$0x7] %vm2016_vm11, %v5734_v59 }
 0x452   :  { %v7880_v42 = vpop.permute.xlu0 %2511  ;;  %v2685_v58 = vperm.slane %v2500_v55, %v7906_v41  ;;  %2018 = vst.msk [vmem:[#allocation2 + $0x18] sm:$0x7] %vm2016_vm11, %v5734_v59 }
 0x453   :  { %v2488_v15 = vpop.permute.xlu1 %2487  ;;  %v2691_v11 = vperm.slane %v7880_v42, %v7906_v41  ;;  %2019 = vst.msk [vmem:[#allocation2 + $0x13] sm:$0x7] %vm2016_vm11, %v5734_v59 }
 0x454   :  { %v2678_v49 = vperm.slane %v2488_v15, %v7906_v41  ;;  %2020 = vst.msk [vmem:[#allocation2 + $0x2b] sm:$0x7] %vm2016_vm11, %v5734_v59 }
 0x456   :  { %2616 = vperm.xlu2 %5193, %v1996_v17   ;;  %v2680_v19 = vsel %vm2679_vm9, %v2678_v49, %v2676_v13 }
 0x457   :  { %v2774_v55 = vsel %vm396_vm6, %v2683_v22, %v2680_v19 }
 0x458   :  { %2646 = vperm.xlu0 %5191, %v2006_v28  }
 0x459   :  { %2622 = vperm.xlu1 %5192, %v1998_v50   ;;  %v2509_v39 = vpop.permute.xlu2 %2508  ;;  %v9973_v50 = vld [vmem:[#allocation105_spill] sm:$0xff] }
 0x45a   :  { %v7888_v4 = vpop.permute.xlu0 %2520  ;;  %v2690_v52 = vperm.slane %v2509_v39, %v7903_v37  ;;  %v2008_v39 = vmul.f32 %v9973_v50, %v9881_v24  ;;  %v2010_v24 = vmul.f32 %v9975_v60, %v9974_v31 }
 0x45b   :  { %v2497_v21 = vpop.permute.xlu1 %2496 }
 0x45c   :  { %v2684_v23 = vperm.slane %v2497_v21, %v7903_v37  ;;  %v2696_v21 = vperm.slane %v7888_v4, %v7903_v37  ;;  %v2692_v12 = vsel %vm2679_vm9, %v2691_v11, %v2690_v52 }
 0x45e   :  { %2625 = vperm.xlu2 %5193, %v1999_v5   ;;  %v2686_v44 = vsel %vm2679_vm9, %v2685_v58, %v2684_v23  ;;  %v9980_v23 = vld [vmem:[#allocation108_spill] sm:$0xff] }
 0x45f   :  { %v2775_v15 = vsel %vm2378_vm1, %v2686_v44, %v2774_v55  ;;  %v2014_v13 = vmul.f32 %v9980_v23, %v7208_v18 }
 0x460   :  { %2655 = vperm.xlu0 %5191, %v2009_v43  }
 0x461   :  { %2631 = vperm.xlu1 %5192, %v2001_v38   ;;  %v2518_v53 = vpop.permute.xlu2 %2517 }
 0x462   :  { %v2530_v56 = vpop.permute.xlu0 %2529  ;;  %v2694_v26 = vperm.slane %v2518_v53, %v7906_v41 }
 0x463   :  { %v2506_v34 = vpop.permute.xlu1 %2505  ;;  %v2700_v42 = vperm.slane %v2530_v56, %v7906_v41 }
 0x464   :  { %v2688_v14 = vperm.slane %v2506_v34, %v7906_v41  ;;  %v9976_v34 = vld [vmem:[#allocation10_spill] sm:$0xff] }
 0x466   :  { %2634 = vperm.xlu2 %5193, %v2002_v29   ;;  %v2689_v48 = vsel %vm2679_vm9, %v2688_v14, %v2687_v47  ;;  %v9977_v29 = vld [vmem:[#allocation107_spill] sm:$0xff] }
 0x467   :  { %v2776_v17 = vsel %vm401_vm7, %v2689_v48, %v2775_v15  ;;  %v2011_v27 = vmul.f32 %v9977_v29, %v7204_v9  ;;  %v9981_v9 = vld [vmem:[#allocation9_spill] sm:$0xff] }
 0x468   :  { %2664 = vperm.xlu0 %5191, %v2012_v2   ;;  %v2777_v5 = vsel %vm2381_vm2, %v2692_v12, %v2776_v17  ;;  %v9978_v2 = vld [vmem:[#allocation49_spill] sm:$0xff] }
 0x469   :  { %2640 = vperm.xlu1 %5192, %v2004_v30   ;;  %v2527_v8 = vpop.permute.xlu2 %2526  ;;  %v2013_v0 = vmul.f32 %v9979_v62, %v9978_v2 }
 0x46a   :  { %v7910_v36 = vpop.permute.xlu0 %2538  ;;  %v2699_v28 = vperm.slane %v2527_v8, %v7903_v37 }
 0x46b   :  { %v2515_v46 = vpop.permute.xlu1 %2514  ;;  %v2705_v6 = vperm.slane %v7910_v36, %v7903_v37 }
 0x46c   :  { %v2693_v25 = vperm.slane %v2515_v46, %v7903_v37  ;;  %v2701_v38 = vsel %vm2679_vm9, %v2700_v42, %v2699_v28 }
 0x46e   :  { %2643 = vperm.xlu2 %5193, %v2005_v40   ;;  %v2695_v33 = vsel %vm2679_vm9, %v2694_v26, %v2693_v25 }
 0x46f   :  { %v2778_v1 = vsel %vm2383_vm3, %v2695_v33, %v2777_v5 }
 0x470   :  { %2673 = vperm.xlu0 %5191, %v2015_v35  }
 0x471   :  { %2649 = vperm.xlu1 %5192, %v2007_v10   ;;  %v7937_v7 = vpop.permute.xlu2 %2535 }
 0x472   :  { %v7942_v57 = vpop.permute.xlu0 %2547  ;;  %v2703_v3 = vperm.slane %v7937_v7, %v7906_v41 }
 0x473   :  { %v2524_v63 = vpop.permute.xlu1 %2523  ;;  %v2709_v25 = vperm.slane %v7942_v57, %v7906_v41 }
 0x474   :  { %v2697_v51 = vperm.slane %v2524_v63, %v7906_v41 }
 0x476   :  { %v2698_v43 = vsel %vm2679_vm9, %v2697_v51, %v2696_v21  ;;  %2652 = vperm.xlu2 %5193, %v2008_v39  }
 0x477   :  { %v2779_v4 = vsel %vm2385_vm4, %v2698_v43, %v2778_v1 }
 0x478   :  { %v2780_v53 = vsel %vm2387_vm5, %v2701_v38, %v2779_v4  ;;  %5226 = vset.pattern.permute.xlu0 %v9976_v34 }
 0x479   :  { %2807 = vst.msk [vmem:[#allocation2 + $0x3] sm:$0xff] %vm2806_vm10, %v2780_v53  ;;  %2658 = vperm.xlu1 %5192, %v2010_v24   ;;  %v2545_v56 = vpop.permute.xlu2 %2544 }
 0x47a   :  { %v2557_v16 = vpop.permute.xlu0 %2556  ;;  %v2708_v61 = vperm.slane %v2545_v56, %v7903_v37 }
 0x47b   :  { %v2533_v54 = vpop.permute.xlu1 %2532  ;;  %v2714_v55 = vperm.slane %v2557_v16, %v7903_v37 }
 0x47c   :  { %v2702_v47 = vperm.slane %v2533_v54, %v7903_v37  ;;  %v2710_v26 = vsel %vm2679_vm9, %v2709_v25, %v2708_v61 }
 0x47e   :  { %2661 = vperm.xlu2 %5193, %v2011_v27   ;;  %v2704_v48 = vsel %vm2679_vm9, %v2703_v3, %v2702_v47 }
 0x480   :  { %v2819_v56 = vld [vmem:[#allocation2 + $0x2] sm:$0xff] }
 0x481   :  { %2667 = vperm.xlu1 %5192, %v2013_v0   ;;  %v2554_v30 = vpop.permute.xlu2 %2553  ;;  %v2815_v54 = vld [vmem:[#allocation2 + $0x1] sm:$0xff] }
 0x482   :  { %v2566_v49 = vpop.permute.xlu0 %2565  ;;  %v2712_v36 = vperm.slane %v2554_v30, %v7906_v41 }
 0x483   :  { %v2542_v8 = vpop.permute.xlu1 %2541  ;;  %v2718_v50 = vperm.slane %v2566_v49, %v7906_v41 }
 0x484   :  { %v2706_v18 = vperm.slane %v2542_v8, %v7906_v41 }
 0x486   :  { %2670 = vperm.xlu2 %5193, %v2014_v13   ;;  %v2707_v35 = vsel %vm2679_vm9, %v2706_v18, %v2705_v6 }
 0x487   :  { %v2781_v52 = vsel %vm396_vm6, %v2707_v35, %v2704_v48 }
 0x488   :  { %v2782_v28 = vsel %vm2378_vm1, %v2710_v26, %v2781_v52 }
 0x489   :  { %v2563_v45 = vpop.permute.xlu2 %2562  ;;  %5224 = vset.pattern.permute.xlu1 %v9976_v34 }
 0x48a   :  { %v2575_v14 = vpop.permute.xlu0 %2574  ;;  %v2717_v17 = vperm.slane %v2563_v45, %v7903_v37 }
 0x48b   :  { %v2551_v46 = vpop.permute.xlu1 %2550  ;;  %v2723_v42 = vperm.slane %v2575_v14, %v7903_v37 }
 0x48c   :  { %v2711_v44 = vperm.slane %v2551_v46, %v7903_v37  ;;  %v2719_v5 = vsel %vm2679_vm9, %v2718_v50, %v2717_v17 }
 0x48e   :  { %5225 = vset.pattern.permute.xlu2 %v9981_v9  ;;  %v2713_v15 = vsel %vm2679_vm9, %v2712_v36, %v2711_v44 }
 0x48f   :  { %v2783_v33 = vsel %vm401_vm7, %v2713_v15, %v2782_v28 }
 0x491   :  { %v2572_v20 = vpop.permute.xlu2 %2571 }
 0x492   :  { %v7971_v40 = vpop.permute.xlu0 %2583  ;;  %v2721_v57 = vperm.slane %v2572_v20, %v7906_v41 }
 0x493   :  { %v2560_v58 = vpop.permute.xlu1 %2559 }
 0x494   :  { %v2715_v10 = vperm.slane %v2560_v58, %v7906_v41  ;;  %v2727_v58 = vperm.slane %v7971_v40, %v7906_v41 }
 0x496   :  { %v2716_v7 = vsel %vm2679_vm9, %v2715_v10, %v2714_v55 }
 0x497   :  { %v2784_v39 = vsel %vm2381_vm2, %v2716_v7, %v2783_v33 }
 0x498   :  { %v2785_v43 = vsel %vm2383_vm3, %v2719_v5, %v2784_v39 }
 0x499   :  { %v7977_v19 = vpop.permute.xlu2 %2580 }
 0x49a   :  { %v2593_v32 = vpop.permute.xlu0 %2592  ;;  %v2726_v45 = vperm.slane %v7977_v19, %v7903_v37 }
 0x49b   :  { %v2569_v22 = vpop.permute.xlu1 %2568  ;;  %v2732_v59 = vperm.slane %v2593_v32, %v7903_v37 }
 0x49c   :  { %v2720_v11 = vperm.slane %v2569_v22, %v7903_v37  ;;  %v2728_v35 = vsel %vm2679_vm9, %v2727_v58, %v2726_v45 }
 0x49e   :  { %v2722_v12 = vsel %vm2679_vm9, %v2721_v57, %v2720_v11 }
 0x49f   :  { %v2786_v31 = vsel %vm2385_vm4, %v2722_v12, %v2785_v43 }
 0x4a1   :  { %v2590_v63 = vpop.permute.xlu2 %2589 }
 0x4a2   :  { %v2602_v21 = vpop.permute.xlu0 %2601  ;;  %v2730_v14 = vperm.slane %v2590_v63, %v7906_v41 }
 0x4a3   :  { %v2578_v51 = vpop.permute.xlu1 %2577  ;;  %v2736_v10 = vperm.slane %v2602_v21, %v7906_v41 }
 0x4a4   :  { %v2724_v1 = vperm.slane %v2578_v51, %v7906_v41 }
 0x4a6   :  { %v2725_v60 = vsel %vm2679_vm9, %v2724_v1, %v2723_v42 }
 0x4a7   :  { %v2787_v24 = vsel %vm2387_vm5, %v2725_v60, %v2786_v31 }
 0x4a8   :  { %2808 = vst.msk [vmem:[#allocation2 + $0xb] sm:$0xff] %vm2806_vm10, %v2787_v24 }
 0x4a9   :  { %v2599_v38 = vpop.permute.xlu2 %2598 }
 0x4aa   :  { %v2611_v53 = vpop.permute.xlu0 %2610  ;;  %v2735_v19 = vperm.slane %v2599_v38, %v7903_v37 }
 0x4ab   :  { %v2587_v4 = vpop.permute.xlu1 %2586  ;;  %v2741_v40 = vperm.slane %v2611_v53, %v7903_v37 }
 0x4ac   :  { %v2729_v23 = vperm.slane %v2587_v4, %v7903_v37  ;;  %v2737_v36 = vsel %vm2679_vm9, %v2736_v10, %v2735_v19 }
 0x4ae   :  { %v2731_v18 = vsel %vm2679_vm9, %v2730_v14, %v2729_v23 }
 0x4af   :  { %v2820_v16 = vld [vmem:[#allocation2 + $0xa] sm:$0xff]  ;;  %v2788_v61 = vsel %vm396_vm6, %v2731_v18, %v2728_v35 }
 0x4b0   :  { %v2816_v29 = vld [vmem:[#allocation2 + $0x9] sm:$0xff]  ;;  %v5204_v27 = vpack.i.bf16 %v2820_v16, %v2819_v56 }
 0x4b1   :  { %v5194_v2 = vpack.i.bf16 %v2816_v29, %v2815_v54  ;;  %v2608_v62 = vpop.permute.xlu2 %2607 }
 0x4b2   :  { %5205 = vrot.lane.b32.xlu0 %v5204_v27, %s5735_s5  ;;  %v2620_v30 = vpop.permute.xlu0 %2619  ;;  %v2739_v32 = vperm.slane %v2608_v62, %v7906_v41  ;;  %v2968_v27 = vld [vmem:[%s9451_s4 + $0xd8] sm:$0xff] }
 0x4b3   :  { %5195 = vrot.lane.b32.xlu1 %v5194_v2, %s5736_s26  ;;  %v2596_v0 = vpop.permute.xlu1 %2595  ;;  %v2745_v11 = vperm.slane %v2620_v30, %v7906_v41  ;;  %3014 = vmatpush.msra.mxu1 %v2968_v27 }
 0x4b4   :  { %v2733_v13 = vperm.slane %v2596_v0, %v7906_v41 }
 0x4b6   :  { %v2734_v6 = vsel %vm2679_vm9, %v2733_v13, %v2732_v59 }
 0x4b7   :  { %v2789_v22 = vsel %vm2378_vm1, %v2734_v6, %v2788_v61  ;;  %v2956_v61 = vld [vmem:[%s9451_s4 + $0x78] sm:$0xff] }
 0x4b8   :  { %v2790_v52 = vsel %vm401_vm7, %v2737_v36, %v2789_v22  ;;  %2981 = vmatpush.msrb.mxu3 %v2956_v61 }
 0x4b9   :  { %v2617_v49 = vpop.permute.xlu2 %2616 }
 0x4ba   :  { %v2629_v46 = vpop.permute.xlu0 %2628  ;;  %v2744_v55 = vperm.slane %v2617_v49, %v7903_v37 }
 0x4bb   :  { %v2605_v8 = vpop.permute.xlu1 %2604  ;;  %v2750_v53 = vperm.slane %v2629_v46, %v7903_v37 }
 0x4bc   :  { %v2738_v47 = vperm.slane %v2605_v8, %v7903_v37  ;;  %v2746_v63 = vsel %vm2679_vm9, %v2745_v11, %v2744_v55  ;;  %v2966_v55 = vld [vmem:[%s9451_s4 + $0xc8] sm:$0xff] }
 0x4be   :  { %v2740_v48 = vsel %vm2679_vm9, %v2739_v32, %v2738_v47  ;;  %v2967_v32 = vld [vmem:[%s9451_s4 + $0xd0] sm:$0xff] }
 0x4bf   :  { %v2791_v26 = vsel %vm2381_vm2, %v2740_v48, %v2790_v52  ;;  %3015 = vmatpush.msra.mxu1 %v2967_v32 }
 0x4c1   :  { %v2626_v20 = vpop.permute.xlu2 %2625  ;;  %3016 = vmatpush.msra.mxu1 %v2966_v55  ;;  %v8178_v55 = vpop.f32.mrf.mxu1 }
 0x4c2   :  { %v2638_v7 = vpop.permute.xlu0 %2637  ;;  %v2748_v33 = vperm.slane %v2626_v20, %v7906_v41 }
 0x4c3   :  { %v2614_v3 = vpop.permute.xlu1 %2613  ;;  %v2754_v2 = vperm.slane %v2638_v7, %v7906_v41 }
 0x4c4   :  { %v2742_v44 = vperm.slane %v2614_v3, %v7906_v41 }
 0x4c6   :  { %v2743_v25 = vsel %vm2679_vm9, %v2742_v44, %v2741_v40 }
 0x4c7   :  { %v2792_v17 = vsel %vm2383_vm3, %v2743_v25, %v2791_v26 }
 0x4c8   :  { %v2793_v39 = vsel %vm2385_vm4, %v2746_v63, %v2792_v17  ;;  %v2954_v63 = vld [vmem:[%s9451_s4 + $0x68] sm:$0xff] }
 0x4c9   :  { %v2635_v15 = vpop.permute.xlu2 %2634 }
 0x4ca   :  { %v2647_v42 = vpop.permute.xlu0 %2646  ;;  %v2753_v56 = vperm.slane %v2635_v15, %v7903_v37 }
 0x4cb   :  { %v2623_v28 = vpop.permute.xlu1 %2622  ;;  %v2759_v62 = vperm.slane %v2647_v42, %v7903_v37  ;;  %v2963_v42 = vld [vmem:[%s9451_s4 + $0xb0] sm:$0xff] }
 0x4cc   :  { %v2747_v57 = vperm.slane %v2623_v28, %v7903_v37  ;;  %v2755_v49 = vsel %vm2679_vm9, %v2754_v2, %v2753_v56  ;;  %v2960_v56 = vld [vmem:[%s9451_s4 + $0x98] sm:$0xff]  ;;  %v2832_v2 = vld [vmem:[#allocation2 + $0xd] sm:$0xff] }
 0x4ce   :  { %v2749_v50 = vsel %vm2679_vm9, %v2748_v33, %v2747_v57 }
 0x4cf   :  { %v2794_v21 = vsel %vm2387_vm5, %v2749_v50, %v2793_v39  ;;  %v2953_v50 = vld [vmem:[%s9451_s4 + $0x60] sm:$0xff] }
 0x4d0   :  { %2809 = vst.msk [vmem:[#allocation2 + $0x1b] sm:$0xff] %vm2806_vm10, %v2794_v21  ;;  %v2965_v39 = vld [vmem:[%s9451_s4 + $0xc0] sm:$0xff]  ;;  %v2964_v21 = vld [vmem:[%s9451_s4 + $0xb8] sm:$0xff] }
 0x4d1   :  { %v2644_v12 = vpop.permute.xlu2 %2643  ;;  %3017 = vmatpush.msra.mxu1 %v2965_v39 }
 0x4d2   :  { %v2656_v43 = vpop.permute.xlu0 %2655  ;;  %v2757_v29 = vperm.slane %v2644_v12, %v7906_v41  ;;  %v2824_v12 = vld [vmem:[#allocation2 + $0xb] sm:$0xff] }
 0x4d3   :  { %v2632_v51 = vpop.permute.xlu1 %2631  ;;  %v2763_v20 = vperm.slane %v2656_v43, %v7906_v41  ;;  %3018 = vmatpush.msra.mxu1 %v2964_v21  ;;  %v8183_v21 = vpop.f32.mrf.mxu1 }
 0x4d4   :  { %v2751_v38 = vperm.slane %v2632_v51, %v7906_v41  ;;  %v2952_v51 = vld [vmem:[%s9451_s4 + $0x58] sm:$0xff] }
 0x4d5   :  { %3019 = vmatpush.msra.mxu1 %v2963_v42 }
 0x4d6   :  { %v2752_v0 = vsel %vm2679_vm9, %v2751_v38, %v2750_v53  ;;  %v2950_v38 = vld [vmem:[%s9451_s4 + $0x48] sm:$0xff]  ;;  %v2949_v53 = vld [vmem:[%s9451_s4 + $0x40] sm:$0xff] }
 0x4d7   :  { %v2795_v13 = vsel %vm396_vm6, %v2755_v49, %v2752_v0  ;;  %v2825_v52 = vld [vmem:[#allocation2 + $0x1b] sm:$0xff]  ;;  %v2835_v49 = vld [vmem:[#allocation2 + $0x6] sm:$0xff]  ;;  %vm2923_vm6 = vcmask 523264  }
 0x4d8   :  { %v2821_v15 = vld [vmem:[#allocation2 + $0x1a] sm:$0xff] }
 0x4d9   :  { %v2653_v1 = vpop.permute.xlu2 %2652  ;;  %v2817_v26 = vld [vmem:[#allocation2 + $0x19] sm:$0xff] }
 0x4da   :  { %v2665_v24 = vpop.permute.xlu0 %2664  ;;  %v2762_v45 = vperm.slane %v2653_v1, %v7903_v37  ;;  %v2951_v1 = vld [vmem:[%s9451_s4 + $0x50] sm:$0xff]  ;;  %v2945_v0 = vld [vmem:[%s9451_s4 + $0x20] sm:$0xff] }
 0x4db   :  { %v2641_v5 = vpop.permute.xlu1 %2640  ;;  %v2768_v35 = vperm.slane %v2665_v24, %v7903_v37  ;;  %v2962_v24 = vld [vmem:[%s9451_s4 + $0xa8] sm:$0xff] }
 0x4dc   :  { %v2756_v4 = vperm.slane %v2641_v5, %v7903_v37  ;;  %v2764_v19 = vsel %vm2679_vm9, %v2763_v20, %v2762_v45  ;;  %v2823_v5 = vld [vmem:[#allocation2 + $0x3] sm:$0xff]  ;;  %3020 = vmatpush.msra.mxu1 %v2962_v24  ;;  %v2959_v45 = vld [vmem:[%s9451_s4 + $0x90] sm:$0xff] }
 0x4dd   :  { %v2957_v20 = vld [vmem:[%s9451_s4 + $0x80] sm:$0xff] }
 0x4de   :  { %v2758_v30 = vsel %vm2679_vm9, %v2757_v29, %v2756_v4  ;;  %v2961_v4 = vld [vmem:[%s9451_s4 + $0xa0] sm:$0xff]  ;;  %v2836_v29 = vld [vmem:[#allocation2 + $0xe] sm:$0xff] }
 0x4df   :  { %v2796_v46 = vsel %vm2378_vm1, %v2758_v30, %v2795_v13  ;;  %3021 = vmatpush.msra.mxu1 %v2961_v4  ;;  %v2943_v13 = vld [vmem:[%s9451_s4 + $0x10] sm:$0xff]  ;;  %v8190_v4 = vpop.f32.mrf.mxu3 }
 0x4e0   :  { %9982 = vst [vmem:[#allocation109_spill] sm:$0xff] %v8190_v4 }
 0x4e1   :  { %v2662_v60 = vpop.permute.xlu2 %2661  ;;  %3022 = vmatpush.msra.mxu1 %v2960_v56  ;;  %v2828_v56 = vld [vmem:[#allocation2 + $0xc] sm:$0xff] }
 0x4e2   :  { %v2766_v59 = vperm.slane %v2662_v60, %v7906_v41  ;;  %v2674_v58 = vpop.permute.xlu0 %2673  ;;  %v5214_v60 = vpack.i.bf16 %v2824_v12, %v2823_v5  ;;  %v2827_v5 = vld [vmem:[#allocation2 + $0x4] sm:$0xff] }
 0x4e3   :  { %v2650_v31 = vpop.permute.xlu1 %2649  ;;  %v2772_v10 = vperm.slane %v2674_v58, %v7906_v41  ;;  %3023 = vmatpush.msra.mxu1 %v2959_v45 }
 0x4e4   :  { %v2760_v16 = vperm.slane %v2650_v31, %v7906_v41  ;;  %v2831_v31 = vld [vmem:[#allocation2 + $0x5] sm:$0xff] }
 0x4e6   :  { %v2761_v8 = vsel %vm2679_vm9, %v2760_v16, %v2759_v62  ;;  %v2948_v16 = vld [vmem:[%s9451_s4 + $0x38] sm:$0xff]  ;;  %v2946_v62 = vld [vmem:[%s9451_s4 + $0x28] sm:$0xff] }
 0x4e7   :  { %v2797_v18 = vsel %vm401_vm7, %v2761_v8, %v2796_v46  ;;  %v2941_v46 = vld [vmem:[%s9451_s4] sm:$0xff]  ;;  %vm2928_vm7 = vcmask 785408  }
 0x4e8   :  { %v2798_v40 = vsel %vm2381_vm2, %v2764_v19, %v2797_v18 }
 0x4e9   :  { %v2671_v14 = vpop.permute.xlu2 %2670 }
 0x4ea   :  { %v2771_v6 = vperm.slane %v2671_v14, %v7903_v37  ;;  %v2942_v14 = vld [vmem:[%s9451_s4 + $0x8] sm:$0xff] }
 0x4eb   :  { %v2659_v54 = vpop.permute.xlu1 %2658 }
 0x4ec   :  { %v2765_v23 = vperm.slane %v2659_v54, %v7903_v37  ;;  %v2773_v48 = vsel %vm2679_vm9, %v2772_v10, %v2771_v6  ;;  %v2947_v54 = vld [vmem:[%s9451_s4 + $0x30] sm:$0xff] }
 0x4ee   :  { %v2767_v47 = vsel %vm2679_vm9, %v2766_v59, %v2765_v23  ;;  %v2944_v23 = vld [vmem:[%s9451_s4 + $0x18] sm:$0xff]  ;;  %v2958_v59 = vld [vmem:[%s9451_s4 + $0x88] sm:$0xff] }
 0x4ef   :  { %v2799_v37 = vsel %vm2383_vm3, %v2767_v47, %v2798_v40  ;;  %3024 = vmatpush.msra.mxu1 %v2958_v59 }
 0x4f1   :  { %3025 = vmatpush.msra.mxu1 %v2957_v20 }
 0x4f3   :  { %v2668_v3 = vpop.permute.xlu1 %2667 }
 0x4f4   :  { %v2769_v44 = vperm.slane %v2668_v3, %v7906_v41  ;;  %v2955_v41 = vld [vmem:[%s9451_s4 + $0x70] sm:$0xff] }
 0x4f5   :  { %2982 = vmatpush.msrb.mxu3 %v2955_v41 }
 0x4f6   :  { %v2770_v22 = vsel %vm2679_vm9, %v2769_v44, %v2768_v35  ;;  %v2811_v35 = vld [vmem:[#allocation2] sm:$0xff] }
 0x4f7   :  { %v2800_v36 = vsel %vm2385_vm4, %v2770_v22, %v2799_v37  ;;  %2983 = vmatpush.msrb.mxu3 %v2954_v63  ;;  %v2812_v22 = vld [vmem:[#allocation2 + $0x8] sm:$0xff] }
 0x4f8   :  { %v2801_v25 = vsel %vm2387_vm5, %v2773_v48, %v2800_v36 }
 0x4f9   :  { %2810 = vst.msk [vmem:[#allocation2 + $0x23] sm:$0xff] %vm2806_vm10, %v2801_v25  ;;  %2984 = vmatpush.msrb.mxu3 %v2953_v50 }
 0x4fb   :  { %2985 = vmatpush.msrb.mxu3 %v2952_v51 }
 0x4fd   :  { %2986 = vmatpush.msrb.mxu3 %v2951_v1 }
 0x4ff   :  { %2987 = vmatpush.msrb.mxu3 %v2950_v38 }
 0x500   :  { %v2826_v7 = vld [vmem:[#allocation2 + $0x23] sm:$0xff] }
 0x501   :  { %v2822_v11 = vld [vmem:[#allocation2 + $0x22] sm:$0xff]  ;;  %v5219_v28 = vpack.i.bf16 %v2826_v7, %v2825_v52  ;;  %2988 = vmatpush.msrb.mxu3 %v2949_v53 }
 0x502   :  { %v2818_v17 = vld [vmem:[#allocation2 + $0x21] sm:$0xff]  ;;  %v5209_v33 = vpack.i.bf16 %v2822_v11, %v2821_v15 }
 0x503   :  { %v5199_v57 = vpack.i.bf16 %v2818_v17, %v2817_v26  ;;  %5220 = vrot.lane.b32.xlu0 %v5219_v28, %s5737_s15  ;;  %v2833_v43 = vld [vmem:[#allocation2 + $0x1d] sm:$0xff]  ;;  %v2834_v27 = vld [vmem:[#allocation2 + $0x25] sm:$0xff]  ;;  %2989 = vmatpush.msrb.mxu3 %v2948_v16 }
 0x504   :  { %5210 = vrot.lane.b32.xlu1 %v5209_v33, %s5735_s5  ;;  %v2837_v30 = vld [vmem:[#allocation2 + $0x1e] sm:$0xff]  ;;  %v2838_v8 = vld [vmem:[#allocation2 + $0x26] sm:$0xff] }
 0x505   :  { %5200 = vrot.lane.b32.xlu2 %v5199_v57, %s5736_s26  ;;  %2990 = vmatpush.msrb.mxu3 %v2947_v54  ;;  %v2813_v28 = vld [vmem:[#allocation2 + $0x18] sm:$0xff]  ;;  %v2814_v12 = vld [vmem:[#allocation2 + $0x20] sm:$0xff] }
 0x507   :  { %2991 = vmatpush.msrb.mxu3 %v2946_v62  ;;  %v8198_v62 = vpop.f32.mrf.mxu3 }
 0x508   :  { %9983 = vst [vmem:[#allocation36_spill] sm:$0xff] %v8198_v62 }
 0x509   :  { %2992 = vmatpush.msrb.mxu3 %v2945_v0  ;;  %v2829_v0 = vld [vmem:[#allocation2 + $0x1c] sm:$0xff] }
 0x50b   :  { %2895 = vrot.lane.b32.xlu0 %v2833_v43, %s5736_s26  ;;  %2993 = vmatpush.msrb.mxu3 %v2944_v23 }
 0x50c   :  { %2891 = vrot.lane.b32.xlu1 %v2831_v31, %s5736_s26 }
 0x50d   :  { %5215 = vrot.lane.b32.xlu2 %v5214_v60, %s5737_s15  ;;  %2994 = vmatpush.msrb.mxu3 %v2943_v13  ;;  %v2830_v13 = vld [vmem:[#allocation2 + $0x24] sm:$0xff] }
 0x50f   :  { %2995 = vmatpush.msrb.mxu3 %v2942_v14  ;;  %v8206_v14 = vpop.f32.mrf.mxu3 }
 0x510   :  { %9984 = vst [vmem:[#allocation110_spill] sm:$0xff] %v8206_v14 }
 0x511   :  { %2996 = vmatpush.msrb.mxu3 %v2941_v46 }
 0x513   :  { %2909 = vrot.lane.b32.xlu0 %v2836_v29, %s5735_s5 }
 0x514   :  { %2897 = vrot.lane.b32.xlu1 %v2834_v27, %s5736_s26 }
 0x515   :  { %2893 = vrot.lane.b32.xlu2 %v2832_v2, %s5736_s26  ;;  %v8195_v2 = vpop.f32.mrf.mxu1 }
 0x51c   :  { %2911 = vrot.lane.b32.xlu1 %v2837_v30, %s5735_s5 }
 0x51d   :  { %2907 = vrot.lane.b32.xlu2 %v2835_v49, %s5735_s5  ;;  %v8203_v23 = vpop.f32.mrf.mxu1 }
 0x524   :  { %v5206_v6 = vpop.permute.xlu0 %5205 }
 0x525   :  { %2913 = vrot.lane.b32.xlu2 %v2838_v8, %s5735_s5  ;;  %v5196_v58 = vpop.permute.xlu1 %5195  ;;  %v5207_v3 = vunpack.i.l.bf16 %v5206_v6  ;;  %v5208_v37 = vunpack.i.h.bf16 %v5206_v6  ;;  %v8210_v20 = vpop.f32.mrf.mxu1 }
 0x526   :  { %v5197_v47 = vunpack.i.l.bf16 %v5196_v58  ;;  %v5198_v10 = vunpack.i.h.bf16 %v5196_v58  ;;  %v8212_v58 = vpop.f32.mrf.mxu3 }
 0x528   :  { %v2919_v19 = vsel %vm108_vm0, %v2811_v35, %v5197_v47  ;;  %v2920_v36 = vsel %vm108_vm0, %v2812_v22, %v5198_v10 }
 0x529   :  { %v2924_v32 = vsel %vm2923_vm6, %v2919_v19, %v5207_v3  ;;  %v2925_v25 = vsel %vm2923_vm6, %v2920_v36, %v5208_v37 }
 0x52e   :  { %v8216_v6 = vpop.f32.mrf.mxu3 }
 0x52f   :  { %9985 = vst [vmem:[#allocation111_spill] sm:$0xff] %v8216_v6 }
 0x536   :  { %v8220_v3 = vpop.f32.mrf.mxu3 }
 0x537   :  { %9986 = vst [vmem:[#allocation42_spill] sm:$0xff] %v8220_v3 }
 0x53e   :  { %v8224_v19 = vpop.f32.mrf.mxu3 }
 0x53f   :  { %9987 = vst [vmem:[#allocation43_spill] sm:$0xff] %v8224_v19 }
 0x55f   :  { %v5201_v18 = vpop.permute.xlu2 %5200 }
 0x560   :  { %v5202_v52 = vunpack.i.l.bf16 %v5201_v18  ;;  %v5203_v63 = vunpack.i.h.bf16 %v5201_v18  ;;  %v8214_v18 = vpop.f32.mrf.mxu1 }
 0x562   :  { %v2921_v33 = vsel %vm108_vm0, %v2813_v28, %v5202_v52  ;;  %v2922_v43 = vsel %vm108_vm0, %v2814_v12, %v5203_v63 }
 0x567   :  { %v5216_v44 = vpop.permute.xlu2 %5215 }
 0x568   :  { %v5217_v61 = vunpack.i.l.bf16 %v5216_v44  ;;  %v5218_v48 = vunpack.i.h.bf16 %v5216_v44  ;;  %v8218_v47 = vpop.f32.mrf.mxu1 }
 0x56a   :  { %v2929_v40 = vsel %vm2928_vm7, %v2924_v32, %v5217_v61  ;;  %v2930_v41 = vsel %vm2928_vm7, %v2925_v25, %v5218_v48  ;;  %v8228_v61 = vpop.f32.mrf.mxu3 }
 0x56b   :  { %2997 = vmatmul.f32.vlgmr.msrb.gmra.mxu3 %v2929_v40  ;;  %9988 = vst [vmem:[#allocation44_spill] sm:$0xff] %v8228_v61 }
 0x56f   :  { %v2894_v15 = vpop.permute.xlu2 %2893 }
 0x570   :  { %v2934_v16 = vsel %vm108_vm0, %v2828_v56, %v2894_v15  ;;  %v8222_v35 = vpop.f32.mrf.mxu1 }
 0x572   :  { %v8232_v10 = vpop.f32.mrf.mxu3 }
 0x573   :  { %3000 = vmatmul.f32.gmra.mxu3 %v2930_v41 }
 0x575   :  { %v5221_v26 = vpop.permute.xlu0 %5220 }
 0x576   :  { %v5211_v7 = vpop.permute.xlu1 %5210  ;;  %v5222_v11 = vunpack.i.l.bf16 %v5221_v26  ;;  %v5223_v51 = vunpack.i.h.bf16 %v5221_v26 }
 0x577   :  { %v5212_v17 = vunpack.i.l.bf16 %v5211_v7  ;;  %v5213_v39 = vunpack.i.h.bf16 %v5211_v7  ;;  %v2908_v31 = vpop.permute.xlu2 %2907 }
 0x578   :  { %v8226_v44 = vpop.f32.mrf.mxu1 }
 0x579   :  { %v2926_v57 = vsel %vm2923_vm6, %v2921_v33, %v5212_v17  ;;  %v2927_v24 = vsel %vm2923_vm6, %v2922_v43, %v5213_v39  ;;  %v8248_v17 = vpop.f32.mrf.mxu0 }
 0x57a   :  { %v2931_v50 = vsel %vm2928_vm7, %v2926_v57, %v5222_v11  ;;  %v2932_v53 = vsel %vm2928_vm7, %v2927_v24, %v5223_v51  ;;  %v8236_v37 = vpop.f32.mrf.mxu3 }
 0x57b   :  { %3003 = vmatmul.f32.gmra.mxu3 %v2931_v50  ;;  %9989 = vst [vmem:[#allocation74_spill] sm:$0xff] %v8236_v37 }
 0x57d   :  { %v2896_v42 = vpop.permute.xlu0 %2895 }
 0x57e   :  { %v2892_v1 = vpop.permute.xlu1 %2891  ;;  %v2935_v30 = vsel %vm108_vm0, %v2829_v0, %v2896_v42 }
 0x57f   :  { %v2933_v60 = vsel %vm108_vm0, %v2827_v5, %v2892_v1  ;;  %v2914_v46 = vpop.permute.xlu2 %2913 }
 0x580   :  { %v2937_v38 = vsel %vm2923_vm6, %v2933_v60, %v2908_v31  ;;  %v8230_v32 = vpop.f32.mrf.mxu1 }
 0x581   :  { %5074 = vmatmul.msk.f32.vlgmr.msra.gmra.mxu1 %vm2928_vm7, %v2937_v38  ;;  %v8250_v51 = vpop.f32.mrf.mxu0 }
 0x582   :  { %v8240_v48 = vpop.f32.mrf.mxu3 }
 0x583   :  { %3006 = vmatmul.f32.gmra.mxu3 %v2932_v53  ;;  %9990 = vst [vmem:[#allocation53_spill] sm:$0xff] %v8240_v48 }
 0x585   :  { %v2910_v54 = vpop.permute.xlu0 %2909 }
 0x586   :  { %v2898_v29 = vpop.permute.xlu1 %2897  ;;  %v2938_v27 = vsel %vm2923_vm6, %v2934_v16, %v2910_v54 }
 0x587   :  { %v2936_v45 = vsel %vm108_vm0, %v2830_v13, %v2898_v29 }
 0x588   :  { %v2940_v59 = vsel %vm2923_vm6, %v2936_v45, %v2914_v46  ;;  %v8234_v40 = vpop.f32.mrf.mxu1 }
 0x589   :  { %5075 = vmatmul.msk.f32.gmra.mxu1 %vm2928_vm7, %v2938_v27  ;;  %v8252_v0 = vpop.f32.mrf.mxu0 }
 0x58a   :  { %v8244_v25 = vpop.f32.mrf.mxu3 }
 0x58b   :  { %9991 = vst [vmem:[#allocation65_spill] sm:$0xff] %v8244_v25 }
 0x58e   :  { %v2912_v49 = vpop.permute.xlu1 %2911 }
 0x58f   :  { %v2939_v8 = vsel %vm2923_vm6, %v2935_v30, %v2912_v49 }
 0x590   :  { %v8238_v22 = vpop.f32.mrf.mxu1 }
 0x591   :  { %5076 = vmatmul.msk.f32.gmra.mxu1 %vm2928_vm7, %v2939_v8 }
 0x598   :  { %v8242_v36 = vpop.f32.mrf.mxu1 }
 0x599   :  { %5077 = vmatmul.msk.f32.gmra.mxu1 %vm2928_vm7, %v2940_v59 }
 0x5a0   :  { %v8246_v41 = vpop.f32.mrf.mxu1 }
 0x5ee   :  { %v2998_v52 = vpop.f32.mrf.mxu3 }
 0x5f6   :  { %v3001_v11 = vpop.f32.mrf.mxu3 }
 0x5fe   :  { %v3027_v15 = vpop.f32.mrf.mxu1  ;;  %v3004_v39 = vpop.f32.mrf.mxu3 }
 0x5ff   :  { %v3028_v26 = vadd.f32 %v3027_v15, %v2998_v52 }
 0x601   :  { %v5078_v7 = vmul.f32 -1.442695, %v3028_v26 }
 0x603   :  { %5278 = vpow2.f32 %v5078_v7 }
 0x606   :  { %v3030_v28 = vpop.f32.mrf.mxu1  ;;  %v3007_v53 = vpop.f32.mrf.mxu3 }
 0x607   :  { %v3031_v33 = vadd.f32 %v3030_v28, %v3001_v11 }
 0x609   :  { %v5279_v57 = vpop.eup %5278  ;;  %v5079_v63 = vmul.f32 -1.442695, %v3031_v33 }
 0x60a   :  { %v3051_v50 = vadd.f32 1.0, %v5279_v57 }
 0x60b   :  { %5280 = vpow2.f32 %v5079_v63 }
 0x60c   :  { %5282 = vrcp.f32 %v3051_v50  ;;  %v3066_v38 = vand.u32 2147483648, %v3051_v50  ;;  %v3064_v54 = vand.u32 2147483647, %v3051_v50  ;;  %vm3060_vm13 = vweird.f32 %v3051_v50 }
 0x60e   :  { %v3033_v12 = vpop.f32.mrf.mxu1  ;;  %v3067_v13 = vor.u32 1.1754944e-38, %v3066_v38  ;;  %vm3065_vm15 = vcmp.eq.f32.partialorder %v3064_v54, 8.507059e+37 }
 0x60f   :  { %v3034_v42 = vadd.f32 %v3033_v12, %v3004_v39 }
 0x611   :  { %v5281_v5 = vpop.eup %5280  ;;  %v5080_v1 = vmul.f32 -1.442695, %v3034_v42 }
 0x612   :  { %v5283_v43 = vpop.eup %5282  ;;  %v3052_v31 = vadd.f32 1.0, %v5281_v5 }
 0x613   :  { %v3056_v60 = vmul.f32 %v5283_v43, %v3051_v50  ;;  %5284 = vpow2.f32 %v5080_v1  ;;  %vm3061_vm12 = vweird.f32 %v5283_v43  ;;  %v8261_v50 = vpop.f32.mrf.mxu0 }
 0x614   :  { %5286 = vrcp.f32 %v3052_v31  ;;  %vm3062_vm14 = vmor %vm3060_vm13, %vm3061_vm12  ;;  %v3081_v42 = vand.u32 2147483648, %v3052_v31  ;;  %vm3075_vm2 = vweird.f32 %v3052_v31  ;;  %v3079_v5 = vand.u32 2147483647, %v3052_v31 }
 0x615   :  { %v3057_v24 = vsub.f32 1.0, %v3056_v60 }
 0x616   :  { %v3036_v56 = vpop.f32.mrf.mxu1  ;;  %v3082_v38 = vor.u32 1.1754944e-38, %v3081_v42  ;;  %vm3080_vm4 = vcmp.eq.f32.partialorder %v3079_v5, 8.507059e+37 }
 0x617   :  { %v3058_v16 = vmul.f32 %v5283_v43, %v3057_v24  ;;  %v3037_v29 = vadd.f32 %v3036_v56, %v3007_v53 }
 0x619   :  { %v5285_v27 = vpop.eup %5284  ;;  %v3059_v30 = vadd.f32 %v5283_v43, %v3058_v16  ;;  %v5081_v49 = vmul.f32 -1.442695, %v3037_v29 }
 0x61a   :  { %v5287_v8 = vpop.eup %5286  ;;  %v3053_v45 = vadd.f32 1.0, %v5285_v27 }
 0x61b   :  { %v3063_v46 = vsel %vm3062_vm14, %v5283_v43, %v3059_v30  ;;  %v3071_v59 = vmul.f32 %v5287_v8, %v3052_v31  ;;  %5288 = vpow2.f32 %v5081_v49  ;;  %vm3076_vm1 = vweird.f32 %v5287_v8  ;;  %v8268_v54 = vpop.f32.mrf.mxu0 }
 0x61c   :  { %v8254_v52 = vsel %vm3065_vm15, %v3067_v13, %v3063_v46  ;;  %5290 = vrcp.f32 %v3053_v45  ;;  %vm3077_vm3 = vmor %vm3075_vm2, %vm3076_vm1  ;;  %v3096_v31 = vand.u32 2147483648, %v3053_v45  ;;  %vm3090_vm8 = vweird.f32 %v3053_v45 }
 0x61d   :  { %v3072_v15 = vsub.f32 1.0, %v3071_v59  ;;  %v3141_v26 = vperm.slane %v8254_v52, 2  ;;  %v3128_v7 = vperm.slane %v8254_v52, 1  ;;  %v3115_v11 = vperm.slane %v8254_v52, 0 }
 0x61e   :  { %v3206_v43 = vperm.slane %v8254_v52, 7  ;;  %v3094_v29 = vand.u32 2147483647, %v3053_v45  ;;  %v3154_v59 = vperm.slane %v8254_v52, 3 }
 0x61f   :  { %v3073_v28 = vmul.f32 %v5287_v8, %v3072_v15  ;;  %3152 = vperm.xlu0 %5226, %v3141_v26   ;;  %3133 = vperm.xlu2 %5225, %v3128_v7  }
 0x620   :  { %3126 = vperm.xlu1 %5224, %v3115_v11   ;;  %vm3095_vm10 = vcmp.eq.f32.partialorder %v3094_v29, 8.507059e+37 }
 0x621   :  { %v5289_v33 = vpop.eup %5288  ;;  %v3074_v39 = vadd.f32 %v5287_v8, %v3073_v28 }
 0x622   :  { %v5291_v57 = vpop.eup %5290  ;;  %v3054_v63 = vadd.f32 1.0, %v5289_v33 }
 0x623   :  { %v3086_v12 = vmul.f32 %v5291_v57, %v3053_v45  ;;  %v3078_v60 = vsel %vm3077_vm3, %v5287_v8, %v3074_v39  ;;  %vm3091_vm5 = vweird.f32 %v5291_v57  ;;  %v3097_v8 = vor.u32 1.1754944e-38, %v3096_v31  ;;  %v8279_v15 = vpop.f32.mrf.mxu0 }
 0x624   :  { %5292 = vrcp.f32 %v3054_v63  ;;  %v8266_v53 = vsel %vm3080_vm4, %v3082_v38, %v3078_v60  ;;  %vm3092_vm9 = vmor %vm3090_vm8, %vm3091_vm5  ;;  %v3111_v28 = vand.u32 2147483648, %v3054_v63  ;;  %vm3105_vm6 = vweird.f32 %v3054_v63  ;;  %v8291_v60 = vpop.f32.mrf.mxu2 }
 0x625   :  { %v3087_v1 = vsub.f32 1.0, %v3086_v12  ;;  %v3271_v27 = vperm.slane %v8266_v53, 4  ;;  %v3109_v33 = vand.u32 2147483647, %v3054_v63  ;;  %v3193_v38 = vperm.slane %v8254_v52, 6 }
 0x626   :  { %v3112_v42 = vor.u32 1.1754944e-38, %v3111_v28  ;;  %v3284_v6 = vperm.slane %v8266_v53, 5 }
 0x627   :  { %v3088_v24 = vmul.f32 %v5291_v57, %v3087_v1  ;;  %3217 = vperm.xlu0 %5226, %v3206_v43   ;;  %3146 = vperm.xlu2 %5225, %v3141_v26   ;;  %vm3110_vm12 = vcmp.eq.f32.partialorder %v3109_v33, 8.507059e+37  ;;  %v8341_v33 = vld [vmem:[%s9453_s6] ss:$0 sm:$0xff] }
 0x628   :  { %3139 = vperm.xlu1 %5224, %v3128_v7  }
 0x629   :  { %v3089_v56 = vadd.f32 %v5291_v57, %v3088_v24 }
 0x62a   :  { %v5293_v16 = vpop.eup %5292 }
 0x62b   :  { %v3093_v30 = vsel %vm3092_vm9, %v5291_v57, %v3089_v56  ;;  %v3101_v49 = vmul.f32 %v5293_v16, %v3054_v63  ;;  %vm3106_vm11 = vweird.f32 %v5293_v16  ;;  %v3167_v57 = vperm.slane %v8254_v52, 4  ;;  %v8287_v5 = vpop.f32.mrf.mxu0 }
 0x62c   :  { %v8275_v13 = vsel %vm3095_vm10, %v3097_v8, %v3093_v30  ;;  %vm3107_vm7 = vmor %vm3105_vm6, %vm3106_vm11  ;;  %v8301_v56 = vpop.f32.mrf.mxu2  ;;  %v3219_v8 = vperm.slane %v8266_v53, 0 }
 0x62d   :  { %v3102_v46 = vsub.f32 1.0, %v3101_v49  ;;  %v9559_v45 = vperm.slane %v8275_v13, 1  ;;  %v9557_v39 = vperm.slane %v8275_v13, 6 }
 0x62f   :  { %5228 = vset.pattern.permute.xlu2 %v9976_v34  ;;  %3282 = vperm.xlu0 %5226, %v3271_v27   ;;  %v3103_v26 = vmul.f32 %v5293_v16, %v3102_v46  ;;  %v3245_v46 = vperm.slane %v8266_v53, 2 }
 0x630   :  { %5227 = vset.pattern.permute.xlu1 %v9981_v9 }
 0x631   :  { %v3104_v7 = vadd.f32 %v5293_v16, %v3103_v26 }
 0x633   :  { %v3108_v12 = vsel %vm3107_vm7, %v5293_v16, %v3104_v7  ;;  %v8298_v24 = vpop.f32.mrf.mxu0  ;;  %v3180_v16 = vperm.slane %v8254_v52, 5  ;;  %v9558_v7 = vperm.slane %v8275_v13, 4 }
 0x634   :  { %v8289_v1 = vsel %vm3110_vm12, %v3112_v42, %v3108_v12  ;;  %v8311_v29 = vpop.f32.mrf.mxu2 }
 0x635   :  { %v9556_v63 = vperm.slane %v8289_v1, 3 }
 0x637   :  { %3165 = vperm.xlu2 %5228, %v3154_v59   ;;  %3347 = vperm.xlu0 %5226, %v9559_v45  }
 0x638   :  { %3159 = vperm.xlu1 %5227, %v3154_v59   ;;  %v9560_v59 = vperm.slane %v8266_v53, 7 }
 0x63b   :  { %v8305_v31 = vpop.f32.mrf.mxu0 }
 0x63c   :  { %v8317_v49 = vpop.f32.mrf.mxu2 }
 0x63f   :  { %3178 = vperm.xlu2 %5228, %v3167_v57   ;;  %3412 = vperm.xlu0 %5226, %v9557_v39  }
 0x640   :  { %3172 = vperm.xlu1 %5227, %v3167_v57  }
 0x643   :  { %v8313_v30 = vpop.f32.mrf.mxu0 }
 0x647   :  { %5230 = vset.pattern.permute.xlu2 %v9981_v9  ;;  %3477 = vperm.xlu0 %5226, %v9556_v63  }
 0x648   :  { %5229 = vset.pattern.permute.xlu1 %v9976_v34 }
 0x64b   :  { %v8321_v52 = vpop.f32.mrf.mxu0 }
 0x64f   :  { %3198 = vperm.xlu2 %5230, %v3193_v38   ;;  %5247 = vset.pattern.permute.xlu0 %v9981_v9 }
 0x650   :  { %3191 = vperm.xlu1 %5229, %v3180_v16  }
 0x653   :  { %v8329_v26 = vpop.f32.mrf.mxu0 }
 0x657   :  { %3211 = vperm.xlu2 %5230, %v3206_v43   ;;  %3120 = vperm.xlu0 %5247, %v3115_v11   ;;  %v8323_v11 = vpop.f32.mrf.mxu2  ;;  %v3232_v43 = vperm.slane %v8266_v53, 1 }
 0x658   :  { %3204 = vperm.xlu1 %5229, %v3193_v38  }
 0x65b   :  { %v8345_v38 = vpop.f32.mrf.mxu0 }
 0x65f   :  { %5232 = vset.pattern.permute.xlu2 %v9976_v34  ;;  %3185 = vperm.xlu0 %5247, %v3180_v16   ;;  %v8332_v28 = vpop.f32.mrf.mxu2  ;;  %v3258_v16 = vperm.slane %v8266_v53, 3 }
 0x660   :  { %5231 = vset.pattern.permute.xlu1 %v9981_v9 }
 0x667   :  { %3230 = vperm.xlu2 %5232, %v3219_v8   ;;  %3250 = vperm.xlu0 %5247, %v3245_v46   ;;  %v8351_v63 = vpop.f32.mrf.mxu2 }
 0x668   :  { %3224 = vperm.xlu1 %5231, %v3219_v8   ;;  %v9562_v8 = vperm.slane %v8289_v1, 1  ;;  %9992 = vst [vmem:[#allocation68_spill] sm:$0xff] %v8351_v63 }
 0x66f   :  { %3243 = vperm.xlu2 %5232, %v3232_v43   ;;  %3315 = vperm.xlu0 %5247, %v9560_v59   ;;  %v8356_v59 = vpop.f32.mrf.mxu0 }
 0x670   :  { %3237 = vperm.xlu1 %5231, %v3232_v43  }
 0x677   :  { %5234 = vset.pattern.permute.xlu2 %v9981_v9  ;;  %3380 = vperm.xlu0 %5247, %v9558_v7  }
 0x678   :  { %5233 = vset.pattern.permute.xlu1 %v9976_v34 }
 0x679   :  { %v3134_v57 = vpop.permute.xlu2 %3133 }
 0x67a   :  { %v3533_v12 = vmul.f32 %v3134_v57, %v8252_v0 }
 0x67c   :  { %v3601_v42 = vadd.f32 %v8341_v33, %v3533_v12  ;;  %v9561_v12 = vperm.slane %v8289_v1, 6 }
 0x67e   :  { %v5084_v43 = vmul.f32 -1.442695, %v3601_v42 }
 0x67f   :  { %3263 = vperm.xlu2 %5234, %v3258_v16   ;;  %3445 = vperm.xlu0 %5247, %v9562_v8  }
 0x680   :  { %5294 = vpow2.f32 %v5084_v43  ;;  %3256 = vperm.xlu1 %5233, %v3245_v46   ;;  %v8362_v46 = vpop.f32.mrf.mxu2 }
 0x681   :  { %v3147_v39 = vpop.permute.xlu2 %3146 }
 0x682   :  { %v3535_v0 = vmul.f32 %v3147_v39, %v8268_v54 }
 0x684   :  { %v3603_v57 = vadd.f32 %v8341_v33, %v3535_v0 }
 0x686   :  { %v5295_v7 = vpop.eup %5294  ;;  %v5086_v45 = vmul.f32 -1.442695, %v3603_v57 }
 0x687   :  { %v3857_v42 = vadd.f32 1.0, %v5295_v7  ;;  %3276 = vperm.xlu2 %5234, %v3271_v27   ;;  %3510 = vperm.xlu0 %5247, %v9561_v12   ;;  %v8369_v27 = vpop.f32.mrf.mxu0 }
 0x688   :  { %5296 = vpow2.f32 %v5086_v45  ;;  %3269 = vperm.xlu1 %5233, %v3258_v16   ;;  %v8373_v12 = vpop.f32.mrf.mxu2 }
 0x689   :  { %5298 = vrcp.f32 %v3857_v42  ;;  %v3960_v57 = vand.u32 2147483648, %v3857_v42  ;;  %v3958_v8 = vand.u32 2147483647, %v3857_v42  ;;  %vm3954_vm14 = vweird.f32 %v3857_v42 }
 0x68b   :  { %vm3959_vm1 = vcmp.eq.f32.partialorder %v3958_v8, 8.507059e+37 }
 0x68e   :  { %v5297_v54 = vpop.eup %5296 }
 0x68f   :  { %v5299_v39 = vpop.eup %5298  ;;  %v8364_v43 = vadd.f32 1.0, %v5297_v54  ;;  %5236 = vset.pattern.permute.xlu2 %v9976_v34  ;;  %5252 = vset.pattern.permute.xlu0 %v9976_v34  ;;  %v746_v14 = vpop.f32.mrf.mxu0 }
 0x690   :  { %v3950_v7 = vmul.f32 %v5299_v39, %v3857_v42  ;;  %5235 = vset.pattern.permute.xlu1 %v9981_v9  ;;  %vm3955_vm13 = vweird.f32 %v5299_v39 }
 0x691   :  { %5300 = vrcp.f32 %v8364_v43  ;;  %v3153_v45 = vpop.permute.xlu0 %3152  ;;  %v3166_v37 = vpop.permute.xlu2 %3165  ;;  %vm3956_vm15 = vmor %vm3954_vm14, %vm3955_vm13  ;;  %vm3984_vm3 = vweird.f32 %v8364_v43 }
 0x692   :  { %v3951_v16 = vsub.f32 1.0, %v3950_v7  ;;  %v3536_v0 = vmul.f32 %v3153_v45, %v8279_v15  ;;  %v3538_v19 = vmul.f32 %v3166_v37, %v8298_v24  ;;  %v3961_v7 = vor.u32 1.1754944e-38, %v3960_v57  ;;  %v3127_v45 = vpop.permute.xlu1 %3126 }
 0x693   :  { %v3532_v24 = vmul.f32 %v3127_v45, %v8250_v51  ;;  %v3990_v57 = vand.u32 2147483648, %v8364_v43  ;;  %v3297_v51 = vperm.slane %v8266_v53, 6 }
 0x694   :  { %v3952_v54 = vmul.f32 %v5299_v39, %v3951_v16  ;;  %v3604_v25 = vadd.f32 %v8341_v33, %v3536_v0  ;;  %v3606_v15 = vadd.f32 %v8341_v33, %v3538_v19 }
 0x695   :  { %v3600_v19 = vadd.f32 %v8341_v33, %v3532_v24  ;;  %v3991_v45 = vor.u32 1.1754944e-38, %v3990_v57 }
 0x696   :  { %v3953_v48 = vadd.f32 %v5299_v39, %v3952_v54  ;;  %v5087_v62 = vmul.f32 -1.442695, %v3604_v25  ;;  %v5089_v37 = vmul.f32 -1.442695, %v3606_v15  ;;  %v5609_v54 = vld [vmem:[#allocation3 + $0x10] sm:$0xff] }
 0x697   :  { %v5301_v61 = vpop.eup %5300  ;;  %3295 = vperm.xlu2 %5236, %v3284_v6   ;;  %v5083_v8 = vmul.f32 -1.442695, %v3600_v19 }
 0x698   :  { %v3957_v16 = vsel %vm3956_vm15, %v5299_v39, %v3953_v48  ;;  %v3980_v3 = vmul.f32 %v5301_v61, %v8364_v43  ;;  %5302 = vpow2.f32 %v5087_v62  ;;  %3289 = vperm.xlu1 %5235, %v3284_v6   ;;  %vm3985_vm2 = vweird.f32 %v5301_v61 }
 0x699   :  { %v3962_v0 = vsel %vm3959_vm1, %v3961_v7, %v3957_v16  ;;  %5304 = vpow2.f32 %v5089_v37  ;;  %v3218_v4 = vpop.permute.xlu0 %3217  ;;  %v3988_v62 = vand.u32 2147483647, %v8364_v43  ;;  %v8386_v7 = vpop.f32.mrf.mxu2  ;;  %vm3986_vm4 = vmor %vm3984_vm3, %vm3985_vm2 }
 0x69a   :  { %v4881_v42 = vadd.f32 %v5609_v54, %v3962_v0  ;;  %v3981_v25 = vsub.f32 1.0, %v3980_v3  ;;  %v3546_v6 = vmul.f32 %v3218_v4, %v746_v14  ;;  %9993 = vst [vmem:[#allocation59_spill] sm:$0xff] %v8386_v7  ;;  %5306 = vpow2.f32 %v5083_v8  ;;  %v3179_v0 = vpop.permute.xlu2 %3178  ;;  %v3140_v19 = vpop.permute.xlu1 %3139 }
 0x69b   :  { %vm3989_vm5 = vcmp.eq.f32.partialorder %v3988_v62, 8.507059e+37  ;;  %v3540_v14 = vmul.f32 %v3179_v0, %v8313_v30  ;;  %v3534_v30 = vmul.f32 %v3140_v19, %v8261_v50 }
 0x69c   :  { %4945 = vst.msk [vmem:[#allocation6 + $0x10] sm:$0xff] %vm108_vm0, %v4881_v42  ;;  %v3982_v48 = vmul.f32 %v5301_v61, %v3981_v25  ;;  %v3614_v15 = vadd.f32 %v8341_v33, %v3546_v6  ;;  %v5610_v42 = vld [vmem:[#allocation3 + $0x20] sm:$0xff] }
 0x69d   :  { %v3608_v57 = vadd.f32 %v8341_v33, %v3540_v14  ;;  %v3602_v8 = vadd.f32 %v8341_v33, %v3534_v30 }
 0x69e   :  { %v5303_v39 = vpop.eup %5302  ;;  %v3983_v3 = vadd.f32 %v5301_v61, %v3982_v48  ;;  %v5097_v4 = vmul.f32 -1.442695, %v3614_v15 }
 0x69f   :  { %v3860_v16 = vadd.f32 1.0, %v5303_v39  ;;  %3308 = vperm.xlu2 %5236, %v3297_v51   ;;  %v5305_v24 = vpop.eup %5304  ;;  %v5091_v48 = vmul.f32 -1.442695, %v3608_v57  ;;  %v5085_v50 = vmul.f32 -1.442695, %v3602_v8 }
 0x6a0   :  { %v3987_v37 = vsel %vm3986_vm4, %v5301_v61, %v3983_v3  ;;  %3302 = vperm.xlu1 %5235, %v3297_v51   ;;  %v8391_v43 = vadd.f32 1.0, %v5305_v24  ;;  %v5307_v61 = vpop.eup %5306 }
 0x6a1   :  { %v3992_v54 = vsel %vm3989_vm5, %v3991_v45, %v3987_v37  ;;  %5308 = vrcp.f32 %v3860_v16  ;;  %v8397_v62 = vadd.f32 1.0, %v5307_v61  ;;  %v8401_v39 = vpop.f32.mrf.mxu2  ;;  %v4003_v15 = vand.u32 2147483647, %v3860_v16  ;;  %v3283_v37 = vpop.permute.xlu0 %3282 }
 0x6a2   :  { %v4883_v25 = vadd.f32 %v5610_v42, %v3992_v54  ;;  %5310 = vpow2.f32 %v5097_v4  ;;  %v4005_v45 = vand.u32 2147483648, %v3860_v16  ;;  %v4033_v24 = vand.u32 2147483647, %v8391_v43 }
 0x6a3   :  { %5312 = vrcp.f32 %v8391_v43  ;;  %v3556_v54 = vmul.f32 %v3283_v37, %v8222_v35  ;;  %vm3999_vm8 = vweird.f32 %v3860_v16  ;;  %vm8412_vm10 = vcmp.eq.f32.partialorder %v4003_v15, 8.507059e+37 }
 0x6a4   :  { %4947 = vst.msk [vmem:[#allocation6 + $0x20] sm:$0xff] %vm108_vm0, %v4883_v25  ;;  %5314 = vpow2.f32 %v5091_v48  ;;  %v4035_v25 = vand.u32 2147483648, %v8391_v43  ;;  %v4006_v30 = vor.u32 1.1754944e-38, %v4005_v45  ;;  %vm4029_vm11 = vweird.f32 %v8391_v43 }
 0x6a5   :  { %5316 = vrcp.f32 %v8397_v62  ;;  %vm8418_vm6 = vcmp.eq.f32.partialorder %v4033_v24, 8.507059e+37  ;;  %v3624_v15 = vadd.f32 %v8341_v33, %v3556_v54  ;;  %vm3939_vm13 = vweird.f32 %v8397_v62 }
 0x6a6   :  { %v4036_v57 = vor.u32 1.1754944e-38, %v4035_v25  ;;  %v3943_v24 = vand.u32 2147483647, %v8397_v62 }
 0x6a7   :  { %v5309_v6 = vpop.eup %5308  ;;  %5238 = vset.pattern.permute.xlu2 %v9981_v9 }
 0x6a8   :  { %v5311_v51 = vpop.eup %5310  ;;  %v3995_v3 = vmul.f32 %v5309_v6, %v3860_v16  ;;  %5237 = vset.pattern.permute.xlu1 %v9976_v34  ;;  %vm4000_vm9 = vweird.f32 %v5309_v6  ;;  %vm3944_vm2 = vcmp.eq.f32.partialorder %v3943_v24, 8.507059e+37 }
 0x6a9   :  { %v8405_v0 = vadd.f32 1.0, %v5311_v51  ;;  %v5313_v4 = vpop.eup %5312  ;;  %vm4001_vm7 = vmor %vm3999_vm8, %vm4000_vm9 }
 0x6aa   :  { %v3996_v14 = vsub.f32 1.0, %v3995_v3  ;;  %v4025_v42 = vmul.f32 %v5313_v4, %v8391_v43  ;;  %v5315_v48 = vpop.eup %5314  ;;  %vm4030_vm12 = vweird.f32 %v5313_v4 }
 0x6ab   :  { %5318 = vrcp.f32 %v8405_v0  ;;  %v5317_v35 = vpop.eup %5316  ;;  %v8422_v37 = vadd.f32 1.0, %v5315_v48  ;;  %v3945_v48 = vand.u32 2147483648, %v8397_v62  ;;  %vm4031_vm14 = vmor %vm4029_vm11, %vm4030_vm12  ;;  %vm4149_vm3 = vweird.f32 %v8405_v0 }
 0x6ac   :  { %v3997_v19 = vmul.f32 %v5309_v6, %v3996_v14  ;;  %v4026_v8 = vsub.f32 1.0, %v4025_v42  ;;  %5320 = vpow2.f32 %v5085_v50  ;;  %v3935_v45 = vmul.f32 %v5317_v35, %v8397_v62 }
 0x6ad   :  { %v9998_v42 = vperm.slane %v8275_v13, 0  ;;  %5322 = vrcp.f32 %v8422_v37  ;;  %vm3940_vm15 = vweird.f32 %v5317_v35 }
 0x6ae   :  { %v3998_v51 = vadd.f32 %v5309_v6, %v3997_v19  ;;  %v4027_v14 = vmul.f32 %v5313_v4, %v4026_v8  ;;  %v9999_v19 = vperm.slane %v8266_v53, 7  ;;  %v3936_v25 = vsub.f32 1.0, %v3935_v45  ;;  %v3199_v8 = vpop.permute.xlu2 %3198  ;;  %vm3941_vm1 = vmor %vm3939_vm13, %vm3940_vm15 }
 0x6af   :  { %3328 = vperm.xlu2 %5238, %v9998_v42   ;;  %v8437_v42 = vpop.f32.mrf.mxu2  ;;  %v4153_v53 = vand.u32 2147483647, %v8405_v0  ;;  %v3543_v61 = vmul.f32 %v3199_v8, %v8345_v38 }
 0x6b0   :  { %v4002_v50 = vsel %vm4001_vm7, %v5309_v6, %v3998_v51  ;;  %3321 = vperm.xlu1 %5237, %v9999_v19   ;;  %v4028_v54 = vadd.f32 %v5313_v4, %v4027_v14  ;;  %10000 = vst [vmem:[#allocation75_spill] sm:$0xff] %v8437_v42  ;;  %v5611_v6 = vld [vmem:[#allocation3 + $0x28] sm:$0xff]  ;;  %v5107_v19 = vmul.f32 -1.442695, %v3624_v15  ;;  %v3937_v45 = vmul.f32 %v5317_v35, %v3936_v25  ;;  %v5612_v42 = vld [vmem:[#allocation3 + $0x38] sm:$0xff] }
 0x6b1   :  { %v4007_v16 = vsel %vm8412_vm10, %v4006_v30, %v4002_v50  ;;  %v5319_v7 = vpop.eup %5318  ;;  %v3946_v25 = vor.u32 1.1754944e-38, %v3945_v48  ;;  %vm8460_vm5 = vcmp.eq.f32.partialorder %v4153_v53, 8.507059e+37  ;;  %v4063_v53 = vand.u32 2147483647, %v8422_v37 }
 0x6b2   :  { %v4884_v51 = vadd.f32 %v5611_v6, %v4007_v16  ;;  %v5321_v30 = vpop.eup %5320  ;;  %v4032_v14 = vsel %vm4031_vm14, %v5313_v4, %v4028_v54  ;;  %v4145_v50 = vmul.f32 %v5319_v7, %v8405_v0  ;;  %v4155_v6 = vand.u32 2147483648, %v8405_v0 }
 0x6b3   :  { %v4037_v16 = vsel %vm8418_vm6, %v4036_v57, %v4032_v14  ;;  %v8449_v43 = vadd.f32 1.0, %v5321_v30  ;;  %5324 = vpow2.f32 %v5107_v19  ;;  %v3938_v63 = vadd.f32 %v5317_v35, %v3937_v45  ;;  %v5323_v54 = vpop.eup %5322  ;;  %v3160_v57 = vpop.permute.xlu1 %3159  ;;  %v5613_v30 = vld [vmem:[#allocation3 + $0x8] sm:$0xff] }
 0x6b4   :  { %4948 = vst.msk [vmem:[#allocation6 + $0x28] sm:$0xff] %vm108_vm0, %v4884_v51  ;;  %v4886_v15 = vadd.f32 %v5612_v42, %v4037_v16  ;;  %v4146_v38 = vsub.f32 1.0, %v4145_v50  ;;  %v3611_v4 = vadd.f32 %v8341_v33, %v3543_v61  ;;  %vm4150_vm4 = vweird.f32 %v5319_v7 }
 0x6b5   :  { %5326 = vrcp.f32 %v8449_v43  ;;  %v3942_v3 = vsel %vm3941_vm1, %v5317_v35, %v3938_v63  ;;  %v4055_v42 = vmul.f32 %v5323_v54, %v8422_v37  ;;  %v10001_v51 = vperm.slane %v8275_v13, 1  ;;  %vm4151_vm8 = vmor %vm4149_vm3, %vm4150_vm4 }
 0x6b6   :  { %4950 = vst.msk [vmem:[#allocation6 + $0x38] sm:$0xff] %vm108_vm0, %v4886_v15  ;;  %v4147_v8 = vmul.f32 %v5319_v7, %v4146_v38  ;;  %v3947_v19 = vsel %vm3944_vm2, %v3946_v25, %v3942_v3  ;;  %v4156_v24 = vor.u32 1.1754944e-38, %v4155_v6  ;;  %v5094_v48 = vmul.f32 -1.442695, %v3611_v4 }
 0x6b7   :  { %3341 = vperm.xlu2 %5238, %v10001_v51   ;;  %v10004_v61 = vperm.slane %v8275_v13, 0  ;;  %v4880_v14 = vadd.f32 %v5613_v30, %v3947_v19  ;;  %v4056_v35 = vsub.f32 1.0, %v4055_v42  ;;  %v3537_v45 = vmul.f32 %v3160_v57, %v8287_v5  ;;  %v8475_v5 = vpop.f32.mrf.mxu2  ;;  %v5614_v57 = vld [vmem:[#allocation3 + $0x78] sm:$0xff]  ;;  %v3348_v51 = vpop.permute.xlu0 %3347 }
 0x6b8   :  { %v4148_v63 = vadd.f32 %v5319_v7, %v4147_v8  ;;  %vm4060_vm9 = vweird.f32 %v5323_v54  ;;  %v4065_v16 = vand.u32 2147483648, %v8422_v37  ;;  %5328 = vpow2.f32 %v5094_v48 }
 0x6b9   :  { %3334 = vperm.xlu1 %5237, %v10004_v61   ;;  %v5325_v50 = vpop.eup %5324  ;;  %4944 = vst.msk [vmem:[#allocation6 + $0x8] sm:$0xff] %vm108_vm0, %v4880_v14  ;;  %v4057_v15 = vmul.f32 %v5323_v54, %v4056_v35  ;;  %v3605_v4 = vadd.f32 %v8341_v33, %v3537_v45  ;;  %vm4059_vm10 = vweird.f32 %v8422_v37  ;;  %vm4064_vm6 = vcmp.eq.f32.partialorder %v4063_v53, 8.507059e+37 }
 0x6ba   :  { %v4152_v6 = vsel %vm4151_vm8, %v5319_v7, %v4148_v63  ;;  %v8472_v38 = vadd.f32 1.0, %v5325_v50  ;;  %vm4061_vm11 = vmor %vm4059_vm10, %vm4060_vm9  ;;  %v4066_v7 = vor.u32 1.1754944e-38, %v4065_v16  ;;  %v3973_v30 = vand.u32 2147483647, %v8449_v43  ;;  %v5615_v63 = vld [vmem:[#allocation3 + $0x48] sm:$0xff] }
 0x6bb   :  { %v5327_v25 = vpop.eup %5326  ;;  %v4157_v0 = vsel %vm8460_vm5, %v4156_v24, %v4152_v6  ;;  %v4058_v8 = vadd.f32 %v5323_v54, %v4057_v15  ;;  %v5088_v62 = vmul.f32 -1.442695, %v3605_v4  ;;  %v3566_v24 = vmul.f32 %v3348_v51, %v8317_v49  ;;  %v3212_v49 = vpop.permute.xlu2 %3211 }
 0x6bc   :  { %v4894_v3 = vadd.f32 %v5614_v57, %v4157_v0  ;;  %v3965_v42 = vmul.f32 %v5327_v25, %v8449_v43  ;;  %5330 = vrcp.f32 %v8472_v38  ;;  %vm3970_vm7 = vweird.f32 %v5327_v25 }
 0x6bd   :  { %v4062_v19 = vsel %vm4061_vm11, %v5323_v54, %v4058_v8  ;;  %v3975_v14 = vand.u32 2147483648, %v8449_v43  ;;  %5332 = vpow2.f32 %v5088_v62  ;;  %v3634_v54 = vadd.f32 %v8341_v33, %v3566_v24  ;;  %v5616_v62 = vld [vmem:[#allocation3 + $0x18] sm:$0xff] }
 0x6be   :  { %4958 = vst.msk [vmem:[#allocation6 + $0x78] sm:$0xff] %vm108_vm0, %v4894_v3  ;;  %v3966_v48 = vsub.f32 1.0, %v3965_v42  ;;  %v5329_v61 = vpop.eup %5328  ;;  %v4067_v37 = vsel %vm4064_vm6, %v4066_v7, %v4062_v19  ;;  %vm3969_vm12 = vweird.f32 %v8449_v43  ;;  %v3545_v4 = vmul.f32 %v3212_v49, %v8369_v27  ;;  %v3173_v3 = vpop.permute.xlu1 %3172 }
 0x6bf   :  { %5240 = vset.pattern.permute.xlu2 %v9976_v34  ;;  %v4888_v35 = vadd.f32 %v5615_v63, %v4067_v37  ;;  %v8489_v50 = vadd.f32 1.0, %v5329_v61  ;;  %vm3971_vm13 = vmor %vm3969_vm12, %vm3970_vm7  ;;  %v3976_v6 = vor.u32 1.1754944e-38, %v3975_v14  ;;  %v5117_v15 = vmul.f32 -1.442695, %v3634_v54  ;;  %v3413_v8 = vpop.permute.xlu0 %3412  ;;  %v821_v51 = vpop.f32.mrf.mxu2 }
 0x6c0   :  { %v3967_v45 = vmul.f32 %v5327_v25, %v3966_v48  ;;  %vm3974_vm14 = vcmp.eq.f32.partialorder %v3973_v30, 8.507059e+37  ;;  %v3349_v42 = vperm.slane %v8275_v13, 2  ;;  %v4303_v43 = vand.u32 2147483647, %v8472_v38 }
 0x6c1   :  { %5239 = vset.pattern.permute.xlu1 %v9981_v9  ;;  %4952 = vst.msk [vmem:[#allocation6 + $0x48] sm:$0xff] %vm108_vm0, %v4888_v35  ;;  %5334 = vrcp.f32 %v8489_v50  ;;  %v3613_v19 = vadd.f32 %v8341_v33, %v3545_v4  ;;  %v3539_v27 = vmul.f32 %v3173_v3, %v8305_v31  ;;  %v4305_v37 = vand.u32 2147483648, %v8472_v38 }
 0x6c2   :  { %v3968_v53 = vadd.f32 %v5327_v25, %v3967_v45  ;;  %v5331_v16 = vpop.eup %5330  ;;  %5336 = vpow2.f32 %v5117_v15  ;;  %vm4299_vm1 = vweird.f32 %v8472_v38  ;;  %v3362_v49 = vperm.slane %v8275_v13, 3 }
 0x6c3   :  { %v4295_v57 = vmul.f32 %v5331_v16, %v8472_v38  ;;  %v5333_v48 = vpop.eup %5332  ;;  %v5096_v14 = vmul.f32 -1.442695, %v3613_v19  ;;  %vm4300_vm15 = vweird.f32 %v5331_v16  ;;  %v3607_v45 = vadd.f32 %v8341_v33, %v3539_v27 }
 0x6c4   :  { %v3972_v0 = vsel %vm3971_vm13, %v5327_v25, %v3968_v53  ;;  %v3576_v25 = vmul.f32 %v3413_v8, %v821_v51  ;;  %v8503_v30 = vadd.f32 1.0, %v5333_v48  ;;  %vm4304_vm2 = vcmp.eq.f32.partialorder %v4303_v43, 8.507059e+37  ;;  %vm4301_vm3 = vmor %vm4299_vm1, %vm4300_vm15 }
 0x6c5   :  { %v3977_v7 = vsel %vm3974_vm14, %v3976_v6, %v3972_v0  ;;  %v4296_v61 = vsub.f32 1.0, %v4295_v57  ;;  %v4108_v6 = vand.u32 2147483647, %v8489_v50  ;;  %v4306_v4 = vor.u32 1.1754944e-38, %v4305_v37 }
 0x6c6   :  { %v4882_v24 = vadd.f32 %v5616_v62, %v3977_v7  ;;  %v3644_v54 = vadd.f32 %v8341_v33, %v3576_v25  ;;  %5338 = vrcp.f32 %v8503_v30  ;;  %v5090_v57 = vmul.f32 -1.442695, %v3607_v45  ;;  %v8516_v7 = vpop.f32.mrf.mxu0  ;;  %v5617_v62 = vld [vmem:[#allocation3 + $0xc8] sm:$0xff] }
 0x6c7   :  { %3360 = vperm.xlu2 %5240, %v3349_v42   ;;  %v5335_v63 = vpop.eup %5334  ;;  %v4297_v35 = vmul.f32 %v5331_v16, %v4296_v61  ;;  %5340 = vpow2.f32 %v5096_v14  ;;  %v4110_v38 = vand.u32 2147483648, %v8489_v50  ;;  %v3478_v51 = vpop.permute.xlu0 %3477  ;;  %v3414_v61 = vperm.slane %v8275_v13, 7 }
 0x6c8   :  { %4946 = vst.msk [vmem:[#allocation6 + $0x18] sm:$0xff] %vm108_vm0, %v4882_v24  ;;  %v4100_v31 = vmul.f32 %v5335_v63, %v8489_v50  ;;  %v5337_v15 = vpop.eup %5336  ;;  %v5127_v3 = vmul.f32 -1.442695, %v3644_v54  ;;  %vm4105_vm4 = vweird.f32 %v5335_v63  ;;  %5342 = vpow2.f32 %v5090_v57 }
 0x6c9   :  { %3354 = vperm.xlu1 %5239, %v3349_v42   ;;  %v4298_v53 = vadd.f32 %v5331_v16, %v4297_v35  ;;  %v8514_v42 = vadd.f32 1.0, %v5337_v15  ;;  %v3586_v48 = vmul.f32 %v3478_v51, %v8212_v58  ;;  %vm4104_vm5 = vweird.f32 %v8489_v50  ;;  %v3192_v15 = vpop.permute.xlu1 %3191 }
 0x6ca   :  { %v4101_v0 = vsub.f32 1.0, %v4100_v31  ;;  %vm4106_vm8 = vmor %vm4104_vm5, %vm4105_vm4  ;;  %vm4109_vm9 = vcmp.eq.f32.partialorder %v4108_v6, 8.507059e+37  ;;  %v4111_v58 = vor.u32 1.1754944e-38, %v4110_v38  ;;  %v4018_v45 = vand.u32 2147483647, %v8503_v30  ;;  %v5618_v6 = vld [vmem:[#allocation3 + $0x60] sm:$0xff] }
 0x6cb   :  { %v4302_v8 = vsel %vm4301_vm3, %v5331_v16, %v4298_v53  ;;  %5344 = vrcp.f32 %v8514_v42  ;;  %v3388_v16 = vperm.slane %v8275_v13, 5  ;;  %v3654_v37 = vadd.f32 %v8341_v33, %v3586_v48 }
 0x6cc   :  { %v4307_v19 = vsel %vm4304_vm2, %v4306_v4, %v4302_v8  ;;  %v4102_v43 = vmul.f32 %v5335_v63, %v4101_v0  ;;  %v5339_v27 = vpop.eup %5338  ;;  %5346 = vpow2.f32 %v5127_v3  ;;  %v4020_v31 = vand.u32 2147483648, %v8503_v30 }
 0x6cd   :  { %v4904_v24 = vadd.f32 %v5617_v62, %v4307_v19  ;;  %v5341_v14 = vpop.eup %5340  ;;  %v4010_v35 = vmul.f32 %v5339_v27, %v8503_v30  ;;  %v5137_v50 = vmul.f32 -1.442695, %v3654_v37  ;;  %vm4014_vm10 = vweird.f32 %v8503_v30 }
 0x6ce   :  { %v4103_v25 = vadd.f32 %v5335_v63, %v4102_v43  ;;  %v8529_v53 = vadd.f32 1.0, %v5341_v14  ;;  %v3542_v0 = vmul.f32 %v3192_v15, %v8329_v26  ;;  %v5343_v57 = vpop.eup %5342  ;;  %v4453_v8 = vand.u32 2147483647, %v8514_v42 }
 0x6cf   :  { %3373 = vperm.xlu2 %5240, %v3362_v49   ;;  %4968 = vst.msk [vmem:[#allocation6 + $0xc8] sm:$0xff] %vm108_vm0, %v4904_v24  ;;  %v4455_v38 = vand.u32 2147483648, %v8514_v42  ;;  %vm4015_vm11 = vweird.f32 %v5339_v27  ;;  %v8536_v19 = vadd.f32 1.0, %v5343_v57  ;;  %vm8539_vm6 = vcmp.eq.f32.partialorder %v4018_v45, 8.507059e+37 }
 0x6d0   :  { %v4107_v54 = vsel %vm4106_vm8, %v5335_v63, %v4103_v25  ;;  %5348 = vrcp.f32 %v8529_v53  ;;  %v4021_v48 = vor.u32 1.1754944e-38, %v4020_v31  ;;  %v3610_v24 = vadd.f32 %v8341_v33, %v3542_v0  ;;  %v3231_v25 = vpop.permute.xlu2 %3230  ;;  %vm4016_vm12 = vmor %vm4014_vm10, %vm4015_vm11 }
 0x6d1   :  { %3367 = vperm.xlu1 %5239, %v3362_v49   ;;  %v4112_v4 = vsel %vm4109_vm9, %v4111_v58, %v4107_v54  ;;  %v4011_v49 = vsub.f32 1.0, %v4010_v35  ;;  %v5345_v63 = vpop.eup %5344  ;;  %5350 = vpow2.f32 %v5137_v50  ;;  %vm4449_vm7 = vweird.f32 %v8514_v42  ;;  %v751_v58 = vpop.f32.mrf.mxu0 }
 0x6d2   :  { %v4891_v3 = vadd.f32 %v5618_v6, %v4112_v4  ;;  %v5347_v43 = vpop.eup %5346  ;;  %v4445_v62 = vmul.f32 %v5345_v63, %v8514_v42  ;;  %v4138_v14 = vand.u32 2147483647, %v8529_v53  ;;  %5352 = vrcp.f32 %v8536_v19 }
 0x6d3   :  { %v4012_v51 = vmul.f32 %v5339_v27, %v4011_v49  ;;  %vm8552_vm13 = vcmp.eq.f32.partialorder %v4453_v8, 8.507059e+37  ;;  %v4140_v54 = vand.u32 2147483648, %v8529_v53  ;;  %v8557_v31 = vadd.f32 1.0, %v5347_v43 }
 0x6d4   :  { %4955 = vst.msk [vmem:[#allocation6 + $0x60] sm:$0xff] %vm108_vm0, %v4891_v3  ;;  %v4446_v35 = vsub.f32 1.0, %v4445_v62  ;;  %v4456_v15 = vor.u32 1.1754944e-38, %v4455_v38  ;;  %v5093_v4 = vmul.f32 -1.442695, %v3610_v24  ;;  %v3548_v49 = vmul.f32 %v3231_v25, %v751_v58  ;;  %v5619_v3 = vld [vmem:[#allocation3 + $0x30] sm:$0xff] }
 0x6d5   :  { %v4013_v37 = vadd.f32 %v5339_v27, %v4012_v51  ;;  %vm4450_vm14 = vweird.f32 %v5345_v63  ;;  %vm4134_vm15 = vweird.f32 %v8529_v53  ;;  %vm8564_vm1 = vcmp.eq.f32.partialorder %v4138_v14, 8.507059e+37 }
 0x6d6   :  { %v5349_v0 = vpop.eup %5348  ;;  %v4447_v57 = vmul.f32 %v5345_v63, %v4446_v35  ;;  %5354 = vrcp.f32 %v8557_v31  ;;  %v4141_v38 = vor.u32 1.1754944e-38, %v4140_v54  ;;  %v4048_v26 = vand.u32 2147483647, %v8536_v19  ;;  %vm4451_vm2 = vmor %vm4449_vm7, %vm4450_vm14  ;;  %v3205_v35 = vpop.permute.xlu1 %3204 }
 0x6d7   :  { %5242 = vset.pattern.permute.xlu2 %v9981_v9  ;;  %v4017_v50 = vsel %vm4016_vm12, %v5339_v27, %v4013_v37  ;;  %v5351_v6 = vpop.eup %5350  ;;  %v4130_v51 = vmul.f32 %v5349_v0, %v8529_v53  ;;  %5356 = vpow2.f32 %v5093_v4  ;;  %v3616_v37 = vadd.f32 %v8341_v33, %v3548_v49  ;;  %v3121_v54 = vpop.permute.xlu0 %3120  ;;  %v5620_v4 = vld [vmem:[#allocation3 + $0x118] sm:$0xff] }
 0x6d8   :  { %v4022_v30 = vsel %vm8539_vm6, %v4021_v48, %v4017_v50  ;;  %v4448_v27 = vadd.f32 %v5345_v63, %v4447_v57  ;;  %v4050_v48 = vand.u32 2147483648, %v8536_v19  ;;  %v5353_v62 = vpop.eup %5352  ;;  %v8574_v25 = vadd.f32 1.0, %v5351_v6 }
 0x6d9   :  { %5241 = vset.pattern.permute.xlu1 %v9976_v34  ;;  %v4885_v8 = vadd.f32 %v5619_v3, %v4022_v30  ;;  %v4131_v24 = vsub.f32 1.0, %v4130_v51  ;;  %vm4135_vm3 = vweird.f32 %v5349_v0  ;;  %v4040_v58 = vmul.f32 %v5353_v62, %v8536_v19 }
 0x6da   :  { %v4452_v14 = vsel %vm4451_vm2, %v5345_v63, %v4448_v27  ;;  %vm4044_vm4 = vweird.f32 %v8536_v19  ;;  %v4603_v42 = vand.u32 2147483647, %v8557_v31  ;;  %5358 = vrcp.f32 %v8574_v25  ;;  %vm4136_vm9 = vmor %vm4134_vm15, %vm4135_vm3 }
 0x6db   :  { %4949 = vst.msk [vmem:[#allocation6 + $0x30] sm:$0xff] %vm108_vm0, %v4885_v8  ;;  %v4457_v50 = vsel %vm8552_vm13, %v4456_v15, %v4452_v14  ;;  %v4132_v30 = vmul.f32 %v5349_v0, %v4131_v24  ;;  %v4041_v49 = vsub.f32 1.0, %v4040_v58  ;;  %vm8585_vm5 = vcmp.eq.f32.partialorder %v4048_v26, 8.507059e+37  ;;  %v3244_v24 = vpop.permute.xlu2 %3243 }
 0x6dc   :  { %v4914_v63 = vadd.f32 %v5620_v4, %v4457_v50  ;;  %v4051_v6 = vor.u32 1.1754944e-38, %v4050_v48  ;;  %v10013_v3 = vperm.slane %v8275_v13, 4  ;;  %v5355_v45 = vpop.eup %5354  ;;  %vm4599_vm8 = vweird.f32 %v8557_v31 }
 0x6dd   :  { %v4133_v15 = vadd.f32 %v5349_v0, %v4132_v30  ;;  %v5099_v8 = vmul.f32 -1.442695, %v3616_v37  ;;  %v3544_v51 = vmul.f32 %v3205_v35, %v8356_v59  ;;  %v4042_v27 = vmul.f32 %v5353_v62, %v4041_v49  ;;  %v5357_v14 = vpop.eup %5356 }
 0x6de   :  { %4978 = vst.msk [vmem:[#allocation6 + $0x118] sm:$0xff] %vm108_vm0, %v4914_v63  ;;  %vm4045_vm10 = vweird.f32 %v5353_v62  ;;  %v4595_v26 = vmul.f32 %v5355_v45, %v8557_v31  ;;  %v4605_v48 = vand.u32 2147483648, %v8557_v31  ;;  %vm8599_vm11 = vcmp.eq.f32.partialorder %v4603_v42, 8.507059e+37  ;;  %v5621_v63 = vld [vmem:[#allocation3 + $0x70] sm:$0xff] }
 0x6df   :  { %3393 = vperm.xlu2 %5242, %v3388_v16   ;;  %v4137_v58 = vsel %vm4136_vm9, %v5349_v0, %v4133_v15  ;;  %5360 = vpow2.f32 %v5099_v8  ;;  %v3612_v59 = vadd.f32 %v8341_v33, %v3544_v51  ;;  %v4043_v37 = vadd.f32 %v5353_v62, %v4042_v27  ;;  %vm4046_vm6 = vmor %vm4044_vm4, %vm4045_vm10 }
 0x6e0   :  { %v4142_v53 = vsel %vm8564_vm1, %v4141_v38, %v4137_v58  ;;  %v4596_v35 = vsub.f32 1.0, %v4595_v26  ;;  %v8606_v30 = vadd.f32 1.0, %v5357_v14  ;;  %v5359_v4 = vpop.eup %5358  ;;  %v3550_v42 = vmul.f32 %v3244_v24, %v8183_v21  ;;  %v5622_v21 = vld [vmem:[#allocation3 + $0x40] sm:$0xff]  ;;  %v3186_v26 = vpop.permute.xlu0 %3185 }
 0x6e1   :  { %3386 = vperm.xlu1 %5241, %v10013_v3   ;;  %v4893_v49 = vadd.f32 %v5621_v63, %v4142_v53  ;;  %v5095_v0 = vmul.f32 -1.442695, %v3612_v59  ;;  %v3531_v3 = vmul.f32 %v3121_v54, %v8248_v17  ;;  %v4047_v15 = vsel %vm4046_vm6, %v5353_v62, %v4043_v37 }
 0x6e2   :  { %v4597_v8 = vmul.f32 %v5355_v45, %v4596_v35  ;;  %vm4600_vm7 = vweird.f32 %v5355_v45  ;;  %v4745_v43 = vmul.f32 %v5359_v4, %v8574_v25  ;;  %v4052_v38 = vsel %vm8585_vm5, %v4051_v6, %v4047_v15  ;;  %v5623_v35 = vld [vmem:[#allocation3 + $0x168] sm:$0xff] }
 0x6e3   :  { %4957 = vst.msk [vmem:[#allocation6 + $0x70] sm:$0xff] %vm108_vm0, %v4893_v49  ;;  %v4606_v51 = vor.u32 1.1754944e-38, %v4605_v48  ;;  %vm4749_vm12 = vweird.f32 %v8574_v25  ;;  %5362 = vrcp.f32 %v8606_v30  ;;  %v10016_v19 = vperm.slane %v8275_v13, 6  ;;  %vm4601_vm13 = vmor %vm4599_vm8, %vm4600_vm7  ;;  %v3264_v15 = vpop.permute.xlu2 %3263 }
 0x6e4   :  { %v4887_v17 = vadd.f32 %v5622_v21, %v4052_v38  ;;  %v4598_v62 = vadd.f32 %v5355_v45, %v4597_v8  ;;  %v4746_v54 = vsub.f32 1.0, %v4745_v43  ;;  %v4753_v27 = vand.u32 2147483647, %v8574_v25 }
 0x6e5   :  { %v5361_v57 = vpop.eup %5360  ;;  %v4755_v6 = vand.u32 2147483648, %v8574_v25  ;;  %5364 = vpow2.f32 %v5095_v0  ;;  %v3618_v48 = vadd.f32 %v8341_v33, %v3550_v42  ;;  %v3599_v24 = vadd.f32 %v8341_v33, %v3531_v3  ;;  %v8641_v42 = vpop.f32.mrf.mxu2 }
 0x6e6   :  { %4951 = vst.msk [vmem:[#allocation6 + $0x40] sm:$0xff] %vm108_vm0, %v4887_v17  ;;  %v4602_v14 = vsel %vm4601_vm13, %v5355_v45, %v4598_v62  ;;  %v4747_v58 = vmul.f32 %v5359_v4, %v4746_v54  ;;  %vm4750_vm14 = vweird.f32 %v5359_v4  ;;  %v8631_v59 = vadd.f32 1.0, %v5361_v57  ;;  %v5624_v62 = vld [vmem:[#allocation3 + $0x1b8] sm:$0xff]  ;;  %v3225_v57 = vpop.permute.xlu1 %3224 }
 0x6e7   :  { %3406 = vperm.xlu2 %5242, %v10016_v19   ;;  %v5101_v53 = vmul.f32 -1.442695, %v3618_v48  ;;  %v5082_v31 = vmul.f32 -1.442695, %v3599_v24  ;;  %v3541_v37 = vmul.f32 %v3186_v26, %v8321_v52  ;;  %vm8636_vm15 = vcmp.eq.f32.partialorder %v4753_v27, 8.507059e+37  ;;  %vm4751_vm1 = vmor %vm4749_vm12, %vm4750_vm14 }
 0x6e8   :  { %v4748_v49 = vadd.f32 %v5359_v4, %v4747_v58  ;;  %5366 = vrcp.f32 %v8631_v59  ;;  %v4756_v50 = vor.u32 1.1754944e-38, %v4755_v6  ;;  %v4093_v3 = vand.u32 2147483647, %v8606_v30 }
 0x6e9   :  { %3399 = vperm.xlu1 %5241, %v3388_v16   ;;  %v4607_v16 = vsel %vm8599_vm11, %v4606_v51, %v4602_v14  ;;  %v5363_v45 = vpop.eup %5362  ;;  %5368 = vpow2.f32 %v5101_v53  ;;  %v3609_v52 = vadd.f32 %v8341_v33, %v3541_v37  ;;  %v4095_v38 = vand.u32 2147483648, %v8606_v30 }
 0x6ea   :  { %v4924_v63 = vadd.f32 %v5623_v35, %v4607_v16  ;;  %v4752_v8 = vsel %vm4751_vm1, %v5359_v4, %v4748_v49  ;;  %v4085_v43 = vmul.f32 %v5363_v45, %v8606_v30  ;;  %5370 = vpow2.f32 %v5082_v31 }
 0x6eb   :  { %v5365_v51 = vpop.eup %5364  ;;  %v4757_v25 = vsel %vm8636_vm15, %v4756_v50, %v4752_v8  ;;  %v5092_v19 = vmul.f32 -1.442695, %v3609_v52  ;;  %v3427_v21 = vperm.slane %v8289_v1, 0  ;;  %v3453_v17 = vperm.slane %v8289_v1, 2 }
 0x6ec   :  { %4988 = vst.msk [vmem:[#allocation6 + $0x168] sm:$0xff] %vm108_vm0, %v4924_v63  ;;  %v4934_v54 = vadd.f32 %v5624_v62, %v4757_v25  ;;  %v4086_v27 = vsub.f32 1.0, %v4085_v43  ;;  %v8655_v4 = vadd.f32 1.0, %v5365_v51  ;;  %v3553_v26 = vmul.f32 %v3264_v15, %v8210_v20  ;;  %v3251_v20 = vpop.permute.xlu0 %3250  ;;  %v8690_v25 = vld [vmem:[%s9453_s6] ss:$0 sm:$0xff] }
 0x6ed   :  { %vm4089_vm2 = vweird.f32 %v8606_v30  ;;  %vm8660_vm3 = vcmp.eq.f32.partialorder %v4093_v3, 8.507059e+37  ;;  %5372 = vpow2.f32 %v5092_v19  ;;  %v3479_v48 = vperm.slane %v8289_v1, 4  ;;  %v5626_v19 = vld [vmem:[#allocation3 + $0x58] sm:$0xff] }
 0x6ee   :  { %v5367_v24 = vpop.eup %5366  ;;  %4998 = vst.msk [vmem:[#allocation6 + $0x1b8] sm:$0xff] %vm108_vm0, %v4934_v54  ;;  %v4087_v14 = vmul.f32 %v5363_v45, %v4086_v27  ;;  %vm4090_vm4 = vweird.f32 %v5363_v45  ;;  %v4096_v58 = vor.u32 1.1754944e-38, %v4095_v38  ;;  %5374 = vrcp.f32 %v8655_v4  ;;  %v8682_v38 = vpop.f32.mrf.mxu2 }
 0x6ef   :  { %5244 = vset.pattern.permute.xlu2 %v9976_v34  ;;  %v5369_v16 = vpop.eup %5368  ;;  %v4175_v53 = vmul.f32 %v5367_v24, %v8631_v59  ;;  %vm4179_vm5 = vweird.f32 %v8631_v59  ;;  %v3621_v31 = vadd.f32 %v8341_v33, %v3553_v26  ;;  %v3547_v37 = vmul.f32 %v3225_v57, %v8516_v7  ;;  %vm4091_vm8 = vmor %vm4089_vm2, %vm4090_vm4 }
 0x6f0   :  { %v5371_v35 = vpop.eup %5370  ;;  %v4088_v63 = vadd.f32 %v5363_v45, %v4087_v14  ;;  %v4183_v49 = vand.u32 2147483647, %v8631_v59  ;;  %v4185_v0 = vand.u32 2147483648, %v8631_v59  ;;  %v8673_v50 = vadd.f32 1.0, %v5369_v16 }
 0x6f1   :  { %5243 = vset.pattern.permute.xlu1 %v9981_v9  ;;  %v4176_v3 = vsub.f32 1.0, %v4175_v53  ;;  %v4123_v52 = vand.u32 2147483647, %v8655_v4  ;;  %v8678_v15 = vadd.f32 1.0, %v5371_v35  ;;  %v3551_v33 = vmul.f32 %v3251_v20, %v8195_v2 }
 0x6f2   :  { %v4092_v8 = vsel %vm4091_vm8, %v5363_v45, %v4088_v63  ;;  %vm4180_vm9 = vweird.f32 %v5367_v24  ;;  %5376 = vrcp.f32 %v8673_v50  ;;  %v5104_v7 = vmul.f32 -1.442695, %v3621_v31 }
 0x6f3   :  { %v5373_v43 = vpop.eup %5372  ;;  %v4097_v51 = vsel %vm8660_vm3, %v4096_v58, %v4092_v8  ;;  %v4177_v30 = vmul.f32 %v5367_v24, %v4176_v3  ;;  %5378 = vrcp.f32 %v8678_v15  ;;  %v3615_v2 = vadd.f32 %v8690_v25, %v3547_v37  ;;  %vm4181_vm6 = vmor %vm4179_vm5, %vm4180_vm9 }
 0x6f4   :  { %v5375_v45 = vpop.eup %5374  ;;  %v4890_v62 = vadd.f32 %v5626_v19, %v4097_v51  ;;  %vm8695_vm10 = vcmp.eq.f32.partialorder %v4183_v49, 8.507059e+37  ;;  %v4186_v27 = vor.u32 1.1754944e-38, %v4185_v0  ;;  %v4125_v26 = vand.u32 2147483648, %v8655_v4  ;;  %v5627_v49 = vld [vmem:[#allocation3 + $0x88] sm:$0xff]  ;;  %v8728_v8 = vpop.permute.xlu0 %3315 }
 0x6f5   :  { %v4178_v57 = vadd.f32 %v5367_v24, %v4177_v30  ;;  %v4115_v6 = vmul.f32 %v5375_v45, %v8655_v4  ;;  %vm4119_vm11 = vweird.f32 %v8655_v4  ;;  %v4213_v14 = vand.u32 2147483647, %v8673_v50 }
 0x6f6   :  { %4954 = vst.msk [vmem:[#allocation6 + $0x58] sm:$0xff] %vm108_vm0, %v4890_v62  ;;  %vm8709_vm7 = vcmp.eq.f32.partialorder %v4123_v52, 8.507059e+37  ;;  %v4215_v13 = vand.u32 2147483648, %v8673_v50  ;;  %5380 = vpow2.f32 %v5104_v7  ;;  %v5098_v53 = vmul.f32 -1.442695, %v3615_v2 }
 0x6f7   :  { %3425 = vperm.xlu2 %5244, %v3414_v61   ;;  %v4182_v20 = vsel %vm4181_vm6, %v5367_v24, %v4178_v57  ;;  %v4116_v16 = vsub.f32 1.0, %v4115_v6  ;;  %v3619_v31 = vadd.f32 %v8690_v25, %v3551_v33  ;;  %v4126_v59 = vor.u32 1.1754944e-38, %v4125_v26  ;;  %v3277_v33 = vpop.permute.xlu2 %3276  ;;  %v8744_v57 = vpop.f32.mrf.mxu2 }
 0x6f8   :  { %v5377_v37 = vpop.eup %5376  ;;  %v4187_v35 = vsel %vm8695_vm10, %v4186_v27, %v4182_v20  ;;  %vm4209_vm12 = vweird.f32 %v8673_v50  ;;  %vm4120_vm13 = vweird.f32 %v5375_v45  ;;  %vm8724_vm14 = vcmp.eq.f32.partialorder %v4213_v14, 8.507059e+37 }
 0x6f9   :  { %3419 = vperm.xlu1 %5243, %v3414_v61   ;;  %v8714_v61 = vadd.f32 1.0, %v5373_v43  ;;  %v8721_v63 = vpop.eup %5378  ;;  %v4896_v0 = vadd.f32 %v5627_v49, %v4187_v35  ;;  %v4117_v3 = vmul.f32 %v5375_v45, %v4116_v16  ;;  %v4205_v24 = vmul.f32 %v5377_v37, %v8673_v50  ;;  %vm4121_vm1 = vmor %vm4119_vm11, %vm4120_vm13  ;;  %v3238_v49 = vpop.permute.xlu1 %3237 }
 0x6fa   :  { %v4216_v7 = vor.u32 1.1754944e-38, %v4215_v13  ;;  %v3920_v43 = vmul.f32 %v8721_v63, %v8678_v15  ;;  %vm3924_vm15 = vweird.f32 %v8678_v15  ;;  %v3928_v51 = vand.u32 2147483647, %v8678_v15 }
 0x6fb   :  { %5382 = vrcp.f32 %v8714_v61  ;;  %4960 = vst.msk [vmem:[#allocation6 + $0x88] sm:$0xff] %vm108_vm0, %v4896_v0  ;;  %v4118_v30 = vadd.f32 %v5375_v45, %v4117_v3  ;;  %v4206_v2 = vsub.f32 1.0, %v4205_v24  ;;  %v5102_v19 = vmul.f32 -1.442695, %v3619_v31 }
 0x6fc   :  { %5384 = vpow2.f32 %v5098_v53  ;;  %v5381_v62 = vpop.eup %5380  ;;  %vm4210_vm2 = vweird.f32 %v5377_v37  ;;  %v3921_v54 = vsub.f32 1.0, %v3920_v43  ;;  %v3930_v27 = vand.u32 2147483648, %v8678_v15  ;;  %v5628_v53 = vld [vmem:[#allocation3 + $0x68] sm:$0xff] }
 0x6fd   :  { %v3555_v26 = vmul.f32 %v3277_v33, %v8218_v47  ;;  %v4122_v6 = vsel %vm4121_vm1, %v5375_v45, %v4118_v30  ;;  %v4207_v14 = vmul.f32 %v5377_v37, %v4206_v2  ;;  %v8746_v13 = vadd.f32 1.0, %v5381_v62  ;;  %vm4211_vm5 = vmor %vm4209_vm12, %vm4210_vm2 }
 0x6fe   :  { %5386 = vpow2.f32 %v5102_v19  ;;  %v4127_v4 = vsel %vm8709_vm7, %v4126_v59, %v4122_v6  ;;  %v3922_v16 = vmul.f32 %v8721_v63, %v3921_v54  ;;  %vm3925_vm3 = vweird.f32 %v8721_v63  ;;  %v5630_v6 = vld [vmem:[#allocation3] sm:$0xff] }
 0x6ff   :  { %3438 = vperm.xlu2 %5244, %v3427_v21   ;;  %v3623_v47 = vadd.f32 %v8690_v25, %v3555_v26  ;;  %v4892_v31 = vadd.f32 %v5628_v53, %v4127_v4  ;;  %vm8753_vm4 = vcmp.eq.f32.partialorder %v3928_v51, 8.507059e+37  ;;  %v3931_v59 = vor.u32 1.1754944e-38, %v3930_v27  ;;  %vm3926_vm8 = vmor %vm3924_vm15, %vm3925_vm3  ;;  %v3381_v26 = vpop.permute.xlu0 %3380 }
 0x700   :  { %v3923_v58 = vadd.f32 %v8721_v63, %v3922_v16  ;;  %v4078_v0 = vand.u32 2147483647, %v8714_v61  ;;  %5388 = vrcp.f32 %v8746_v13  ;;  %v4080_v50 = vand.u32 2147483648, %v8714_v61 }
 0x701   :  { %3432 = vperm.xlu1 %5243, %v3427_v21   ;;  %v5383_v20 = vpop.eup %5382  ;;  %v4208_v21 = vadd.f32 %v5377_v37, %v4207_v14  ;;  %4956 = vst.msk [vmem:[#allocation6 + $0x68] sm:$0xff] %vm108_vm0, %v4892_v31  ;;  %v5106_v43 = vmul.f32 -1.442695, %v3623_v47  ;;  %v3549_v19 = vmul.f32 %v3238_v49, %v8178_v55  ;;  %v3492_v55 = vperm.slane %v8289_v1, 5  ;;  %v3296_v49 = vpop.permute.xlu2 %3295 }
 0x702   :  { %v4070_v45 = vmul.f32 %v5383_v20, %v8714_v61  ;;  %v5385_v3 = vpop.eup %5384  ;;  %v3927_v30 = vsel %vm3926_vm8, %v8721_v63, %v3923_v58  ;;  %vm4075_vm9 = vweird.f32 %v5383_v20  ;;  %vm4074_vm10 = vweird.f32 %v8714_v61 }
 0x703   :  { %v4212_v24 = vsel %vm4211_vm5, %v5377_v37, %v4208_v21  ;;  %v8773_v2 = vadd.f32 1.0, %v5385_v3  ;;  %v5629_v37 = vld [vmem:[#allocation3 + $0x98] sm:$0xff]  ;;  %v3932_v15 = vsel %vm8753_vm4, %v3931_v59, %v3927_v30  ;;  %vm4076_vm11 = vmor %vm4074_vm10, %vm4075_vm9  ;;  %v4081_v16 = vor.u32 1.1754944e-38, %v4080_v50  ;;  %v8793_v21 = vpop.f32.mrf.mxu2 }
 0x704   :  { %v4071_v33 = vsub.f32 1.0, %v4070_v45  ;;  %v4217_v51 = vsel %vm8724_vm14, %v4216_v7, %v4212_v24  ;;  %v5387_v62 = vpop.eup %5386  ;;  %v4879_v52 = vadd.f32 %v5630_v6, %v3932_v15  ;;  %v4258_v7 = vand.u32 2147483647, %v8746_v13 }
 0x705   :  { %v4898_v54 = vadd.f32 %v5629_v37, %v4217_v51  ;;  %5390 = vrcp.f32 %v8773_v2  ;;  %v8785_v14 = vadd.f32 1.0, %v5387_v62  ;;  %v3617_v47 = vadd.f32 %v8690_v25, %v3549_v19  ;;  %v3257_v37 = vpop.permute.xlu1 %3256 }
 0x706   :  { %v4072_v27 = vmul.f32 %v5383_v20, %v4071_v33  ;;  %5392 = vpow2.f32 %v5106_v43  ;;  %v5389_v4 = vpop.eup %5388  ;;  %4943 = vst.msk [vmem:[#allocation6] sm:$0xff] %vm108_vm0, %v4879_v52  ;;  %v3561_v53 = vmul.f32 %v8728_v8, %v8242_v36  ;;  %v3571_v31 = vmul.f32 %v3381_v26, %v8373_v12  ;;  %v5631_v36 = vld [vmem:[#allocation3 + $0x50] sm:$0xff] }
 0x707   :  { %5246 = vset.pattern.permute.xlu2 %v9981_v9  ;;  %4962 = vst.msk [vmem:[#allocation6 + $0x98] sm:$0xff] %vm108_vm0, %v4898_v54  ;;  %vm4079_vm6 = vcmp.eq.f32.partialorder %v4078_v0, 8.507059e+37  ;;  %v4250_v61 = vmul.f32 %v5389_v4, %v8746_v13  ;;  %v4260_v45 = vand.u32 2147483648, %v8746_v13  ;;  %vm4254_vm7 = vweird.f32 %v8746_v13 }
 0x708   :  { %v4073_v63 = vadd.f32 %v5383_v20, %v4072_v27  ;;  %vm8798_vm12 = vcmp.eq.f32.partialorder %v4258_v7, 8.507059e+37  ;;  %5394 = vrcp.f32 %v8785_v14  ;;  %v5100_v0 = vmul.f32 -1.442695, %v3617_v47 }
 0x709   :  { %5245 = vset.pattern.permute.xlu1 %v9976_v34  ;;  %v4251_v8 = vsub.f32 1.0, %v4250_v61  ;;  %v4170_v24 = vand.u32 2147483648, %v8773_v2  ;;  %v3629_v33 = vadd.f32 %v8690_v25, %v3561_v53  ;;  %v3639_v50 = vadd.f32 %v8690_v25, %v3571_v31  ;;  %v3446_v61 = vpop.permute.xlu0 %3445 }
 0x70a   :  { %v4077_v35 = vsel %vm4076_vm11, %v5383_v20, %v4073_v63  ;;  %v4168_v20 = vand.u32 2147483647, %v8773_v2  ;;  %v3558_v43 = vmul.f32 %v3296_v49, %v8230_v32  ;;  %vm4255_vm13 = vweird.f32 %v5389_v4 }
 0x70b   :  { %v4082_v58 = vsel %vm4079_vm6, %v4081_v16, %v4077_v35  ;;  %v5391_v3 = vpop.eup %5390  ;;  %v4252_v30 = vmul.f32 %v5389_v4, %v4251_v8  ;;  %v4261_v19 = vor.u32 1.1754944e-38, %v4260_v45  ;;  %vm4164_vm14 = vweird.f32 %v8773_v2  ;;  %vm4256_vm1 = vmor %vm4254_vm7, %vm4255_vm13 }
 0x70c   :  { %v4889_v12 = vadd.f32 %v5631_v36, %v4082_v58  ;;  %v5393_v51 = vpop.eup %5392  ;;  %v4160_v62 = vmul.f32 %v5391_v3, %v8773_v2  ;;  %5396 = vpow2.f32 %v5100_v0  ;;  %v5112_v15 = vmul.f32 -1.442695, %v3629_v33  ;;  %v834_v58 = vpop.f32.mrf.mxu2  ;;  %v5632_v36 = vld [vmem:[#allocation3 + $0xb0] sm:$0xff] }
 0x70d   :  { %v8813_v54 = vadd.f32 1.0, %v5393_v51  ;;  %v10031_v32 = vperm.slane %v8289_v1, 1  ;;  %v4253_v27 = vadd.f32 %v5389_v4, %v4252_v30  ;;  %vm8817_vm15 = vcmp.eq.f32.partialorder %v4168_v20, 8.507059e+37 }
 0x70e   :  { %4953 = vst.msk [vmem:[#allocation6 + $0x50] sm:$0xff] %vm108_vm0, %v4889_v12  ;;  %v4161_v26 = vsub.f32 1.0, %v4160_v62  ;;  %v5122_v52 = vmul.f32 -1.442695, %v3639_v50  ;;  %v5395_v7 = vpop.eup %5394  ;;  %v4171_v63 = vor.u32 1.1754944e-38, %v4170_v24  ;;  %v3626_v16 = vadd.f32 %v8690_v25, %v3558_v43 }
 0x70f   :  { %3458 = vperm.xlu2 %5246, %v3453_v17   ;;  %5398 = vrcp.f32 %v8813_v54  ;;  %v3552_v47 = vmul.f32 %v3257_v37, %v8203_v23  ;;  %v4257_v53 = vsel %vm4256_vm1, %v5389_v4, %v4253_v27  ;;  %vm4165_vm2 = vweird.f32 %v5391_v3 }
 0x710   :  { %v4162_v31 = vmul.f32 %v5391_v3, %v4161_v26  ;;  %v4220_v35 = vmul.f32 %v5395_v7, %v8785_v14  ;;  %v4262_v45 = vsel %vm8798_vm12, %v4261_v19, %v4257_v53  ;;  %v4228_v49 = vand.u32 2147483647, %v8785_v14  ;;  %vm4166_vm3 = vmor %vm4164_vm14, %vm4165_vm2 }
 0x711   :  { %3451 = vperm.xlu1 %5245, %v10031_v32   ;;  %v4230_v13 = vand.u32 2147483648, %v8785_v14  ;;  %5400 = vpow2.f32 %v5112_v15  ;;  %v4901_v12 = vadd.f32 %v5632_v36, %v4262_v45  ;;  %vm4224_vm4 = vweird.f32 %v8785_v14 }
 0x712   :  { %v4163_v8 = vadd.f32 %v5391_v3, %v4162_v31  ;;  %v4221_v20 = vsub.f32 1.0, %v4220_v35  ;;  %5402 = vpow2.f32 %v5122_v52  ;;  %v5397_v23 = vpop.eup %5396  ;;  %v5109_v4 = vmul.f32 -1.442695, %v3626_v16  ;;  %v3309_v35 = vpop.permute.xlu2 %3308 }
 0x713   :  { %v3620_v59 = vadd.f32 %v8690_v25, %v3552_v47  ;;  %v3581_v0 = vmul.f32 %v3446_v61, %v834_v58  ;;  %4965 = vst.msk [vmem:[#allocation6 + $0xb0] sm:$0xff] %vm108_vm0, %v4901_v12  ;;  %vm4225_vm5 = vweird.f32 %v5395_v7  ;;  %v8837_v50 = vadd.f32 1.0, %v5397_v23  ;;  %v5634_v61 = vld [vmem:[#allocation3 + $0xa0] sm:$0xff] }
 0x714   :  { %v4167_v24 = vsel %vm4166_vm3, %v5391_v3, %v4163_v8  ;;  %v4222_v33 = vmul.f32 %v5395_v7, %v4221_v20  ;;  %v10034_v43 = vperm.slane %v8289_v1, 3  ;;  %vm8843_vm8 = vcmp.eq.f32.partialorder %v4228_v49, 8.507059e+37  ;;  %v5633_v3 = vld [vmem:[#allocation3 + $0x80] sm:$0xff]  ;;  %vm4226_vm9 = vmor %vm4224_vm4, %vm4225_vm5 }
 0x715   :  { %v5399_v51 = vpop.eup %5398  ;;  %v4172_v2 = vsel %vm8817_vm15, %v4171_v63, %v4167_v24  ;;  %5404 = vpow2.f32 %v5109_v4  ;;  %v5103_v19 = vmul.f32 -1.442695, %v3620_v59  ;;  %v4231_v15 = vor.u32 1.1754944e-38, %v4230_v13 }
 0x716   :  { %v4895_v62 = vadd.f32 %v5633_v3, %v4172_v2  ;;  %v4223_v37 = vadd.f32 %v5395_v7, %v4222_v33  ;;  %v4280_v32 = vmul.f32 %v5399_v51, %v8813_v54  ;;  %v4288_v26 = vand.u32 2147483647, %v8813_v54 }
 0x717   :  { %3471 = vperm.xlu2 %5246, %v10034_v43   ;;  %v5401_v27 = vpop.eup %5400  ;;  %v4290_v6 = vand.u32 2147483648, %v8813_v54  ;;  %5406 = vrcp.f32 %v8837_v50  ;;  %v3649_v52 = vadd.f32 %v8690_v25, %v3581_v0  ;;  %vm4285_vm10 = vweird.f32 %v5399_v51 }
 0x718   :  { %4959 = vst.msk [vmem:[#allocation6 + $0x80] sm:$0xff] %vm108_vm0, %v4895_v62  ;;  %v4227_v63 = vsel %vm4226_vm9, %v5395_v7, %v4223_v37  ;;  %v4281_v16 = vsub.f32 1.0, %v4280_v32  ;;  %v8858_v47 = vadd.f32 1.0, %v5401_v27  ;;  %5408 = vpow2.f32 %v5103_v19  ;;  %v3270_v7 = vpop.permute.xlu1 %3269 }
 0x719   :  { %3464 = vperm.xlu1 %5245, %v3453_v17   ;;  %v5403_v17 = vpop.eup %5402  ;;  %v4232_v14 = vsel %vm8843_vm8, %v4231_v15, %v4227_v63  ;;  %v4198_v53 = vand.u32 2147483647, %v8837_v50  ;;  %v4200_v13 = vand.u32 2147483648, %v8837_v50  ;;  %vm4284_vm11 = vweird.f32 %v8813_v54 }
 0x71a   :  { %v8863_v31 = vadd.f32 1.0, %v5403_v17  ;;  %v4899_v45 = vadd.f32 %v5634_v61, %v4232_v14  ;;  %v4282_v49 = vmul.f32 %v5399_v51, %v4281_v16  ;;  %5410 = vrcp.f32 %v8858_v47  ;;  %vm4286_vm7 = vmor %vm4284_vm11, %vm4285_vm10 }
 0x71b   :  { %v5405_v58 = vpop.eup %5404  ;;  %vm8868_vm6 = vcmp.eq.f32.partialorder %v4288_v26, 8.507059e+37  ;;  %v4291_v12 = vor.u32 1.1754944e-38, %v4290_v6  ;;  %v4380_v20 = vand.u32 2147483648, %v8858_v47  ;;  %v3560_v4 = vmul.f32 %v3309_v35, %v8238_v22 }
 0x71c   :  { %5412 = vrcp.f32 %v8863_v31  ;;  %4963 = vst.msk [vmem:[#allocation6 + $0xa0] sm:$0xff] %vm108_vm0, %v4899_v45  ;;  %v4283_v8 = vadd.f32 %v5399_v51, %v4282_v49  ;;  %v8875_v23 = vadd.f32 1.0, %v5405_v58  ;;  %vm4194_vm12 = vweird.f32 %v8837_v50 }
 0x71d   :  { %v5407_v59 = vpop.eup %5406  ;;  %v4378_v54 = vand.u32 2147483647, %v8858_v47  ;;  %v5132_v0 = vmul.f32 -1.442695, %v3649_v52  ;;  %v3554_v24 = vmul.f32 %v3270_v7, %v8214_v18  ;;  %vm8885_vm13 = vcmp.eq.f32.partialorder %v4198_v53, 8.507059e+37  ;;  %v3511_v53 = vpop.permute.xlu0 %3510 }
 0x71e   :  { %v5409_v33 = vpop.eup %5408  ;;  %v4287_v43 = vsel %vm4286_vm7, %v5399_v51, %v4283_v8  ;;  %v4190_v2 = vmul.f32 %v5407_v59, %v8837_v50  ;;  %v4201_v30 = vor.u32 1.1754944e-38, %v4200_v13  ;;  %v4528_v19 = vand.u32 2147483647, %v8863_v31  ;;  %v5635_v51 = vld [vmem:[#allocation3 + $0xc0] sm:$0xff] }
 0x71f   :  { %5249 = vset.pattern.permute.xlu2 %v9976_v34  ;;  %v4292_v3 = vsel %vm8868_vm6, %v4291_v12, %v4287_v43  ;;  %vm4374_vm14 = vweird.f32 %v8858_v47  ;;  %v4530_v18 = vand.u32 2147483648, %v8863_v31  ;;  %5414 = vrcp.f32 %v8875_v23  ;;  %v3329_v43 = vpop.permute.xlu2 %3328 }
 0x720   :  { %v5411_v62 = vpop.eup %5410  ;;  %v4903_v37 = vadd.f32 %v5635_v51, %v4292_v3  ;;  %v4191_v15 = vsub.f32 1.0, %v4190_v2  ;;  %v4381_v32 = vor.u32 1.1754944e-38, %v4380_v20  ;;  %vm4524_vm15 = vweird.f32 %v8863_v31  ;;  %v3290_v58 = vpop.permute.xlu1 %3289 }
 0x721   :  { %5248 = vset.pattern.permute.xlu1 %v9981_v9  ;;  %v4370_v26 = vmul.f32 %v5411_v62, %v8858_v47  ;;  %vm8897_vm1 = vcmp.eq.f32.partialorder %v4378_v54, 8.507059e+37  ;;  %v8901_v52 = vadd.f32 1.0, %v5409_v33  ;;  %5416 = vpow2.f32 %v5132_v0 }
 0x722   :  { %v5413_v27 = vpop.eup %5412  ;;  %v3628_v17 = vadd.f32 %v8690_v25, %v3560_v4  ;;  %4967 = vst.msk [vmem:[#allocation6 + $0xc0] sm:$0xff] %vm108_vm0, %v4903_v37  ;;  %v4192_v63 = vmul.f32 %v5407_v59, %v4191_v15  ;;  %vm4195_vm2 = vweird.f32 %v5407_v59  ;;  %vm8906_vm3 = vcmp.eq.f32.partialorder %v4528_v19, 8.507059e+37 }
 0x723   :  { %v4520_v16 = vmul.f32 %v5413_v27, %v8863_v31  ;;  %v4371_v35 = vsub.f32 1.0, %v4370_v26  ;;  %v4531_v61 = vor.u32 1.1754944e-38, %v4530_v18  ;;  %v4333_v45 = vand.u32 2147483647, %v8875_v23  ;;  %vm4196_vm8 = vmor %vm4194_vm12, %vm4195_vm2 }
 0x724   :  { %5418 = vrcp.f32 %v8901_v52  ;;  %v4193_v49 = vadd.f32 %v5407_v59, %v4192_v63  ;;  %vm4375_vm4 = vweird.f32 %v5411_v62  ;;  %vm4329_vm5 = vweird.f32 %v8875_v23  ;;  %v5637_v63 = vld [vmem:[#allocation3 + $0xf0] sm:$0xff] }
 0x725   :  { %v4521_v13 = vsub.f32 1.0, %v4520_v16  ;;  %v4335_v7 = vand.u32 2147483648, %v8875_v23  ;;  %v5415_v36 = vpop.eup %5414  ;;  %v4372_v12 = vmul.f32 %v5411_v62, %v4371_v35  ;;  %v5111_v8 = vmul.f32 -1.442695, %v3628_v17  ;;  %vm4376_vm6 = vmor %vm4374_vm14, %vm4375_vm4 }
 0x726   :  { %v3622_v20 = vadd.f32 %v8690_v25, %v3554_v24  ;;  %v3591_v4 = vmul.f32 %v3511_v53, %v8232_v10  ;;  %v4197_v54 = vsel %vm4196_vm8, %v5407_v59, %v4193_v49  ;;  %vm4525_vm9 = vweird.f32 %v5413_v27  ;;  %v5636_v10 = vld [vmem:[#allocation3 + $0x90] sm:$0xff]  ;;  %v5638_v53 = vld [vmem:[#allocation3 + $0x140] sm:$0xff] }
 0x727   :  { %3490 = vperm.xlu2 %5249, %v3479_v48   ;;  %v4522_v0 = vmul.f32 %v5413_v27, %v4521_v13  ;;  %v4325_v33 = vmul.f32 %v5415_v36, %v8875_v23  ;;  %v5417_v2 = vpop.eup %5416  ;;  %v4202_v50 = vsel %vm8885_vm13, %v4201_v30, %v4197_v54  ;;  %v4373_v19 = vadd.f32 %v5411_v62, %v4372_v12  ;;  %vm4526_vm7 = vmor %vm4524_vm15, %vm4525_vm9 }
 0x728   :  { %vm4330_vm10 = vweird.f32 %v5415_v36  ;;  %vm8926_vm11 = vcmp.eq.f32.partialorder %v4333_v45, 8.507059e+37  ;;  %v4897_v24 = vadd.f32 %v5636_v10, %v4202_v50  ;;  %v8933_v18 = vadd.f32 1.0, %v5417_v2  ;;  %v3303_v12 = vpop.permute.xlu1 %3302 }
 0x729   :  { %3484 = vperm.xlu1 %5248, %v3479_v48   ;;  %v4523_v48 = vadd.f32 %v5413_v27, %v4522_v0  ;;  %v4326_v59 = vsub.f32 1.0, %v4325_v33  ;;  %v4377_v37 = vsel %vm4376_vm6, %v5411_v62, %v4373_v19  ;;  %5420 = vpow2.f32 %v5111_v8  ;;  %vm4331_vm12 = vmor %vm4329_vm5, %vm4330_vm10  ;;  %v3342_v0 = vpop.permute.xlu2 %3341 }
 0x72a   :  { %v5419_v51 = vpop.eup %5418  ;;  %v5105_v22 = vmul.f32 -1.442695, %v3622_v20  ;;  %v3659_v30 = vadd.f32 %v8690_v25, %v3591_v4  ;;  %4961 = vst.msk [vmem:[#allocation6 + $0x90] sm:$0xff] %vm108_vm0, %v4897_v24  ;;  %v4382_v47 = vsel %vm8897_vm1, %v4381_v32, %v4377_v37  ;;  %v4336_v31 = vor.u32 1.1754944e-38, %v4335_v7  ;;  %v5639_v20 = vld [vmem:[#allocation3 + $0xd8] sm:$0xff]  ;;  %v5640_v24 = vld [vmem:[#allocation3 + $0xa8] sm:$0xff] }
 0x72b   :  { %v4527_v15 = vsel %vm4526_vm7, %v5413_v27, %v4523_v48  ;;  %v4327_v26 = vmul.f32 %v5415_v36, %v4326_v59  ;;  %v4235_v17 = vmul.f32 %v5419_v51, %v8901_v52  ;;  %v4909_v16 = vadd.f32 %v5637_v63, %v4382_v47 }
 0x72c   :  { %v4532_v62 = vsel %vm8906_vm3, %v4531_v61, %v4527_v15  ;;  %5422 = vrcp.f32 %v8933_v18  ;;  %v4243_v13 = vand.u32 2147483647, %v8901_v52  ;;  %vm4240_vm13 = vweird.f32 %v5419_v51 }
 0x72d   :  { %v4919_v35 = vadd.f32 %v5638_v53, %v4532_v62  ;;  %v4328_v45 = vadd.f32 %v5415_v36, %v4327_v26  ;;  %v4236_v49 = vsub.f32 1.0, %v4235_v17  ;;  %4973 = vst.msk [vmem:[#allocation6 + $0xf0] sm:$0xff] %vm108_vm0, %v4909_v16  ;;  %v4245_v32 = vand.u32 2147483648, %v8901_v52 }
 0x72e   :  { %5424 = vpow2.f32 %v5105_v22  ;;  %v5142_v27 = vmul.f32 -1.442695, %v3659_v30  ;;  %v3557_v61 = vmul.f32 %v3290_v58, %v8226_v44  ;;  %v3563_v7 = vmul.f32 %v3329_v43, %v8291_v60 }
 0x72f   :  { %3503 = vperm.xlu2 %5249, %v3492_v55   ;;  %4983 = vst.msk [vmem:[#allocation6 + $0x140] sm:$0xff] %vm108_vm0, %v4919_v35  ;;  %v4332_v6 = vsel %vm4331_vm12, %v5415_v36, %v4328_v45  ;;  %v4237_v14 = vmul.f32 %v5419_v51, %v4236_v49  ;;  %v5421_v8 = vpop.eup %5420  ;;  %vm4239_vm14 = vweird.f32 %v8901_v52  ;;  %v4246_v44 = vor.u32 1.1754944e-38, %v4245_v32 }
 0x730   :  { %v4337_v23 = vsel %vm8926_vm11, %v4336_v31, %v4332_v6  ;;  %5426 = vpow2.f32 %v5142_v27  ;;  %v3625_v36 = vadd.f32 %v8690_v25, %v3557_v61  ;;  %vm4241_vm15 = vmor %vm4239_vm14, %vm4240_vm13  ;;  %v3631_v60 = vadd.f32 %v8690_v25, %v3563_v7  ;;  %v3322_v26 = vpop.permute.xlu1 %3321  ;;  %v5641_v7 = vld [vmem:[#allocation3 + $0x190] sm:$0xff] }
 0x731   :  { %3497 = vperm.xlu1 %5248, %v3492_v55   ;;  %v4906_v4 = vadd.f32 %v5639_v20, %v4337_v23  ;;  %v4238_v54 = vadd.f32 %v5419_v51, %v4237_v14  ;;  %v8962_v55 = vadd.f32 1.0, %v5421_v8  ;;  %v3559_v58 = vmul.f32 %v3303_v12, %v8234_v40  ;;  %v3361_v53 = vpop.permute.xlu2 %3360 }
 0x732   :  { %v5423_v33 = vpop.eup %5422  ;;  %vm4244_vm1 = vcmp.eq.f32.partialorder %v4243_v13, 8.507059e+37  ;;  %v4678_v19 = vand.u32 2147483647, %v8933_v18  ;;  %v3565_v3 = vmul.f32 %v3342_v0, %v8311_v29  ;;  %v3518_v10 = vperm.slane %v8289_v1, 7 }
 0x733   :  { %4970 = vst.msk [vmem:[#allocation6 + $0xd8] sm:$0xff] %vm108_vm0, %v4906_v4  ;;  %v4242_v52 = vsel %vm4241_vm15, %v5419_v51, %v4238_v54  ;;  %v4670_v43 = vmul.f32 %v5423_v33, %v8933_v18  ;;  %5428 = vrcp.f32 %v8962_v55  ;;  %v5108_v37 = vmul.f32 -1.442695, %v3625_v36 }
 0x734   :  { %v5425_v2 = vpop.eup %5424  ;;  %v4247_v50 = vsel %vm4244_vm1, %v4246_v44, %v4242_v52  ;;  %vm4674_vm2 = vweird.f32 %v8933_v18  ;;  %v4680_v22 = vand.u32 2147483648, %v8933_v18  ;;  %v5114_v30 = vmul.f32 -1.442695, %v3631_v60 }
 0x735   :  { %v4900_v48 = vadd.f32 %v5640_v24, %v4247_v50  ;;  %v4671_v59 = vsub.f32 1.0, %v4670_v43  ;;  %v8974_v40 = vadd.f32 1.0, %v5425_v2  ;;  %v3627_v47 = vadd.f32 %v8690_v25, %v3559_v58 }
 0x736   :  { %v5427_v51 = vpop.eup %5426  ;;  %vm4675_vm3 = vweird.f32 %v5423_v33  ;;  %v4363_v15 = vand.u32 2147483647, %v8962_v55  ;;  %vm8984_vm4 = vcmp.eq.f32.partialorder %v4678_v19, 8.507059e+37  ;;  %v3633_v31 = vadd.f32 %v8690_v25, %v3565_v3 }
 0x737   :  { %5251 = vset.pattern.permute.xlu2 %v9981_v9  ;;  %4964 = vst.msk [vmem:[#allocation6 + $0xa8] sm:$0xff] %vm108_vm0, %v4900_v48  ;;  %v4672_v29 = vmul.f32 %v5423_v33, %v4671_v59  ;;  %5430 = vrcp.f32 %v8974_v40  ;;  %v8988_v17 = vadd.f32 1.0, %v5427_v51  ;;  %v5110_v63 = vmul.f32 -1.442695, %v3627_v47  ;;  %vm4676_vm5 = vmor %vm4674_vm2, %vm4675_vm3 }
 0x738   :  { %5432 = vpow2.f32 %v5108_v37  ;;  %v4681_v35 = vor.u32 1.1754944e-38, %v4680_v22  ;;  %vm4359_vm8 = vweird.f32 %v8962_v55  ;;  %vm8997_vm9 = vcmp.eq.f32.partialorder %v4363_v15, 8.507059e+37  ;;  %v5642_v15 = vld [vmem:[#allocation3 + $0xe8] sm:$0xff] }
 0x739   :  { %5250 = vset.pattern.permute.xlu1 %v9976_v34  ;;  %v5429_v16 = vpop.eup %5428  ;;  %v4673_v62 = vadd.f32 %v5423_v33, %v4672_v29  ;;  %v4365_v34 = vand.u32 2147483648, %v8962_v55  ;;  %5434 = vpow2.f32 %v5114_v30  ;;  %v4273_v32 = vand.u32 2147483647, %v8974_v40  ;;  %v3374_v47 = vpop.permute.xlu2 %3373 }
 0x73a   :  { %v4355_v45 = vmul.f32 %v5429_v16, %v8962_v55  ;;  %5436 = vrcp.f32 %v8988_v17  ;;  %v4275_v27 = vand.u32 2147483648, %v8974_v40  ;;  %v5116_v14 = vmul.f32 -1.442695, %v3633_v31 }
 0x73b   :  { %v4677_v49 = vsel %vm4676_vm5, %v5423_v33, %v4673_v62  ;;  %5438 = vpow2.f32 %v5110_v63  ;;  %vm4360_vm10 = vweird.f32 %v5429_v16  ;;  %v4366_v8 = vor.u32 1.1754944e-38, %v4365_v34 }
 0x73c   :  { %v4682_v18 = vsel %vm8984_vm4, %v4681_v35, %v4677_v49  ;;  %v4356_v6 = vsub.f32 1.0, %v4355_v45  ;;  %v4828_v23 = vand.u32 2147483647, %v8988_v17  ;;  %v4830_v36 = vand.u32 2147483648, %v8988_v17  ;;  %vm4361_vm7 = vmor %vm4359_vm8, %vm4360_vm10 }
 0x73d   :  { %v5431_v61 = vpop.eup %5430  ;;  %v4929_v12 = vadd.f32 %v5641_v7, %v4682_v18  ;;  %5440 = vpow2.f32 %v5116_v14  ;;  %v10051_v0 = vperm.slane %v8289_v1, 6  ;;  %vm4269_vm11 = vweird.f32 %v8974_v40 }
 0x73e   :  { %v5433_v20 = vpop.eup %5432  ;;  %v4357_v4 = vmul.f32 %v5429_v16, %v4356_v6  ;;  %v4265_v54 = vmul.f32 %v5431_v61, %v8974_v40  ;;  %vm9014_vm6 = vcmp.eq.f32.partialorder %v4273_v32, 8.507059e+37  ;;  %v3562_v58 = vmul.f32 %v3322_v26, %v8246_v41  ;;  %v3335_v41 = vpop.permute.xlu1 %3334  ;;  %v5643_v32 = vld [vmem:[#allocation3 + $0xb8] sm:$0xff] }
 0x73f   :  { %3523 = vperm.xlu2 %5251, %v3518_v10   ;;  %v5435_v33 = vpop.eup %5434  ;;  %4993 = vst.msk [vmem:[#allocation6 + $0x190] sm:$0xff] %vm108_vm0, %v4929_v12  ;;  %v9018_v60 = vadd.f32 1.0, %v5433_v20  ;;  %v4276_v50 = vor.u32 1.1754944e-38, %v4275_v27  ;;  %vm4824_vm12 = vweird.f32 %v8988_v17  ;;  %vm9028_vm13 = vcmp.eq.f32.partialorder %v4828_v23, 8.507059e+37  ;;  %v5644_v23 = vld [vmem:[#allocation3 + $0x1e0] sm:$0xff] }
 0x740   :  { %v5437_v52 = vpop.eup %5436  ;;  %v4358_v43 = vadd.f32 %v5429_v16, %v4357_v4  ;;  %v4266_v2 = vsub.f32 1.0, %v4265_v54  ;;  %v9021_v19 = vadd.f32 1.0, %v5435_v33  ;;  %vm4270_vm14 = vweird.f32 %v5431_v61 }
 0x741   :  { %3516 = vperm.xlu1 %5250, %v10051_v0   ;;  %v4820_v3 = vmul.f32 %v5437_v52, %v8988_v17  ;;  %5442 = vrcp.f32 %v9018_v60  ;;  %v5439_v48 = vpop.eup %5438  ;;  %v4831_v51 = vor.u32 1.1754944e-38, %v4830_v36  ;;  %v3630_v30 = vadd.f32 %v8690_v25, %v3562_v58  ;;  %vm4271_vm15 = vmor %vm4269_vm11, %vm4270_vm14 }
 0x742   :  { %v4362_v59 = vsel %vm4361_vm7, %v5429_v16, %v4358_v43  ;;  %v4267_v37 = vmul.f32 %v5431_v61, %v4266_v2  ;;  %5444 = vrcp.f32 %v9021_v19  ;;  %v3568_v63 = vmul.f32 %v3361_v53, %v8332_v28 }
 0x743   :  { %v4367_v55 = vsel %vm8997_vm9, %v4366_v8, %v4362_v59  ;;  %v4821_v22 = vsub.f32 1.0, %v4820_v3  ;;  %v5441_v29 = vpop.eup %5440  ;;  %v3564_v16 = vmul.f32 %v3335_v41, %v8301_v56  ;;  %vm4825_vm1 = vweird.f32 %v5437_v52  ;;  %v3394_v41 = vpop.permute.xlu2 %3393 }
 0x744   :  { %v4908_v26 = vadd.f32 %v5642_v15, %v4367_v55  ;;  %v4268_v9 = vadd.f32 %v5431_v61, %v4267_v37  ;;  %v4318_v34 = vand.u32 2147483647, %v9018_v60  ;;  %v9042_v31 = vadd.f32 1.0, %v5439_v48  ;;  %vm4826_vm3 = vmor %vm4824_vm12, %vm4825_vm1 }
 0x745   :  { %v4822_v62 = vmul.f32 %v5437_v52, %v4821_v22  ;;  %vm4314_vm2 = vweird.f32 %v9018_v60  ;;  %v4320_v45 = vand.u32 2147483648, %v9018_v60  ;;  %v3570_v28 = vmul.f32 %v3374_v47, %v8362_v46 }
 0x746   :  { %4972 = vst.msk [vmem:[#allocation6 + $0xe8] sm:$0xff] %vm108_vm0, %v4908_v26  ;;  %v4272_v35 = vsel %vm4271_vm15, %v5431_v61, %v4268_v9  ;;  %v4408_v49 = vand.u32 2147483647, %v9021_v19  ;;  %v9053_v13 = vadd.f32 1.0, %v5441_v29  ;;  %vm4404_vm4 = vweird.f32 %v9021_v19  ;;  %v3355_v43 = vpop.permute.xlu1 %3354  ;;  %v5645_v9 = vld [vmem:[#allocation3 + $0xd0] sm:$0xff] }
 0x747   :  { %v5443_v56 = vpop.eup %5442  ;;  %v4277_v40 = vsel %vm9014_vm6, %v4276_v50, %v4272_v35  ;;  %v4823_v53 = vadd.f32 %v5437_v52, %v4822_v62  ;;  %v4410_v1 = vand.u32 2147483648, %v9021_v19  ;;  %5446 = vrcp.f32 %v9042_v31 }
 0x748   :  { %v4902_v27 = vadd.f32 %v5643_v32, %v4277_v40  ;;  %v4310_v46 = vmul.f32 %v5443_v56, %v9018_v60  ;;  %vm9062_vm5 = vcmp.eq.f32.partialorder %v4318_v34, 8.507059e+37  ;;  %v5113_v14 = vmul.f32 -1.442695, %v3630_v30 }
 0x749   :  { %3529 = vperm.xlu1 %5250, %v3518_v10   ;;  %v5445_v10 = vpop.eup %5444  ;;  %v4827_v18 = vsel %vm4826_vm3, %v5437_v52, %v4823_v53  ;;  %v3636_v61 = vadd.f32 %v8690_v25, %v3568_v63  ;;  %v4321_v12 = vor.u32 1.1754944e-38, %v4320_v45  ;;  %vm9071_vm8 = vcmp.eq.f32.partialorder %v4408_v49, 8.507059e+37 }
 0x74a   :  { %4966 = vst.msk [vmem:[#allocation6 + $0xb8] sm:$0xff] %vm108_vm0, %v4902_v27  ;;  %v4832_v17 = vsel %vm9028_vm13, %v4831_v51, %v4827_v18  ;;  %v4311_v7 = vsub.f32 1.0, %v4310_v46  ;;  %v4400_v8 = vmul.f32 %v5445_v10, %v9021_v19  ;;  %v4348_v54 = vand.u32 2147483647, %v9042_v31  ;;  %v9107_v27 = vld [vmem:[%s9453_s6] ss:$0 sm:$0xff] }
 0x74b   :  { %v4939_v20 = vadd.f32 %v5644_v23, %v4832_v17  ;;  %5448 = vrcp.f32 %v9053_v13  ;;  %vm4315_vm9 = vweird.f32 %v5443_v56  ;;  %v4411_v33 = vor.u32 1.1754944e-38, %v4410_v1 }
 0x74c   :  { %v4312_v36 = vmul.f32 %v5443_v56, %v4311_v7  ;;  %v4401_v0 = vsub.f32 1.0, %v4400_v8  ;;  %vm4344_vm10 = vweird.f32 %v9042_v31  ;;  %v4350_v44 = vand.u32 2147483648, %v9042_v31  ;;  %vm4316_vm6 = vmor %vm4314_vm2, %vm4315_vm9 }
 0x74d   :  { %5003 = vst.msk [vmem:[#allocation6 + $0x1e0] sm:$0xff] %vm108_vm0, %v4939_v20  ;;  %5450 = vpow2.f32 %v5113_v14  ;;  %v5119_v58 = vmul.f32 -1.442695, %v3636_v61  ;;  %v3632_v52 = vadd.f32 %v8690_v25, %v3564_v16  ;;  %v5447_v2 = vpop.eup %5446  ;;  %vm4405_vm11 = vweird.f32 %v5445_v10 }
 0x74e   :  { %v4313_v50 = vadd.f32 %v5443_v56, %v4312_v36  ;;  %v4402_v3 = vmul.f32 %v5445_v10, %v4401_v0  ;;  %v3638_v24 = vadd.f32 %v8690_v25, %v3570_v28  ;;  %v4340_v48 = vmul.f32 %v5447_v2, %v9042_v31  ;;  %vm4406_vm12 = vmor %vm4404_vm4, %vm4405_vm11  ;;  %v5646_v28 = vld [vmem:[#allocation3 + $0x100] sm:$0xff]  ;;  %v3368_v6 = vpop.permute.xlu1 %3367  ;;  %v10062_v36 = vld [vmem:[#allocation68_spill] sm:$0xff] }
 0x74f   :  { %vm9086_vm7 = vcmp.eq.f32.partialorder %v4348_v54, 8.507059e+37  ;;  %v4440_v37 = vand.u32 2147483648, %v9053_v13  ;;  %5452 = vpow2.f32 %v5119_v58  ;;  %v5115_v22 = vmul.f32 -1.442695, %v3632_v52  ;;  %v9131_v58 = vpop.permute.xlu2 %3406 }
 0x750   :  { %v4317_v51 = vsel %vm4316_vm6, %v5443_v56, %v4313_v50  ;;  %v4403_v55 = vadd.f32 %v5445_v10, %v4402_v3  ;;  %v5121_v30 = vmul.f32 -1.442695, %v3638_v24  ;;  %v4341_v60 = vsub.f32 1.0, %v4340_v48 }
 0x751   :  { %v5449_v47 = vpop.eup %5448  ;;  %v4322_v29 = vsel %vm9062_vm5, %v4321_v12, %v4317_v51  ;;  %v3567_v15 = vmul.f32 %v3355_v43, %v8323_v11  ;;  %v3573_v26 = vmul.f32 %v3394_v41, %v8401_v39  ;;  %vm4345_vm13 = vweird.f32 %v5447_v2  ;;  %v5648_v12 = vld [vmem:[#allocation3 + $0xe0] sm:$0xff]  ;;  %v5649_v43 = vld [vmem:[#allocation3 + $0x110] sm:$0xff] }
 0x752   :  { %v4905_v63 = vadd.f32 %v5645_v9, %v4322_v29  ;;  %v4407_v16 = vsel %vm4406_vm12, %v5445_v10, %v4403_v55  ;;  %v4430_v62 = vmul.f32 %v5449_v47, %v9053_v13  ;;  %v4342_v45 = vmul.f32 %v5447_v2, %v4341_v60  ;;  %vm4346_vm14 = vmor %vm4344_vm10, %vm4345_vm13 }
 0x753   :  { %v5451_v34 = vpop.eup %5450  ;;  %v4412_v35 = vsel %vm9071_vm8, %v4411_v33, %v4407_v16  ;;  %5454 = vpow2.f32 %v5115_v22  ;;  %v3635_v19 = vadd.f32 %v8690_v25, %v3567_v15  ;;  %v4351_v49 = vor.u32 1.1754944e-38, %v4350_v44 }
 0x754   :  { %4969 = vst.msk [vmem:[#allocation6 + $0xd0] sm:$0xff] %vm108_vm0, %v4905_v63  ;;  %v4911_v11 = vadd.f32 %v5646_v28, %v4412_v35  ;;  %v4431_v56 = vsub.f32 1.0, %v4430_v62  ;;  %v9102_v39 = vadd.f32 1.0, %v5451_v34  ;;  %5456 = vpow2.f32 %v5121_v30 }
 0x755   :  { %v5453_v40 = vpop.eup %5452  ;;  %v4343_v53 = vadd.f32 %v5447_v2, %v4342_v45  ;;  %v5118_v32 = vmul.f32 -1.442695, %v3635_v19  ;;  %v3641_v46 = vadd.f32 %v9107_v27, %v3573_v26  ;;  %vm4435_vm15 = vweird.f32 %v5449_v47 }
 0x756   :  { %4975 = vst.msk [vmem:[#allocation6 + $0x100] sm:$0xff] %vm108_vm0, %v4911_v11  ;;  %v4432_v25 = vmul.f32 %v5449_v47, %v4431_v56  ;;  %v4438_v1 = vand.u32 2147483647, %v9053_v13  ;;  %5458 = vrcp.f32 %v9102_v39  ;;  %vm4434_vm1 = vweird.f32 %v9053_v13 }
 0x757   :  { %v4347_v10 = vsel %vm4346_vm14, %v5447_v2, %v4343_v53  ;;  %v9117_v18 = vadd.f32 1.0, %v5453_v40  ;;  %5460 = vpow2.f32 %v5118_v32  ;;  %v4441_v17 = vor.u32 1.1754944e-38, %v4440_v37  ;;  %vm4436_vm2 = vmor %vm4434_vm1, %vm4435_vm15  ;;  %v3387_v53 = vpop.permute.xlu1 %3386 }
 0x758   :  { %v4352_v14 = vsel %vm9086_vm7, %v4351_v49, %v4347_v10  ;;  %v4433_v61 = vadd.f32 %v5449_v47, %v4432_v25  ;;  %v5124_v31 = vmul.f32 -1.442695, %v3641_v46  ;;  %v4393_v23 = vand.u32 2147483647, %v9102_v39  ;;  %v3426_v49 = vpop.permute.xlu2 %3425 }
 0x759   :  { %v5455_v7 = vpop.eup %5454  ;;  %v4907_v8 = vadd.f32 %v5648_v12, %v4352_v14  ;;  %v4395_v20 = vand.u32 2147483648, %v9102_v39  ;;  %5462 = vrcp.f32 %v9117_v18  ;;  %vm4439_vm3 = vcmp.eq.f32.partialorder %v4438_v1, 8.507059e+37  ;;  %v5650_v12 = vld [vmem:[#allocation3 + $0xf8] sm:$0xff] }
 0x75a   :  { %v5457_v13 = vpop.eup %5456  ;;  %v4437_v4 = vsel %vm4436_vm2, %v5449_v47, %v4433_v61  ;;  %v9125_v54 = vadd.f32 1.0, %v5455_v7  ;;  %v3569_v0 = vmul.f32 %v3368_v6, %v10062_v36  ;;  %5464 = vpow2.f32 %v5124_v31 }
 0x75b   :  { %4971 = vst.msk [vmem:[#allocation6 + $0xe0] sm:$0xff] %vm108_vm0, %v4907_v8  ;;  %v4442_v33 = vsel %vm4439_vm3, %v4441_v17, %v4437_v4  ;;  %v9129_v44 = vadd.f32 1.0, %v5457_v13  ;;  %v4483_v50 = vand.u32 2147483647, %v9117_v18  ;;  %v4485_v3 = vand.u32 2147483648, %v9117_v18 }
 0x75c   :  { %v5459_v52 = vpop.eup %5458  ;;  %v4913_v2 = vadd.f32 %v5649_v43, %v4442_v33  ;;  %5466 = vrcp.f32 %v9125_v54  ;;  %vm4389_vm4 = vweird.f32 %v9102_v39  ;;  %vm9138_vm5 = vcmp.eq.f32.partialorder %v4393_v23, 8.507059e+37 }
 0x75d   :  { %v5461_v24 = vpop.eup %5460  ;;  %v4385_v41 = vmul.f32 %v5459_v52, %v9102_v39  ;;  %v4396_v59 = vor.u32 1.1754944e-38, %v4395_v20  ;;  %vm4479_vm8 = vweird.f32 %v9117_v18  ;;  %v4423_v37 = vand.u32 2147483647, %v9125_v54 }
 0x75e   :  { %4977 = vst.msk [vmem:[#allocation6 + $0x110] sm:$0xff] %vm108_vm0, %v4913_v2  ;;  %5468 = vrcp.f32 %v9129_v44  ;;  %v3637_v51 = vadd.f32 %v9107_v27, %v3569_v0  ;;  %v4425_v30 = vand.u32 2147483648, %v9125_v54  ;;  %v4515_v47 = vand.u32 2147483648, %v9129_v44 }
 0x75f   :  { %v5463_v55 = vpop.eup %5462  ;;  %v4386_v22 = vsub.f32 1.0, %v4385_v41  ;;  %v9149_v29 = vadd.f32 1.0, %v5461_v24  ;;  %vm4390_vm9 = vweird.f32 %v5459_v52  ;;  %vm9152_vm10 = vcmp.eq.f32.partialorder %v4483_v50, 8.507059e+37 }
 0x760   :  { %v4475_v60 = vmul.f32 %v5463_v55, %v9117_v18  ;;  %v4486_v26 = vor.u32 1.1754944e-38, %v4485_v3  ;;  %v5465_v9 = vpop.eup %5464  ;;  %vm4419_vm11 = vweird.f32 %v9125_v54  ;;  %v4513_v16 = vand.u32 2147483647, %v9129_v44  ;;  %vm4391_vm13 = vmor %vm4389_vm4, %vm4390_vm9  ;;  %v5651_v3 = vld [vmem:[#allocation3 + $0x128] sm:$0xff] }
 0x761   :  { %v4387_v63 = vmul.f32 %v5459_v52, %v4386_v22  ;;  %5470 = vrcp.f32 %v9149_v29  ;;  %vm4480_vm6 = vweird.f32 %v5463_v55  ;;  %v4470_v35 = vand.u32 2147483648, %v9149_v29 }
 0x762   :  { %v5467_v62 = vpop.eup %5466  ;;  %v4476_v34 = vsub.f32 1.0, %v4475_v60  ;;  %v9160_v45 = vadd.f32 1.0, %v5465_v9  ;;  %vm9163_vm7 = vcmp.eq.f32.partialorder %v4423_v37, 8.507059e+37  ;;  %v4426_v56 = vor.u32 1.1754944e-38, %v4425_v30  ;;  %vm4481_vm3 = vmor %vm4479_vm8, %vm4480_vm6  ;;  %v10073_v30 = vld [vmem:[#allocation59_spill] sm:$0xff] }
 0x763   :  { %v4388_v19 = vadd.f32 %v5459_v52, %v4387_v63  ;;  %v4415_v28 = vmul.f32 %v5467_v62, %v9125_v54  ;;  %vm4509_vm12 = vweird.f32 %v9129_v44  ;;  %v4516_v40 = vor.u32 1.1754944e-38, %v4515_v47  ;;  %v3439_v63 = vpop.permute.xlu2 %3438 }
 0x764   :  { %v5469_v32 = vpop.eup %5468  ;;  %v4477_v46 = vmul.f32 %v5463_v55, %v4476_v34  ;;  %vm4420_vm14 = vweird.f32 %v5467_v62  ;;  %v4468_v25 = vand.u32 2147483647, %v9149_v29  ;;  %5472 = vrcp.f32 %v9160_v45 }
 0x765   :  { %v4392_v1 = vsel %vm4391_vm13, %v5459_v52, %v4388_v19  ;;  %v4416_v10 = vsub.f32 1.0, %v4415_v28  ;;  %v4505_v6 = vmul.f32 %v5469_v32, %v9129_v44  ;;  %vm9174_vm15 = vcmp.eq.f32.partialorder %v4513_v16, 8.507059e+37  ;;  %vm4421_vm9 = vmor %vm4419_vm11, %vm4420_vm14 }
 0x766   :  { %v5120_v61 = vmul.f32 -1.442695, %v3637_v51  ;;  %v4397_v17 = vsel %vm9138_vm5, %v4396_v59, %v4392_v1  ;;  %v4478_v39 = vadd.f32 %v5463_v55, %v4477_v46  ;;  %vm4510_vm1 = vweird.f32 %v5469_v32 }
 0x767   :  { %vm4464_vm2 = vweird.f32 %v9149_v29  ;;  %v4471_v31 = vor.u32 1.1754944e-38, %v4470_v35  ;;  %v5471_v7 = vpop.eup %5470  ;;  %v4910_v8 = vadd.f32 %v5650_v12, %v4397_v17  ;;  %v4417_v23 = vmul.f32 %v5467_v62, %v4416_v10  ;;  %vm4511_vm6 = vmor %vm4509_vm12, %vm4510_vm1  ;;  %v5653_v35 = vld [vmem:[#allocation3 + $0x138] sm:$0xff]  ;;  %v5654_v10 = vld [vmem:[#allocation3 + $0x120] sm:$0xff] }
 0x768   :  { %v4506_v20 = vsub.f32 1.0, %v4505_v6  ;;  %v4560_v13 = vand.u32 2147483648, %v9160_v45  ;;  %v4482_v4 = vsel %vm4481_vm3, %v5463_v55, %v4478_v39  ;;  %v4460_v36 = vmul.f32 %v5471_v7, %v9149_v29 }
 0x769   :  { %vm4465_vm4 = vweird.f32 %v5471_v7  ;;  %vm9186_vm5 = vcmp.eq.f32.partialorder %v4468_v25, 8.507059e+37  ;;  %v4558_v33 = vand.u32 2147483647, %v9160_v45  ;;  %4974 = vst.msk [vmem:[#allocation6 + $0xf8] sm:$0xff] %vm108_vm0, %v4910_v8  ;;  %v4487_v18 = vsel %vm9152_vm10, %v4486_v26, %v4482_v4 }
 0x76a   :  { %v4418_v52 = vadd.f32 %v5467_v62, %v4417_v23  ;;  %v4507_v43 = vmul.f32 %v5469_v32, %v4506_v20  ;;  %vm4554_vm8 = vweird.f32 %v9160_v45  ;;  %v4561_v2 = vor.u32 1.1754944e-38, %v4560_v13  ;;  %v5473_v50 = vpop.eup %5472  ;;  %vm4466_vm11 = vmor %vm4464_vm2, %vm4465_vm4 }
 0x76b   :  { %v4916_v24 = vadd.f32 %v5651_v3, %v4487_v18  ;;  %v4461_v41 = vsub.f32 1.0, %v4460_v36  ;;  %5474 = vpow2.f32 %v5120_v61  ;;  %v3575_v48 = vmul.f32 %v9131_v58, %v8475_v5  ;;  %v3400_v5 = vpop.permute.xlu1 %3399  ;;  %v5652_v58 = vld [vmem:[#allocation3 + $0x108] sm:$0xff] }
 0x76c   :  { %v4422_v59 = vsel %vm4421_vm9, %v5467_v62, %v4418_v52  ;;  %v4508_v37 = vadd.f32 %v5469_v32, %v4507_v43  ;;  %v4550_v51 = vmul.f32 %v5473_v50, %v9160_v45  ;;  %vm4555_vm10 = vweird.f32 %v5473_v50 }
 0x76d   :  { %4980 = vst.msk [vmem:[#allocation6 + $0x128] sm:$0xff] %vm108_vm0, %v4916_v24  ;;  %v4427_v55 = vsel %vm9163_vm7, %v4426_v56, %v4422_v59  ;;  %v4462_v54 = vmul.f32 %v5471_v7, %v4461_v41  ;;  %v3643_v22 = vadd.f32 %v9107_v27, %v3575_v48  ;;  %v3572_v47 = vmul.f32 %v3387_v53, %v10073_v30  ;;  %vm4556_vm7 = vmor %vm4554_vm8, %vm4555_vm10 }
 0x76e   :  { %v4912_v60 = vadd.f32 %v5652_v58, %v4427_v55  ;;  %v4512_v15 = vsel %vm4511_vm6, %v5469_v32, %v4508_v37  ;;  %v4551_v26 = vsub.f32 1.0, %v4550_v51  ;;  %v3578_v9 = vmul.f32 %v3426_v49, %v8682_v38  ;;  %v10074_v38 = vld [vmem:[#allocation75_spill] sm:$0xff] }
 0x76f   :  { %v4517_v16 = vsel %vm9174_vm15, %v4516_v40, %v4512_v15  ;;  %v4463_v62 = vadd.f32 %v5471_v7, %v4462_v54  ;;  %v5126_v34 = vmul.f32 -1.442695, %v3643_v22  ;;  %v3640_v44 = vadd.f32 %v9107_v27, %v3572_v47  ;;  %v3459_v54 = vpop.permute.xlu2 %3458 }
 0x770   :  { %4976 = vst.msk [vmem:[#allocation6 + $0x108] sm:$0xff] %vm108_vm0, %v4912_v60  ;;  %v4918_v19 = vadd.f32 %v5653_v35, %v4517_v16  ;;  %v4552_v28 = vmul.f32 %v5473_v50, %v4551_v26  ;;  %v3646_v11 = vadd.f32 %v9107_v27, %v3578_v9  ;;  %v3574_v56 = vmul.f32 %v3400_v5, %v10074_v38 }
 0x771   :  { %v5475_v53 = vpop.eup %5474  ;;  %v4467_v49 = vsel %vm4466_vm11, %v5471_v7, %v4463_v62  ;;  %5476 = vpow2.f32 %v5126_v34  ;;  %v5123_v40 = vmul.f32 -1.442695, %v3640_v44  ;;  %v3580_v32 = vmul.f32 %v3439_v63, %v8793_v21 }
 0x772   :  { %4982 = vst.msk [vmem:[#allocation6 + $0x138] sm:$0xff] %vm108_vm0, %v4918_v19  ;;  %v4472_v46 = vsel %vm9186_vm5, %v4471_v31, %v4467_v49  ;;  %v4553_v25 = vadd.f32 %v5473_v50, %v4552_v28  ;;  %v3893_v1 = vadd.f32 1.0, %v5475_v53  ;;  %v5129_v29 = vmul.f32 -1.442695, %v3646_v11  ;;  %v5655_v31 = vld [vmem:[#allocation3 + $0x150] sm:$0xff] }
 0x773   :  { %v4915_v6 = vadd.f32 %v5654_v10, %v4472_v46  ;;  %5478 = vpow2.f32 %v5123_v40  ;;  %v3642_v14 = vadd.f32 %v9107_v27, %v3574_v56  ;;  %v3648_v61 = vadd.f32 %v9107_v27, %v3580_v32  ;;  %v3420_v8 = vpop.permute.xlu1 %3419  ;;  %v5656_v11 = vld [vmem:[#allocation3 + $0x130] sm:$0xff] }
 0x774   :  { %v4557_v21 = vsel %vm4556_vm7, %v5473_v50, %v4553_v25  ;;  %vm4559_vm12 = vcmp.eq.f32.partialorder %v4558_v33, 8.507059e+37  ;;  %5480 = vrcp.f32 %v3893_v1  ;;  %v3577_v45 = vmul.f32 %v3420_v8, %v8641_v42 }
 0x775   :  { %4979 = vst.msk [vmem:[#allocation6 + $0x120] sm:$0xff] %vm108_vm0, %v4915_v6  ;;  %v4562_v17 = vsel %vm4559_vm12, %v4561_v2, %v4557_v21  ;;  %5482 = vpow2.f32 %v5129_v29  ;;  %v5125_v39 = vmul.f32 -1.442695, %v3642_v14  ;;  %v5131_v12 = vmul.f32 -1.442695, %v3648_v61 }
 0x776   :  { %v4921_v7 = vadd.f32 %v5655_v31, %v4562_v17  ;;  %v3645_v4 = vadd.f32 %v9107_v27, %v3577_v45  ;;  %v4498_v0 = vand.u32 2147483647, %v3893_v1  ;;  %v4500_v52 = vand.u32 2147483648, %v3893_v1 }
 0x777   :  { %v5477_v23 = vpop.eup %5476  ;;  %5484 = vpow2.f32 %v5125_v39  ;;  %vm4494_vm13 = vweird.f32 %v3893_v1  ;;  %v3472_v8 = vpop.permute.xlu2 %3471 }
 0x778   :  { %4985 = vst.msk [vmem:[#allocation6 + $0x150] sm:$0xff] %vm108_vm0, %v4921_v7  ;;  %v9231_v20 = vadd.f32 1.0, %v5477_v23  ;;  %5486 = vpow2.f32 %v5131_v12  ;;  %v5128_v42 = vmul.f32 -1.442695, %v3645_v4  ;;  %vm9242_vm14 = vcmp.eq.f32.partialorder %v4498_v0, 8.507059e+37 }
 0x779   :  { %v5479_v13 = vpop.eup %5478  ;;  %v4501_v51 = vor.u32 1.1754944e-38, %v4500_v52 }
 0x77a   :  { %v5481_v36 = vpop.eup %5480  ;;  %5488 = vrcp.f32 %v9231_v20  ;;  %v9235_v43 = vadd.f32 1.0, %v5479_v13  ;;  %v4588_v24 = vand.u32 2147483647, %v9231_v20  ;;  %v4590_v41 = vand.u32 2147483648, %v9231_v20  ;;  %v10083_v13 = vld [vmem:[#allocation109_spill] sm:$0xff] }
 0x77b   :  { %v5483_v33 = vpop.eup %5482  ;;  %v4490_v18 = vmul.f32 %v5481_v36, %v3893_v1  ;;  %vm4495_vm15 = vweird.f32 %v5481_v36  ;;  %vm4584_vm1 = vweird.f32 %v9231_v20  ;;  %v3583_v4 = vmul.f32 %v3459_v54, %v10083_v13 }
 0x77c   :  { %v9237_v2 = vadd.f32 1.0, %v5483_v33  ;;  %5490 = vrcp.f32 %v9235_v43  ;;  %v4543_v30 = vand.u32 2147483647, %v9235_v43  ;;  %vm9254_vm2 = vcmp.eq.f32.partialorder %v4588_v24, 8.507059e+37  ;;  %vm4496_vm3 = vmor %vm4494_vm13, %vm4495_vm15 }
 0x77d   :  { %v5485_v50 = vpop.eup %5484  ;;  %v4491_v3 = vsub.f32 1.0, %v4490_v18  ;;  %v4591_v15 = vor.u32 1.1754944e-38, %v4590_v41  ;;  %v4545_v26 = vand.u32 2147483648, %v9235_v43  ;;  %vm4539_vm4 = vweird.f32 %v9235_v43  ;;  %v3433_v41 = vpop.permute.xlu1 %3432 }
 0x77e   :  { %v5487_v48 = vpop.eup %5486  ;;  %5492 = vrcp.f32 %v9237_v2  ;;  %v9247_v55 = vadd.f32 1.0, %v5485_v50  ;;  %v4633_v9 = vand.u32 2147483647, %v9237_v2  ;;  %v4635_v63 = vand.u32 2147483648, %v9237_v2 }
 0x77f   :  { %v4492_v37 = vmul.f32 %v5481_v36, %v4491_v3  ;;  %v9251_v47 = vadd.f32 1.0, %v5487_v48  ;;  %5494 = vpow2.f32 %v5128_v42  ;;  %vm9268_vm5 = vcmp.eq.f32.partialorder %v4543_v30, 8.507059e+37  ;;  %v10084_v3 = vld [vmem:[#allocation110_spill] sm:$0xff] }
 0x780   :  { %v5489_v22 = vpop.eup %5488  ;;  %5496 = vrcp.f32 %v9247_v55  ;;  %vm4629_vm8 = vweird.f32 %v9237_v2  ;;  %v4546_v32 = vor.u32 1.1754944e-38, %v4545_v26  ;;  %vm9274_vm10 = vcmp.eq.f32.partialorder %v4633_v9, 8.507059e+37 }
 0x781   :  { %v4493_v5 = vadd.f32 %v5481_v36, %v4492_v37  ;;  %v4580_v58 = vmul.f32 %v5489_v22, %v9231_v20  ;;  %5498 = vrcp.f32 %v9251_v47  ;;  %vm4585_vm9 = vweird.f32 %v5489_v22  ;;  %v5658_v37 = vld [vmem:[#allocation3 + $0x148] sm:$0xff] }
 0x782   :  { %v5491_v16 = vpop.eup %5490  ;;  %v4636_v25 = vor.u32 1.1754944e-38, %v4635_v63  ;;  %vm4569_vm6 = vweird.f32 %v9247_v55  ;;  %v4573_v10 = vand.u32 2147483647, %v9247_v55  ;;  %vm4586_vm11 = vmor %vm4584_vm1, %vm4585_vm9  ;;  %v4575_v21 = vand.u32 2147483648, %v9247_v55 }
 0x783   :  { %v4497_v62 = vsel %vm4496_vm3, %v5481_v36, %v4493_v5  ;;  %v4581_v34 = vsub.f32 1.0, %v4580_v58  ;;  %v4535_v19 = vmul.f32 %v5491_v16, %v9235_v43  ;;  %vm4540_vm7 = vweird.f32 %v5491_v16  ;;  %v5657_v36 = vld [vmem:[#allocation3 + $0x160] sm:$0xff] }
 0x784   :  { %v5493_v44 = vpop.eup %5492  ;;  %v4502_v35 = vsel %vm9242_vm14, %v4501_v51, %v4497_v62  ;;  %v4663_v12 = vand.u32 2147483647, %v9251_v47  ;;  %vm4541_vm13 = vmor %vm4539_vm4, %vm4540_vm7  ;;  %v4665_v50 = vand.u32 2147483648, %v9251_v47  ;;  %v3585_v24 = vmul.f32 %v3472_v8, %v10084_v3 }
 0x785   :  { %v4917_v38 = vadd.f32 %v5656_v11, %v4502_v35  ;;  %v4582_v56 = vmul.f32 %v5489_v22, %v4581_v34  ;;  %v4625_v53 = vmul.f32 %v5493_v44, %v9237_v2  ;;  %v5495_v49 = vpop.eup %5494  ;;  %v4536_v40 = vsub.f32 1.0, %v4535_v19  ;;  %v836_v35 = vpop.f32.mrf.mxu2  ;;  %v5660_v19 = vld [vmem:[#allocation3 + $0x158] sm:$0xff] }
 0x786   :  { %v9281_v6 = vadd.f32 1.0, %v5495_v49  ;;  %v5497_v14 = vpop.eup %5496  ;;  %vm4630_vm12 = vweird.f32 %v5493_v44  ;;  %v3651_v58 = vadd.f32 %v9107_v27, %v3583_v4  ;;  %v4576_v60 = vor.u32 1.1754944e-38, %v4575_v21  ;;  %v5662_v4 = vld [vmem:[#allocation3 + $0x170] sm:$0xff] }
 0x787   :  { %4981 = vst.msk [vmem:[#allocation6 + $0x130] sm:$0xff] %vm108_vm0, %v4917_v38  ;;  %v4583_v1 = vadd.f32 %v5489_v22, %v4582_v56  ;;  %v4626_v29 = vsub.f32 1.0, %v4625_v53  ;;  %v4537_v61 = vmul.f32 %v5491_v16, %v4536_v40  ;;  %v5499_v17 = vpop.eup %5498  ;;  %v4565_v7 = vmul.f32 %v5497_v14, %v9247_v55  ;;  %vm4631_vm14 = vmor %vm4629_vm8, %vm4630_vm12  ;;  %v5661_v38 = vld [vmem:[#allocation3 + $0x188] sm:$0xff]  ;;  %v3491_v40 = vpop.permute.xlu2 %3490 }
 0x788   :  { %v4655_v20 = vmul.f32 %v5499_v17, %v9251_v47  ;;  %5500 = vrcp.f32 %v9281_v6  ;;  %vm4570_vm15 = vweird.f32 %v5497_v14  ;;  %vm4660_vm1 = vweird.f32 %v5499_v17 }
 0x789   :  { %v4587_v39 = vsel %vm4586_vm11, %v5489_v22, %v4583_v1  ;;  %v4627_v31 = vmul.f32 %v5493_v44, %v4626_v29  ;;  %v4538_v45 = vadd.f32 %v5491_v16, %v4537_v61  ;;  %v4566_v18 = vsub.f32 1.0, %v4565_v7  ;;  %v5659_v22 = vld [vmem:[#allocation3 + $0x178] sm:$0xff]  ;;  %vm4571_vm3 = vmor %vm4569_vm6, %vm4570_vm15 }
 0x78a   :  { %v4592_v23 = vsel %vm9254_vm2, %v4591_v15, %v4587_v39  ;;  %v4656_v42 = vsub.f32 1.0, %v4655_v20  ;;  %vm4659_vm2 = vweird.f32 %v9251_v47  ;;  %v3653_v26 = vadd.f32 %v9107_v27, %v3585_v24 }
 0x78b   :  { %v4923_v0 = vadd.f32 %v5657_v36, %v4592_v23  ;;  %v4628_v33 = vadd.f32 %v5493_v44, %v4627_v31  ;;  %v4542_v52 = vsel %vm4541_vm13, %v5491_v16, %v4538_v45  ;;  %v4567_v59 = vmul.f32 %v5497_v14, %v4566_v18 }
 0x78c   :  { %v4547_v43 = vsel %vm9268_vm5, %v4546_v32, %v4542_v52  ;;  %v4657_v54 = vmul.f32 %v5499_v17, %v4656_v42  ;;  %v3579_v9 = vmul.f32 %v3433_v41, %v8744_v57  ;;  %vm4574_vm4 = vcmp.eq.f32.partialorder %v4573_v10, 8.507059e+37  ;;  %vm4661_vm5 = vmor %vm4659_vm2, %vm4660_vm1  ;;  %v3452_v32 = vpop.permute.xlu1 %3451  ;;  %v10086_v52 = vld [vmem:[#allocation44_spill] sm:$0xff] }
 0x78d   :  { %4987 = vst.msk [vmem:[#allocation6 + $0x160] sm:$0xff] %vm108_vm0, %v4923_v0  ;;  %v4632_v48 = vsel %vm4631_vm14, %v5493_v44, %v4628_v33  ;;  %v4920_v51 = vadd.f32 %v5658_v37, %v4547_v43  ;;  %v4568_v5 = vadd.f32 %v5497_v14, %v4567_v59  ;;  %v4666_v47 = vor.u32 1.1754944e-38, %v4665_v50  ;;  %v10087_v50 = vld [vmem:[#allocation36_spill] sm:$0xff] }
 0x78e   :  { %v4637_v2 = vsel %vm9274_vm10, %v4636_v25, %v4632_v48  ;;  %v4658_v15 = vadd.f32 %v5499_v17, %v4657_v54  ;;  %v5501_v63 = vpop.eup %5500  ;;  %v5134_v62 = vmul.f32 -1.442695, %v3651_v58  ;;  %vm4664_vm8 = vcmp.eq.f32.partialorder %v4663_v12, 8.507059e+37  ;;  %v10085_v25 = vld [vmem:[#allocation42_spill] sm:$0xff] }
 0x78f   :  { %v4926_v30 = vadd.f32 %v5659_v22, %v4637_v2  ;;  %4984 = vst.msk [vmem:[#allocation6 + $0x148] sm:$0xff] %vm108_vm0, %v4920_v51  ;;  %v4572_v16 = vsel %vm4571_vm3, %v5497_v14, %v4568_v5  ;;  %v4610_v55 = vmul.f32 %v5501_v63, %v9281_v6  ;;  %v5136_v57 = vmul.f32 -1.442695, %v3653_v26  ;;  %v3504_v0 = vpop.permute.xlu2 %3503 }
 0x790   :  { %v4577_v34 = vsel %vm4574_vm4, %v4576_v60, %v4572_v16  ;;  %v4662_v44 = vsel %vm4661_vm5, %v5499_v17, %v4658_v15  ;;  %5502 = vpow2.f32 %v5134_v62  ;;  %v3647_v49 = vadd.f32 %v9107_v27, %v3579_v9 }
 0x791   :  { %4990 = vst.msk [vmem:[#allocation6 + $0x178] sm:$0xff] %vm108_vm0, %v4926_v30  ;;  %v4922_v28 = vadd.f32 %v5660_v19, %v4577_v34  ;;  %v4667_v11 = vsel %vm4664_vm8, %v4666_v47, %v4662_v44  ;;  %v4611_v53 = vsub.f32 1.0, %v4610_v55  ;;  %v4620_v46 = vand.u32 2147483648, %v9281_v6 }
 0x792   :  { %v4928_v56 = vadd.f32 %v5661_v38, %v4667_v11  ;;  %5504 = vpow2.f32 %v5136_v57  ;;  %v3588_v1 = vmul.f32 %v3491_v40, %v10085_v25  ;;  %v3582_v29 = vmul.f32 %v3452_v32, %v836_v35 }
 0x793   :  { %4986 = vst.msk [vmem:[#allocation6 + $0x158] sm:$0xff] %vm108_vm0, %v4922_v28  ;;  %v4612_v10 = vmul.f32 %v5501_v63, %v4611_v53  ;;  %vm4615_vm9 = vweird.f32 %v5501_v63  ;;  %v4618_v14 = vand.u32 2147483647, %v9281_v6  ;;  %v5130_v61 = vmul.f32 -1.442695, %v3647_v49 }
 0x794   :  { %4992 = vst.msk [vmem:[#allocation6 + $0x188] sm:$0xff] %vm108_vm0, %v4928_v56  ;;  %v3656_v21 = vadd.f32 %v9107_v27, %v3588_v1  ;;  %v3650_v17 = vadd.f32 %v9107_v27, %v3582_v29  ;;  %vm4614_vm10 = vweird.f32 %v9281_v6  ;;  %v4621_v7 = vor.u32 1.1754944e-38, %v4620_v46  ;;  %v3465_v33 = vpop.permute.xlu1 %3464  ;;  %v10094_v46 = vld [vmem:[#allocation53_spill] sm:$0xff] }
 0x795   :  { %v4613_v39 = vadd.f32 %v5501_v63, %v4612_v10  ;;  %5506 = vpow2.f32 %v5130_v61  ;;  %vm4616_vm6 = vmor %vm4614_vm10, %vm4615_vm9  ;;  %vm4619_vm11 = vcmp.eq.f32.partialorder %v4618_v14, 8.507059e+37  ;;  %v3590_v42 = vmul.f32 %v3504_v0, %v10086_v52 }
 0x796   :  { %v5503_v31 = vpop.eup %5502  ;;  %v5139_v12 = vmul.f32 -1.442695, %v3656_v21  ;;  %v5133_v8 = vmul.f32 -1.442695, %v3650_v17  ;;  %v3584_v3 = vmul.f32 %v3465_v33, %v10087_v50  ;;  %v5664_v50 = vld [vmem:[#allocation3 + $0x1b0] sm:$0xff] }
 0x797   :  { %v4617_v23 = vsel %vm4616_vm6, %v5501_v63, %v4613_v39  ;;  %v3907_v45 = vadd.f32 1.0, %v5503_v31  ;;  %v3658_v51 = vadd.f32 %v9107_v27, %v3590_v42 }
 0x798   :  { %v5505_v20 = vpop.eup %5504  ;;  %v4622_v13 = vsel %vm4619_vm11, %v4621_v7, %v4617_v23  ;;  %5508 = vpow2.f32 %v5139_v12  ;;  %v3652_v30 = vadd.f32 %v9107_v27, %v3584_v3  ;;  %v5663_v7 = vld [vmem:[#allocation3 + $0x1a0] sm:$0xff] }
 0x799   :  { %v4925_v36 = vadd.f32 %v5662_v4, %v4622_v13  ;;  %5510 = vrcp.f32 %v3907_v45  ;;  %v9325_v18 = vadd.f32 1.0, %v5505_v20  ;;  %v4708_v24 = vand.u32 2147483647, %v3907_v45  ;;  %v3524_v35 = vpop.permute.xlu2 %3523 }
 0x79a   :  { %5512 = vpow2.f32 %v5133_v8  ;;  %v4710_v48 = vand.u32 2147483648, %v3907_v45  ;;  %vm4704_vm7 = vweird.f32 %v3907_v45  ;;  %v5141_v34 = vmul.f32 -1.442695, %v3658_v51 }
 0x79b   :  { %v5507_v6 = vpop.eup %5506  ;;  %4989 = vst.msk [vmem:[#allocation6 + $0x170] sm:$0xff] %vm108_vm0, %v4925_v36  ;;  %5514 = vrcp.f32 %v9325_v18  ;;  %v4738_v37 = vand.u32 2147483647, %v9325_v18  ;;  %vm9339_vm12 = vcmp.eq.f32.partialorder %v4708_v24, 8.507059e+37  ;;  %v4740_v58 = vand.u32 2147483648, %v9325_v18 }
 0x79c   :  { %v9331_v41 = vadd.f32 1.0, %v5507_v6  ;;  %v4711_v63 = vor.u32 1.1754944e-38, %v4710_v48  ;;  %vm4734_vm13 = vweird.f32 %v9325_v18  ;;  %v5135_v55 = vmul.f32 -1.442695, %v3652_v30  ;;  %v3485_v39 = vpop.permute.xlu1 %3484 }
 0x79d   :  { %vm9351_vm14 = vcmp.eq.f32.partialorder %v4738_v37, 8.507059e+37  ;;  %v4741_v11 = vor.u32 1.1754944e-38, %v4740_v58  ;;  %v3593_v25 = vmul.f32 %v3524_v35, %v10094_v46  ;;  %v10096_v35 = vld [vmem:[#allocation43_spill] sm:$0xff] }
 0x79e   :  { %v5509_v43 = vpop.eup %5508  ;;  %5516 = vrcp.f32 %v9331_v41  ;;  %v4650_v60 = vand.u32 2147483648, %v9331_v41  ;;  %v4648_v16 = vand.u32 2147483647, %v9331_v41  ;;  %vm4644_vm1 = vweird.f32 %v9331_v41 }
 0x79f   :  { %v5511_v59 = vpop.eup %5510  ;;  %v9336_v22 = vadd.f32 1.0, %v5509_v43  ;;  %v3661_v23 = vadd.f32 %v9107_v27, %v3593_v25 }
 0x7a0   :  { %v5513_v2 = vpop.eup %5512  ;;  %v4700_v54 = vmul.f32 %v5511_v59, %v3907_v45  ;;  %vm4705_vm15 = vweird.f32 %v5511_v59  ;;  %v4651_v57 = vor.u32 1.1754944e-38, %v4650_v60  ;;  %vm9358_vm3 = vcmp.eq.f32.partialorder %v4648_v16, 8.507059e+37  ;;  %v10095_v45 = vld [vmem:[#allocation111_spill] sm:$0xff] }
 0x7a1   :  { %v9345_v15 = vadd.f32 1.0, %v5513_v2  ;;  %v5515_v26 = vpop.eup %5514  ;;  %5518 = vrcp.f32 %v9336_v22  ;;  %v4783_v49 = vand.u32 2147483647, %v9336_v22  ;;  %vm4706_vm4 = vmor %vm4704_vm7, %vm4705_vm15  ;;  %vm4779_vm5 = vweird.f32 %v9336_v22 }
 0x7a2   :  { %v4701_v9 = vsub.f32 1.0, %v4700_v54  ;;  %v4730_v47 = vmul.f32 %v5515_v26, %v9325_v18  ;;  %vm4735_vm2 = vweird.f32 %v5515_v26  ;;  %v4785_v32 = vand.u32 2147483648, %v9336_v22 }
 0x7a3   :  { %5520 = vrcp.f32 %v9345_v15  ;;  %v4693_v14 = vand.u32 2147483647, %v9345_v15  ;;  %vm4689_vm9 = vweird.f32 %v9345_v15  ;;  %vm4736_vm10 = vmor %vm4734_vm13, %vm4735_vm2  ;;  %v3587_v20 = vmul.f32 %v3485_v39, %v10095_v45 }
 0x7a4   :  { %v4702_v44 = vmul.f32 %v5511_v59, %v4701_v9  ;;  %v5517_v19 = vpop.eup %5516  ;;  %v4731_v28 = vsub.f32 1.0, %v4730_v47  ;;  %5522 = vpow2.f32 %v5141_v34  ;;  %v4695_v0 = vand.u32 2147483648, %v9345_v15 }
 0x7a5   :  { %v4640_v56 = vmul.f32 %v5517_v19, %v9331_v41  ;;  %5524 = vpow2.f32 %v5135_v55  ;;  %vm4645_vm8 = vweird.f32 %v5517_v19  ;;  %v5144_v52 = vmul.f32 -1.442695, %v3661_v23  ;;  %v5665_v41 = vld [vmem:[#allocation3 + $0x180] sm:$0xff] }
 0x7a6   :  { %v4703_v38 = vadd.f32 %v5511_v59, %v4702_v44  ;;  %v4732_v40 = vmul.f32 %v5515_v26, %v4731_v28  ;;  %v3655_v18 = vadd.f32 %v9107_v27, %v3587_v20  ;;  %vm4646_vm6 = vmor %vm4644_vm1, %vm4645_vm8  ;;  %v4786_v58 = vor.u32 1.1754944e-38, %v4785_v32  ;;  %v5667_v28 = vld [vmem:[#allocation3 + $0x198] sm:$0xff] }
 0x7a7   :  { %v5519_v1 = vpop.eup %5518  ;;  %v4641_v10 = vsub.f32 1.0, %v4640_v56  ;;  %5526 = vpow2.f32 %v5144_v52  ;;  %vm4784_vm13 = vcmp.eq.f32.partialorder %v4783_v49, 8.507059e+37  ;;  %v4696_v47 = vor.u32 1.1754944e-38, %v4695_v0 }
 0x7a8   :  { %v4707_v29 = vsel %vm4706_vm4, %v5511_v59, %v4703_v38  ;;  %v4733_v21 = vadd.f32 %v5515_v26, %v4732_v40  ;;  %v4775_v17 = vmul.f32 %v5519_v1, %v9336_v22  ;;  %vm4780_vm11 = vweird.f32 %v5519_v1  ;;  %v5666_v22 = vld [vmem:[#allocation3 + $0x1c8] sm:$0xff] }
 0x7a9   :  { %v4712_v61 = vsel %vm9339_vm12, %v4711_v63, %v4707_v29  ;;  %v5521_v31 = vpop.eup %5520  ;;  %v4642_v8 = vmul.f32 %v5517_v19, %v4641_v10  ;;  %vm4781_vm12 = vmor %vm4779_vm5, %vm4780_vm11  ;;  %v5138_v60 = vmul.f32 -1.442695, %v3655_v18  ;;  %v3498_v63 = vpop.permute.xlu1 %3497  ;;  %vm4694_vm15 = vcmp.eq.f32.partialorder %v4693_v14, 8.507059e+37 }
 0x7aa   :  { %v4931_v12 = vadd.f32 %v5663_v7, %v4712_v61  ;;  %v4737_v13 = vsel %vm4736_vm10, %v5515_v26, %v4733_v21  ;;  %v4776_v4 = vsub.f32 1.0, %v4775_v17  ;;  %v4685_v36 = vmul.f32 %v5521_v31, %v9345_v15  ;;  %v5523_v42 = vpop.eup %5522  ;;  %v10097_v21 = vld [vmem:[#allocation74_spill] sm:$0xff] }
 0x7ab   :  { %v4742_v33 = vsel %vm9351_vm14, %v4741_v11, %v4737_v13  ;;  %v4643_v6 = vadd.f32 %v5517_v19, %v4642_v8  ;;  %v5525_v48 = vpop.eup %5524  ;;  %vm4690_vm7 = vweird.f32 %v5521_v31  ;;  %v9386_v37 = vadd.f32 1.0, %v5523_v42 }
 0x7ac   :  { %4995 = vst.msk [vmem:[#allocation6 + $0x1a0] sm:$0xff] %vm108_vm0, %v4931_v12  ;;  %v4933_v3 = vadd.f32 %v5664_v50, %v4742_v33  ;;  %v4777_v24 = vmul.f32 %v5519_v1, %v4776_v4  ;;  %v4686_v43 = vsub.f32 1.0, %v4685_v36  ;;  %v9391_v30 = vadd.f32 1.0, %v5525_v48  ;;  %vm4691_vm14 = vmor %vm4689_vm9, %vm4690_vm7  ;;  %v5668_v50 = vld [vmem:[#allocation3 + $0x1d8] sm:$0xff]  ;;  %v5669_v48 = vld [vmem:[#allocation3 + $0x1a8] sm:$0xff] }
 0x7ad   :  { %v4647_v59 = vsel %vm4646_vm6, %v5517_v19, %v4643_v6  ;;  %5528 = vrcp.f32 %v9386_v37  ;;  %v5527_v44 = vpop.eup %5526  ;;  %v3589_v19 = vmul.f32 %v3498_v63, %v10096_v35  ;;  %v4813_v32 = vand.u32 2147483647, %v9386_v37 }
 0x7ae   :  { %4997 = vst.msk [vmem:[#allocation6 + $0x1b0] sm:$0xff] %vm108_vm0, %v4933_v3  ;;  %v4652_v51 = vsel %vm9358_vm3, %v4651_v57, %v4647_v59  ;;  %v4778_v2 = vadd.f32 %v5519_v1, %v4777_v24  ;;  %v4687_v54 = vmul.f32 %v5521_v31, %v4686_v43  ;;  %5530 = vrcp.f32 %v9391_v30 }
 0x7af   :  { %v4927_v5 = vadd.f32 %v5665_v41, %v4652_v51  ;;  %5532 = vpow2.f32 %v5138_v60  ;;  %v9403_v57 = vadd.f32 1.0, %v5527_v44  ;;  %v3657_v15 = vadd.f32 %v9107_v27, %v3589_v19  ;;  %v5670_v60 = vld [vmem:[%s9453_s6] ss:$0 sm:$0xff]  ;;  %s5738_s6 = smov [#allocation6]  }
 0x7b0   :  { %v4782_v26 = vsel %vm4781_vm12, %v5519_v1, %v4778_v2  ;;  %v4688_v9 = vadd.f32 %v5521_v31, %v4687_v54  ;;  %v4815_v46 = vand.u32 2147483648, %v9386_v37  ;;  %v4723_v14 = vand.u32 2147483647, %v9391_v30  ;;  %v10098_v2 = vld [vmem:[#allocation65_spill] sm:$0xff]  ;;  %v5671_v44 = vld [vmem:[#allocation3 + $0x1f0] sm:$0xff]  ;;  %s5011_s18 = sshll.u32 %s5738_s6, 4  ;;  %s5012_s18 = int_to_ptr.vmem [resolvable:$true] %s5011_s18 }
 0x7b1   :  { %4991 = vst.msk [vmem:[#allocation6 + $0x180] sm:$0xff] %vm108_vm0, %v4927_v5  ;;  %v4787_v16 = vsel %vm4784_vm13, %v4786_v58, %v4782_v26  ;;  %5534 = vrcp.f32 %v9403_v57  ;;  %v5140_v25 = vmul.f32 -1.442695, %v3657_v15  ;;  %v4725_v61 = vand.u32 2147483648, %v9391_v30 }
 0x7b2   :  { %v4936_v62 = vadd.f32 %v5666_v22, %v4787_v16  ;;  %v4692_v34 = vsel %vm4691_vm14, %v5521_v31, %v4688_v9  ;;  %vm4809_vm2 = vweird.f32 %v9386_v37  ;;  %vm4814_vm4 = vcmp.eq.f32.partialorder %v4813_v32, 8.507059e+37 }
 0x7b3   :  { %v4697_v55 = vsel %vm4694_vm15, %v4696_v47, %v4692_v34  ;;  %v5529_v38 = vpop.eup %5528  ;;  %v3517_v1 = vpop.permute.xlu1 %3516  ;;  %5536 = vpow2.f32 %v5140_v25  ;;  %vm4719_vm5 = vweird.f32 %v9391_v30  ;;  %v4816_v45 = vor.u32 1.1754944e-38, %v4815_v46 }
 0x7b4   :  { %5000 = vst.msk [vmem:[#allocation6 + $0x1c8] sm:$0xff] %vm108_vm0, %v4936_v62  ;;  %v4930_v11 = vadd.f32 %v5667_v28, %v4697_v55  ;;  %v5531_v56 = vpop.eup %5530  ;;  %v4805_v53 = vmul.f32 %v5529_v38, %v9386_v37  ;;  %v3592_v17 = vmul.f32 %v3517_v1, %v10097_v21  ;;  %vm4810_vm1 = vweird.f32 %v5529_v38 }
 0x7b5   :  { %v4715_v49 = vmul.f32 %v5531_v56, %v9391_v30  ;;  %v5533_v29 = vpop.eup %5532  ;;  %vm4720_vm3 = vweird.f32 %v5531_v56  ;;  %vm4811_vm8 = vmor %vm4809_vm2, %vm4810_vm1  ;;  %vm4724_vm9 = vcmp.eq.f32.partialorder %v4723_v14, 8.507059e+37  ;;  %v4726_v36 = vor.u32 1.1754944e-38, %v4725_v61 }
 0x7b6   :  { %4994 = vst.msk [vmem:[#allocation6 + $0x198] sm:$0xff] %vm108_vm0, %v4930_v11  ;;  %v4806_v40 = vsub.f32 1.0, %v4805_v53  ;;  %v9415_v31 = vadd.f32 1.0, %v5533_v29  ;;  %v3660_v12 = vadd.f32 %v9107_v27, %v3592_v17  ;;  %vm4721_vm10 = vmor %vm4719_vm5, %vm4720_vm3  ;;  %v4858_v0 = vand.u32 2147483647, %v9403_v57 }
 0x7b7   :  { %v4716_v10 = vsub.f32 1.0, %v4715_v49  ;;  %v5535_v8 = vpop.eup %5534  ;;  %v4860_v18 = vand.u32 2147483648, %v9403_v57  ;;  %vm4854_vm11 = vweird.f32 %v9403_v57  ;;  %v5672_v49 = vld [vmem:[#allocation3 + $0x1c0] sm:$0xff] }
 0x7b8   :  { %v4807_v39 = vmul.f32 %v5529_v38, %v4806_v40  ;;  %5538 = vrcp.f32 %v9415_v31  ;;  %v4850_v13 = vmul.f32 %v5535_v8, %v9403_v57  ;;  %v5143_v33 = vmul.f32 -1.442695, %v3660_v12  ;;  %v5673_v12 = vld [vmem:[#allocation3 + $0x1d0] sm:$0xff] }
 0x7b9   :  { %v4717_v7 = vmul.f32 %v5531_v56, %v4716_v10  ;;  %v5537_v42 = vpop.eup %5536  ;;  %vm4855_vm6 = vweird.f32 %v5535_v8  ;;  %v4861_v58 = vor.u32 1.1754944e-38, %v4860_v18  ;;  %vm4859_vm12 = vcmp.eq.f32.partialorder %v4858_v0, 8.507059e+37 }
 0x7ba   :  { %v4808_v23 = vadd.f32 %v5529_v38, %v4807_v39  ;;  %v4851_v52 = vsub.f32 1.0, %v4850_v13  ;;  %5540 = vpow2.f32 %v5143_v33  ;;  %v3913_v51 = vadd.f32 1.0, %v5537_v42  ;;  %vm4856_vm7 = vmor %vm4854_vm11, %vm4855_vm6 }
 0x7bb   :  { %v4718_v20 = vadd.f32 %v5531_v56, %v4717_v7  ;;  %v3530_v43 = vpop.permute.xlu1 %3529  ;;  %v4768_v22 = vand.u32 2147483647, %v9415_v31  ;;  %v4770_v62 = vand.u32 2147483648, %v9415_v31  ;;  %vm4764_vm14 = vweird.f32 %v9415_v31 }
 0x7bc   :  { %v4812_v4 = vsel %vm4811_vm8, %v5529_v38, %v4808_v23  ;;  %v4852_v37 = vmul.f32 %v5535_v8, %v4851_v52  ;;  %v3594_v54 = vmul.f32 %v3530_v43, %v10098_v2  ;;  %5542 = vrcp.f32 %v3913_v51 }
 0x7bd   :  { %v4817_v27 = vsel %vm4814_vm4, %v4816_v45, %v4812_v4  ;;  %v4722_v6 = vsel %vm4721_vm10, %v5531_v56, %v4718_v20  ;;  %v4771_v57 = vor.u32 1.1754944e-38, %v4770_v62  ;;  %vm4769_vm1 = vcmp.eq.f32.partialorder %v4768_v22, 8.507059e+37 }
 0x7be   :  { %v4938_v3 = vadd.f32 %v5668_v50, %v4817_v27  ;;  %v4727_v24 = vsel %vm4724_vm9, %v4726_v36, %v4722_v6  ;;  %v5539_v30 = vpop.eup %5538  ;;  %v4853_v41 = vadd.f32 %v5535_v8, %v4852_v37  ;;  %v3662_v26 = vadd.f32 %v5670_v60, %v3594_v54  ;;  %v5674_v27 = vld [vmem:[#allocation3 + $0x1e8] sm:$0xff] }
 0x7bf   :  { %v4932_v59 = vadd.f32 %v5669_v48, %v4727_v24  ;;  %v4760_v5 = vmul.f32 %v5539_v30, %v9415_v31  ;;  %vm4765_vm13 = vweird.f32 %v5539_v30  ;;  %v4800_v32 = vand.u32 2147483648, %v3913_v51 }
 0x7c0   :  { %5002 = vst.msk [vmem:[#allocation6 + $0x1d8] sm:$0xff] %vm108_vm0, %v4938_v3  ;;  %v4857_v9 = vsel %vm4856_vm7, %v5535_v8, %v4853_v41  ;;  %v5541_v16 = vpop.eup %5540  ;;  %v5145_v34 = vmul.f32 -1.442695, %v3662_v26  ;;  %vm4766_vm15 = vmor %vm4764_vm14, %vm4765_vm13  ;;  %v4798_v1 = vand.u32 2147483647, %v3913_v51  ;;  %vm4794_vm3 = vweird.f32 %v3913_v51 }
 0x7c1   :  { %4996 = vst.msk [vmem:[#allocation6 + $0x1a8] sm:$0xff] %vm108_vm0, %v4932_v59  ;;  %v4761_v63 = vsub.f32 1.0, %v4760_v5  ;;  %v4862_v47 = vsel %vm4859_vm12, %v4861_v58, %v4857_v9  ;;  %v3916_v19 = vadd.f32 1.0, %v5541_v16  ;;  %v4801_v21 = vor.u32 1.1754944e-38, %v4800_v32  ;;  %v5675_v59 = vld [vmem:[#allocation3 + $0x1f8] sm:$0xff] }
 0x7c2   :  { %v4941_v55 = vadd.f32 %v5671_v44, %v4862_v47  ;;  %5544 = vpow2.f32 %v5145_v34  ;;  %v5543_v28 = vpop.eup %5542  ;;  %vm4799_vm5 = vcmp.eq.f32.partialorder %v4798_v1, 8.507059e+37 }
 0x7c3   :  { %v4762_v35 = vmul.f32 %v5539_v30, %v4761_v63  ;;  %5546 = vrcp.f32 %v3916_v19  ;;  %v4790_v38 = vmul.f32 %v5543_v28, %v3913_v51  ;;  %vm4795_vm2 = vweird.f32 %v5543_v28 }
 0x7c4   :  { %5005 = vst.msk [vmem:[#allocation6 + $0x1f0] sm:$0xff] %vm108_vm0, %v4941_v55  ;;  %vm4796_vm4 = vmor %vm4794_vm3, %vm4795_vm2  ;;  %v4845_v7 = vand.u32 2147483648, %v3916_v19  ;;  %v4843_v45 = vand.u32 2147483647, %v3916_v19  ;;  %vm4839_vm9 = vweird.f32 %v3916_v19 }
 0x7c5   :  { %v4763_v11 = vadd.f32 %v5539_v30, %v4762_v35  ;;  %v4791_v53 = vsub.f32 1.0, %v4790_v38 }
 0x7c6   :  { %v4846_v4 = vor.u32 1.1754944e-38, %v4845_v7  ;;  %vm4844_vm6 = vcmp.eq.f32.partialorder %v4843_v45, 8.507059e+37 }
 0x7c7   :  { %v4767_v15 = vsel %vm4766_vm15, %v5539_v30, %v4763_v11  ;;  %v4792_v25 = vmul.f32 %v5543_v28, %v4791_v53 }
 0x7c8   :  { %v4772_v56 = vsel %vm4769_vm1, %v4771_v57, %v4767_v15  ;;  %v5545_v46 = vpop.eup %5544 }
 0x7c9   :  { %v4935_v40 = vadd.f32 %v5672_v49, %v4772_v56  ;;  %v5547_v29 = vpop.eup %5546  ;;  %v3918_v10 = vadd.f32 1.0, %v5545_v46  ;;  %v4793_v14 = vadd.f32 %v5543_v28, %v4792_v25 }
 0x7ca   :  { %v4835_v61 = vmul.f32 %v5547_v29, %v3916_v19  ;;  %vm4840_vm8 = vweird.f32 %v5547_v29 }
 0x7cb   :  { %4999 = vst.msk [vmem:[#allocation6 + $0x1c0] sm:$0xff] %vm108_vm0, %v4935_v40  ;;  %5548 = vrcp.f32 %v3918_v10  ;;  %v4797_v17 = vsel %vm4796_vm4, %v5543_v28, %v4793_v14  ;;  %vm4841_vm10 = vmor %vm4839_vm9, %vm4840_vm8  ;;  %v4875_v18 = vand.u32 2147483648, %v3918_v10  ;;  %v4873_v50 = vand.u32 2147483647, %v3918_v10 }
 0x7cc   :  { %v4836_v39 = vsub.f32 1.0, %v4835_v61  ;;  %v4802_v31 = vsel %vm4799_vm5, %v4801_v21, %v4797_v17  ;;  %vm4869_vm7 = vweird.f32 %v3918_v10 }
 0x7cd   :  { %v4937_v8 = vadd.f32 %v5673_v12, %v4802_v31  ;;  %v4876_v24 = vor.u32 1.1754944e-38, %v4875_v18  ;;  %vm4874_vm13 = vcmp.eq.f32.partialorder %v4873_v50, 8.507059e+37 }
 0x7ce   :  { %v4837_v23 = vmul.f32 %v5547_v29, %v4836_v39 }
 0x7cf   :  { %5001 = vst.msk [vmem:[#allocation6 + $0x1d0] sm:$0xff] %vm108_vm0, %v4937_v8 }
 0x7d0   :  { %v4838_v20 = vadd.f32 %v5547_v29, %v4837_v23 }
 0x7d1   :  { %v5549_v13 = vpop.eup %5548 }
 0x7d2   :  { %v4842_v36 = vsel %vm4841_vm10, %v5547_v29, %v4838_v20  ;;  %v4865_v0 = vmul.f32 %v5549_v13, %v3918_v10  ;;  %vm4870_vm11 = vweird.f32 %v5549_v13 }
 0x7d3   :  { %v4847_v33 = vsel %vm4844_vm6, %v4846_v4, %v4842_v36  ;;  %vm4871_vm12 = vmor %vm4869_vm7, %vm4870_vm11 }
 0x7d4   :  { %v4940_v6 = vadd.f32 %v5674_v27, %v4847_v33  ;;  %v4866_v52 = vsub.f32 1.0, %v4865_v0 }
 0x7d6   :  { %5004 = vst.msk [vmem:[#allocation6 + $0x1e8] sm:$0xff] %vm108_vm0, %v4940_v6  ;;  %v4867_v42 = vmul.f32 %v5549_v13, %v4866_v52 }
 0x7d8   :  { %v4868_v3 = vadd.f32 %v5549_v13, %v4867_v42 }
 0x7da   :  { %v4872_v43 = vsel %vm4871_vm12, %v5549_v13, %v4868_v3 }
 0x7db   :  { %v4877_v48 = vsel %vm4874_vm13, %v4876_v24, %v4872_v43 }
 0x7dc   :  { %v4942_v37 = vadd.f32 %v5675_v59, %v4877_v48 }
 0x7de   :  { %5006 = vst.msk [vmem:[#allocation6 + $0x1f8] sm:$0xff] %vm108_vm0, %v4942_v37 }
 0x7df   :  { %5019 = dma.vmem_to_hbm [thread:$0]  %s5012_s18, 8192, %s5014_s21, [#allocation5], %s5729_s29, %s5729_s29, %s5730_s30  }
 0x7e0   :  { %5726 = dma.done.wait [#allocation5], 8192  }
 0x7e1   :  { %5727 = vsyncadd [#allocation5], 4294959104 }
 0x7e2   :  { %5024 = vsyncpa [#allocation4], 1 }
 0x7e3   :  { %5025 = vsyncpa [#allocation5], 1 }

</bundles_post_ra>
